<compile_context>
chip_gen: v5e
topology: v5e:2x2
jax: 0.10.0
libtpu: 0.0.40
codegen_flags: <defaults>
</compile_context>

<pallas_src>
import functools

import jax
import jax.numpy as jnp
from jax import lax
from jax.experimental import pallas as pl
from jax.experimental.pallas import tpu as pltpu


# -----------------------------------------------------------------------------
# Pallas kernel: full multi-layer LSTM recurrence + final FC for one BN block
# (transposed layout: features on sublanes, rows on lanes)
# -----------------------------------------------------------------------------
def make_lstm_kernel(num_layers, seq_len, hidden_dim, bn_blk):
    H = hidden_dim
    T = seq_len
    L = num_layers
    BK = bn_blk

    def kernel(*refs):
        x_ref = refs[0]                                   # [C, T*BK]  (cdt)
        wih_refs = [refs[1 + 3 * l] for l in range(L)]    # [4H, in_l] (cdt)
        whh_refs = [refs[2 + 3 * l] for l in range(L)]    # [4H, H]    (cdt)
        b_refs = [refs[3 + 3 * l] for l in range(L)]      # [4H, 1]    (f32)
        wfc_ref = refs[1 + 3 * L]                         # [O_pad, H] (cdt)
        bfc_ref = refs[2 + 3 * L]                         # [O_pad, 1] (f32)
        out_ref = refs[3 + 3 * L]                         # [O_pad, T*BK] f32
        gx_ref = refs[4 + 3 * L]                          # scratch [4H, T*BK] f32
        hs_ref = refs[5 + 3 * L]                          # scratch [H, T*BK] cdt

        cdt = hs_ref.dtype  # compute dtype for MXU operands (bf16 or f32)

        for l in range(L):
            whh = whh_refs[l][...]                        # [4H, H]
            bias = b_refs[l][...]                         # [4H, 1]

            # Hoisted input projection: ONE MXU matmul per layer covering all
            # timesteps.  Layer 0 reads the input block; deeper layers read
            # the previous layer's hidden states.  hs_ref is fully read here
            # BEFORE the time loop rewrites it -> no hazard.
            inp_ref = x_ref if l == 0 else hs_ref
            gx_ref[...] = (
                jnp.dot(wih_refs[l][...], inp_ref[...],
                        preferred_element_type=jnp.float32)
                + bias)                                   # [4H, T*BK] f32

            h = jnp.zeros((H, BK), jnp.float32)
            c = jnp.zeros((H, BK), jnp.float32)

            def cell_step(t, h, c, whh=whh):
                c0 = t * BK
                if not isinstance(t, int):
                    c0 = pl.multiple_of(c0, BK)
                # ONE fused recurrent matmul per step; gates come out as
                # sublane slices (offsets multiple of 8 -> free selection).
                pre = (jnp.dot(whh, h.astype(cdt),
                               preferred_element_type=jnp.float32)
                       + gx_ref[:, pl.ds(c0, BK)])        # [4H, BK] f32
                i_g = jax.nn.sigmoid(pre[0 * H:1 * H, :])
                f_g = jax.nn.sigmoid(pre[1 * H:2 * H, :])
                g_g = jnp.tanh(pre[2 * H:3 * H, :])
                o_g = jax.nn.sigmoid(pre[3 * H:4 * H, :])
                c_new = f_g * c + i_g * g_g
                h_new = o_g * jnp.tanh(c_new)
                hs_ref[:, pl.ds(c0, BK)] = h_new.astype(cdt)
                return h_new, c_new

            if T <= 16:
                # Small T: fully unrolled -> LLO sees across steps.
                for t in range(T):
                    h, c = cell_step(t, h, c)
            else:
                # Large T: partially-unrolled fori_loop bounds vreg live
                # ranges while keeping scheduling visibility.
                h, c = lax.fori_loop(0, T,
                                     lambda t, hc: cell_step(t, *hc),
                                     (h, c), unroll=4)

        # Final FC over all timesteps at once; output is [O_pad8, T*BK]:
        # lane-dense store over T*BK, only sublane padding (O -> 8).
        out_ref[...] = (
            jnp.dot(wfc_ref[...], hs_ref[...],
                    preferred_element_type=jnp.float32)
            + bfc_ref[...]).astype(out_ref.dtype)

    return kernel


# -----------------------------------------------------------------------------
# Parameter initialization (mimics nn.LSTM / nn.Linear shapes)
# -----------------------------------------------------------------------------
def init_params(key, input_dim, hidden_dim, num_layers, output_dim):
    params = {"layers": []}
    k = 1.0 / jnp.sqrt(hidden_dim)
    for l in range(num_layers):
        in_l = input_dim if l == 0 else hidden_dim
        key, k1, k2, k3, k4 = jax.random.split(key, 5)
        layer = {
            "w_ih": jax.random.uniform(k1, (4 * hidden_dim, in_l),
                                       jnp.float32, -k, k),
            "w_hh": jax.random.uniform(k2, (4 * hidden_dim, hidden_dim),
                                       jnp.float32, -k, k),
            "b_ih": jax.random.uniform(k3, (4 * hidden_dim,),
                                       jnp.float32, -k, k),
            "b_hh": jax.random.uniform(k4, (4 * hidden_dim,),
                                       jnp.float32, -k, k),
        }
        params["layers"].append(layer)
    key, k5, k6 = jax.random.split(key, 3)
    kf = 1.0 / jnp.sqrt(hidden_dim)
    params["fc_w"] = jax.random.uniform(k5, (output_dim, hidden_dim),
                                        jnp.float32, -kf, kf)
    params["fc_b"] = jax.random.uniform(k6, (output_dim,),
                                        jnp.float32, -kf, kf)
    return params


def _pick_bn_block(bn):
    """Rows per grid step.

    Rows live on the lane axis (time-major within a block) so BK has no
    (8,128) constraint itself; the wrapper pads BN up to nb*BK.  Cap at 256
    (vreg/VMEM pressure) and, whenever BN permits, make nb >= 2 so the
    "parallel" grid axis can shard across v7x's two TensorCores.
    """
    if bn <= 16:
        return bn
    return min(256, max(16, (bn + 1) // 2))


def _vmem_limit_bytes(T, bk, C, H, o_pad, cbytes):
    """Per-block VMEM residency estimate (with double-buffered in/out)."""
    tb = T * bk
    est = (2 * C * tb * cbytes          # input block (double-buffered)
           + 2 * o_pad * tb * 4         # output block (double-buffered, f32)
           + 4 * H * tb * 4             # gx scratch (f32)
           + H * tb * cbytes            # hs scratch
           + 2 * (4 * H) * (C + 2 * H + 2) * 4)  # weights/biases, generous
    # 2x headroom, at least the comfortable default, stay well under v7x's
    # 64 MiB physical VMEM.
    return int(min(max(2 * est, 16 * 2**20), 48 * 2**20))


# -----------------------------------------------------------------------------
# Wrapper: PyTorch-equivalent forward of LSTMModel
# -----------------------------------------------------------------------------
@functools.partial(jax.jit, static_argnames=("hidden_dim", "num_layers",
                                             "output_dim", "compute_dtype"))
def lstm_model_forward(x, params, *, hidden_dim, num_layers, output_dim,
                       compute_dtype=jnp.bfloat16):
    # x: [B, T, N, C]  (float32)
    B, T, N, C = x.shape
    BN = B * N
    H = hidden_dim
    O = output_dim
    O_pad = max(8, ((O + 7) // 8) * 8)        # pad FC rows to a sublane tile

    bn_blk = _pick_bn_block(BN)
    nb = pl.cdiv(BN, bn_blk)
    bn_pad = nb * bn_blk

    cdt = compute_dtype
    cbytes = jnp.dtype(cdt).itemsize

    # [B,T,N,C] -> [B,N,T,C] -> [BN,T,C] (pad BN) -> transposed per-block 2D:
    #   x_blk[i, c, t*BK + j] == feature c of row (i*BK + j) at time t
    x_bn = jnp.transpose(x, (0, 2, 1, 3)).reshape(BN, T, C)
    if bn_pad != BN:
        x_bn = jnp.pad(x_bn, ((0, bn_pad - BN), (0, 0), (0, 0)))
    x_blk = (x_bn.reshape(nb, bn_blk, T, C)
             .transpose(0, 3, 2, 1)
             .reshape(nb, C, T * bn_blk)
             .astype(cdt))

    # Weight prep: PyTorch layouts already match the transposed kernel layout
    # (W[4H,in] @ inp[in,·] == (inp @ W.T).T).  Cast matmul operands to the
    # compute dtype; keep biases f32 (they add into the f32 gx).
    flat_w = []
    for layer in params["layers"]:
        flat_w.append(layer["w_ih"].astype(cdt))                       # [4H,in_l]
        flat_w.append(layer["w_hh"].astype(cdt))                       # [4H,H]
        flat_w.append((layer["b_ih"] + layer["b_hh"])[:, None]
                      .astype(jnp.float32))                            # [4H,1]
    wfc = jnp.pad(params["fc_w"], ((0, O_pad - O), (0, 0))).astype(cdt)  # [O_pad,H]
    bfc = jnp.pad(params["fc_b"], (0, O_pad - O))[:, None].astype(jnp.float32)

    in_specs = [pl.BlockSpec((None, C, T * bn_blk), lambda i: (i, 0, 0))]
    for l in range(num_layers):
        in_l = C if l == 0 else H
        in_specs.append(pl.BlockSpec((4 * H, in_l), lambda i: (0, 0)))
        in_specs.append(pl.BlockSpec((4 * H, H), lambda i: (0, 0)))
        in_specs.append(pl.BlockSpec((4 * H, 1), lambda i: (0, 0)))
    in_specs.append(pl.BlockSpec((O_pad, H), lambda i: (0, 0)))
    in_specs.append(pl.BlockSpec((O_pad, 1), lambda i: (0, 0)))

    kernel = make_lstm_kernel(num_layers, T, H, bn_blk)

    out_blk = pl.pallas_call(
        kernel,
        out_shape=jax.ShapeDtypeStruct((nb, O_pad, T * bn_blk), jnp.float32),
        grid=(nb,),
        in_specs=in_specs,
        out_specs=pl.BlockSpec((None, O_pad, T * bn_blk),
                               lambda i: (i, 0, 0)),
        scratch_shapes=[
            pltpu.VMEM((4 * H, T * bn_blk), jnp.float32),  # gx: input gates
            pltpu.VMEM((H, T * bn_blk), cdt),              # hs: layer hiddens
        ],
        compiler_params=pltpu.CompilerParams(
            dimension_semantics=("parallel",),
            vmem_limit_bytes=_vmem_limit_bytes(T, bn_blk, C, H, O_pad,
                                               cbytes)),
    )(x_blk, *flat_w, wfc, bfc)

    # [nb, O_pad, T*BK] -> [BN, T, O] -> [B, T, N, O]
    out = (out_blk.reshape(nb, O_pad, T, bn_blk)
           .transpose(0, 3, 2, 1)
           .reshape(bn_pad, T, O_pad)[:BN, :, :O])
    out = out.reshape(B, N, T, O)
    out = jnp.transpose(out, (0, 2, 1, 3))
    return out


# -----------------------------------------------------------------------------
# Pure-JAX reference (mirrors PyTorch nn.LSTM + nn.Linear semantics, f32)
# -----------------------------------------------------------------------------
def lstm_model_reference(x, params, *, hidden_dim, num_layers, output_dim):
    B, T, N, C = x.shape
    BN = B * N
    H = hidden_dim
    seq = jnp.transpose(x, (0, 2, 1, 3)).reshape(BN, T, C)
    for layer in params["layers"]:
        w_ih, w_hh = layer["w_ih"], layer["w_hh"]
        b = layer["b_ih"] + layer["b_hh"]
        h = jnp.zeros((BN, H), jnp.float32)
        c = jnp.zeros((BN, H), jnp.float32)
        outs = []
        for t in range(T):
            gates = seq[:, t] @ w_ih.T + h @ w_hh.T + b
            i_g = jax.nn.sigmoid(gates[:, 0 * H:1 * H])
            f_g = jax.nn.sigmoid(gates[:, 1 * H:2 * H])
            g_g = jnp.tanh(gates[:, 2 * H:3 * H])
            o_g = jax.nn.sigmoid(gates[:, 3 * H:4 * H])
            c = f_g * c + i_g * g_g
            h = o_g * jnp.tanh(c)
            outs.append(h)
        seq = jnp.stack(outs, axis=1)
    out = seq @ params["fc_w"].T + params["fc_b"]
    out = out.reshape(B, N, T, output_dim)
    return jnp.transpose(out, (0, 2, 1, 3))


if __name__ == "__main__":
    # Small, forward-consistent shapes
    B, T, N, C = 2, 8, 16, 4         # batch, seq_len, num_nodes, input_dim
    H, L, O = 32, 2, 2               # hidden_dim, num_layers, output_dim

    key = jax.random.PRNGKey(0)
    key, kx, kp = jax.random.split(key, 3)
    x = jax.random.normal(kx, (B, T, N, C), jnp.float32)
    params = init_params(kp, C, H, L, O)

    ref = lstm_model_reference(x, params, hidden_dim=H, num_layers=L,
                               output_dim=O)

    # f32 matmul operands: strict check of the kernel math vs the reference.
    out32 = lstm_model_forward(x, params, hidden_dim=H, num_layers=L,
                               output_dim=O, compute_dtype=jnp.float32)
    out32 = jax.block_until_ready(out32)
    assert out32.shape == (B, T, N, O), out32.shape
    assert jnp.allclose(out32, ref, rtol=1e-4, atol=1e-4), (
        float(jnp.max(jnp.abs(out32 - ref))))

    # bf16 matmul operands (performance path; f32 accumulation and gate math):
    # looser tolerance accounts for bf16 rounding over T*L dependent steps.
    out16 = lstm_model_forward(x, params, hidden_dim=H, num_layers=L,
                               output_dim=O, compute_dtype=jnp.bfloat16)
    out16 = jax.block_until_ready(out16)
    assert out16.shape == (B, T, N, O), out16.shape
    assert jnp.allclose(out16, ref, rtol=1e-1, atol=1e-1), (
        float(jnp.max(jnp.abs(out16 - ref))))

    print("KERNEL_OK")
</pallas_src>

<mosaic_0001>
module attributes {stable_mosaic.version = 11 : i64} {
  func.func @kernel(%arg0: i32, %arg1: memref<1x4x128xf32, #tpu.memory_space<vmem>>, %arg2: memref<128x4xf32, #tpu.memory_space<vmem>>, %arg3: memref<128x32xf32, #tpu.memory_space<vmem>>, %arg4: memref<128x1xf32, #tpu.memory_space<vmem>>, %arg5: memref<128x32xf32, #tpu.memory_space<vmem>>, %arg6: memref<128x32xf32, #tpu.memory_space<vmem>>, %arg7: memref<128x1xf32, #tpu.memory_space<vmem>>, %arg8: memref<8x32xf32, #tpu.memory_space<vmem>>, %arg9: memref<8x1xf32, #tpu.memory_space<vmem>>, %arg10: memref<1x8x128xf32, #tpu.memory_space<vmem>>, %arg11: memref<128x128xf32, #tpu.memory_space<vmem>>, %arg12: memref<32x128xf32, #tpu.memory_space<vmem>>) attributes {dimension_semantics = [#tpu.dimension_semantics<parallel>], iteration_bounds = array<i64: 2>, scalar_prefetch = 0 : i64, scratch_operands = 2 : i64, tpu.core_type = #tpu.core_type<tc>, window_params = [{transform_indices = @transform_0, window_bounds = array<i64: 1, 4, 128>}, {pipeline_mode = #tpu.pipeline_mode<synchronous>, transform_indices = @transform_1, window_bounds = array<i64: 128, 4>}, {pipeline_mode = #tpu.pipeline_mode<synchronous>, transform_indices = @transform_2, window_bounds = array<i64: 128, 32>}, {pipeline_mode = #tpu.pipeline_mode<synchronous>, transform_indices = @transform_3, window_bounds = array<i64: 128, 1>}, {pipeline_mode = #tpu.pipeline_mode<synchronous>, transform_indices = @transform_4, window_bounds = array<i64: 128, 32>}, {pipeline_mode = #tpu.pipeline_mode<synchronous>, transform_indices = @transform_5, window_bounds = array<i64: 128, 32>}, {pipeline_mode = #tpu.pipeline_mode<synchronous>, transform_indices = @transform_6, window_bounds = array<i64: 128, 1>}, {pipeline_mode = #tpu.pipeline_mode<synchronous>, transform_indices = @transform_7, window_bounds = array<i64: 8, 32>}, {pipeline_mode = #tpu.pipeline_mode<synchronous>, transform_indices = @transform_8, window_bounds = array<i64: 8, 1>}, {transform_indices = @transform_9, window_bounds = array<i64: 1, 8, 128>}]} {
    %c0 = arith.constant 0 : index
    %c0_0 = arith.constant 0 : index
    %0 = vector.load %arg3[%c0, %c0_0] : memref<128x32xf32, #tpu.memory_space<vmem>>, vector<128x32xf32>
    %c0_1 = arith.constant 0 : index
    %c0_2 = arith.constant 0 : index
    %1 = vector.load %arg4[%c0_1, %c0_2] : memref<128x1xf32, #tpu.memory_space<vmem>>, vector<128x1xf32>
    %c0_3 = arith.constant 0 : index
    %c0_4 = arith.constant 0 : index
    %2 = vector.load %arg2[%c0_3, %c0_4] : memref<128x4xf32, #tpu.memory_space<vmem>>, vector<128x4xf32>
    %c0_5 = arith.constant 0 : index
    %c0_6 = arith.constant 0 : index
    %c0_7 = arith.constant 0 : index
    %3 = vector.load %arg1[%c0_5, %c0_6, %c0_7] : memref<1x4x128xf32, #tpu.memory_space<vmem>>, vector<1x4x128xf32>
    %4 = vector.shape_cast %3 : vector<1x4x128xf32> to vector<4x128xf32>
    %cst = arith.constant dense<0.000000e+00> : vector<128x128xf32>
    %5 = tpu.matmul %2, %4, %cst {dimension_numbers = #tpu.dot_dimension_numbers<[1], [0], [0], [1], [0, 0, 1, 1], [], []>} : vector<128x4xf32>, vector<4x128xf32>, vector<128x128xf32> -> vector<128x128xf32>
    %6 = vector.broadcast %1 : vector<128x1xf32> to vector<128x128xf32>
    %7 = arith.addf %5, %6 : vector<128x128xf32>
    %c0_8 = arith.constant 0 : index
    %c0_9 = arith.constant 0 : index
    %8 = vector.load %arg11[%c0_8, %c0_9] : memref<128x128xf32, #tpu.memory_space<vmem>>, vector<128x128xf32>
    tpu.vector_store %arg11[%c0_8, %c0_9], %7 {strides = array<i32>} : memref<128x128xf32, #tpu.memory_space<vmem>>, vector<128x128xf32>,
    %cst_10 = arith.constant 0.000000e+00 : f32
    %9 = vector.broadcast %cst_10 : f32 to vector<32x16xf32>
    %cst_11 = arith.constant 0.000000e+00 : f32
    %10 = vector.broadcast %cst_11 : f32 to vector<32x16xf32>
    %cst_12 = arith.constant dense<0.000000e+00> : vector<128x16xf32>
    %11 = tpu.matmul %0, %9, %cst_12 {dimension_numbers = #tpu.dot_dimension_numbers<[1], [0], [0], [1], [0, 0, 1, 1], [], []>} : vector<128x32xf32>, vector<32x16xf32>, vector<128x16xf32> -> vector<128x16xf32>
    %c0_13 = arith.constant 0 : index
    %c0_14 = arith.constant 0 : index
    %12 = vector.load %arg11[%c0_13, %c0_14] : memref<128x128xf32, #tpu.memory_space<vmem>>, vector<128x16xf32>
    %13 = arith.addf %11, %12 : vector<128x16xf32>
    %14 = vector.extract_strided_slice %13 {offsets = [0, 0], sizes = [32, 16], strides = [1, 1]} : vector<128x16xf32> to vector<32x16xf32>
    %15 = arith.negf %14 : vector<32x16xf32>
    %16 = math.exp %15 : vector<32x16xf32>
    %cst_15 = arith.constant 1.000000e+00 : f32
    %17 = vector.broadcast %cst_15 : f32 to vector<32x16xf32>
    %18 = arith.addf %17, %16 : vector<32x16xf32>
    %19 = arith.divf %17, %18 : vector<32x16xf32>
    %20 = vector.extract_strided_slice %13 {offsets = [32, 0], sizes = [32, 16], strides = [1, 1]} : vector<128x16xf32> to vector<32x16xf32>
    %21 = arith.negf %20 : vector<32x16xf32>
    %22 = math.exp %21 : vector<32x16xf32>
    %cst_16 = arith.constant 1.000000e+00 : f32
    %23 = vector.broadcast %cst_16 : f32 to vector<32x16xf32>
    %24 = arith.addf %23, %22 : vector<32x16xf32>
    %25 = arith.divf %23, %24 : vector<32x16xf32>
    %26 = vector.extract_strided_slice %13 {offsets = [64, 0], sizes = [32, 16], strides = [1, 1]} : vector<128x16xf32> to vector<32x16xf32>
    %27 = math.tanh %26 : vector<32x16xf32>
    %28 = vector.extract_strided_slice %13 {offsets = [96, 0], sizes = [32, 16], strides = [1, 1]} : vector<128x16xf32> to vector<32x16xf32>
    %29 = arith.negf %28 : vector<32x16xf32>
    %30 = math.exp %29 : vector<32x16xf32>
    %cst_17 = arith.constant 1.000000e+00 : f32
    %31 = vector.broadcast %cst_17 : f32 to vector<32x16xf32>
    %32 = arith.addf %31, %30 : vector<32x16xf32>
    %33 = arith.divf %31, %32 : vector<32x16xf32>
    %34 = arith.mulf %25, %10 : vector<32x16xf32>
    %35 = arith.mulf %19, %27 : vector<32x16xf32>
    %36 = arith.addf %34, %35 : vector<32x16xf32>
    %37 = math.tanh %36 : vector<32x16xf32>
    %38 = arith.mulf %33, %37 : vector<32x16xf32>
    %c0_18 = arith.constant 0 : index
    %c0_19 = arith.constant 0 : index
    %39 = vector.load %arg12[%c0_18, %c0_19] : memref<32x128xf32, #tpu.memory_space<vmem>>, vector<32x16xf32>
    tpu.vector_store %arg12[%c0_18, %c0_19], %38 {strides = array<i32>} : memref<32x128xf32, #tpu.memory_space<vmem>>, vector<32x16xf32>,
    %cst_20 = arith.constant dense<0.000000e+00> : vector<128x16xf32>
    %40 = tpu.matmul %0, %38, %cst_20 {dimension_numbers = #tpu.dot_dimension_numbers<[1], [0], [0], [1], [0, 0, 1, 1], [], []>} : vector<128x32xf32>, vector<32x16xf32>, vector<128x16xf32> -> vector<128x16xf32>
    %c0_21 = arith.constant 0 : index
    %c16 = arith.constant 16 : index
    %41 = vector.load %arg11[%c0_21, %c16] : memref<128x128xf32, #tpu.memory_space<vmem>>, vector<128x16xf32>
    %42 = arith.addf %40, %41 : vector<128x16xf32>
    %43 = vector.extract_strided_slice %42 {offsets = [0, 0], sizes = [32, 16], strides = [1, 1]} : vector<128x16xf32> to vector<32x16xf32>
    %44 = arith.negf %43 : vector<32x16xf32>
    %45 = math.exp %44 : vector<32x16xf32>
    %cst_22 = arith.constant 1.000000e+00 : f32
    %46 = vector.broadcast %cst_22 : f32 to vector<32x16xf32>
    %47 = arith.addf %46, %45 : vector<32x16xf32>
    %48 = arith.divf %46, %47 : vector<32x16xf32>
    %49 = vector.extract_strided_slice %42 {offsets = [32, 0], sizes = [32, 16], strides = [1, 1]} : vector<128x16xf32> to vector<32x16xf32>
    %50 = arith.negf %49 : vector<32x16xf32>
    %51 = math.exp %50 : vector<32x16xf32>
    %cst_23 = arith.constant 1.000000e+00 : f32
    %52 = vector.broadcast %cst_23 : f32 to vector<32x16xf32>
    %53 = arith.addf %52, %51 : vector<32x16xf32>
    %54 = arith.divf %52, %53 : vector<32x16xf32>
    %55 = vector.extract_strided_slice %42 {offsets = [64, 0], sizes = [32, 16], strides = [1, 1]} : vector<128x16xf32> to vector<32x16xf32>
    %56 = math.tanh %55 : vector<32x16xf32>
    %57 = vector.extract_strided_slice %42 {offsets = [96, 0], sizes = [32, 16], strides = [1, 1]} : vector<128x16xf32> to vector<32x16xf32>
    %58 = arith.negf %57 : vector<32x16xf32>
    %59 = math.exp %58 : vector<32x16xf32>
    %cst_24 = arith.constant 1.000000e+00 : f32
    %60 = vector.broadcast %cst_24 : f32 to vector<32x16xf32>
    %61 = arith.addf %60, %59 : vector<32x16xf32>
    %62 = arith.divf %60, %61 : vector<32x16xf32>
    %63 = arith.mulf %54, %36 : vector<32x16xf32>
    %64 = arith.mulf %48, %56 : vector<32x16xf32>
    %65 = arith.addf %63, %64 : vector<32x16xf32>
    %66 = math.tanh %65 : vector<32x16xf32>
    %67 = arith.mulf %62, %66 : vector<32x16xf32>
    %c0_25 = arith.constant 0 : index
    %c16_26 = arith.constant 16 : index
    %68 = vector.load %arg12[%c0_25, %c16_26] : memref<32x128xf32, #tpu.memory_space<vmem>>, vector<32x16xf32>
    tpu.vector_store %arg12[%c0_25, %c16_26], %67 {strides = array<i32>} : memref<32x128xf32, #tpu.memory_space<vmem>>, vector<32x16xf32>,
    %cst_27 = arith.constant dense<0.000000e+00> : vector<128x16xf32>
    %69 = tpu.matmul %0, %67, %cst_27 {dimension_numbers = #tpu.dot_dimension_numbers<[1], [0], [0], [1], [0, 0, 1, 1], [], []>} : vector<128x32xf32>, vector<32x16xf32>, vector<128x16xf32> -> vector<128x16xf32>
    %c0_28 = arith.constant 0 : index
    %c32 = arith.constant 32 : index
    %70 = vector.load %arg11[%c0_28, %c32] : memref<128x128xf32, #tpu.memory_space<vmem>>, vector<128x16xf32>
    %71 = arith.addf %69, %70 : vector<128x16xf32>
    %72 = vector.extract_strided_slice %71 {offsets = [0, 0], sizes = [32, 16], strides = [1, 1]} : vector<128x16xf32> to vector<32x16xf32>
    %73 = arith.negf %72 : vector<32x16xf32>
    %74 = math.exp %73 : vector<32x16xf32>
    %cst_29 = arith.constant 1.000000e+00 : f32
    %75 = vector.broadcast %cst_29 : f32 to vector<32x16xf32>
    %76 = arith.addf %75, %74 : vector<32x16xf32>
    %77 = arith.divf %75, %76 : vector<32x16xf32>
    %78 = vector.extract_strided_slice %71 {offsets = [32, 0], sizes = [32, 16], strides = [1, 1]} : vector<128x16xf32> to vector<32x16xf32>
    %79 = arith.negf %78 : vector<32x16xf32>
    %80 = math.exp %79 : vector<32x16xf32>
    %cst_30 = arith.constant 1.000000e+00 : f32
    %81 = vector.broadcast %cst_30 : f32 to vector<32x16xf32>
    %82 = arith.addf %81, %80 : vector<32x16xf32>
    %83 = arith.divf %81, %82 : vector<32x16xf32>
    %84 = vector.extract_strided_slice %71 {offsets = [64, 0], sizes = [32, 16], strides = [1, 1]} : vector<128x16xf32> to vector<32x16xf32>
    %85 = math.tanh %84 : vector<32x16xf32>
    %86 = vector.extract_strided_slice %71 {offsets = [96, 0], sizes = [32, 16], strides = [1, 1]} : vector<128x16xf32> to vector<32x16xf32>
    %87 = arith.negf %86 : vector<32x16xf32>
    %88 = math.exp %87 : vector<32x16xf32>
    %cst_31 = arith.constant 1.000000e+00 : f32
    %89 = vector.broadcast %cst_31 : f32 to vector<32x16xf32>
    %90 = arith.addf %89, %88 : vector<32x16xf32>
    %91 = arith.divf %89, %90 : vector<32x16xf32>
    %92 = arith.mulf %83, %65 : vector<32x16xf32>
    %93 = arith.mulf %77, %85 : vector<32x16xf32>
    %94 = arith.addf %92, %93 : vector<32x16xf32>
    %95 = math.tanh %94 : vector<32x16xf32>
    %96 = arith.mulf %91, %95 : vector<32x16xf32>
    %c0_32 = arith.constant 0 : index
    %c32_33 = arith.constant 32 : index
    %97 = vector.load %arg12[%c0_32, %c32_33] : memref<32x128xf32, #tpu.memory_space<vmem>>, vector<32x16xf32>
    tpu.vector_store %arg12[%c0_32, %c32_33], %96 {strides = array<i32>} : memref<32x128xf32, #tpu.memory_space<vmem>>, vector<32x16xf32>,
    %cst_34 = arith.constant dense<0.000000e+00> : vector<128x16xf32>
    %98 = tpu.matmul %0, %96, %cst_34 {dimension_numbers = #tpu.dot_dimension_numbers<[1], [0], [0], [1], [0, 0, 1, 1], [], []>} : vector<128x32xf32>, vector<32x16xf32>, vector<128x16xf32> -> vector<128x16xf32>
    %c0_35 = arith.constant 0 : index
    %c48 = arith.constant 48 : index
    %99 = vector.load %arg11[%c0_35, %c48] : memref<128x128xf32, #tpu.memory_space<vmem>>, vector<128x16xf32>
    %100 = arith.addf %98, %99 : vector<128x16xf32>
    %101 = vector.extract_strided_slice %100 {offsets = [0, 0], sizes = [32, 16], strides = [1, 1]} : vector<128x16xf32> to vector<32x16xf32>
    %102 = arith.negf %101 : vector<32x16xf32>
    %103 = math.exp %102 : vector<32x16xf32>
    %cst_36 = arith.constant 1.000000e+00 : f32
    %104 = vector.broadcast %cst_36 : f32 to vector<32x16xf32>
    %105 = arith.addf %104, %103 : vector<32x16xf32>
    %106 = arith.divf %104, %105 : vector<32x16xf32>
    %107 = vector.extract_strided_slice %100 {offsets = [32, 0], sizes = [32, 16], strides = [1, 1]} : vector<128x16xf32> to vector<32x16xf32>
    %108 = arith.negf %107 : vector<32x16xf32>
    %109 = math.exp %108 : vector<32x16xf32>
    %cst_37 = arith.constant 1.000000e+00 : f32
    %110 = vector.broadcast %cst_37 : f32 to vector<32x16xf32>
    %111 = arith.addf %110, %109 : vector<32x16xf32>
    %112 = arith.divf %110, %111 : vector<32x16xf32>
    %113 = vector.extract_strided_slice %100 {offsets = [64, 0], sizes = [32, 16], strides = [1, 1]} : vector<128x16xf32> to vector<32x16xf32>
    %114 = math.tanh %113 : vector<32x16xf32>
    %115 = vector.extract_strided_slice %100 {offsets = [96, 0], sizes = [32, 16], strides = [1, 1]} : vector<128x16xf32> to vector<32x16xf32>
    %116 = arith.negf %115 : vector<32x16xf32>
    %117 = math.exp %116 : vector<32x16xf32>
    %cst_38 = arith.constant 1.000000e+00 : f32
    %118 = vector.broadcast %cst_38 : f32 to vector<32x16xf32>
    %119 = arith.addf %118, %117 : vector<32x16xf32>
    %120 = arith.divf %118, %119 : vector<32x16xf32>
    %121 = arith.mulf %112, %94 : vector<32x16xf32>
    %122 = arith.mulf %106, %114 : vector<32x16xf32>
    %123 = arith.addf %121, %122 : vector<32x16xf32>
    %124 = math.tanh %123 : vector<32x16xf32>
    %125 = arith.mulf %120, %124 : vector<32x16xf32>
    %c0_39 = arith.constant 0 : index
    %c48_40 = arith.constant 48 : index
    %126 = vector.load %arg12[%c0_39, %c48_40] : memref<32x128xf32, #tpu.memory_space<vmem>>, vector<32x16xf32>
    tpu.vector_store %arg12[%c0_39, %c48_40], %125 {strides = array<i32>} : memref<32x128xf32, #tpu.memory_space<vmem>>, vector<32x16xf32>,
    %cst_41 = arith.constant dense<0.000000e+00> : vector<128x16xf32>
    %127 = tpu.matmul %0, %125, %cst_41 {dimension_numbers = #tpu.dot_dimension_numbers<[1], [0], [0], [1], [0, 0, 1, 1], [], []>} : vector<128x32xf32>, vector<32x16xf32>, vector<128x16xf32> -> vector<128x16xf32>
    %c0_42 = arith.constant 0 : index
    %c64 = arith.constant 64 : index
    %128 = vector.load %arg11[%c0_42, %c64] : memref<128x128xf32, #tpu.memory_space<vmem>>, vector<128x16xf32>
    %129 = arith.addf %127, %128 : vector<128x16xf32>
    %130 = vector.extract_strided_slice %129 {offsets = [0, 0], sizes = [32, 16], strides = [1, 1]} : vector<128x16xf32> to vector<32x16xf32>
    %131 = arith.negf %130 : vector<32x16xf32>
    %132 = math.exp %131 : vector<32x16xf32>
    %cst_43 = arith.constant 1.000000e+00 : f32
    %133 = vector.broadcast %cst_43 : f32 to vector<32x16xf32>
    %134 = arith.addf %133, %132 : vector<32x16xf32>
    %135 = arith.divf %133, %134 : vector<32x16xf32>
    %136 = vector.extract_strided_slice %129 {offsets = [32, 0], sizes = [32, 16], strides = [1, 1]} : vector<128x16xf32> to vector<32x16xf32>
    %137 = arith.negf %136 : vector<32x16xf32>
    %138 = math.exp %137 : vector<32x16xf32>
    %cst_44 = arith.constant 1.000000e+00 : f32
    %139 = vector.broadcast %cst_44 : f32 to vector<32x16xf32>
    %140 = arith.addf %139, %138 : vector<32x16xf32>
    %141 = arith.divf %139, %140 : vector<32x16xf32>
    %142 = vector.extract_strided_slice %129 {offsets = [64, 0], sizes = [32, 16], strides = [1, 1]} : vector<128x16xf32> to vector<32x16xf32>
    %143 = math.tanh %142 : vector<32x16xf32>
    %144 = vector.extract_strided_slice %129 {offsets = [96, 0], sizes = [32, 16], strides = [1, 1]} : vector<128x16xf32> to vector<32x16xf32>
    %145 = arith.negf %144 : vector<32x16xf32>
    %146 = math.exp %145 : vector<32x16xf32>
    %cst_45 = arith.constant 1.000000e+00 : f32
    %147 = vector.broadcast %cst_45 : f32 to vector<32x16xf32>
    %148 = arith.addf %147, %146 : vector<32x16xf32>
    %149 = arith.divf %147, %148 : vector<32x16xf32>
    %150 = arith.mulf %141, %123 : vector<32x16xf32>
    %151 = arith.mulf %135, %143 : vector<32x16xf32>
    %152 = arith.addf %150, %151 : vector<32x16xf32>
    %153 = math.tanh %152 : vector<32x16xf32>
    %154 = arith.mulf %149, %153 : vector<32x16xf32>
    %c0_46 = arith.constant 0 : index
    %c64_47 = arith.constant 64 : index
    %155 = vector.load %arg12[%c0_46, %c64_47] : memref<32x128xf32, #tpu.memory_space<vmem>>, vector<32x16xf32>
    tpu.vector_store %arg12[%c0_46, %c64_47], %154 {strides = array<i32>} : memref<32x128xf32, #tpu.memory_space<vmem>>, vector<32x16xf32>,
    %cst_48 = arith.constant dense<0.000000e+00> : vector<128x16xf32>
    %156 = tpu.matmul %0, %154, %cst_48 {dimension_numbers = #tpu.dot_dimension_numbers<[1], [0], [0], [1], [0, 0, 1, 1], [], []>} : vector<128x32xf32>, vector<32x16xf32>, vector<128x16xf32> -> vector<128x16xf32>
    %c0_49 = arith.constant 0 : index
    %c80 = arith.constant 80 : index
    %157 = vector.load %arg11[%c0_49, %c80] : memref<128x128xf32, #tpu.memory_space<vmem>>, vector<128x16xf32>
    %158 = arith.addf %156, %157 : vector<128x16xf32>
    %159 = vector.extract_strided_slice %158 {offsets = [0, 0], sizes = [32, 16], strides = [1, 1]} : vector<128x16xf32> to vector<32x16xf32>
    %160 = arith.negf %159 : vector<32x16xf32>
    %161 = math.exp %160 : vector<32x16xf32>
    %cst_50 = arith.constant 1.000000e+00 : f32
    %162 = vector.broadcast %cst_50 : f32 to vector<32x16xf32>
    %163 = arith.addf %162, %161 : vector<32x16xf32>
    %164 = arith.divf %162, %163 : vector<32x16xf32>
    %165 = vector.extract_strided_slice %158 {offsets = [32, 0], sizes = [32, 16], strides = [1, 1]} : vector<128x16xf32> to vector<32x16xf32>
    %166 = arith.negf %165 : vector<32x16xf32>
    %167 = math.exp %166 : vector<32x16xf32>
    %cst_51 = arith.constant 1.000000e+00 : f32
    %168 = vector.broadcast %cst_51 : f32 to vector<32x16xf32>
    %169 = arith.addf %168, %167 : vector<32x16xf32>
    %170 = arith.divf %168, %169 : vector<32x16xf32>
    %171 = vector.extract_strided_slice %158 {offsets = [64, 0], sizes = [32, 16], strides = [1, 1]} : vector<128x16xf32> to vector<32x16xf32>
    %172 = math.tanh %171 : vector<32x16xf32>
    %173 = vector.extract_strided_slice %158 {offsets = [96, 0], sizes = [32, 16], strides = [1, 1]} : vector<128x16xf32> to vector<32x16xf32>
    %174 = arith.negf %173 : vector<32x16xf32>
    %175 = math.exp %174 : vector<32x16xf32>
    %cst_52 = arith.constant 1.000000e+00 : f32
    %176 = vector.broadcast %cst_52 : f32 to vector<32x16xf32>
    %177 = arith.addf %176, %175 : vector<32x16xf32>
    %178 = arith.divf %176, %177 : vector<32x16xf32>
    %179 = arith.mulf %170, %152 : vector<32x16xf32>
    %180 = arith.mulf %164, %172 : vector<32x16xf32>
    %181 = arith.addf %179, %180 : vector<32x16xf32>
    %182 = math.tanh %181 : vector<32x16xf32>
    %183 = arith.mulf %178, %182 : vector<32x16xf32>
    %c0_53 = arith.constant 0 : index
    %c80_54 = arith.constant 80 : index
    %184 = vector.load %arg12[%c0_53, %c80_54] : memref<32x128xf32, #tpu.memory_space<vmem>>, vector<32x16xf32>
    tpu.vector_store %arg12[%c0_53, %c80_54], %183 {strides = array<i32>} : memref<32x128xf32, #tpu.memory_space<vmem>>, vector<32x16xf32>,
    %cst_55 = arith.constant dense<0.000000e+00> : vector<128x16xf32>
    %185 = tpu.matmul %0, %183, %cst_55 {dimension_numbers = #tpu.dot_dimension_numbers<[1], [0], [0], [1], [0, 0, 1, 1], [], []>} : vector<128x32xf32>, vector<32x16xf32>, vector<128x16xf32> -> vector<128x16xf32>
    %c0_56 = arith.constant 0 : index
    %c96 = arith.constant 96 : index
    %186 = vector.load %arg11[%c0_56, %c96] : memref<128x128xf32, #tpu.memory_space<vmem>>, vector<128x16xf32>
    %187 = arith.addf %185, %186 : vector<128x16xf32>
    %188 = vector.extract_strided_slice %187 {offsets = [0, 0], sizes = [32, 16], strides = [1, 1]} : vector<128x16xf32> to vector<32x16xf32>
    %189 = arith.negf %188 : vector<32x16xf32>
    %190 = math.exp %189 : vector<32x16xf32>
    %cst_57 = arith.constant 1.000000e+00 : f32
    %191 = vector.broadcast %cst_57 : f32 to vector<32x16xf32>
    %192 = arith.addf %191, %190 : vector<32x16xf32>
    %193 = arith.divf %191, %192 : vector<32x16xf32>
    %194 = vector.extract_strided_slice %187 {offsets = [32, 0], sizes = [32, 16], strides = [1, 1]} : vector<128x16xf32> to vector<32x16xf32>
    %195 = arith.negf %194 : vector<32x16xf32>
    %196 = math.exp %195 : vector<32x16xf32>
    %cst_58 = arith.constant 1.000000e+00 : f32
    %197 = vector.broadcast %cst_58 : f32 to vector<32x16xf32>
    %198 = arith.addf %197, %196 : vector<32x16xf32>
    %199 = arith.divf %197, %198 : vector<32x16xf32>
    %200 = vector.extract_strided_slice %187 {offsets = [64, 0], sizes = [32, 16], strides = [1, 1]} : vector<128x16xf32> to vector<32x16xf32>
    %201 = math.tanh %200 : vector<32x16xf32>
    %202 = vector.extract_strided_slice %187 {offsets = [96, 0], sizes = [32, 16], strides = [1, 1]} : vector<128x16xf32> to vector<32x16xf32>
    %203 = arith.negf %202 : vector<32x16xf32>
    %204 = math.exp %203 : vector<32x16xf32>
    %cst_59 = arith.constant 1.000000e+00 : f32
    %205 = vector.broadcast %cst_59 : f32 to vector<32x16xf32>
    %206 = arith.addf %205, %204 : vector<32x16xf32>
    %207 = arith.divf %205, %206 : vector<32x16xf32>
    %208 = arith.mulf %199, %181 : vector<32x16xf32>
    %209 = arith.mulf %193, %201 : vector<32x16xf32>
    %210 = arith.addf %208, %209 : vector<32x16xf32>
    %211 = math.tanh %210 : vector<32x16xf32>
    %212 = arith.mulf %207, %211 : vector<32x16xf32>
    %c0_60 = arith.constant 0 : index
    %c96_61 = arith.constant 96 : index
    %213 = vector.load %arg12[%c0_60, %c96_61] : memref<32x128xf32, #tpu.memory_space<vmem>>, vector<32x16xf32>
    tpu.vector_store %arg12[%c0_60, %c96_61], %212 {strides = array<i32>} : memref<32x128xf32, #tpu.memory_space<vmem>>, vector<32x16xf32>,
    %cst_62 = arith.constant dense<0.000000e+00> : vector<128x16xf32>
    %214 = tpu.matmul %0, %212, %cst_62 {dimension_numbers = #tpu.dot_dimension_numbers<[1], [0], [0], [1], [0, 0, 1, 1], [], []>} : vector<128x32xf32>, vector<32x16xf32>, vector<128x16xf32> -> vector<128x16xf32>
    %c0_63 = arith.constant 0 : index
    %c112 = arith.constant 112 : index
    %215 = vector.load %arg11[%c0_63, %c112] : memref<128x128xf32, #tpu.memory_space<vmem>>, vector<128x16xf32>
    %216 = arith.addf %214, %215 : vector<128x16xf32>
    %217 = vector.extract_strided_slice %216 {offsets = [0, 0], sizes = [32, 16], strides = [1, 1]} : vector<128x16xf32> to vector<32x16xf32>
    %218 = arith.negf %217 : vector<32x16xf32>
    %219 = math.exp %218 : vector<32x16xf32>
    %cst_64 = arith.constant 1.000000e+00 : f32
    %220 = vector.broadcast %cst_64 : f32 to vector<32x16xf32>
    %221 = arith.addf %220, %219 : vector<32x16xf32>
    %222 = arith.divf %220, %221 : vector<32x16xf32>
    %223 = vector.extract_strided_slice %216 {offsets = [32, 0], sizes = [32, 16], strides = [1, 1]} : vector<128x16xf32> to vector<32x16xf32>
    %224 = arith.negf %223 : vector<32x16xf32>
    %225 = math.exp %224 : vector<32x16xf32>
    %cst_65 = arith.constant 1.000000e+00 : f32
    %226 = vector.broadcast %cst_65 : f32 to vector<32x16xf32>
    %227 = arith.addf %226, %225 : vector<32x16xf32>
    %228 = arith.divf %226, %227 : vector<32x16xf32>
    %229 = vector.extract_strided_slice %216 {offsets = [64, 0], sizes = [32, 16], strides = [1, 1]} : vector<128x16xf32> to vector<32x16xf32>
    %230 = math.tanh %229 : vector<32x16xf32>
    %231 = vector.extract_strided_slice %216 {offsets = [96, 0], sizes = [32, 16], strides = [1, 1]} : vector<128x16xf32> to vector<32x16xf32>
    %232 = arith.negf %231 : vector<32x16xf32>
    %233 = math.exp %232 : vector<32x16xf32>
    %cst_66 = arith.constant 1.000000e+00 : f32
    %234 = vector.broadcast %cst_66 : f32 to vector<32x16xf32>
    %235 = arith.addf %234, %233 : vector<32x16xf32>
    %236 = arith.divf %234, %235 : vector<32x16xf32>
    %237 = arith.mulf %228, %210 : vector<32x16xf32>
    %238 = arith.mulf %222, %230 : vector<32x16xf32>
    %239 = arith.addf %237, %238 : vector<32x16xf32>
    %240 = math.tanh %239 : vector<32x16xf32>
    %241 = arith.mulf %236, %240 : vector<32x16xf32>
    %c0_67 = arith.constant 0 : index
    %c112_68 = arith.constant 112 : index
    %242 = vector.load %arg12[%c0_67, %c112_68] : memref<32x128xf32, #tpu.memory_space<vmem>>, vector<32x16xf32>
    tpu.vector_store %arg12[%c0_67, %c112_68], %241 {strides = array<i32>} : memref<32x128xf32, #tpu.memory_space<vmem>>, vector<32x16xf32>,
    %c0_69 = arith.constant 0 : index
    %c0_70 = arith.constant 0 : index
    %243 = vector.load %arg6[%c0_69, %c0_70] : memref<128x32xf32, #tpu.memory_space<vmem>>, vector<128x32xf32>
    %c0_71 = arith.constant 0 : index
    %c0_72 = arith.constant 0 : index
    %244 = vector.load %arg7[%c0_71, %c0_72] : memref<128x1xf32, #tpu.memory_space<vmem>>, vector<128x1xf32>
    %c0_73 = arith.constant 0 : index
    %c0_74 = arith.constant 0 : index
    %245 = vector.load %arg5[%c0_73, %c0_74] : memref<128x32xf32, #tpu.memory_space<vmem>>, vector<128x32xf32>
    %c0_75 = arith.constant 0 : index
    %c0_76 = arith.constant 0 : index
    %246 = vector.load %arg12[%c0_75, %c0_76] : memref<32x128xf32, #tpu.memory_space<vmem>>, vector<32x128xf32>
    %cst_77 = arith.constant dense<0.000000e+00> : vector<128x128xf32>
    %247 = tpu.matmul %245, %246, %cst_77 {dimension_numbers = #tpu.dot_dimension_numbers<[1], [0], [0], [1], [0, 0, 1, 1], [], []>} : vector<128x32xf32>, vector<32x128xf32>, vector<128x128xf32> -> vector<128x128xf32>
    %248 = vector.broadcast %244 : vector<128x1xf32> to vector<128x128xf32>
    %249 = arith.addf %247, %248 : vector<128x128xf32>
    %c0_78 = arith.constant 0 : index
    %c0_79 = arith.constant 0 : index
    %250 = vector.load %arg11[%c0_78, %c0_79] : memref<128x128xf32, #tpu.memory_space<vmem>>, vector<128x128xf32>
    tpu.vector_store %arg11[%c0_78, %c0_79], %249 {strides = array<i32>} : memref<128x128xf32, #tpu.memory_space<vmem>>, vector<128x128xf32>,
    %cst_80 = arith.constant 0.000000e+00 : f32
    %251 = vector.broadcast %cst_80 : f32 to vector<32x16xf32>
    %cst_81 = arith.constant 0.000000e+00 : f32
    %252 = vector.broadcast %cst_81 : f32 to vector<32x16xf32>
    %cst_82 = arith.constant dense<0.000000e+00> : vector<128x16xf32>
    %253 = tpu.matmul %243, %251, %cst_82 {dimension_numbers = #tpu.dot_dimension_numbers<[1], [0], [0], [1], [0, 0, 1, 1], [], []>} : vector<128x32xf32>, vector<32x16xf32>, vector<128x16xf32> -> vector<128x16xf32>
    %c0_83 = arith.constant 0 : index
    %c0_84 = arith.constant 0 : index
    %254 = vector.load %arg11[%c0_83, %c0_84] : memref<128x128xf32, #tpu.memory_space<vmem>>, vector<128x16xf32>
    %255 = arith.addf %253, %254 : vector<128x16xf32>
    %256 = vector.extract_strided_slice %255 {offsets = [0, 0], sizes = [32, 16], strides = [1, 1]} : vector<128x16xf32> to vector<32x16xf32>
    %257 = arith.negf %256 : vector<32x16xf32>
    %258 = math.exp %257 : vector<32x16xf32>
    %cst_85 = arith.constant 1.000000e+00 : f32
    %259 = vector.broadcast %cst_85 : f32 to vector<32x16xf32>
    %260 = arith.addf %259, %258 : vector<32x16xf32>
    %261 = arith.divf %259, %260 : vector<32x16xf32>
    %262 = vector.extract_strided_slice %255 {offsets = [32, 0], sizes = [32, 16], strides = [1, 1]} : vector<128x16xf32> to vector<32x16xf32>
    %263 = arith.negf %262 : vector<32x16xf32>
    %264 = math.exp %263 : vector<32x16xf32>
    %cst_86 = arith.constant 1.000000e+00 : f32
    %265 = vector.broadcast %cst_86 : f32 to vector<32x16xf32>
    %266 = arith.addf %265, %264 : vector<32x16xf32>
    %267 = arith.divf %265, %266 : vector<32x16xf32>
    %268 = vector.extract_strided_slice %255 {offsets = [64, 0], sizes = [32, 16], strides = [1, 1]} : vector<128x16xf32> to vector<32x16xf32>
    %269 = math.tanh %268 : vector<32x16xf32>
    %270 = vector.extract_strided_slice %255 {offsets = [96, 0], sizes = [32, 16], strides = [1, 1]} : vector<128x16xf32> to vector<32x16xf32>
    %271 = arith.negf %270 : vector<32x16xf32>
    %272 = math.exp %271 : vector<32x16xf32>
    %cst_87 = arith.constant 1.000000e+00 : f32
    %273 = vector.broadcast %cst_87 : f32 to vector<32x16xf32>
    %274 = arith.addf %273, %272 : vector<32x16xf32>
    %275 = arith.divf %273, %274 : vector<32x16xf32>
    %276 = arith.mulf %267, %252 : vector<32x16xf32>
    %277 = arith.mulf %261, %269 : vector<32x16xf32>
    %278 = arith.addf %276, %277 : vector<32x16xf32>
    %279 = math.tanh %278 : vector<32x16xf32>
    %280 = arith.mulf %275, %279 : vector<32x16xf32>
    %c0_88 = arith.constant 0 : index
    %c0_89 = arith.constant 0 : index
    %281 = vector.load %arg12[%c0_88, %c0_89] : memref<32x128xf32, #tpu.memory_space<vmem>>, vector<32x16xf32>
    tpu.vector_store %arg12[%c0_88, %c0_89], %280 {strides = array<i32>} : memref<32x128xf32, #tpu.memory_space<vmem>>, vector<32x16xf32>,
    %cst_90 = arith.constant dense<0.000000e+00> : vector<128x16xf32>
    %282 = tpu.matmul %243, %280, %cst_90 {dimension_numbers = #tpu.dot_dimension_numbers<[1], [0], [0], [1], [0, 0, 1, 1], [], []>} : vector<128x32xf32>, vector<32x16xf32>, vector<128x16xf32> -> vector<128x16xf32>
    %c0_91 = arith.constant 0 : index
    %c16_92 = arith.constant 16 : index
    %283 = vector.load %arg11[%c0_91, %c16_92] : memref<128x128xf32, #tpu.memory_space<vmem>>, vector<128x16xf32>
    %284 = arith.addf %282, %283 : vector<128x16xf32>
    %285 = vector.extract_strided_slice %284 {offsets = [0, 0], sizes = [32, 16], strides = [1, 1]} : vector<128x16xf32> to vector<32x16xf32>
    %286 = arith.negf %285 : vector<32x16xf32>
    %287 = math.exp %286 : vector<32x16xf32>
    %cst_93 = arith.constant 1.000000e+00 : f32
    %288 = vector.broadcast %cst_93 : f32 to vector<32x16xf32>
    %289 = arith.addf %288, %287 : vector<32x16xf32>
    %290 = arith.divf %288, %289 : vector<32x16xf32>
    %291 = vector.extract_strided_slice %284 {offsets = [32, 0], sizes = [32, 16], strides = [1, 1]} : vector<128x16xf32> to vector<32x16xf32>
    %292 = arith.negf %291 : vector<32x16xf32>
    %293 = math.exp %292 : vector<32x16xf32>
    %cst_94 = arith.constant 1.000000e+00 : f32
    %294 = vector.broadcast %cst_94 : f32 to vector<32x16xf32>
    %295 = arith.addf %294, %293 : vector<32x16xf32>
    %296 = arith.divf %294, %295 : vector<32x16xf32>
    %297 = vector.extract_strided_slice %284 {offsets = [64, 0], sizes = [32, 16], strides = [1, 1]} : vector<128x16xf32> to vector<32x16xf32>
    %298 = math.tanh %297 : vector<32x16xf32>
    %299 = vector.extract_strided_slice %284 {offsets = [96, 0], sizes = [32, 16], strides = [1, 1]} : vector<128x16xf32> to vector<32x16xf32>
    %300 = arith.negf %299 : vector<32x16xf32>
    %301 = math.exp %300 : vector<32x16xf32>
    %cst_95 = arith.constant 1.000000e+00 : f32
    %302 = vector.broadcast %cst_95 : f32 to vector<32x16xf32>
    %303 = arith.addf %302, %301 : vector<32x16xf32>
    %304 = arith.divf %302, %303 : vector<32x16xf32>
    %305 = arith.mulf %296, %278 : vector<32x16xf32>
    %306 = arith.mulf %290, %298 : vector<32x16xf32>
    %307 = arith.addf %305, %306 : vector<32x16xf32>
    %308 = math.tanh %307 : vector<32x16xf32>
    %309 = arith.mulf %304, %308 : vector<32x16xf32>
    %c0_96 = arith.constant 0 : index
    %c16_97 = arith.constant 16 : index
    %310 = vector.load %arg12[%c0_96, %c16_97] : memref<32x128xf32, #tpu.memory_space<vmem>>, vector<32x16xf32>
    tpu.vector_store %arg12[%c0_96, %c16_97], %309 {strides = array<i32>} : memref<32x128xf32, #tpu.memory_space<vmem>>, vector<32x16xf32>,
    %cst_98 = arith.constant dense<0.000000e+00> : vector<128x16xf32>
    %311 = tpu.matmul %243, %309, %cst_98 {dimension_numbers = #tpu.dot_dimension_numbers<[1], [0], [0], [1], [0, 0, 1, 1], [], []>} : vector<128x32xf32>, vector<32x16xf32>, vector<128x16xf32> -> vector<128x16xf32>
    %c0_99 = arith.constant 0 : index
    %c32_100 = arith.constant 32 : index
    %312 = vector.load %arg11[%c0_99, %c32_100] : memref<128x128xf32, #tpu.memory_space<vmem>>, vector<128x16xf32>
    %313 = arith.addf %311, %312 : vector<128x16xf32>
    %314 = vector.extract_strided_slice %313 {offsets = [0, 0], sizes = [32, 16], strides = [1, 1]} : vector<128x16xf32> to vector<32x16xf32>
    %315 = arith.negf %314 : vector<32x16xf32>
    %316 = math.exp %315 : vector<32x16xf32>
    %cst_101 = arith.constant 1.000000e+00 : f32
    %317 = vector.broadcast %cst_101 : f32 to vector<32x16xf32>
    %318 = arith.addf %317, %316 : vector<32x16xf32>
    %319 = arith.divf %317, %318 : vector<32x16xf32>
    %320 = vector.extract_strided_slice %313 {offsets = [32, 0], sizes = [32, 16], strides = [1, 1]} : vector<128x16xf32> to vector<32x16xf32>
    %321 = arith.negf %320 : vector<32x16xf32>
    %322 = math.exp %321 : vector<32x16xf32>
    %cst_102 = arith.constant 1.000000e+00 : f32
    %323 = vector.broadcast %cst_102 : f32 to vector<32x16xf32>
    %324 = arith.addf %323, %322 : vector<32x16xf32>
    %325 = arith.divf %323, %324 : vector<32x16xf32>
    %326 = vector.extract_strided_slice %313 {offsets = [64, 0], sizes = [32, 16], strides = [1, 1]} : vector<128x16xf32> to vector<32x16xf32>
    %327 = math.tanh %326 : vector<32x16xf32>
    %328 = vector.extract_strided_slice %313 {offsets = [96, 0], sizes = [32, 16], strides = [1, 1]} : vector<128x16xf32> to vector<32x16xf32>
    %329 = arith.negf %328 : vector<32x16xf32>
    %330 = math.exp %329 : vector<32x16xf32>
    %cst_103 = arith.constant 1.000000e+00 : f32
    %331 = vector.broadcast %cst_103 : f32 to vector<32x16xf32>
    %332 = arith.addf %331, %330 : vector<32x16xf32>
    %333 = arith.divf %331, %332 : vector<32x16xf32>
    %334 = arith.mulf %325, %307 : vector<32x16xf32>
    %335 = arith.mulf %319, %327 : vector<32x16xf32>
    %336 = arith.addf %334, %335 : vector<32x16xf32>
    %337 = math.tanh %336 : vector<32x16xf32>
    %338 = arith.mulf %333, %337 : vector<32x16xf32>
    %c0_104 = arith.constant 0 : index
    %c32_105 = arith.constant 32 : index
    %339 = vector.load %arg12[%c0_104, %c32_105] : memref<32x128xf32, #tpu.memory_space<vmem>>, vector<32x16xf32>
    tpu.vector_store %arg12[%c0_104, %c32_105], %338 {strides = array<i32>} : memref<32x128xf32, #tpu.memory_space<vmem>>, vector<32x16xf32>,
    %cst_106 = arith.constant dense<0.000000e+00> : vector<128x16xf32>
    %340 = tpu.matmul %243, %338, %cst_106 {dimension_numbers = #tpu.dot_dimension_numbers<[1], [0], [0], [1], [0, 0, 1, 1], [], []>} : vector<128x32xf32>, vector<32x16xf32>, vector<128x16xf32> -> vector<128x16xf32>
    %c0_107 = arith.constant 0 : index
    %c48_108 = arith.constant 48 : index
    %341 = vector.load %arg11[%c0_107, %c48_108] : memref<128x128xf32, #tpu.memory_space<vmem>>, vector<128x16xf32>
    %342 = arith.addf %340, %341 : vector<128x16xf32>
    %343 = vector.extract_strided_slice %342 {offsets = [0, 0], sizes = [32, 16], strides = [1, 1]} : vector<128x16xf32> to vector<32x16xf32>
    %344 = arith.negf %343 : vector<32x16xf32>
    %345 = math.exp %344 : vector<32x16xf32>
    %cst_109 = arith.constant 1.000000e+00 : f32
    %346 = vector.broadcast %cst_109 : f32 to vector<32x16xf32>
    %347 = arith.addf %346, %345 : vector<32x16xf32>
    %348 = arith.divf %346, %347 : vector<32x16xf32>
    %349 = vector.extract_strided_slice %342 {offsets = [32, 0], sizes = [32, 16], strides = [1, 1]} : vector<128x16xf32> to vector<32x16xf32>
    %350 = arith.negf %349 : vector<32x16xf32>
    %351 = math.exp %350 : vector<32x16xf32>
    %cst_110 = arith.constant 1.000000e+00 : f32
    %352 = vector.broadcast %cst_110 : f32 to vector<32x16xf32>
    %353 = arith.addf %352, %351 : vector<32x16xf32>
    %354 = arith.divf %352, %353 : vector<32x16xf32>
    %355 = vector.extract_strided_slice %342 {offsets = [64, 0], sizes = [32, 16], strides = [1, 1]} : vector<128x16xf32> to vector<32x16xf32>
    %356 = math.tanh %355 : vector<32x16xf32>
    %357 = vector.extract_strided_slice %342 {offsets = [96, 0], sizes = [32, 16], strides = [1, 1]} : vector<128x16xf32> to vector<32x16xf32>
    %358 = arith.negf %357 : vector<32x16xf32>
    %359 = math.exp %358 : vector<32x16xf32>
    %cst_111 = arith.constant 1.000000e+00 : f32
    %360 = vector.broadcast %cst_111 : f32 to vector<32x16xf32>
    %361 = arith.addf %360, %359 : vector<32x16xf32>
    %362 = arith.divf %360, %361 : vector<32x16xf32>
    %363 = arith.mulf %354, %336 : vector<32x16xf32>
    %364 = arith.mulf %348, %356 : vector<32x16xf32>
    %365 = arith.addf %363, %364 : vector<32x16xf32>
    %366 = math.tanh %365 : vector<32x16xf32>
    %367 = arith.mulf %362, %366 : vector<32x16xf32>
    %c0_112 = arith.constant 0 : index
    %c48_113 = arith.constant 48 : index
    %368 = vector.load %arg12[%c0_112, %c48_113] : memref<32x128xf32, #tpu.memory_space<vmem>>, vector<32x16xf32>
    tpu.vector_store %arg12[%c0_112, %c48_113], %367 {strides = array<i32>} : memref<32x128xf32, #tpu.memory_space<vmem>>, vector<32x16xf32>,
    %cst_114 = arith.constant dense<0.000000e+00> : vector<128x16xf32>
    %369 = tpu.matmul %243, %367, %cst_114 {dimension_numbers = #tpu.dot_dimension_numbers<[1], [0], [0], [1], [0, 0, 1, 1], [], []>} : vector<128x32xf32>, vector<32x16xf32>, vector<128x16xf32> -> vector<128x16xf32>
    %c0_115 = arith.constant 0 : index
    %c64_116 = arith.constant 64 : index
    %370 = vector.load %arg11[%c0_115, %c64_116] : memref<128x128xf32, #tpu.memory_space<vmem>>, vector<128x16xf32>
    %371 = arith.addf %369, %370 : vector<128x16xf32>
    %372 = vector.extract_strided_slice %371 {offsets = [0, 0], sizes = [32, 16], strides = [1, 1]} : vector<128x16xf32> to vector<32x16xf32>
    %373 = arith.negf %372 : vector<32x16xf32>
    %374 = math.exp %373 : vector<32x16xf32>
    %cst_117 = arith.constant 1.000000e+00 : f32
    %375 = vector.broadcast %cst_117 : f32 to vector<32x16xf32>
    %376 = arith.addf %375, %374 : vector<32x16xf32>
    %377 = arith.divf %375, %376 : vector<32x16xf32>
    %378 = vector.extract_strided_slice %371 {offsets = [32, 0], sizes = [32, 16], strides = [1, 1]} : vector<128x16xf32> to vector<32x16xf32>
    %379 = arith.negf %378 : vector<32x16xf32>
    %380 = math.exp %379 : vector<32x16xf32>
    %cst_118 = arith.constant 1.000000e+00 : f32
    %381 = vector.broadcast %cst_118 : f32 to vector<32x16xf32>
    %382 = arith.addf %381, %380 : vector<32x16xf32>
    %383 = arith.divf %381, %382 : vector<32x16xf32>
    %384 = vector.extract_strided_slice %371 {offsets = [64, 0], sizes = [32, 16], strides = [1, 1]} : vector<128x16xf32> to vector<32x16xf32>
    %385 = math.tanh %384 : vector<32x16xf32>
    %386 = vector.extract_strided_slice %371 {offsets = [96, 0], sizes = [32, 16], strides = [1, 1]} : vector<128x16xf32> to vector<32x16xf32>
    %387 = arith.negf %386 : vector<32x16xf32>
    %388 = math.exp %387 : vector<32x16xf32>
    %cst_119 = arith.constant 1.000000e+00 : f32
    %389 = vector.broadcast %cst_119 : f32 to vector<32x16xf32>
    %390 = arith.addf %389, %388 : vector<32x16xf32>
    %391 = arith.divf %389, %390 : vector<32x16xf32>
    %392 = arith.mulf %383, %365 : vector<32x16xf32>
    %393 = arith.mulf %377, %385 : vector<32x16xf32>
    %394 = arith.addf %392, %393 : vector<32x16xf32>
    %395 = math.tanh %394 : vector<32x16xf32>
    %396 = arith.mulf %391, %395 : vector<32x16xf32>
    %c0_120 = arith.constant 0 : index
    %c64_121 = arith.constant 64 : index
    %397 = vector.load %arg12[%c0_120, %c64_121] : memref<32x128xf32, #tpu.memory_space<vmem>>, vector<32x16xf32>
    tpu.vector_store %arg12[%c0_120, %c64_121], %396 {strides = array<i32>} : memref<32x128xf32, #tpu.memory_space<vmem>>, vector<32x16xf32>,
    %cst_122 = arith.constant dense<0.000000e+00> : vector<128x16xf32>
    %398 = tpu.matmul %243, %396, %cst_122 {dimension_numbers = #tpu.dot_dimension_numbers<[1], [0], [0], [1], [0, 0, 1, 1], [], []>} : vector<128x32xf32>, vector<32x16xf32>, vector<128x16xf32> -> vector<128x16xf32>
    %c0_123 = arith.constant 0 : index
    %c80_124 = arith.constant 80 : index
    %399 = vector.load %arg11[%c0_123, %c80_124] : memref<128x128xf32, #tpu.memory_space<vmem>>, vector<128x16xf32>
    %400 = arith.addf %398, %399 : vector<128x16xf32>
    %401 = vector.extract_strided_slice %400 {offsets = [0, 0], sizes = [32, 16], strides = [1, 1]} : vector<128x16xf32> to vector<32x16xf32>
    %402 = arith.negf %401 : vector<32x16xf32>
    %403 = math.exp %402 : vector<32x16xf32>
    %cst_125 = arith.constant 1.000000e+00 : f32
    %404 = vector.broadcast %cst_125 : f32 to vector<32x16xf32>
    %405 = arith.addf %404, %403 : vector<32x16xf32>
    %406 = arith.divf %404, %405 : vector<32x16xf32>
    %407 = vector.extract_strided_slice %400 {offsets = [32, 0], sizes = [32, 16], strides = [1, 1]} : vector<128x16xf32> to vector<32x16xf32>
    %408 = arith.negf %407 : vector<32x16xf32>
    %409 = math.exp %408 : vector<32x16xf32>
    %cst_126 = arith.constant 1.000000e+00 : f32
    %410 = vector.broadcast %cst_126 : f32 to vector<32x16xf32>
    %411 = arith.addf %410, %409 : vector<32x16xf32>
    %412 = arith.divf %410, %411 : vector<32x16xf32>
    %413 = vector.extract_strided_slice %400 {offsets = [64, 0], sizes = [32, 16], strides = [1, 1]} : vector<128x16xf32> to vector<32x16xf32>
    %414 = math.tanh %413 : vector<32x16xf32>
    %415 = vector.extract_strided_slice %400 {offsets = [96, 0], sizes = [32, 16], strides = [1, 1]} : vector<128x16xf32> to vector<32x16xf32>
    %416 = arith.negf %415 : vector<32x16xf32>
    %417 = math.exp %416 : vector<32x16xf32>
    %cst_127 = arith.constant 1.000000e+00 : f32
    %418 = vector.broadcast %cst_127 : f32 to vector<32x16xf32>
    %419 = arith.addf %418, %417 : vector<32x16xf32>
    %420 = arith.divf %418, %419 : vector<32x16xf32>
    %421 = arith.mulf %412, %394 : vector<32x16xf32>
    %422 = arith.mulf %406, %414 : vector<32x16xf32>
    %423 = arith.addf %421, %422 : vector<32x16xf32>
    %424 = math.tanh %423 : vector<32x16xf32>
    %425 = arith.mulf %420, %424 : vector<32x16xf32>
    %c0_128 = arith.constant 0 : index
    %c80_129 = arith.constant 80 : index
    %426 = vector.load %arg12[%c0_128, %c80_129] : memref<32x128xf32, #tpu.memory_space<vmem>>, vector<32x16xf32>
    tpu.vector_store %arg12[%c0_128, %c80_129], %425 {strides = array<i32>} : memref<32x128xf32, #tpu.memory_space<vmem>>, vector<32x16xf32>,
    %cst_130 = arith.constant dense<0.000000e+00> : vector<128x16xf32>
    %427 = tpu.matmul %243, %425, %cst_130 {dimension_numbers = #tpu.dot_dimension_numbers<[1], [0], [0], [1], [0, 0, 1, 1], [], []>} : vector<128x32xf32>, vector<32x16xf32>, vector<128x16xf32> -> vector<128x16xf32>
    %c0_131 = arith.constant 0 : index
    %c96_132 = arith.constant 96 : index
    %428 = vector.load %arg11[%c0_131, %c96_132] : memref<128x128xf32, #tpu.memory_space<vmem>>, vector<128x16xf32>
    %429 = arith.addf %427, %428 : vector<128x16xf32>
    %430 = vector.extract_strided_slice %429 {offsets = [0, 0], sizes = [32, 16], strides = [1, 1]} : vector<128x16xf32> to vector<32x16xf32>
    %431 = arith.negf %430 : vector<32x16xf32>
    %432 = math.exp %431 : vector<32x16xf32>
    %cst_133 = arith.constant 1.000000e+00 : f32
    %433 = vector.broadcast %cst_133 : f32 to vector<32x16xf32>
    %434 = arith.addf %433, %432 : vector<32x16xf32>
    %435 = arith.divf %433, %434 : vector<32x16xf32>
    %436 = vector.extract_strided_slice %429 {offsets = [32, 0], sizes = [32, 16], strides = [1, 1]} : vector<128x16xf32> to vector<32x16xf32>
    %437 = arith.negf %436 : vector<32x16xf32>
    %438 = math.exp %437 : vector<32x16xf32>
    %cst_134 = arith.constant 1.000000e+00 : f32
    %439 = vector.broadcast %cst_134 : f32 to vector<32x16xf32>
    %440 = arith.addf %439, %438 : vector<32x16xf32>
    %441 = arith.divf %439, %440 : vector<32x16xf32>
    %442 = vector.extract_strided_slice %429 {offsets = [64, 0], sizes = [32, 16], strides = [1, 1]} : vector<128x16xf32> to vector<32x16xf32>
    %443 = math.tanh %442 : vector<32x16xf32>
    %444 = vector.extract_strided_slice %429 {offsets = [96, 0], sizes = [32, 16], strides = [1, 1]} : vector<128x16xf32> to vector<32x16xf32>
    %445 = arith.negf %444 : vector<32x16xf32>
    %446 = math.exp %445 : vector<32x16xf32>
    %cst_135 = arith.constant 1.000000e+00 : f32
    %447 = vector.broadcast %cst_135 : f32 to vector<32x16xf32>
    %448 = arith.addf %447, %446 : vector<32x16xf32>
    %449 = arith.divf %447, %448 : vector<32x16xf32>
    %450 = arith.mulf %441, %423 : vector<32x16xf32>
    %451 = arith.mulf %435, %443 : vector<32x16xf32>
    %452 = arith.addf %450, %451 : vector<32x16xf32>
    %453 = math.tanh %452 : vector<32x16xf32>
    %454 = arith.mulf %449, %453 : vector<32x16xf32>
    %c0_136 = arith.constant 0 : index
    %c96_137 = arith.constant 96 : index
    %455 = vector.load %arg12[%c0_136, %c96_137] : memref<32x128xf32, #tpu.memory_space<vmem>>, vector<32x16xf32>
    tpu.vector_store %arg12[%c0_136, %c96_137], %454 {strides = array<i32>} : memref<32x128xf32, #tpu.memory_space<vmem>>, vector<32x16xf32>,
    %cst_138 = arith.constant dense<0.000000e+00> : vector<128x16xf32>
    %456 = tpu.matmul %243, %454, %cst_138 {dimension_numbers = #tpu.dot_dimension_numbers<[1], [0], [0], [1], [0, 0, 1, 1], [], []>} : vector<128x32xf32>, vector<32x16xf32>, vector<128x16xf32> -> vector<128x16xf32>
    %c0_139 = arith.constant 0 : index
    %c112_140 = arith.constant 112 : index
    %457 = vector.load %arg11[%c0_139, %c112_140] : memref<128x128xf32, #tpu.memory_space<vmem>>, vector<128x16xf32>
    %458 = arith.addf %456, %457 : vector<128x16xf32>
    %459 = vector.extract_strided_slice %458 {offsets = [0, 0], sizes = [32, 16], strides = [1, 1]} : vector<128x16xf32> to vector<32x16xf32>
    %460 = arith.negf %459 : vector<32x16xf32>
    %461 = math.exp %460 : vector<32x16xf32>
    %cst_141 = arith.constant 1.000000e+00 : f32
    %462 = vector.broadcast %cst_141 : f32 to vector<32x16xf32>
    %463 = arith.addf %462, %461 : vector<32x16xf32>
    %464 = arith.divf %462, %463 : vector<32x16xf32>
    %465 = vector.extract_strided_slice %458 {offsets = [32, 0], sizes = [32, 16], strides = [1, 1]} : vector<128x16xf32> to vector<32x16xf32>
    %466 = arith.negf %465 : vector<32x16xf32>
    %467 = math.exp %466 : vector<32x16xf32>
    %cst_142 = arith.constant 1.000000e+00 : f32
    %468 = vector.broadcast %cst_142 : f32 to vector<32x16xf32>
    %469 = arith.addf %468, %467 : vector<32x16xf32>
    %470 = arith.divf %468, %469 : vector<32x16xf32>
    %471 = vector.extract_strided_slice %458 {offsets = [64, 0], sizes = [32, 16], strides = [1, 1]} : vector<128x16xf32> to vector<32x16xf32>
    %472 = math.tanh %471 : vector<32x16xf32>
    %473 = vector.extract_strided_slice %458 {offsets = [96, 0], sizes = [32, 16], strides = [1, 1]} : vector<128x16xf32> to vector<32x16xf32>
    %474 = arith.negf %473 : vector<32x16xf32>
    %475 = math.exp %474 : vector<32x16xf32>
    %cst_143 = arith.constant 1.000000e+00 : f32
    %476 = vector.broadcast %cst_143 : f32 to vector<32x16xf32>
    %477 = arith.addf %476, %475 : vector<32x16xf32>
    %478 = arith.divf %476, %477 : vector<32x16xf32>
    %479 = arith.mulf %470, %452 : vector<32x16xf32>
    %480 = arith.mulf %464, %472 : vector<32x16xf32>
    %481 = arith.addf %479, %480 : vector<32x16xf32>
    %482 = math.tanh %481 : vector<32x16xf32>
    %483 = arith.mulf %478, %482 : vector<32x16xf32>
    %c0_144 = arith.constant 0 : index
    %c112_145 = arith.constant 112 : index
    %484 = vector.load %arg12[%c0_144, %c112_145] : memref<32x128xf32, #tpu.memory_space<vmem>>, vector<32x16xf32>
    tpu.vector_store %arg12[%c0_144, %c112_145], %483 {strides = array<i32>} : memref<32x128xf32, #tpu.memory_space<vmem>>, vector<32x16xf32>,
    %c0_146 = arith.constant 0 : index
    %c0_147 = arith.constant 0 : index
    %485 = vector.load %arg8[%c0_146, %c0_147] : memref<8x32xf32, #tpu.memory_space<vmem>>, vector<8x32xf32>
    %c0_148 = arith.constant 0 : index
    %c0_149 = arith.constant 0 : index
    %486 = vector.load %arg12[%c0_148, %c0_149] : memref<32x128xf32, #tpu.memory_space<vmem>>, vector<32x128xf32>
    %cst_150 = arith.constant dense<0.000000e+00> : vector<8x128xf32>
    %487 = tpu.matmul %485, %486, %cst_150 {dimension_numbers = #tpu.dot_dimension_numbers<[1], [0], [0], [1], [0, 0, 1, 1], [], []>} : vector<8x32xf32>, vector<32x128xf32>, vector<8x128xf32> -> vector<8x128xf32>
    %c0_151 = arith.constant 0 : index
    %c0_152 = arith.constant 0 : index
    %488 = vector.load %arg9[%c0_151, %c0_152] : memref<8x1xf32, #tpu.memory_space<vmem>>, vector<8x1xf32>
    %489 = vector.broadcast %488 : vector<8x1xf32> to vector<8x128xf32>
    %490 = arith.addf %487, %489 : vector<8x128xf32>
    %c0_153 = arith.constant 0 : index
    %c0_154 = arith.constant 0 : index
    %c0_155 = arith.constant 0 : index
    %491 = vector.load %arg10[%c0_153, %c0_154, %c0_155] : memref<1x8x128xf32, #tpu.memory_space<vmem>>, vector<1x8x128xf32>
    %492 = vector.shape_cast %491 : vector<1x8x128xf32> to vector<8x128xf32>
    %493 = vector.shape_cast %490 : vector<8x128xf32> to vector<1x8x128xf32>
    tpu.vector_store %arg10[%c0_153, %c0_154, %c0_155], %493 {strides = array<i32>} : memref<1x8x128xf32, #tpu.memory_space<vmem>>, vector<1x8x128xf32>,
    return
  }
  func.func @transform_0(%arg0: i32) -> (i32, i32, i32) {
    %c0_i32 = arith.constant 0 : i32
    %c0_i32_0 = arith.constant 0 : i32
    %c0_i32_1 = arith.constant 0 : i32
    return %arg0, %c0_i32, %c0_i32_0 : i32, i32, i32
  }
  func.func @transform_1(%arg0: i32) -> (i32, i32) {
    %c0_i32 = arith.constant 0 : i32
    %c0_i32_0 = arith.constant 0 : i32
    %c0_i32_1 = arith.constant 0 : i32
    return %c0_i32, %c0_i32_0 : i32, i32
  }
  func.func @transform_2(%arg0: i32) -> (i32, i32) {
    %c0_i32 = arith.constant 0 : i32
    %c0_i32_0 = arith.constant 0 : i32
    %c0_i32_1 = arith.constant 0 : i32
    return %c0_i32, %c0_i32_0 : i32, i32
  }
  func.func @transform_3(%arg0: i32) -> (i32, i32) {
    %c0_i32 = arith.constant 0 : i32
    %c0_i32_0 = arith.constant 0 : i32
    %c0_i32_1 = arith.constant 0 : i32
    return %c0_i32, %c0_i32_0 : i32, i32
  }
  func.func @transform_4(%arg0: i32) -> (i32, i32) {
    %c0_i32 = arith.constant 0 : i32
    %c0_i32_0 = arith.constant 0 : i32
    %c0_i32_1 = arith.constant 0 : i32
    return %c0_i32, %c0_i32_0 : i32, i32
  }
  func.func @transform_5(%arg0: i32) -> (i32, i32) {
    %c0_i32 = arith.constant 0 : i32
    %c0_i32_0 = arith.constant 0 : i32
    %c0_i32_1 = arith.constant 0 : i32
    return %c0_i32, %c0_i32_0 : i32, i32
  }
  func.func @transform_6(%arg0: i32) -> (i32, i32) {
    %c0_i32 = arith.constant 0 : i32
    %c0_i32_0 = arith.constant 0 : i32
    %c0_i32_1 = arith.constant 0 : i32
    return %c0_i32, %c0_i32_0 : i32, i32
  }
  func.func @transform_7(%arg0: i32) -> (i32, i32) {
    %c0_i32 = arith.constant 0 : i32
    %c0_i32_0 = arith.constant 0 : i32
    %c0_i32_1 = arith.constant 0 : i32
    return %c0_i32, %c0_i32_0 : i32, i32
  }
  func.func @transform_8(%arg0: i32) -> (i32, i32) {
    %c0_i32 = arith.constant 0 : i32
    %c0_i32_0 = arith.constant 0 : i32
    %c0_i32_1 = arith.constant 0 : i32
    return %c0_i32, %c0_i32_0 : i32, i32
  }
  func.func @transform_9(%arg0: i32) -> (i32, i32, i32) {
    %c0_i32 = arith.constant 0 : i32
    %c0_i32_0 = arith.constant 0 : i32
    %c0_i32_1 = arith.constant 0 : i32
    return %arg0, %c0_i32, %c0_i32_0 : i32, i32, i32
  }
}

</mosaic_0001>

<bundles_post_ra>
// kernel: lstm_model_forward.1
= control target key start
LH: loop header
LB: loop body
LE: loop exit
PB: predicated region body
PF: predicated region fallthrough
CT: control target
= control target key end

     0   :  { %s9259_s30 = smov 0   ;;  %s15954_s0 = inlined_call_operand.vmem [shape: f32[2,4,128], index: 0, kind: input, shape index: {}]   ;;  %s15955_s1 = inlined_call_operand.vmem [shape: f32[128,4], index: 1, kind: input, shape index: {}]   ;;  %s15956_s2 = inlined_call_operand.vmem [shape: f32[128,32], index: 2, kind: input, shape index: {}]   ;;  %s15957_s3 = inlined_call_operand.vmem [shape: f32[128,1], index: 3, kind: input, shape index: {}]   ;;  %s15958_s4 = inlined_call_operand.vmem [shape: f32[128,32], index: 4, kind: input, shape index: {}]   ;;  %s15959_s5 = inlined_call_operand.vmem [shape: f32[128,32], index: 5, kind: input, shape index: {}]   ;;  %s15960_s6 = inlined_call_operand.vmem [shape: f32[128,1], index: 6, kind: input, shape index: {}]   ;;  %s15961_s7 = inlined_call_operand.vmem [shape: f32[8,32], index: 7, kind: input, shape index: {}]   ;;  %s15962_s8 = inlined_call_operand.vmem [shape: f32[8,1], index: 8, kind: input, shape index: {}]   ;;  %s15963_s9 = inlined_call_operand.vmem [shape: f32[2,8,128], index: 9, kind: output, shape index: {}]  }
   0x1 LB: > { %s7557_s10 = sadd.s32 4294967295, %s9198_s30   ;;  %p7561_p0 = scmp.ge.s32.totalorder %s9198_s30, 1  ;;  %s9198_s30 = sphi %s9259_s30, %s19_s30  }
   0x2   : > { %p286_p1 = scmp.lt.s32.totalorder %s9198_s30, 3 }
   0x4   : > { %p287_p2 = pnand %p7561_p0, %p286_p1 }
   0x6   : > { %290 = sbr.rel (%p287_p2) target bundleno = 4912 (0x1330), region = 56 }
   0xb   : > { %v347_v0 = vld [vmem:[%s15957_s3 + $0x18] sm:$0xff]  ;;  %p320_p3 = scmp.lt.s32.totalorder %s7557_s10, 1  ;;  %v9200_v1 = vmov 0   ;;  %v9273_v2 = vld [vmem:[%s15956_s2] sm:$0xff]  ;;  %vm607_vm0 = vcmask 261120   ;;  %v337_v3 = vld [vmem:[%s15956_s2 + $0x48] sm:$0xff] }
   0xc   : > { %8067 = vset.pattern.permute.xlu0 %v9200_v1  ;;  %8068 = vset.pattern.permute.xlu1 %v9200_v1  ;;  %v15964_v4 = vmov 0.0   ;;  %v346_v5 = vld [vmem:[%s15957_s3 + $0x10] sm:$0xff]  ;;  %vm506_vm1 = vcmask 1043456   ;;  %v360_v6 = vld [vmem:[%s15955_s1] sm:$0xff]  ;;  %vm457_vm2 = vcmask 31744   ;;  %v369_v7 = vld [vmem:[%s15955_s1 + $0x48] sm:$0xff] }
   0xd   : > { %394 = vperm.xlu0 %8067, %v347_v0   ;;  %s16653_s10 = smov (!%p320_p3, %s7557_s10), 1  ;;  %671 = vmatpush.msra.mxu1 %v15964_v4  ;;  %v345_v9 = vld [vmem:[%s15957_s3 + $0x8] sm:$0xff]  ;;  %v351_v10 = vld [vmem:[%s15957_s3 + $0x38] sm:$0xff]  ;;  %v338_v12 = vld [vmem:[%s15956_s2 + $0x50] sm:$0xff]  ;;  %s9202_s16 = smov 112  }
   0xe   : > { %8049 = vmatpush.msra.mxu2 %v15964_v4  ;;  %7581 = vmatmul.msk.f32.vlgmr.msra.gmra.mxu1 %vm607_vm0, %v9273_v2  ;;  %s7562_s19 = sshll.u32 %s16653_s10, 2  ;;  %v9309_v11 = vld [vmem:[%s15956_s2 + $0x8] sm:$0xff]  ;;  %v350_v13 = vld [vmem:[%s15957_s3 + $0x30] sm:$0xff]  ;;  %v344_v17 = vld [vmem:[%s15957_s3] sm:$0xff]  ;;  %s9203_s17 = smov 96  }
   0xf   : > { %7590 = vmatmul.msk.f32.vlgmr.msra.gmra.mxu2 %vm607_vm0, %v337_v3  ;;  %389 = vperm.xlu1 %8068, %v346_v5   ;;  %s323_s22 = scalar_lea.vmem %s15954_s0, %s7562_s19  ;;  %v361_v14 = vld [vmem:[%s15955_s1 + $0x8] sm:$0xff]  ;;  %v370_v15 = vld [vmem:[%s15955_s1 + $0x50] sm:$0xff]  ;;  %v9342_v19 = vld [vmem:[%s15956_s2 + $0x58] sm:$0xff]  ;;  %s9204_s18 = smov 80  }
  0x10   : > { %8069 = vset.pattern.permute.xlu2 %v9200_v1  ;;  %v376_v8 = vld [vmem:[%s323_s22] sm:$0xf]  ;;  %v349_v16 = vld [vmem:[%s15957_s3 + $0x28] sm:$0xff]  ;;  %v9337_v18 = vld [vmem:[%s15956_s2 + $0x10] sm:$0xff]  ;;  %15981 = vst [vmem:[#allocation4_spill] sm:$0xff] %v9342_v19  ;;  %s9205_s19 = smov 64  }
  0x11   : > { %7564 = vmatpush.msk.msra.mxu0 %vm506_vm1, %v376_v8  ;;  %8048 = vmatpush.msk.msra.mxu3 %vm506_vm1, %v376_v8  ;;  %v348_v20 = vld [vmem:[%s15957_s3 + $0x20] sm:$0xff]  ;;  %v362_v21 = vld [vmem:[%s15955_s1 + $0x10] sm:$0xff]  ;;  %v371_v22 = vld [vmem:[%s15955_s1 + $0x58] sm:$0xff]  ;;  %s9206_s24 = smov 48   ;;  %s9207_s25 = smov 32  }
  0x12   : > { %7565 = vmatmul.msk.f32.vlgmr.msra.gmra.mxu0 %vm457_vm2, %v360_v6  ;;  %7574 = vmatmul.msk.f32.vlgmr.msra.gmra.mxu3 %vm457_vm2, %v369_v7  ;;  %v359_v23 = vld [vmem:[%s15957_s3 + $0x78] sm:$0xff]  ;;  %v358_v24 = vld [vmem:[%s15957_s3 + $0x70] sm:$0xff]  ;;  %v9373_v26 = vld [vmem:[%s15956_s2 + $0x60] sm:$0xff]  ;;  %s9208_s26 = smov 16  }
  0x13   : > { %384 = vperm.xlu2 %8069, %v345_v9   ;;  %v9368_v25 = vld [vmem:[%s15956_s2 + $0x18] sm:$0xff]  ;;  %15982 = vst [vmem:[#allocation5_spill] sm:$0xff] %v9373_v26  ;;  %v357_v27 = vld [vmem:[%s15957_s3 + $0x68] sm:$0xff]  ;;  %v372_v29 = vld [vmem:[%s15955_s1 + $0x60] sm:$0xff] }
  0x14   : > { %v363_v28 = vld [vmem:[%s15955_s1 + $0x18] sm:$0xff]  ;;  %v356_v30 = vld [vmem:[%s15957_s3 + $0x60] sm:$0xff]  ;;  %v9404_v33 = vld [vmem:[%s15956_s2 + $0x68] sm:$0xff] }
  0x15   : > { %414 = vperm.xlu0 %8067, %v351_v10   ;;  %v355_v31 = vld [vmem:[%s15957_s3 + $0x58] sm:$0xff]  ;;  %v9399_v32 = vld [vmem:[%s15956_s2 + $0x20] sm:$0xff]  ;;  %15983 = vst [vmem:[#allocation6_spill] sm:$0xff] %v9404_v33  ;;  %v354_v34 = vld [vmem:[%s15957_s3 + $0x50] sm:$0xff] }
  0x16   : > { %7582 = vmatmul.msk.f32.gmra.mxu1 %vm607_vm0, %v9309_v11  ;;  %v364_v35 = vld [vmem:[%s15955_s1 + $0x20] sm:$0xff]  ;;  %v373_v36 = vld [vmem:[%s15955_s1 + $0x68] sm:$0xff]  ;;  %v9435_v40 = vld [vmem:[%s15956_s2 + $0x70] sm:$0xff] }
  0x17   : > { %7591 = vmatmul.msk.f32.gmra.mxu2 %vm607_vm0, %v338_v12  ;;  %409 = vperm.xlu1 %8068, %v350_v13   ;;  %v353_v37 = vld [vmem:[%s15957_s3 + $0x48] sm:$0xff]  ;;  %v352_v38 = vld [vmem:[%s15957_s3 + $0x40] sm:$0xff]  ;;  %15984 = vst [vmem:[#allocation7_spill] sm:$0xff] %v9435_v40  ;;  %v374_v42 = vld [vmem:[%s15955_s1 + $0x70] sm:$0xff] }
  0x18   : > { %v9430_v39 = vld [vmem:[%s15956_s2 + $0x28] sm:$0xff]  ;;  %v9452_v43 = vld [vmem:[%s15956_s2 + $0x30] sm:$0xff]  ;;  %v9457_v44 = vld [vmem:[%s15956_s2 + $0x78] sm:$0xff] }
  0x19   : > { %v365_v41 = vld [vmem:[%s15955_s1 + $0x28] sm:$0xff]  ;;  %15985 = vst [vmem:[#allocation8_spill] sm:$0xff] %v9457_v44  ;;  %v366_v45 = vld [vmem:[%s15955_s1 + $0x30] sm:$0xff]  ;;  %v375_v46 = vld [vmem:[%s15955_s1 + $0x78] sm:$0xff] }
  0x1a   : > { %7566 = vmatmul.msk.f32.gmra.mxu0 %vm457_vm2, %v361_v14  ;;  %7575 = vmatmul.msk.f32.gmra.mxu3 %vm457_vm2, %v370_v15  ;;  %v9474_v47 = vld [vmem:[%s15956_s2 + $0x38] sm:$0xff]  ;;  %v9485_v49 = vld [vmem:[%s15956_s2 + $0x40] sm:$0xff] }
  0x1b   : > { %404 = vperm.xlu2 %8069, %v349_v16   ;;  %15986 = vst [vmem:[#allocation9_spill] sm:$0xff] %v9474_v47  ;;  %v367_v48 = vld [vmem:[%s15955_s1 + $0x38] sm:$0xff]  ;;  %v368_v50 = vld [vmem:[%s15955_s1 + $0x40] sm:$0xff] }
  0x1c   : > { %15987 = vst [vmem:[#allocation10_spill] sm:$0xff] %v9485_v49 }
  0x1d   : > { %379 = vperm.xlu0 %8067, %v344_v17  }
  0x1e   : > { %7583 = vmatmul.msk.f32.gmra.mxu1 %vm607_vm0, %v9337_v18 }
  0x1f   : > { %7592 = vmatmul.msk.f32.gmra.mxu2 %vm607_vm0, %v9342_v19  ;;  %399 = vperm.xlu1 %8068, %v348_v20  }
  0x22   : > { %7567 = vmatmul.msk.f32.gmra.mxu0 %vm457_vm2, %v362_v21  ;;  %7576 = vmatmul.msk.f32.gmra.mxu3 %vm457_vm2, %v371_v22 }
  0x23   : > { %454 = vperm.xlu2 %8069, %v359_v23  }
  0x25   : > { %449 = vperm.xlu0 %8067, %v358_v24  }
  0x26   : > { %7584 = vmatmul.msk.f32.gmra.mxu1 %vm607_vm0, %v9368_v25 }
  0x27   : > { %7593 = vmatmul.msk.f32.gmra.mxu2 %vm607_vm0, %v9373_v26  ;;  %444 = vperm.xlu1 %8068, %v357_v27  }
  0x2a   : > { %7568 = vmatmul.msk.f32.gmra.mxu0 %vm457_vm2, %v363_v28  ;;  %7577 = vmatmul.msk.f32.gmra.mxu3 %vm457_vm2, %v372_v29 }
  0x2b   : > { %439 = vperm.xlu2 %8069, %v356_v30  }
  0x2d   : > { %434 = vperm.xlu0 %8067, %v355_v31  }
  0x2e   : > { %7585 = vmatmul.msk.f32.gmra.mxu1 %vm607_vm0, %v9399_v32 }
  0x2f   : > { %7594 = vmatmul.msk.f32.gmra.mxu2 %vm607_vm0, %v9404_v33  ;;  %429 = vperm.xlu1 %8068, %v354_v34  }
  0x32   : > { %7569 = vmatmul.msk.f32.gmra.mxu0 %vm457_vm2, %v364_v35  ;;  %7578 = vmatmul.msk.f32.gmra.mxu3 %vm457_vm2, %v373_v36 }
  0x33   : > { %424 = vperm.xlu2 %8069, %v353_v37  }
  0x35   : > { %419 = vperm.xlu0 %8067, %v352_v38  }
  0x36   : > { %7586 = vmatmul.msk.f32.gmra.mxu1 %vm607_vm0, %v9430_v39 }
  0x37   : > { %7595 = vmatmul.msk.f32.gmra.mxu2 %vm607_vm0, %v9435_v40 }
  0x3a   : > { %7570 = vmatmul.msk.f32.gmra.mxu0 %vm457_vm2, %v365_v41  ;;  %7579 = vmatmul.msk.f32.gmra.mxu3 %vm457_vm2, %v374_v42 }
  0x3e   : > { %7587 = vmatmul.msk.f32.gmra.mxu1 %vm607_vm0, %v9452_v43 }
  0x3f   : > { %7596 = vmatmul.msk.f32.gmra.mxu2 %vm607_vm0, %v9457_v44 }
  0x42   : > { %7571 = vmatmul.msk.f32.gmra.mxu0 %vm457_vm2, %v366_v45  ;;  %7580 = vmatmul.msk.f32.gmra.mxu3 %vm457_vm2, %v375_v46 }
  0x46   : > { %7588 = vmatmul.msk.f32.gmra.mxu1 %vm607_vm0, %v9474_v47 }
  0x4a   : > { %7572 = vmatmul.msk.f32.gmra.mxu0 %vm457_vm2, %v367_v48 }
  0x4e   : > { %7589 = vmatmul.msk.f32.gmra.mxu1 %vm607_vm0, %v9485_v49 }
  0x52   : > { %7573 = vmatmul.msk.f32.gmra.mxu0 %vm457_vm2, %v368_v50 }
  0x6d   : > { %v385_v53 = vpop.permute.xlu2 %384 }
  0x75   : > { %v9499_v60 = vpop.permute.xlu2 %404 }
  0x7d   : > { %v9511_v9 = vpop.permute.xlu2 %454 }
  0x7f   : > { %v395_v51 = vpop.permute.xlu0 %394 }
  0x81   : > { %v390_v55 = vpop.permute.xlu1 %389 }
  0x85   : > { %v440_v27 = vpop.permute.xlu2 %439 }
  0x87   : > { %v9493_v52 = vpop.permute.xlu0 %414 }
  0x89   : > { %v9502_v1 = vpop.permute.xlu1 %409 }
  0x8b   : > { %v673_v54 = vpop.f32.mrf.mxu1 }
  0x8f   : > { %v380_v56 = vpop.permute.xlu0 %379  ;;  %v527_v57 = vpop.f32.mrf.mxu0 }
  0x90   : > { %v9495_v58 = vadd.f32 %v527_v57, %v380_v56 }
  0x91   : > { %v400_v16 = vpop.permute.xlu1 %399 }
  0x92   : > { %v9497_v59 = vpop.f32.mrf.mxu2  ;;  %v674_v62 = vadd.f32 %v673_v54, %v9495_v58 }
  0x93   : > { %v676_v61 = vpop.f32.mrf.mxu1 }
  0x94   : > { %v7597_v5 = vmul.f32 -1.442695, %v674_v62 }
  0x95   : > { %v554_v63 = vpop.f32.mrf.mxu3 }
  0x96   : > { %8070 = vpow2.f32 %v7597_v5 }
  0x97   : > { %v530_v0 = vpop.f32.mrf.mxu0  ;;  %v450_v46 = vpop.permute.xlu0 %449 }
  0x98   : > { %v9504_v3 = vadd.f32 %v530_v0, %v385_v53 }
  0x99   : > { %v445_v38 = vpop.permute.xlu1 %444 }
  0x9a   : > { %v9506_v6 = vpop.f32.mrf.mxu2  ;;  %1012 = vrot.lane.b32.xlu2 %v9504_v3, %s9202_s16  ;;  %v677_v8 = vadd.f32 %v676_v61, %v9504_v3 }
  0x9b   : > { %v679_v7 = vpop.f32.mrf.mxu1 }
  0x9c   : > { %v7598_v12 = vmul.f32 -1.442695, %v677_v8  ;;  %v8071_v21 = vpop.eup %8070 }
  0x9d   : > { %v557_v10 = vpop.f32.mrf.mxu3  ;;  %v9520_v24 = vadd.f32 1.0, %v8071_v21 }
  0x9e   : > { %8072 = vpow2.f32 %v7598_v12 }
  0x9f   : > { %v533_v13 = vpop.f32.mrf.mxu0  ;;  %vm742_vm4 = vweird.f32 %v9520_v24 }
  0xa0   : > { %v9513_v14 = vadd.f32 %v533_v13, %v390_v55 }
  0xa2   : > { %v9515_v15 = vpop.f32.mrf.mxu2  ;;  %v680_v17 = vadd.f32 %v679_v7, %v9513_v14  ;;  %1014 = vrot.lane.b32.xlu0 %v9513_v14, %s9202_s16 }
  0xa3   : > { %v682_v20 = vpop.f32.mrf.mxu1 }
  0xa4   : > { %v7599_v22 = vmul.f32 -1.442695, %v680_v17  ;;  %v8073_v30 = vpop.eup %8072 }
  0xa5   : > { %v560_v23 = vpop.f32.mrf.mxu3  ;;  %v9528_v37 = vadd.f32 1.0, %v8073_v30 }
  0xa6   : > { %8074 = vpow2.f32 %v7599_v22 }
  0xa7   : > { %v536_v28 = vpop.f32.mrf.mxu0  ;;  %8076 = vrcp.f32 %v9520_v24  ;;  %vm757_vm6 = vweird.f32 %v9528_v37 }
  0xa8   : > { %v9522_v29 = vadd.f32 %v536_v28, %v395_v51  ;;  %v425_v51 = vpop.permute.xlu2 %424 }
  0xa9   : > { %v9543_v62 = vadd.f32 %v554_v63, %v425_v51 }
  0xaa   : > { %v709_v31 = vpop.f32.mrf.mxu2  ;;  %v683_v34 = vadd.f32 %v682_v20, %v9522_v29  ;;  %1016 = vrot.lane.b32.xlu1 %v9522_v29, %s9202_s16 }
  0xab   : > { %v685_v35 = vpop.f32.mrf.mxu1  ;;  %v701_v22 = vadd.f32 %v9497_v59, %v9543_v62 }
  0xac   : > { %v8075_v36 = vpop.eup %8074  ;;  %v7600_v41 = vmul.f32 -1.442695, %v683_v34 }
  0xad   : > { %v563_v42 = vpop.f32.mrf.mxu3  ;;  %v9530_v45 = vadd.f32 1.0, %v8075_v36  ;;  %v9532_v50 = vpop.eup %8076 }
  0xae   : > { %8078 = vpow2.f32 %v7600_v41  ;;  %v9537_v54 = vadd.f32 %v563_v42, %v440_v27  ;;  %v738_v61 = vmul.f32 %v9532_v50, %v9520_v24  ;;  %v435_v27 = vpop.permute.xlu0 %434  ;;  %vm743_vm3 = vweird.f32 %v9532_v50 }
  0xaf   : > { %v539_v48 = vpop.f32.mrf.mxu0  ;;  %8080 = vrcp.f32 %v9528_v37  ;;  %v9570_v41 = vadd.f32 %v560_v23, %v435_v27  ;;  %vm9608_vm7 = vmor %vm742_vm4, %vm743_vm3  ;;  %vm772_vm10 = vweird.f32 %v9530_v45 }
  0xb0   : > { %v9535_v53 = vadd.f32 %v539_v48, %v400_v16  ;;  %8082 = vrcp.f32 %v9530_v45  ;;  %v710_v7 = vadd.f32 %v709_v31, %v9537_v54  ;;  %v430_v16 = vpop.permute.xlu1 %429  ;;  %v739_v20 = vsub.f32 1.0, %v738_v61 }
  0xb1   : > { %v9562_v34 = vadd.f32 %v557_v10, %v430_v16 }
  0xb2   : > { %v712_v55 = vpop.f32.mrf.mxu2  ;;  %v686_v56 = vadd.f32 %v685_v35, %v9535_v53  ;;  %v7605_v35 = vmul.f32 -1.442695, %v710_v7  ;;  %v740_v48 = vmul.f32 %v9532_v50, %v739_v20 }
  0xb3   : > { %v688_v57 = vpop.f32.mrf.mxu1  ;;  %v704_v23 = vadd.f32 %v9506_v6, %v9562_v34 }
  0xb4   : > { %v8079_v0 = vpop.eup %8078  ;;  %v7601_v5 = vmul.f32 -1.442695, %v686_v56  ;;  %v748_v56 = vand.u32 2147483648, %v9520_v24  ;;  %v741_v20 = vadd.f32 %v9532_v50, %v740_v48 }
  0xb5   : > { %v566_v8 = vpop.f32.mrf.mxu3  ;;  %v9546_v12 = vpop.eup %8080  ;;  %v9548_v13 = vadd.f32 1.0, %v8079_v0 }
  0xb6   : > { %8084 = vpow2.f32 %v7601_v5  ;;  %v9550_v17 = vadd.f32 %v566_v8, %v445_v38  ;;  %v9554_v63 = vpop.eup %8082  ;;  %v753_v31 = vmul.f32 %v9546_v12, %v9528_v37  ;;  %v763_v5 = vand.u32 2147483648, %v9528_v37 }
  0xb7   : > { %v542_v21 = vpop.f32.mrf.mxu0  ;;  %8086 = vrcp.f32 %v9548_v13  ;;  %vm758_vm9 = vweird.f32 %v9546_v12  ;;  %vm773_vm11 = vweird.f32 %v9554_v63  ;;  %vm787_vm15 = vweird.f32 %v9548_v13 }
  0xb8   : > { %v9557_v28 = vadd.f32 %v542_v21, %v9499_v60  ;;  %v713_v30 = vadd.f32 %v712_v55, %v9550_v17  ;;  %v768_v60 = vmul.f32 %v9554_v63, %v9530_v45  ;;  %8088 = vtanh.f32 %v701_v22  ;;  %vm9656_vm12 = vmor %vm757_vm6, %vm758_vm9 }
  0xb9   : > { %v746_v55 = vand.u32 2147483647, %v9520_v24  ;;  %v707_v21 = vadd.f32 %v9515_v15, %v9570_v41  ;;  %v761_v22 = vand.u32 2147483647, %v9528_v37  ;;  %v749_v15 = vor.u32 1.1754944e-38, %v748_v56  ;;  %vm9682_vm14 = vmor %vm772_vm10, %vm773_vm11 }
  0xba   : > { %v7606_v36 = vmul.f32 -1.442695, %v713_v30  ;;  %v689_v38 = vadd.f32 %v688_v57, %v9557_v28  ;;  %1020 = vrot.lane.b32.xlu0 %v9557_v28, %s9202_s16  ;;  %v715_v59 = vpop.f32.mrf.mxu2  ;;  %v754_v57 = vsub.f32 1.0, %v753_v31  ;;  %v769_v8 = vsub.f32 1.0, %v768_v60 }
  0xbb   : > { %v691_v42 = vpop.f32.mrf.mxu1  ;;  %vm9598_vm5 = vcmp.eq.f32.partialorder %v746_v55, 8.507059e+37  ;;  %vm9618_vm8 = vcmp.eq.f32.partialorder %v761_v22, 8.507059e+37  ;;  %v778_v56 = vand.u32 2147483648, %v9530_v45  ;;  %v793_v37 = vand.u32 2147483648, %v9548_v13 }
  0xbc   : > { %v8085_v10 = vpop.eup %8084  ;;  %8090 = vpow2.f32 %v7606_v36  ;;  %v7602_v51 = vmul.f32 -1.442695, %v689_v38  ;;  %v755_v31 = vmul.f32 %v9546_v12, %v754_v57  ;;  %v764_v38 = vor.u32 1.1754944e-38, %v763_v5 }
  0xbd   : > { %8092 = vpow2.f32 %v7605_v35  ;;  %v9575_v61 = vadd.f32 1.0, %v8085_v10  ;;  %v569_v0 = vpop.f32.mrf.mxu3  ;;  %v9587_v27 = vpop.eup %8086  ;;  %v770_v48 = vmul.f32 %v9554_v63, %v769_v8 }
  0xbe   : > { %8094 = vpow2.f32 %v7602_v51  ;;  %v9580_v7 = vadd.f32 %v569_v0, %v450_v46  ;;  %v9595_v30 = vpop.eup %8088  ;;  %v783_v10 = vmul.f32 %v9587_v27, %v9548_v13  ;;  %v745_v51 = vsel %vm9608_vm7, %v9532_v50, %v741_v20 }
  0xbf   : > { %v545_v16 = vpop.f32.mrf.mxu0  ;;  %8096 = vrcp.f32 %v9575_v61  ;;  %v756_v50 = vadd.f32 %v9546_v12, %v755_v31  ;;  %v771_v24 = vadd.f32 %v9554_v63, %v770_v48  ;;  %vm788_vm1 = vweird.f32 %v9587_v27 }
  0xc0   : > { %v9591_v6 = vadd.f32 %v545_v16, %v9502_v1  ;;  %v716_v46 = vadd.f32 %v715_v59, %v9580_v7  ;;  %8098 = vtanh.f32 %v704_v23  ;;  %vm818_vm2 = vweird.f32 %v9575_v61  ;;  %vm9743_vm3 = vmor %vm787_vm15, %vm788_vm1 }
  0xc1   : > { %8100 = vtanh.f32 %v707_v21  ;;  %v760_v35 = vsel %vm9656_vm12, %v9546_v12, %v756_v50 }
  0xc2   : > { %v8091_v36 = vpop.eup %8090  ;;  %v7607_v1 = vmul.f32 -1.442695, %v716_v46  ;;  %v692_v60 = vadd.f32 %v691_v42, %v9591_v6  ;;  %1022 = vrot.lane.b32.xlu1 %v9591_v6, %s9202_s16  ;;  %v718_v23 = vpop.f32.mrf.mxu2  ;;  %v776_v46 = vand.u32 2147483647, %v9530_v45  ;;  %v765_v45 = vsel %vm9618_vm8, %v764_v38, %v760_v35 }
  0xc3   : > { %v8093_v59 = vpop.eup %8092  ;;  %v9623_v57 = vadd.f32 1.0, %v8091_v36  ;;  %v694_v16 = vpop.f32.mrf.mxu1 }
  0xc4   : > { %v8095_v55 = vpop.eup %8094  ;;  %8102 = vpow2.f32 %v7607_v1  ;;  %v7603_v0 = vmul.f32 -1.442695, %v692_v60  ;;  %v9633_v21 = vadd.f32 1.0, %v8093_v59  ;;  %v784_v1 = vsub.f32 1.0, %v783_v10 }
  0xc5   : > { %v9625_v5 = vadd.f32 1.0, %v8095_v55  ;;  %v572_v8 = vpop.f32.mrf.mxu3  ;;  %v9630_v20 = vpop.eup %8096  ;;  %vm9664_vm13 = vcmp.eq.f32.partialorder %v776_v46, 8.507059e+37  ;;  %vm913_vm8 = vweird.f32 %v9623_v57  ;;  %v917_v40 = vand.u32 2147483647, %v9623_v57 }
  0xc6   : > { %8104 = vpow2.f32 %v7603_v0  ;;  %v9636_v22 = vadd.f32 %v572_v8, %v9511_v9  ;;  %v8099_v36 = vpop.eup %8098  ;;  %v9650_v9 = vsel %vm9598_vm5, %v749_v15, %v745_v51  ;;  %v814_v55 = vmul.f32 %v9630_v20, %v9575_v61 }
  0xc7   : > { %8106 = vrcp.f32 %v9625_v5  ;;  %v548_v60 = vpop.f32.mrf.mxu0  ;;  %v9660_v10 = vpop.eup %8100  ;;  %vm819_vm7 = vweird.f32 %v9630_v20  ;;  %vm833_vm9 = vweird.f32 %v9625_v5 }
  0xc8   : > { %8108 = vrcp.f32 %v9623_v57  ;;  %v9643_v31 = vadd.f32 %v548_v60, %v9493_v52  ;;  %v719_v59 = vadd.f32 %v718_v23, %v9636_v22  ;;  %1040 = vrot.lane.b32.xlu0 %v9636_v22, %s9202_s16  ;;  %v779_v52 = vor.u32 1.1754944e-38, %v778_v56  ;;  %vm9788_vm10 = vmor %vm818_vm2, %vm819_vm7 }
  0xc9   : > { %8110 = vrcp.f32 %v9633_v21  ;;  %v785_v56 = vmul.f32 %v9587_v27, %v784_v1  ;;  %v791_v60 = vand.u32 2147483647, %v9548_v13  ;;  %v815_v48 = vsub.f32 1.0, %v814_v55 }
  0xca   : > { %v8103_v15 = vpop.eup %8102  ;;  %v7608_v51 = vmul.f32 -1.442695, %v719_v59  ;;  %v695_v23 = vadd.f32 %v694_v16, %v9643_v31  ;;  %1024 = vrot.lane.b32.xlu2 %v9643_v31, %s9202_s16  ;;  %1010 = vrot.lane.b32.xlu1 %v9495_v58, %s9202_s16  ;;  %v775_v16 = vsel %vm9682_vm14, %v9554_v63, %v771_v24  ;;  %v824_v1 = vand.u32 2147483648, %v9575_v61 }
  0xcb   : > { %v9688_v8 = vadd.f32 1.0, %v8103_v15  ;;  %v9704_v63 = vor.u32 1.1754944e-38, %v793_v37  ;;  %v780_v38 = vsel %vm9664_vm13, %v779_v52, %v775_v16  ;;  %v697_v55 = vpop.f32.mrf.mxu1  ;;  %v9712_v35 = vadd.f32 %v9587_v27, %v785_v56 }
  0xcc   : > { %v8105_v46 = vpop.eup %8104  ;;  %8112 = vpow2.f32 %v7608_v51  ;;  %v7604_v50 = vmul.f32 -1.442695, %v695_v23  ;;  %v420_v51 = vpop.permute.xlu0 %419  ;;  %v822_v37 = vand.u32 2147483647, %v9575_v61  ;;  %v9724_v52 = vmul.f32 %v9595_v30, %v765_v45 }
  0xcd   : > { %v9696_v59 = vpop.eup %8106  ;;  %8114 = vrcp.f32 %v9688_v8  ;;  %v9700_v15 = vadd.f32 1.0, %v8105_v46  ;;  %v816_v0 = vmul.f32 %v9630_v20, %v815_v48  ;;  %v9727_v56 = vmul.f32 %v8099_v36, %v780_v38 }
  0xce   : > { %v9702_v4 = vpop.eup %8108  ;;  %v829_v24 = vmul.f32 %v9696_v59, %v9625_v5  ;;  %8116 = vpow2.f32 %v7604_v50  ;;  %v9731_v50 = vor.u32 1.1754944e-38, %v824_v1  ;;  %vm9747_vm4 = vcmp.eq.f32.partialorder %v791_v60, 8.507059e+37 }
  0xcf   : > { %8118 = vrcp.f32 %v9700_v15  ;;  %v551_v42 = vpop.f32.mrf.mxu0  ;;  %v9716_v23 = vpop.eup %8110  ;;  %v909_v16 = vmul.f32 %v9702_v4, %v9623_v57  ;;  %v839_v38 = vand.u32 2147483648, %v9625_v5  ;;  %v790_v13 = vsel %vm9743_vm3, %v9587_v27, %v9712_v35 }
  0xd0   : > { %v830_v12 = vsub.f32 1.0, %v829_v24  ;;  %v9719_v46 = vadd.f32 %v551_v42, %v420_v51  ;;  %1034 = vrot.lane.b32.xlu0 %v9537_v54, %s9202_s16  ;;  %vm9762_vm5 = vcmp.eq.f32.partialorder %v822_v37, 8.507059e+37  ;;  %vm834_vm6 = vweird.f32 %v9696_v59 }
  0xd1   : > { %v837_v48 = vand.u32 2147483647, %v9625_v5  ;;  %v910_v35 = vsub.f32 1.0, %v909_v16  ;;  %v817_v37 = vadd.f32 %v9630_v20, %v816_v0  ;;  %v919_v16 = vand.u32 2147483648, %v9623_v57  ;;  %vm835_vm11 = vmor %vm833_vm9, %vm834_vm6 }
  0xd2   : > { %v8113_v44 = vpop.eup %8112  ;;  %v831_v24 = vmul.f32 %v9696_v59, %v830_v12  ;;  %v698_v51 = vadd.f32 %v697_v55, %v9719_v46  ;;  %1018 = vrot.lane.b32.xlu2 %v9535_v53, %s9202_s16  ;;  %1038 = vrot.lane.b32.xlu1 %v9580_v7, %s9202_s16  ;;  %v894_v55 = vmul.f32 %v9716_v23, %v9633_v21  ;;  %vm898_vm13 = vweird.f32 %v9633_v21 }
  0xd3   : > { %v9753_v1 = vpop.eup %8114  ;;  %v9756_v42 = vadd.f32 1.0, %v8113_v44  ;;  %vm838_vm12 = vcmp.eq.f32.partialorder %v837_v48, 8.507059e+37  ;;  %v911_v33 = vmul.f32 %v9702_v4, %v910_v35  ;;  %vm914_vm15 = vweird.f32 %v9702_v4 }
  0xd4   : > { %v8117_v12 = vpop.eup %8116  ;;  %8120 = vtanh.f32 %v698_v51  ;;  %v832_v27 = vadd.f32 %v9696_v59, %v831_v24  ;;  %v924_v30 = vmul.f32 %v9753_v1, %v9688_v8  ;;  %v854_v24 = vand.u32 2147483648, %v9700_v15 }
  0xd5   : > { %v8119_v44 = vpop.eup %8118  ;;  %v9771_v45 = vadd.f32 1.0, %v8117_v12  ;;  %8122 = vrcp.f32 %v9756_v42  ;;  %v840_v12 = vor.u32 1.1754944e-38, %v839_v38  ;;  %v852_v38 = vand.u32 2147483647, %v9700_v15 }
  0xd6   : > { %v844_v51 = vmul.f32 %v8119_v44, %v9700_v15  ;;  %v836_v61 = vsel %vm835_vm11, %v9696_v59, %v832_v27  ;;  %v895_v26 = vsub.f32 1.0, %v894_v55  ;;  %vm849_vm14 = vweird.f32 %v8119_v44 }
  0xd7   : > { %8124 = vrcp.f32 %v9771_v45  ;;  %v925_v48 = vsub.f32 1.0, %v924_v30  ;;  %v841_v47 = vsel %vm838_vm12, %v840_v12, %v836_v61  ;;  %v9811_v59 = vsel %vm9747_vm4, %v9704_v63, %v790_v13 }
  0xd8   : > { %v845_v0 = vsub.f32 1.0, %v844_v51  ;;  %1028 = vrot.lane.b32.xlu0 %v9543_v62, %s9202_s16  ;;  %v821_v51 = vsel %vm9788_vm10, %v9630_v20, %v817_v37  ;;  %v920_v20 = vor.u32 1.1754944e-38, %v919_v16  ;;  %v954_v55 = vmul.f32 0.0, %v841_v47 }
  0xd9   : > { %vm848_vm1 = vweird.f32 %v9700_v15  ;;  %vm9817_vm2 = vcmp.eq.f32.partialorder %v852_v38, 8.507059e+37  ;;  %vm9821_vm3 = vcmp.eq.f32.partialorder %v917_v40, 8.507059e+37  ;;  %v826_v63 = vsel %vm9762_vm5, %v9731_v50, %v821_v51  ;;  %vm9850_vm5 = vmor %vm913_vm8, %vm914_vm15 }
  0xda   : > { %v8121_v19 = vpop.eup %8120  ;;  %v846_v49 = vmul.f32 %v8119_v44, %v845_v0  ;;  %1036 = vrot.lane.b32.xlu2 %v9550_v17, %s9202_s16  ;;  %1032 = vrot.lane.b32.xlu1 %v9570_v41, %s9202_s16  ;;  %vm973_vm4 = vcmask 130048   ;;  %vm850_vm6 = vmor %vm848_vm1, %vm849_vm14  ;;  %v855_v15 = vor.u32 1.1754944e-38, %v854_v24  ;;  %vm928_vm7 = vweird.f32 %v9688_v8 }
  0xdb   : > { %v9814_v27 = vpop.eup %8122  ;;  %v957_v47 = vmul.f32 %v8121_v19, %v9650_v9  ;;  %v9833_v40 = vadd.f32 %v9724_v52, %v954_v55  ;;  %v926_v60 = vmul.f32 %v9753_v1, %v925_v48  ;;  %v896_v50 = vmul.f32 %v9716_v23, %v895_v26 }
  0xdc   : > { %v847_v35 = vadd.f32 %v8119_v44, %v846_v49  ;;  %v912_v49 = vadd.f32 %v9702_v4, %v911_v33  ;;  %v939_v19 = vmul.f32 %v9814_v27, %v9756_v42  ;;  %v953_v16 = vmul.f32 0.0, %v826_v63 }
  0xdd   : > { %v8125_v36 = vpop.eup %8124  ;;  %8126 = vtanh.f32 %v9833_v40  ;;  %v932_v52 = vand.u32 2147483647, %v9688_v8  ;;  %vm899_vm9 = vweird.f32 %v9716_v23  ;;  %v869_v5 = vand.u32 2147483648, %v9771_v45 }
  0xde   : > { %v859_v13 = vmul.f32 %v8125_v36, %v9771_v45  ;;  %v851_v12 = vsel %vm850_vm6, %v8119_v44, %v847_v35  ;;  %v867_v0 = vand.u32 2147483647, %v9771_v45  ;;  %v916_v24 = vsel %vm9850_vm5, %v9702_v4, %v912_v49  ;;  %vm9874_vm11 = vmor %vm898_vm13, %vm899_vm9 }
  0xdf   : > { %v856_v9 = vsel %vm9817_vm2, %v855_v15, %v851_v12  ;;  %v9860_v38 = vadd.f32 %v957_v47, %v953_v16  ;;  %vm864_vm8 = vweird.f32 %v8125_v36  ;;  %v897_v51 = vadd.f32 %v9716_v23, %v896_v50 }
  0xe0   : > { %v860_v33 = vsub.f32 1.0, %v859_v13  ;;  %1442 = vrot.lane.b32.xlu0 %v9643_v31, %s9203_s17  ;;  %v955_v44 = vmul.f32 0.0, %v856_v9  ;;  %v940_v48 = vsub.f32 1.0, %v939_v19  ;;  %v927_v55 = vadd.f32 %v9753_v1, %v926_v60  ;;  %v16025_v60 = vld [vmem:[#allocation5_spill] sm:$0xff] }
  0xe1   : > { %vm929_vm10 = vweird.f32 %v9753_v1  ;;  %8128 = vtanh.f32 %v9860_v38  ;;  %vm863_vm12 = vweird.f32 %v9771_v45  ;;  %v870_v63 = vor.u32 1.1754944e-38, %v869_v5 }
  0xe2   : > { %v861_v61 = vmul.f32 %v8125_v36, %v860_v33  ;;  %1030 = vrot.lane.b32.xlu2 %v9562_v34, %s9202_s16  ;;  %1026 = vrot.lane.b32.xlu1 %v9719_v46, %s9202_s16  ;;  %v9867_v57 = vadd.f32 %v9727_v56, %v955_v44  ;;  %v934_v56 = vand.u32 2147483648, %v9688_v8  ;;  %vm865_vm14 = vmor %vm863_vm12, %vm864_vm8  ;;  %v921_v47 = vsel %vm9821_vm3, %v920_v20, %v916_v24 }
  0xe3   : > { %v8127_v37 = vpop.eup %8126  ;;  %v16016_v15 = vand.u32 2147483647, %v9633_v21  ;;  %v16019_v13 = vand.u32 2147483648, %v9633_v21  ;;  %vm868_vm15 = vcmp.eq.f32.partialorder %v867_v0, 8.507059e+37  ;;  %vm9896_vm1 = vmor %vm928_vm7, %vm929_vm10  ;;  %v901_v30 = vsel %vm9874_vm11, %v9716_v23, %v897_v51 }
  0xe4   : > { %v862_v35 = vadd.f32 %v8125_v36, %v861_v61  ;;  %8130 = vtanh.f32 %v9867_v57  ;;  %v970_v20 = vmul.f32 %v8127_v37, %v921_v47  ;;  %v941_v19 = vmul.f32 %v9814_v27, %v940_v48  ;;  %v10054_v47 = vld [vmem:[%s15956_s2 + $0x50] sm:$0xff] }
  0xe5   : > { %vm9886_vm13 = vcmp.eq.f32.partialorder %v16016_v15, 8.507059e+37  ;;  %v905_v45 = vor.u32 1.1754944e-38, %v16019_v13  ;;  %v931_v21 = vsel %vm9896_vm1, %v9753_v1, %v927_v55  ;;  %v935_v9 = vor.u32 1.1754944e-38, %v934_v56  ;;  %v16023_v55 = vld [vmem:[#allocation10_spill] sm:$0xff]  ;;  %v10037_v56 = vld [vmem:[%s15956_s2 + $0x48] sm:$0xff]  ;;  %v16024_v13 = vld [vmem:[#allocation4_spill] sm:$0xff] }
  0xe6   : > { %v866_v12 = vsel %vm865_vm14, %v8125_v36, %v862_v35  ;;  %v960_v36 = vmul.f32 %v9660_v10, %v9811_v59  ;;  %975 = vst.msk [vmem:[#allocation3 + $0x8] sm:$0xff] %vm973_vm4, %v970_v20  ;;  %vm933_vm2 = vcmp.eq.f32.partialorder %v932_v52, 8.507059e+37  ;;  %v942_v10 = vadd.f32 %v9814_v27, %v941_v19 }
  0xe7   : > { %v871_v50 = vsel %vm868_vm15, %v870_v63, %v866_v12  ;;  %v8129_v16 = vpop.eup %8128  ;;  %v906_v23 = vsel %vm9886_vm13, %v905_v45, %v901_v30  ;;  %v936_v44 = vsel %vm933_vm2, %v935_v9, %v931_v21  ;;  %vm944_vm3 = vweird.f32 %v9814_v27 }
  0xe8   : > { %1430 = vrot.lane.b32.xlu0 %v9504_v3, %s9203_s17  ;;  %v956_v8 = vmul.f32 0.0, %v871_v50  ;;  %v969_v26 = vmul.f32 %v8129_v16, %v906_v23  ;;  %v949_v52 = vand.u32 2147483648, %v9756_v42  ;;  %vm943_vm6 = vweird.f32 %v9756_v42  ;;  %v16026_v50 = vld [vmem:[#allocation6_spill] sm:$0xff]  ;;  %v16029_v16 = vld [vmem:[#allocation8_spill] sm:$0xff] }
  0xe9   : > { %v947_v5 = vand.u32 2147483647, %v9756_v42  ;;  %vm945_vm7 = vmor %vm943_vm6, %vm944_vm3  ;;  %v16022_v42 = vld [vmem:[#allocation9_spill] sm:$0xff] }
  0xea   : > { %v8131_v33 = vpop.eup %8130  ;;  %1434 = vrot.lane.b32.xlu2 %v9522_v29, %s9203_s17  ;;  %1432 = vrot.lane.b32.xlu1 %v9513_v14, %s9203_s17  ;;  %v9918_v1 = vadd.f32 %v960_v36, %v956_v8  ;;  %974 = vst.msk [vmem:[#allocation3] sm:$0xff] %vm973_vm4, %v969_v26  ;;  %v946_v0 = vsel %vm945_vm7, %v9814_v27, %v942_v10  ;;  %v950_v24 = vor.u32 1.1754944e-38, %v949_v52  ;;  %v16027_v8 = vld [vmem:[#allocation7_spill] sm:$0xff] }
  0xeb   : > { %v971_v59 = vmul.f32 %v8131_v33, %v936_v44  ;;  %vm948_vm5 = vcmp.eq.f32.partialorder %v947_v5, 8.507059e+37 }
  0xec   : > { %8132 = vtanh.f32 %v9918_v1  ;;  %v951_v51 = vsel %vm948_vm5, %v950_v24, %v946_v0 }
  0xed   : > { %976 = vst.msk [vmem:[#allocation3 + $0x10] sm:$0xff] %vm973_vm4, %v971_v59 }
  0xf0   : > { %1436 = vrot.lane.b32.xlu0 %v9535_v53, %s9203_s17 }
  0xf2   : > { %v8133_v61 = vpop.eup %8132  ;;  %1440 = vrot.lane.b32.xlu2 %v9591_v6, %s9203_s17  ;;  %1438 = vrot.lane.b32.xlu1 %v9557_v28, %s9203_s17 }
  0xf3   : > { %v972_v48 = vmul.f32 %v8133_v61, %v951_v51 }
  0xf5   : > { %977 = vst.msk [vmem:[#allocation3 + $0x18] sm:$0xff] %vm973_vm4, %v972_v48  ;;  %1070 = vmatpush.msrb.mxu2 %v972_v48 }
  0xf7   : > { %1071 = vmatpush.msrb.mxu2 %v971_v59 }
  0xf8   : > { %1454 = vrot.lane.b32.xlu0 %v9550_v17, %s9203_s17 }
  0xf9   : > { %1072 = vmatpush.msrb.mxu2 %v970_v20 }
  0xfa   : > { %1428 = vrot.lane.b32.xlu2 %v9495_v58, %s9203_s17  ;;  %1458 = vrot.lane.b32.xlu1 %v9636_v22, %s9203_s17 }
  0xfb   : > { %1073 = vmatpush.msrb.mxu2 %v969_v26 }
  0xfc   : > { %7609 = vmatmul.msk.f32.vlgmr.msrb.gmra.mxu2 %vm607_vm0, %v9273_v2  ;;  %v9974_v2 = vpop.permute.xlu2 %1012 }
 0x100   : > { %1448 = vrot.lane.b32.xlu0 %v9562_v34, %s9203_s17 }
 0x102   : > { %1456 = vrot.lane.b32.xlu2 %v9580_v7, %s9203_s17  ;;  %1452 = vrot.lane.b32.xlu1 %v9537_v54, %s9203_s17 }
 0x104   : > { %7610 = vmatmul.msk.f32.gmra.mxu2 %vm607_vm0, %v9309_v11 }
 0x108   : > { %1852 = vrot.lane.b32.xlu0 %v9522_v29, %s9204_s18 }
 0x10a   : > { %1450 = vrot.lane.b32.xlu2 %v9570_v41, %s9203_s17  ;;  %1446 = vrot.lane.b32.xlu1 %v9543_v62, %s9203_s17 }
 0x10c   : > { %7611 = vmatmul.msk.f32.gmra.mxu2 %vm607_vm0, %v9337_v18 }
 0x110   : > { %1858 = vrot.lane.b32.xlu0 %v9591_v6, %s9204_s18 }
 0x112   : > { %1444 = vrot.lane.b32.xlu2 %v9719_v46, %s9203_s17  ;;  %1860 = vrot.lane.b32.xlu1 %v9643_v31, %s9204_s18 }
 0x114   : > { %7612 = vmatmul.msk.f32.gmra.mxu2 %vm607_vm0, %v9368_v25 }
 0x118   : > { %1846 = vrot.lane.b32.xlu0 %v9495_v58, %s9204_s18 }
 0x11a   : > { %1850 = vrot.lane.b32.xlu2 %v9513_v14, %s9204_s18  ;;  %1848 = vrot.lane.b32.xlu1 %v9504_v3, %s9204_s18 }
 0x11c   : > { %7613 = vmatmul.msk.f32.gmra.mxu2 %vm607_vm0, %v9399_v32  ;;  %v9994_v18 = vpop.permute.xlu1 %1016 }
 0x120   : > { %1874 = vrot.lane.b32.xlu0 %v9580_v7, %s9204_s18 }
 0x122   : > { %1856 = vrot.lane.b32.xlu2 %v9557_v28, %s9204_s18  ;;  %1854 = vrot.lane.b32.xlu1 %v9535_v53, %s9204_s18 }
 0x124   : > { %v9984_v11 = vpop.permute.xlu2 %1024  ;;  %7614 = vmatmul.msk.f32.gmra.mxu2 %vm607_vm0, %v9430_v39 }
 0x128   : > { %1868 = vrot.lane.b32.xlu0 %v9570_v41, %s9204_s18 }
 0x12a   : > { %1876 = vrot.lane.b32.xlu2 %v9636_v22, %s9204_s18  ;;  %1872 = vrot.lane.b32.xlu1 %v9550_v17, %s9204_s18 }
 0x12c   : > { %v9996_v25 = vpop.permute.xlu2 %1018  ;;  %7615 = vmatmul.msk.f32.gmra.mxu2 %vm607_vm0, %v9452_v43 }
 0x130   : > { %1862 = vrot.lane.b32.xlu0 %v9719_v46, %s9204_s18 }
 0x132   : > { %1870 = vrot.lane.b32.xlu2 %v9537_v54, %s9204_s18  ;;  %1866 = vrot.lane.b32.xlu1 %v9562_v34, %s9204_s18 }
 0x134   : > { %v10006_v32 = vpop.permute.xlu1 %1022  ;;  %v10008_v39 = vpop.permute.xlu2 %1036  ;;  %7616 = vmatmul.msk.f32.gmra.mxu2 %vm607_vm0, %v16022_v42 }
 0x138   : > { %2268 = vrot.lane.b32.xlu0 %v9513_v14, %s9205_s19 }
 0x13a   : > { %1864 = vrot.lane.b32.xlu2 %v9543_v62, %s9204_s18  ;;  %2270 = vrot.lane.b32.xlu1 %v9522_v29, %s9205_s19 }
 0x13c   : > { %v10018_v43 = vpop.permute.xlu2 %1030  ;;  %v10020_v27 = vpop.permute.xlu1 %1010  ;;  %7617 = vmatmul.msk.f32.gmra.mxu2 %vm607_vm0, %v16023_v55 }
 0x140   : > { %2274 = vrot.lane.b32.xlu0 %v9557_v28, %s9205_s19 }
 0x142   : > { %2278 = vrot.lane.b32.xlu2 %v9643_v31, %s9205_s19  ;;  %2276 = vrot.lane.b32.xlu1 %v9591_v6, %s9205_s19 }
 0x144   : > { %v10030_v4 = vpop.permute.xlu2 %1434  ;;  %v10032_v35 = vpop.permute.xlu1 %1038  ;;  %7618 = vmatmul.msk.f32.gmra.mxu2 %vm607_vm0, %v10037_v56 }
 0x148   : > { %2294 = vrot.lane.b32.xlu0 %v9636_v22, %s9205_s19 }
 0x14a   : > { %2266 = vrot.lane.b32.xlu2 %v9504_v3, %s9205_s19  ;;  %2264 = vrot.lane.b32.xlu1 %v9495_v58, %s9205_s19 }
 0x14c   : > { %v10047_v37 = vpop.permute.xlu2 %1440  ;;  %v10049_v63 = vpop.permute.xlu1 %1032  ;;  %7619 = vmatmul.msk.f32.gmra.mxu2 %vm607_vm0, %v10054_v47 }
 0x150   : > { %2288 = vrot.lane.b32.xlu0 %v9537_v54, %s9205_s19 }
 0x152   : > { %2272 = vrot.lane.b32.xlu2 %v9535_v53, %s9205_s19  ;;  %2292 = vrot.lane.b32.xlu1 %v9580_v7, %s9205_s19 }
 0x154   : > { %v10064_v15 = vpop.permute.xlu2 %1428  ;;  %v10066_v49 = vpop.permute.xlu1 %1026  ;;  %7620 = vmatmul.msk.f32.gmra.mxu2 %vm607_vm0, %v16024_v13 }
 0x158   : > { %2282 = vrot.lane.b32.xlu0 %v9543_v62, %s9205_s19 }
 0x15a   : > { %2290 = vrot.lane.b32.xlu2 %v9550_v17, %s9205_s19  ;;  %2286 = vrot.lane.b32.xlu1 %v9570_v41, %s9205_s19 }
 0x15c   : > { %v10076_v45 = vpop.permute.xlu2 %1456  ;;  %v10078_v12 = vpop.permute.xlu1 %1432  ;;  %7621 = vmatmul.msk.f32.gmra.mxu2 %vm607_vm0, %v16025_v60 }
 0x160   : > { %2696 = vrot.lane.b32.xlu0 %v9643_v31, %s9206_s24 }
 0x162   : > { %2284 = vrot.lane.b32.xlu2 %v9562_v34, %s9205_s19  ;;  %2280 = vrot.lane.b32.xlu1 %v9719_v46, %s9205_s19 }
 0x164   : > { %v10088_v20 = vpop.permute.xlu2 %1450  ;;  %v10090_v30 = vpop.permute.xlu1 %1438  ;;  %7622 = vmatmul.msk.f32.gmra.mxu2 %vm607_vm0, %v16026_v50 }
 0x168   : > { %2684 = vrot.lane.b32.xlu0 %v9504_v3, %s9206_s24 }
 0x16a   : > { %2688 = vrot.lane.b32.xlu2 %v9522_v29, %s9206_s24  ;;  %2686 = vrot.lane.b32.xlu1 %v9513_v14, %s9206_s24 }
 0x16c   : > { %v10100_v19 = vpop.permute.xlu2 %1444  ;;  %v10102_v21 = vpop.permute.xlu1 %1458  ;;  %7623 = vmatmul.msk.f32.gmra.mxu2 %vm607_vm0, %v16027_v8 }
 0x170   : > { %2690 = vrot.lane.b32.xlu0 %v9535_v53, %s9206_s24 }
 0x172   : > { %2694 = vrot.lane.b32.xlu2 %v9591_v6, %s9206_s24  ;;  %2692 = vrot.lane.b32.xlu1 %v9557_v28, %s9206_s24 }
 0x174   : > { %v10112_v36 = vpop.permute.xlu2 %1850  ;;  %v10114_v9 = vpop.permute.xlu1 %1452  ;;  %7624 = vmatmul.msk.f32.gmra.mxu2 %vm607_vm0, %v16029_v16 }
 0x175   : > { %16028 = vst [vmem:[#allocation9_spill] sm:$0xff] %v10112_v36 }
 0x178   : > { %2708 = vrot.lane.b32.xlu0 %v9550_v17, %s9206_s24 }
 0x17a   : > { %2682 = vrot.lane.b32.xlu2 %v9495_v58, %s9206_s24  ;;  %2712 = vrot.lane.b32.xlu1 %v9636_v22, %s9206_s24 }
 0x17c   : > { %v10124_v23 = vpop.permute.xlu2 %1856  ;;  %v10126_v33 = vpop.permute.xlu1 %1446 }
 0x17d   : > { %16030 = vst [vmem:[#allocation10_spill] sm:$0xff] %v10124_v23 }
 0x17f   : > { %v1075_v44 = vpop.f32.mrf.mxu2 }
 0x180   : > { %2702 = vrot.lane.b32.xlu0 %v9562_v34, %s9206_s24 }
 0x182   : > { %2710 = vrot.lane.b32.xlu2 %v9580_v7, %s9206_s24  ;;  %2706 = vrot.lane.b32.xlu1 %v9537_v54, %s9206_s24 }
 0x184   : > { %v10134_v26 = vpop.permute.xlu2 %1876  ;;  %v10136_v10 = vpop.permute.xlu1 %1860 }
 0x185   : > { %16031 = vst [vmem:[#allocation4_spill] sm:$0xff] %v10134_v26 }
 0x186   : > { %16032 = vst [vmem:[#allocation5_spill] sm:$0xff] %v10136_v10 }
 0x187   : > { %v1078_v59 = vpop.f32.mrf.mxu2 }
 0x188   : > { %3106 = vrot.lane.b32.xlu0 %v9522_v29, %s9207_s25 }
 0x18a   : > { %2704 = vrot.lane.b32.xlu2 %v9570_v41, %s9206_s24  ;;  %2700 = vrot.lane.b32.xlu1 %v9543_v62, %s9206_s24 }
 0x18c   : > { %v10144_v52 = vpop.permute.xlu2 %1870  ;;  %v10146_v5 = vpop.permute.xlu1 %1848 }
 0x18d   : > { %16033 = vst [vmem:[#allocation6_spill] sm:$0xff] %v10144_v52 }
 0x18e   : > { %16034 = vst [vmem:[#allocation7_spill] sm:$0xff] %v10146_v5 }
 0x18f   : > { %v1081_v0 = vpop.f32.mrf.mxu2 }
 0x190   : > { %3112 = vrot.lane.b32.xlu0 %v9591_v6, %s9207_s25 }
 0x192   : > { %2698 = vrot.lane.b32.xlu2 %v9719_v46, %s9206_s24  ;;  %3114 = vrot.lane.b32.xlu1 %v9643_v31, %s9207_s25 }
 0x194   : > { %v10154_v24 = vpop.permute.xlu2 %1864  ;;  %v10156_v61 = vpop.permute.xlu1 %1854 }
 0x195   : > { %16035 = vst [vmem:[#allocation8_spill] sm:$0xff] %v10154_v24 }
 0x196   : > { %16036 = vst [vmem:[#allocation11_spill] sm:$0xff] %v10156_v61 }
 0x197   : > { %v1084_v51 = vpop.f32.mrf.mxu2 }
 0x198   : > { %3100 = vrot.lane.b32.xlu0 %v9495_v58, %s9207_s25 }
 0x19a   : > { %3104 = vrot.lane.b32.xlu2 %v9513_v14, %s9207_s25  ;;  %3102 = vrot.lane.b32.xlu1 %v9504_v3, %s9207_s25 }
 0x19c   : > { %v10164_v48 = vpop.permute.xlu2 %2278  ;;  %v10166_v42 = vpop.permute.xlu1 %1872 }
 0x19d   : > { %16037 = vst [vmem:[#allocation12_spill] sm:$0xff] %v10164_v48 }
 0x19e   : > { %16038 = vst [vmem:[#allocation13_spill] sm:$0xff] %v10166_v42 }
 0x19f   : > { %v1087_v55 = vpop.f32.mrf.mxu2 }
 0x1a0   : > { %3128 = vrot.lane.b32.xlu0 %v9580_v7, %s9207_s25 }
 0x1a2   : > { %3110 = vrot.lane.b32.xlu2 %v9557_v28, %s9207_s25  ;;  %3108 = vrot.lane.b32.xlu1 %v9535_v53, %s9207_s25 }
 0x1a4   : > { %v10174_v13 = vpop.permute.xlu2 %2266  ;;  %v10176_v60 = vpop.permute.xlu1 %1866 }
 0x1a5   : > { %16039 = vst [vmem:[#allocation14_spill] sm:$0xff] %v10174_v13  ;;  %v1076_v13 = vadd.f32 %v1075_v44, %v10020_v27  ;;  %v1079_v27 = vadd.f32 %v1078_v59, %v9974_v2 }
 0x1a6   : > { %16040 = vst [vmem:[#allocation15_spill] sm:$0xff] %v10176_v60 }
 0x1a7   : > { %v1090_v50 = vpop.f32.mrf.mxu2  ;;  %v7625_v24 = vmul.f32 -1.442695, %v1076_v13  ;;  %v1088_v13 = vadd.f32 %v1087_v55, %v9996_v25  ;;  %v7626_v42 = vmul.f32 -1.442695, %v1079_v27 }
 0x1a8   : > { %3122 = vrot.lane.b32.xlu0 %v9570_v41, %s9207_s25 }
 0x1a9   : > { %8134 = vpow2.f32 %v7625_v24  ;;  %v7629_v10 = vmul.f32 -1.442695, %v1088_v13 }
 0x1aa   : > { %3130 = vrot.lane.b32.xlu2 %v9636_v22, %s9207_s25  ;;  %3126 = vrot.lane.b32.xlu1 %v9550_v17, %s9207_s25  ;;  %8136 = vpow2.f32 %v7626_v42 }
 0x1ab   : > { %8138 = vpow2.f32 %v7629_v10 }
 0x1ac   : > { %v10184_v8 = vpop.permute.xlu2 %2272  ;;  %v10186_v16 = vpop.permute.xlu1 %2270 }
 0x1ad   : > { %16041 = vst [vmem:[#allocation16_spill] sm:$0xff] %v10184_v8 }
 0x1ae   : > { %16042 = vst [vmem:[#allocation17_spill] sm:$0xff] %v10186_v16  ;;  %v1015_v16 = vpop.permute.xlu0 %1014 }
 0x1af   : > { %v1093_v48 = vpop.f32.mrf.mxu2  ;;  %v1082_v52 = vadd.f32 %v1081_v0, %v1015_v16 }
 0x1b0   : > { %3116 = vrot.lane.b32.xlu0 %v9719_v46, %s9207_s25 }
 0x1b1   : > { %v7627_v59 = vmul.f32 -1.442695, %v1082_v52 }
 0x1b2   : > { %3124 = vrot.lane.b32.xlu2 %v9537_v54, %s9207_s25  ;;  %3120 = vrot.lane.b32.xlu1 %v9562_v34, %s9207_s25 }
 0x1b4   : > { %v10195_v26 = vpop.permute.xlu2 %2290  ;;  %v10197_v60 = vpop.permute.xlu1 %2276 }
 0x1b5   : > { %16043 = vst [vmem:[#allocation18_spill] sm:$0xff] %v10195_v26 }
 0x1b6   : > { %16044 = vst [vmem:[#allocation19_spill] sm:$0xff] %v10197_v60 }
 0x1b7   : > { %v1096_v8 = vpop.f32.mrf.mxu2 }
 0x1b8   : > { %3522 = vrot.lane.b32.xlu0 %v9513_v14, %s9208_s26  ;;  %v8135_v14 = vpop.eup %8134 }
 0x1b9   : > { %v10219_v2 = vadd.f32 1.0, %v8135_v14 }
 0x1ba   : > { %3118 = vrot.lane.b32.xlu2 %v9543_v62, %s9207_s25  ;;  %3524 = vrot.lane.b32.xlu1 %v9522_v29, %s9208_s26  ;;  %v1021_v29 = vpop.permute.xlu0 %1020 }
 0x1bb   : > { %v1091_v24 = vadd.f32 %v1090_v50, %v1021_v29  ;;  %8140 = vrcp.f32 %v10219_v2  ;;  %vm1144_vm8 = vweird.f32 %v10219_v2 }
 0x1bc   : > { %v10206_v44 = vpop.permute.xlu2 %2284  ;;  %v10208_v26 = vpop.permute.xlu1 %2264  ;;  %8142 = vpow2.f32 %v7627_v59  ;;  %v1097_v59 = vadd.f32 %v1096_v8, %v9984_v11 }
 0x1bd   : > { %16045 = vst [vmem:[#allocation20_spill] sm:$0xff] %v10206_v44 }
 0x1be   : > { %16046 = vst [vmem:[#allocation21_spill] sm:$0xff] %v10208_v26 }
 0x1bf   : > { %v10211_v60 = vpop.f32.mrf.mxu2 }
 0x1c0   : > { %3528 = vrot.lane.b32.xlu0 %v9557_v28, %s9208_s26  ;;  %v1085_v28 = vadd.f32 %v1084_v51, %v9994_v18  ;;  %v1094_v18 = vadd.f32 %v1093_v48, %v10006_v32 }
 0x1c2   : > { %3532 = vrot.lane.b32.xlu2 %v9643_v31, %s9208_s26  ;;  %3530 = vrot.lane.b32.xlu1 %v9591_v6, %s9208_s26  ;;  %v7630_v6 = vmul.f32 -1.442695, %v1091_v24  ;;  %v8137_v31 = vpop.eup %8136  ;;  %v7628_v52 = vmul.f32 -1.442695, %v1085_v28  ;;  %v7631_v27 = vmul.f32 -1.442695, %v1094_v18  ;;  %v10262_v29 = vpop.permute.xlu0 %1040 }
 0x1c3   : > { %v8139_v10 = vpop.eup %8138  ;;  %v10238_v42 = vadd.f32 1.0, %v8137_v31 }
 0x1c4   : > { %v10221_v25 = vpop.permute.xlu2 %2688  ;;  %v10223_v55 = vpop.permute.xlu1 %2292  ;;  %8144 = vpow2.f32 %v7630_v6 }
 0x1c5   : > { %16047 = vst [vmem:[#allocation22_spill] sm:$0xff] %v10221_v25  ;;  %v10240_v50 = vpop.eup %8140  ;;  %8146 = vpow2.f32 %v7628_v52  ;;  %v7632_v52 = vmul.f32 -1.442695, %v1097_v59  ;;  %v1165_v25 = vand.u32 2147483648, %v10238_v42  ;;  %vm1159_vm12 = vweird.f32 %v10238_v42 }
 0x1c6   : > { %16048 = vst [vmem:[#allocation23_spill] sm:$0xff] %v10223_v55  ;;  %v8143_v16 = vpop.eup %8142  ;;  %8148 = vrcp.f32 %v10238_v42  ;;  %vm1145_vm9 = vweird.f32 %v10240_v50 }
 0x1c7   : > { %v10226_v0 = vpop.f32.mrf.mxu2  ;;  %v10253_v32 = vadd.f32 1.0, %v8143_v16  ;;  %vm10307_vm10 = vmor %vm1144_vm8, %vm1145_vm9 }
 0x1c8   : > { %3548 = vrot.lane.b32.xlu0 %v9636_v22, %s9208_s26  ;;  %v10242_v22 = vadd.f32 1.0, %v8139_v10 }
 0x1c9   : > { %vm1174_vm7 = vweird.f32 %v10253_v32 }
 0x1ca   : > { %3520 = vrot.lane.b32.xlu2 %v9504_v3, %s9208_s26  ;;  %3518 = vrot.lane.b32.xlu1 %v9495_v58, %s9208_s26  ;;  %v1140_v58 = vmul.f32 %v10240_v50, %v10219_v2  ;;  %8150 = vrcp.f32 %v10242_v22  ;;  %v8145_v48 = vpop.eup %8144  ;;  %vm1220_vm1 = vweird.f32 %v10242_v22 }
 0x1cb   : > { %8152 = vpow2.f32 %v7631_v27  ;;  %v10266_v28 = vadd.f32 1.0, %v8145_v48  ;;  %v1035_v48 = vpop.permute.xlu0 %1034 }
 0x1cc   : > { %v10236_v51 = vpop.permute.xlu2 %2694  ;;  %v10246_v13 = vpop.permute.xlu1 %2286  ;;  %v1141_v24 = vsub.f32 1.0, %v1140_v58  ;;  %8154 = vrcp.f32 %v10253_v32 }
 0x1cd   : > { %16049 = vst [vmem:[#allocation24_spill] sm:$0xff] %v10236_v51  ;;  %8156 = vrcp.f32 %v10266_v28 }
 0x1ce   : > { %16050 = vst [vmem:[#allocation25_spill] sm:$0xff] %v10246_v13  ;;  %v1142_v11 = vmul.f32 %v10240_v50, %v1141_v24 }
 0x1cf   : > { %v10244_v3 = vpop.f32.mrf.mxu2 }
 0x1d0   : > { %3542 = vrot.lane.b32.xlu0 %v9537_v54, %s9208_s26  ;;  %v8147_v54 = vpop.eup %8146 }
 0x1d1   : > { %v10268_v6 = vpop.eup %8148 }
 0x1d2   : > { %3526 = vrot.lane.b32.xlu2 %v9535_v53, %s9208_s26  ;;  %3546 = vrot.lane.b32.xlu1 %v9580_v7, %s9208_s26  ;;  %v10272_v31 = vpop.eup %8150  ;;  %v10274_v7 = vadd.f32 1.0, %v8147_v54  ;;  %vm1160_vm14 = vweird.f32 %v10268_v6 }
 0x1d3   : > { %v8153_v10 = vpop.eup %8152  ;;  %v1216_v18 = vmul.f32 %v10272_v31, %v10242_v22  ;;  %vm1221_vm13 = vweird.f32 %v10272_v31  ;;  %vm10376_vm6 = vmor %vm1159_vm12, %vm1160_vm14 }
 0x1d4   : > { %v10260_v14 = vpop.permute.xlu2 %2682  ;;  %v10280_v8 = vpop.permute.xlu1 %2280  ;;  %8158 = vrcp.f32 %v10274_v7  ;;  %v10293_v27 = vadd.f32 1.0, %v8153_v10  ;;  %vm10359_vm3 = vmor %vm1220_vm1, %vm1221_vm13 }
 0x1d5   : > { %16051 = vst [vmem:[#allocation26_spill] sm:$0xff] %v10260_v14  ;;  %v10288_v16 = vpop.eup %8154  ;;  %8160 = vpow2.f32 %v7632_v52  ;;  %v1217_v59 = vsub.f32 1.0, %v1216_v18  ;;  %v1148_v52 = vand.u32 2147483647, %v10219_v2  ;;  %v1100_v18 = vadd.f32 %v10211_v60, %v10066_v49 }
 0x1d6   : > { %16052 = vst [vmem:[#allocation27_spill] sm:$0xff] %v10280_v8  ;;  %v1170_v54 = vmul.f32 %v10288_v16, %v10253_v32  ;;  %v10303_v51 = vpop.eup %8156  ;;  %8162 = vrcp.f32 %v10293_v27  ;;  %v1163_v49 = vand.u32 2147483647, %v10238_v42  ;;  %vm1175_vm2 = vweird.f32 %v10288_v16 }
 0x1d7   : > { %v10270_v53 = vpop.f32.mrf.mxu2  ;;  %v1231_v55 = vmul.f32 %v10303_v51, %v10266_v28  ;;  %vm1149_vm11 = vcmp.eq.f32.partialorder %v1148_v52, 8.507059e+37  ;;  %vm10391_vm8 = vmor %vm1174_vm7, %vm1175_vm2 }
 0x1d8   : > { %3536 = vrot.lane.b32.xlu0 %v9543_v62, %s9208_s26  ;;  %v1155_v62 = vmul.f32 %v10268_v6, %v10238_v42  ;;  %vm10343_vm15 = vcmp.eq.f32.partialorder %v1163_v49, 8.507059e+37 }
 0x1da   : > { %3544 = vrot.lane.b32.xlu2 %v9550_v17, %s9208_s26  ;;  %3540 = vrot.lane.b32.xlu1 %v9570_v41, %s9208_s26  ;;  %v1143_v17 = vadd.f32 %v10240_v50, %v1142_v11  ;;  %v1150_v41 = vand.u32 2147483648, %v10219_v2  ;;  %v1156_v10 = vsub.f32 1.0, %v1155_v62  ;;  %v10312_v14 = vpop.eup %8158 }
 0x1db   : > { %v8161_v2 = vpop.eup %8160  ;;  %vm1190_vm1 = vweird.f32 %v10312_v14 }
 0x1dc   : > { %v10295_v58 = vpop.permute.xlu2 %2710  ;;  %v1147_v62 = vsel %vm10307_vm10, %v10240_v50, %v1143_v17  ;;  %v1151_v13 = vor.u32 1.1754944e-38, %v1150_v41  ;;  %v1157_v60 = vmul.f32 %v10268_v6, %v1156_v10  ;;  %v10328_v50 = vpop.permute.xlu1 %2686  ;;  %v1185_v41 = vmul.f32 %v10312_v14, %v10274_v7 }
 0x1dd   : > { %16053 = vst [vmem:[#allocation28_spill] sm:$0xff] %v10295_v58  ;;  %v10334_v17 = vpop.eup %8162  ;;  %vm1236_vm10 = vweird.f32 %v10303_v51 }
 0x1de   : > { %16056 = vst [vmem:[#allocation29_spill] sm:$0xff] %v10328_v50  ;;  %v1186_v49 = vsub.f32 1.0, %v1185_v41  ;;  %vm1251_vm13 = vweird.f32 %v10334_v17 }
 0x1df   : > { %v1111_v24 = vpop.f32.mrf.mxu2 }
 0x1e0   : > { %v1112_v11 = vadd.f32 %v1111_v24, %v1035_v48  ;;  %v1171_v48 = vsub.f32 1.0, %v1170_v54  ;;  %v1218_v24 = vmul.f32 %v10272_v31, %v1217_v59  ;;  %v10338_v54 = vadd.f32 1.0, %v8161_v2 }
 0x1e1   : > { %v1178_v59 = vand.u32 2147483647, %v10253_v32 }
 0x1e2   : > { %v7633_v44 = vmul.f32 -1.442695, %v1112_v11  ;;  %3538 = vrot.lane.b32.xlu2 %v9562_v34, %s9208_s26  ;;  %3534 = vrot.lane.b32.xlu1 %v9719_v46, %s9208_s26  ;;  %v1152_v34 = vsel %vm1149_vm11, %v1151_v13, %v1147_v62  ;;  %v1166_v46 = vor.u32 1.1754944e-38, %v1165_v25  ;;  %v1219_v13 = vadd.f32 %v10272_v31, %v1218_v24 }
 0x1e3   : > { %v1172_v25 = vmul.f32 %v10288_v16, %v1171_v48  ;;  %v1226_v11 = vand.u32 2147483648, %v10242_v22  ;;  %v1158_v62 = vadd.f32 %v10268_v6, %v1157_v60  ;;  %v1224_v24 = vand.u32 2147483647, %v10242_v22 }
 0x1e4   : > { %8164 = vpow2.f32 %v7633_v44  ;;  %v10330_v58 = vpop.permute.xlu2 %2704  ;;  %v1232_v44 = vsub.f32 1.0, %v1231_v55  ;;  %v1246_v55 = vmul.f32 %v10334_v17, %v10293_v27  ;;  %v1223_v22 = vsel %vm10359_vm3, %v10272_v31, %v1219_v13  ;;  %v10396_v13 = vpop.permute.xlu1 %2692 }
 0x1e5   : > { %16057 = vst [vmem:[#allocation30_spill] sm:$0xff] %v10330_v58  ;;  %8166 = vtanh.f32 %v1100_v18  ;;  %v1180_v18 = vand.u32 2147483648, %v10253_v32  ;;  %v1029_v58 = vpop.permute.xlu0 %1028  ;;  %v1173_v8 = vadd.f32 %v10288_v16, %v1172_v25  ;;  %v1227_v23 = vor.u32 1.1754944e-38, %v1226_v11 }
 0x1e6   : > { %8168 = vrcp.f32 %v10338_v54  ;;  %v1233_v50 = vmul.f32 %v10303_v51, %v1232_v44  ;;  %vm10381_vm5 = vcmp.eq.f32.partialorder %v1178_v59, 8.507059e+37  ;;  %v1247_v31 = vsub.f32 1.0, %v1246_v55  ;;  %16068 = vst [vmem:[#allocation31_spill] sm:$0xff] %v10396_v13 }
 0x1e7   : > { %v1114_v52 = vpop.f32.mrf.mxu2  ;;  %vm1225_vm9 = vcmp.eq.f32.partialorder %v1224_v24, 8.507059e+37  ;;  %v1181_v32 = vor.u32 1.1754944e-38, %v1180_v18  ;;  %v1187_v59 = vmul.f32 %v10312_v14, %v1186_v49  ;;  %v1241_v18 = vand.u32 2147483648, %v10266_v28 }
 0x1e8   : > { %v1115_v2 = vadd.f32 %v1114_v52, %v10008_v39  ;;  %v1103_v39 = vadd.f32 %v10226_v0, %v1029_v58  ;;  %v1162_v58 = vsel %vm10376_vm6, %v10268_v6, %v1158_v62  ;;  %v1228_v42 = vsel %vm1225_vm9, %v1227_v23, %v1223_v22 }
 0x1e9   : > { %v1234_v6 = vadd.f32 %v10303_v51, %v1233_v50  ;;  %v1177_v23 = vsel %vm10391_vm8, %v10288_v16, %v1173_v8  ;;  %v1239_v55 = vand.u32 2147483647, %v10266_v28  ;;  %vm1235_vm11 = vweird.f32 %v10266_v28 }
 0x1ea   : > { %v8165_v48 = vpop.eup %8164  ;;  %v7634_v52 = vmul.f32 -1.442695, %v1115_v2  ;;  %v1167_v2 = vsel %vm10343_vm15, %v1166_v46, %v1162_v58  ;;  %v1355_v50 = vmul.f32 %v1228_v42, %v9860_v38  ;;  %v1195_v8 = vand.u32 2147483648, %v10274_v7  ;;  %vm10418_vm12 = vmor %vm1235_vm11, %vm1236_vm10 }
 0x1eb   : > { %v10370_v41 = vadd.f32 1.0, %v8165_v48  ;;  %v8167_v26 = vpop.eup %8166  ;;  %v1106_v46 = vadd.f32 %v10244_v3, %v10018_v43  ;;  %v10429_v28 = vadd.f32 %v10312_v14, %v1187_v59  ;;  %v1238_v60 = vsel %vm10418_vm12, %v10303_v51, %v1234_v6 }
 0x1ec   : > { %8170 = vpow2.f32 %v7634_v52  ;;  %v10398_v25 = vpop.permute.xlu2 %2698  ;;  %v1359_v36 = vmul.f32 %v8167_v26, %v1152_v34  ;;  %v10405_v62 = vpop.eup %8168  ;;  %v1248_v26 = vmul.f32 %v10334_v17, %v1247_v31  ;;  %v1242_v3 = vor.u32 1.1754944e-38, %v1241_v18 }
 0x1ed   : > { %8172 = vrcp.f32 %v10370_v41  ;;  %16069 = vst [vmem:[#allocation32_spill] sm:$0xff] %v10398_v25  ;;  %v1261_v48 = vmul.f32 %v10405_v62, %v10338_v54  ;;  %vm1240_vm14 = vcmp.eq.f32.partialorder %v1239_v55, 8.507059e+37  ;;  %v1256_v22 = vand.u32 2147483648, %v10293_v27 }
 0x1ee   : > { %8174 = vtanh.f32 %v1103_v39  ;;  %v10433_v49 = vadd.f32 %v1359_v36, %v1355_v50  ;;  %v1249_v0 = vadd.f32 %v10334_v17, %v1248_v26  ;;  %vm1250_vm15 = vweird.f32 %v10293_v27  ;;  %v10454_v36 = vpop.permute.xlu1 %2712 }
 0x1ef   : > { %v1117_v11 = vpop.f32.mrf.mxu2  ;;  %v1243_v31 = vsel %vm1240_vm14, %v1242_v3, %v1238_v60  ;;  %v1262_v58 = vsub.f32 1.0, %v1261_v48  ;;  %vm10449_vm2 = vmor %vm1250_vm15, %vm1251_vm13  ;;  %vm1189_vm3 = vweird.f32 %v10274_v7  ;;  %16074 = vst [vmem:[#allocation33_spill] sm:$0xff] %v10454_v36  ;;  %v1304_v18 = vand.u32 2147483647, %v10370_v41 }
 0x1f0   : > { %v1118_v24 = vadd.f32 %v1117_v11, %v10032_v35  ;;  %v10426_v35 = vsel %vm10381_vm5, %v1181_v32, %v1177_v23  ;;  %v1306_v32 = vand.u32 2147483648, %v10370_v41  ;;  %v1356_v55 = vmul.f32 %v1243_v31, %v9833_v40  ;;  %vm10493_vm14 = vmor %vm1189_vm3, %vm1190_vm1 }
 0x1f1   : > { %v1254_v26 = vand.u32 2147483647, %v10293_v27  ;;  %vm1300_vm7 = vweird.f32 %v10370_v41  ;;  %vm1305_vm9 = vcmp.eq.f32.partialorder %v1304_v18, 8.507059e+37  ;;  %vm1266_vm10 = vweird.f32 %v10405_v62 }
 0x1f2   : > { %v8171_v16 = vpop.eup %8170  ;;  %v7635_v38 = vmul.f32 -1.442695, %v1118_v24  ;;  %v1253_v24 = vsel %vm10449_vm2, %v10334_v17, %v1249_v0  ;;  %v1307_v17 = vor.u32 1.1754944e-38, %v1306_v32  ;;  %v1271_v31 = vand.u32 2147483648, %v10338_v54 }
 0x1f3   : > { %v8173_v10 = vpop.eup %8172  ;;  %v10438_v39 = vadd.f32 1.0, %v8171_v16  ;;  %v1109_v16 = vadd.f32 %v10270_v53, %v10049_v63  ;;  %vm1255_vm8 = vcmp.eq.f32.partialorder %v1254_v26, 8.507059e+37  ;;  %vm1265_vm12 = vweird.f32 %v10338_v54 }
 0x1f4   : > { %v8175_v43 = vpop.eup %8174  ;;  %8176 = vpow2.f32 %v7635_v38  ;;  %v1296_v52 = vmul.f32 %v8173_v10, %v10370_v41  ;;  %v10456_v6 = vpop.permute.xlu2 %3104  ;;  %vm1301_vm6 = vweird.f32 %v8173_v10  ;;  %v1263_v38 = vmul.f32 %v10405_v62, %v1262_v58  ;;  %vm10512_vm15 = vmor %vm1265_vm12, %vm1266_vm10 }
 0x1f5   : > { %8178 = vrcp.f32 %v10438_v39  ;;  %v1360_v42 = vmul.f32 %v8175_v43, %v1167_v2  ;;  %16075 = vst [vmem:[#allocation34_spill] sm:$0xff] %v10456_v6  ;;  %v1257_v2 = vor.u32 1.1754944e-38, %v1256_v22  ;;  %vm1302_vm5 = vmor %vm1300_vm7, %vm1301_vm6  ;;  %v1321_v0 = vand.u32 2147483648, %v10438_v39 }
 0x1f6   : > { %8180 = vtanh.f32 %v1106_v46  ;;  %v1297_v51 = vsub.f32 1.0, %v1296_v52  ;;  %v1319_v58 = vand.u32 2147483647, %v10438_v39  ;;  %v1269_v32 = vand.u32 2147483647, %v10338_v54 }
 0x1f7   : > { %v1120_v44 = vpop.f32.mrf.mxu2  ;;  %8182 = vtanh.f32 %v10433_v49  ;;  %v10469_v48 = vadd.f32 %v1360_v42, %v1356_v55  ;;  %v1258_v43 = vsel %vm1255_vm8, %v1257_v2, %v1253_v24  ;;  %vm1315_vm13 = vweird.f32 %v10438_v39 }
 0x1f8   : > { %v1121_v23 = vadd.f32 %v1120_v44, %v10262_v29  ;;  %v1298_v11 = vmul.f32 %v8173_v10, %v1297_v51  ;;  %v1357_v42 = vmul.f32 %v1258_v43, %v9867_v57  ;;  %v1193_v44 = vand.u32 2147483647, %v10274_v7 }
 0x1f9   : > { %v1196_v57 = vor.u32 1.1754944e-38, %v1195_v8  ;;  %v1322_v7 = vor.u32 1.1754944e-38, %v1321_v0  ;;  %v1272_v26 = vor.u32 1.1754944e-38, %v1271_v31  ;;  %vm1320_vm2 = vcmp.eq.f32.partialorder %v1319_v58, 8.507059e+37 }
 0x1fa   : > { %v8177_v50 = vpop.eup %8176  ;;  %v7636_v34 = vmul.f32 -1.442695, %v1121_v23  ;;  %v1299_v46 = vadd.f32 %v8173_v10, %v1298_v11  ;;  %v1192_v23 = vsel %vm10493_vm14, %v10312_v14, %v10429_v28  ;;  %v10505_v11 = vpop.permute.xlu1 %2706  ;;  %vm1194_vm3 = vcmp.eq.f32.partialorder %v1193_v44, 8.507059e+37 }
 0x1fb   : > { %v8179_v29 = vpop.eup %8178  ;;  %v10471_v40 = vadd.f32 1.0, %v8177_v50  ;;  %16078 = vst [vmem:[#allocation35_spill] sm:$0xff] %v10505_v11  ;;  %vm1270_vm6 = vcmp.eq.f32.partialorder %v1269_v32, 8.507059e+37 }
 0x1fc   : > { %v8181_v60 = vpop.eup %8180  ;;  %8184 = vpow2.f32 %v7636_v34  ;;  %v1303_v27 = vsel %vm1302_vm5, %v8173_v10, %v1299_v46  ;;  %v1311_v63 = vmul.f32 %v8179_v29, %v10438_v39  ;;  %v1264_v10 = vadd.f32 %v10405_v62, %v1263_v38  ;;  %v10507_v18 = vpop.permute.xlu2 %3110 }
 0x1fd   : > { %v8183_v53 = vpop.eup %8182  ;;  %8186 = vrcp.f32 %v10471_v40  ;;  %v1308_v41 = vsel %vm1305_vm9, %v1307_v17, %v1303_v27  ;;  %v1361_v22 = vmul.f32 %v8181_v60, %v10426_v35  ;;  %vm1316_vm11 = vweird.f32 %v8179_v29  ;;  %16079 = vst [vmem:[#allocation36_spill] sm:$0xff] %v10507_v18 }
 0x1fe   : > { %8188 = vtanh.f32 %v1109_v16  ;;  %v10477_v3 = vmul.f32 %v8183_v53, %v1308_v41  ;;  %v1312_v52 = vsub.f32 1.0, %v1311_v63  ;;  %vm1317_vm1 = vmor %vm1315_vm13, %vm1316_vm11  ;;  %v1268_v8 = vsel %vm10512_vm15, %v10405_v62, %v1264_v10 }
 0x1ff   : > { %8190 = vtanh.f32 %v10469_v48  ;;  %v10516_v24 = vadd.f32 %v1361_v22, %v1357_v42  ;;  %v1197_v46 = vsel %vm1194_vm3, %v1196_v57, %v1192_v23  ;;  %v1273_v60 = vsel %vm1270_vm6, %v1272_v26, %v1268_v8 }
 0x200   : > { %1379 = vrot.lane.b32.xlu2 %v10477_v3, %s9208_s26  ;;  %v1313_v51 = vmul.f32 %v8179_v29, %v1312_v52  ;;  %v1336_v63 = vand.u32 2147483648, %v10471_v40  ;;  %v1358_v53 = vmul.f32 %v1273_v60, %v9918_v1  ;;  %vm1330_vm5 = vweird.f32 %v10471_v40 }
 0x201   : > { %vm1391_vm13 = vcmask 261248  }
 0x202   : > { %v8185_v59 = vpop.eup %8184  ;;  %v1314_v2 = vadd.f32 %v8179_v29, %v1313_v51  ;;  %v1337_v52 = vor.u32 1.1754944e-38, %v1336_v63  ;;  %v10531_v0 = vpop.permute.xlu1 %2700  ;;  %v10597_v63 = vld [vmem:[%s15956_s2 + $0x28] sm:$0xff] }
 0x203   : > { %v8187_v55 = vpop.eup %8186  ;;  %v1294_v14 = vadd.f32 1.0, %v8185_v59  ;;  %16082 = vst [vmem:[#allocation37_spill] sm:$0xff] %v10531_v0 }
 0x204   : > { %v8189_v28 = vpop.eup %8188  ;;  %v1318_v39 = vsel %vm1317_vm1, %v8179_v29, %v1314_v2  ;;  %v1326_v50 = vmul.f32 %v8187_v55, %v10471_v40  ;;  %vm1331_vm7 = vweird.f32 %v8187_v55  ;;  %v1334_v29 = vand.u32 2147483647, %v10471_v40  ;;  %v10533_v10 = vpop.permute.xlu2 %3130 }
 0x205   : > { %v8191_v16 = vpop.eup %8190  ;;  %8192 = vrcp.f32 %v1294_v14  ;;  %v1323_v34 = vsel %vm1320_vm2, %v1322_v7, %v1318_v39  ;;  %v1362_v27 = vmul.f32 %v8189_v28, %v1197_v46  ;;  %vm1332_vm9 = vmor %vm1330_vm5, %vm1331_vm7  ;;  %16083 = vst [vmem:[#allocation38_spill] sm:$0xff] %v10533_v10  ;;  %v1351_v1 = vand.u32 2147483648, %v1294_v14  ;;  %v10557_v39 = vld [vmem:[%s15956_s2 + $0x8] sm:$0xff] }
 0x206   : > { %v1372_v38 = vmul.f32 %v8191_v16, %v1323_v34  ;;  %v1327_v17 = vsub.f32 1.0, %v1326_v50  ;;  %8194 = vtanh.f32 %v10516_v24  ;;  %vm1335_vm8 = vcmp.eq.f32.partialorder %v1334_v29, 8.507059e+37  ;;  %v10568_v16 = vld [vmem:[%s15956_s2 + $0x10] sm:$0xff] }
 0x207   : > { %v10529_v22 = vadd.f32 %v1362_v27, %v1358_v53  ;;  %v1349_v32 = vand.u32 2147483647, %v1294_v14  ;;  %vm1345_vm11 = vweird.f32 %v1294_v14  ;;  %v1352_v23 = vor.u32 1.1754944e-38, %v1351_v1  ;;  %v10590_v27 = vld [vmem:[%s15956_s2 + $0x20] sm:$0xff]  ;;  %v10608_v53 = vld [vmem:[%s15956_s2 + $0x30] sm:$0xff] }
 0x208   : > { %1381 = vrot.lane.b32.xlu2 %v1372_v38, %s9208_s26  ;;  %v1328_v62 = vmul.f32 %v8187_v55, %v1327_v17 }
 0x209   : > { %8196 = vtanh.f32 %v10529_v22  ;;  %vm1350_vm14 = vcmp.eq.f32.partialorder %v1349_v32, 8.507059e+37 }
 0x20a   : > { %v1329_v41 = vadd.f32 %v8187_v55, %v1328_v62 }
 0x20b   : > { %v8193_v43 = vpop.eup %8192 }
 0x20c   : > { %v1333_v31 = vsel %vm1332_vm9, %v8187_v55, %v1329_v41  ;;  %v1341_v51 = vmul.f32 %v8193_v43, %v1294_v14  ;;  %v8195_v58 = vpop.eup %8194  ;;  %vm1346_vm10 = vweird.f32 %v8193_v43  ;;  %v10537_v55 = vpop.permute.xlu1 %3114  ;;  %v10546_v14 = vld [vmem:[%s15956_s2] sm:$0xff] }
 0x20d   : > { %v1338_v42 = vsel %vm1335_vm8, %v1337_v52, %v1333_v31  ;;  %vm1347_vm12 = vmor %vm1345_vm11, %vm1346_vm10  ;;  %16084 = vst [vmem:[#allocation39_spill] sm:$0xff] %v10537_v55  ;;  %v10539_v7 = vpop.permute.xlu2 %3124  ;;  %v10616_v52 = vpop.permute.xlu0 %1442  ;;  %v10621_v31 = vld [vmem:[%s15956_s2 + $0x38] sm:$0xff] }
 0x20e   : > { %v1373_v35 = vmul.f32 %v8195_v58, %v1338_v42  ;;  %v1342_v44 = vsub.f32 1.0, %v1341_v51  ;;  %16085 = vst [vmem:[#allocation40_spill] sm:$0xff] %v10539_v7  ;;  %v10631_v42 = vld [vmem:[%s15956_s2 + $0x40] sm:$0xff] }
 0x20f   : > { %v8197_v2 = vpop.eup %8196 }
 0x210   : > { %1383 = vrot.lane.b32.xlu1 %v1373_v35, %s9208_s26  ;;  %v1343_v40 = vmul.f32 %v8193_v43, %v1342_v44 }
 0x212   : > { %v1344_v59 = vadd.f32 %v8193_v43, %v1343_v40 }
 0x214   : > { %v1348_v57 = vsel %vm1347_vm12, %v8193_v43, %v1344_v59  ;;  %v10550_v28 = vpop.permute.xlu1 %3102 }
 0x215   : > { %v1353_v54 = vsel %vm1350_vm14, %v1352_v23, %v1348_v57  ;;  %16086 = vst [vmem:[#allocation41_spill] sm:$0xff] %v10550_v28  ;;  %v10552_v26 = vpop.permute.xlu2 %3118  ;;  %v10650_v57 = vld [vmem:[%s15956_s2 + $0x58] sm:$0xff] }
 0x216   : > { %v1374_v8 = vmul.f32 %v8197_v2, %v1353_v54  ;;  %16087 = vst [vmem:[#allocation42_spill] sm:$0xff] %v10552_v26 }
 0x218   : > { %1488 = vmatpush.msrb.mxu3 %v1374_v8  ;;  %1385 = vrot.lane.b32.xlu2 %v1374_v8, %s9208_s26  ;;  %v10669_v8 = vld [vmem:[%s15956_s2 + $0x68] sm:$0xff] }
 0x21a   : > { %1489 = vmatpush.msrb.mxu3 %v1373_v35  ;;  %v1431_v35 = vpop.permute.xlu0 %1430 }
 0x21c   : > { %1490 = vmatpush.msrb.mxu3 %v1372_v38  ;;  %v10579_v38 = vld [vmem:[%s15956_s2 + $0x18] sm:$0xff] }
 0x21d   : > { %v10563_v50 = vpop.permute.xlu2 %3532 }
 0x21e   : > { %1491 = vmatpush.msrb.mxu3 %v10477_v3  ;;  %v10561_v3 = vpop.permute.xlu1 %3108  ;;  %16089 = vst [vmem:[#allocation44_spill] sm:$0xff] %v10563_v50 }
 0x21f   : > { %7637 = vmatmul.msk.f32.vlgmr.msrb.gmra.mxu3 %vm607_vm0, %v10546_v14  ;;  %16088 = vst [vmem:[#allocation43_spill] sm:$0xff] %v10561_v3 }
 0x222   : > { %v1437_v40 = vpop.permute.xlu0 %1436 }
 0x225   : > { %v10574_v46 = vpop.permute.xlu2 %3520 }
 0x226   : > { %v10572_v34 = vpop.permute.xlu1 %3126  ;;  %16091 = vst [vmem:[#allocation46_spill] sm:$0xff] %v10574_v46 }
 0x227   : > { %7638 = vmatmul.msk.f32.gmra.mxu3 %vm607_vm0, %v10557_v39  ;;  %16090 = vst [vmem:[#allocation45_spill] sm:$0xff] %v10572_v34 }
 0x22a   : > { %v10645_v23 = vpop.permute.xlu0 %1454 }
 0x22d   : > { %v10585_v60 = vpop.permute.xlu2 %3526 }
 0x22e   : > { %v10583_v17 = vpop.permute.xlu1 %3120  ;;  %16093 = vst [vmem:[#allocation48_spill] sm:$0xff] %v10585_v60 }
 0x22f   : > { %7639 = vmatmul.msk.f32.gmra.mxu3 %vm607_vm0, %v10568_v16  ;;  %16092 = vst [vmem:[#allocation47_spill] sm:$0xff] %v10583_v17 }
 0x232   : > { %v10656_v2 = vpop.permute.xlu0 %1448 }
 0x235   : > { %v10603_v29 = vpop.permute.xlu2 %3544 }
 0x236   : > { %v10601_v62 = vpop.permute.xlu1 %3524  ;;  %16095 = vst [vmem:[#allocation50_spill] sm:$0xff] %v10603_v29 }
 0x237   : > { %7640 = vmatmul.msk.f32.gmra.mxu3 %vm607_vm0, %v10579_v38  ;;  %16094 = vst [vmem:[#allocation49_spill] sm:$0xff] %v10601_v62 }
 0x23d   : > { %v10614_v43 = vpop.permute.xlu2 %3538 }
 0x23e   : > { %v10612_v41 = vpop.permute.xlu1 %3530  ;;  %16097 = vst [vmem:[#allocation52_spill] sm:$0xff] %v10614_v43 }
 0x23f   : > { %7641 = vmatmul.msk.f32.gmra.mxu3 %vm607_vm0, %v10590_v27  ;;  %16096 = vst [vmem:[#allocation51_spill] sm:$0xff] %v10612_v41 }
 0x246   : > { %v10626_v58 = vpop.permute.xlu1 %3518 }
 0x247   : > { %7642 = vmatmul.msk.f32.gmra.mxu3 %vm607_vm0, %v10597_v63  ;;  %16098 = vst [vmem:[#allocation53_spill] sm:$0xff] %v10626_v58 }
 0x24e   : > { %v10636_v1 = vpop.permute.xlu1 %3546 }
 0x24f   : > { %7643 = vmatmul.msk.f32.gmra.mxu3 %vm607_vm0, %v10608_v53  ;;  %16099 = vst [vmem:[#allocation54_spill] sm:$0xff] %v10636_v1 }
 0x256   : > { %v10642_v32 = vpop.permute.xlu1 %3540 }
 0x257   : > { %7644 = vmatmul.msk.f32.gmra.mxu3 %vm607_vm0, %v10621_v31  ;;  %16100 = vst [vmem:[#allocation55_spill] sm:$0xff] %v10642_v32 }
 0x25a   : > { %v1380_v51 = vpop.permute.xlu2 %1379 }
 0x25b   : > { %1392 = vst.msk [vmem:[#allocation3] sm:$0xff] %vm1391_vm13, %v1380_v51  ;;  %v10673_v51 = vpop.permute.xlu0 %1852 }
 0x25c   : > { %16102 = vst [vmem:[#allocation57_spill] sm:$0xff] %v10673_v51 }
 0x25f   : > { %7645 = vmatmul.msk.f32.gmra.mxu3 %vm607_vm0, %v10631_v42 }
 0x262   : > { %v1382_v44 = vpop.permute.xlu2 %1381 }
 0x263   : > { %1393 = vst.msk [vmem:[#allocation3 + $0x8] sm:$0xff] %vm1391_vm13, %v1382_v44  ;;  %v10678_v44 = vld [vmem:[%s15956_s2 + $0x70] sm:$0xff] }
 0x267   : > { %7646 = vmatmul.msk.f32.gmra.mxu3 %vm607_vm0, %v10037_v56  ;;  %v10654_v56 = vpop.permute.xlu1 %3534 }
 0x268   : > { %16101 = vst [vmem:[#allocation56_spill] sm:$0xff] %v10654_v56 }
 0x26f   : > { %7647 = vmatmul.msk.f32.gmra.mxu3 %vm607_vm0, %v10054_v47  ;;  %v10661_v47 = vld [vmem:[%s15956_s2 + $0x60] sm:$0xff] }
 0x272   : > { %v1386_v59 = vpop.permute.xlu2 %1385 }
 0x273   : > { %1395 = vst.msk [vmem:[#allocation3 + $0x18] sm:$0xff] %vm1391_vm13, %v1386_v59  ;;  %v10682_v59 = vpop.permute.xlu0 %1858 }
 0x274   : > { %16103 = vst [vmem:[#allocation58_spill] sm:$0xff] %v10682_v59 }
 0x277   : > { %7648 = vmatmul.msk.f32.gmra.mxu3 %vm607_vm0, %v10650_v57 }
 0x27b   : > { %v10691_v56 = vpop.permute.xlu0 %1846 }
 0x27f   : > { %7649 = vmatmul.msk.f32.gmra.mxu3 %vm607_vm0, %v10661_v47 }
 0x282   : > { %v1384_v54 = vpop.permute.xlu1 %1383 }
 0x283   : > { %1394 = vst.msk [vmem:[#allocation3 + $0x10] sm:$0xff] %vm1391_vm13, %v1384_v54  ;;  %v10687_v54 = vld [vmem:[%s15956_s2 + $0x78] sm:$0xff]  ;;  %v10693_v43 = vpop.permute.xlu0 %1874 }
 0x284   : > { %16104 = vst [vmem:[#allocation59_spill] sm:$0xff] %v10693_v43 }
 0x287   : > { %7650 = vmatmul.msk.f32.gmra.mxu3 %vm607_vm0, %v10669_v8 }
 0x28b   : > { %v10695_v29 = vpop.permute.xlu0 %1868 }
 0x28c   : > { %16105 = vst [vmem:[#allocation60_spill] sm:$0xff] %v10695_v29 }
 0x28f   : > { %7651 = vmatmul.msk.f32.gmra.mxu3 %vm607_vm0, %v10678_v44 }
 0x293   : > { %v10697_v62 = vpop.permute.xlu0 %1862 }
 0x294   : > { %16106 = vst [vmem:[#allocation61_spill] sm:$0xff] %v10697_v62 }
 0x297   : > { %7652 = vmatmul.msk.f32.gmra.mxu3 %vm607_vm0, %v10687_v54 }
 0x29b   : > { %v10699_v58 = vpop.permute.xlu0 %2268 }
 0x29c   : > { %16107 = vst [vmem:[#allocation62_spill] sm:$0xff] %v10699_v58 }
 0x2a2   : > { %v1493_v32 = vpop.f32.mrf.mxu3 }
 0x2a3   : > { %v10701_v10 = vpop.permute.xlu0 %2274  ;;  %v1494_v26 = vadd.f32 %v1493_v32, %v10064_v15 }
 0x2a4   : > { %16108 = vst [vmem:[#allocation63_spill] sm:$0xff] %v10701_v10 }
 0x2a5   : > { %v7653_v7 = vmul.f32 -1.442695, %v1494_v26 }
 0x2a7   : > { %8198 = vpow2.f32 %v7653_v7 }
 0x2aa   : > { %v1496_v1 = vpop.f32.mrf.mxu3 }
 0x2ab   : > { %v10704_v34 = vpop.permute.xlu0 %2294  ;;  %v1497_v55 = vadd.f32 %v1496_v1, %v1431_v35 }
 0x2ac   : > { %16109 = vst [vmem:[#allocation64_spill] sm:$0xff] %v10704_v34 }
 0x2ad   : > { %v7654_v36 = vmul.f32 -1.442695, %v1497_v55  ;;  %v8199_v0 = vpop.eup %8198 }
 0x2ae   : > { %v10711_v13 = vadd.f32 1.0, %v8199_v0 }
 0x2af   : > { %8200 = vpow2.f32 %v7654_v36 }
 0x2b0   : > { %vm1562_vm1 = vweird.f32 %v10711_v13 }
 0x2b2   : > { %v1499_v60 = vpop.f32.mrf.mxu3 }
 0x2b3   : > { %v10708_v28 = vpop.permute.xlu0 %2288  ;;  %v1500_v25 = vadd.f32 %v1499_v60, %v10078_v12 }
 0x2b4   : > { %16110 = vst [vmem:[#allocation65_spill] sm:$0xff] %v10708_v28 }
 0x2b5   : > { %v7655_v15 = vmul.f32 -1.442695, %v1500_v25  ;;  %v8201_v55 = vpop.eup %8200 }
 0x2b6   : > { %v10721_v36 = vadd.f32 1.0, %v8201_v55 }
 0x2b8   : > { %v1581_v62 = vand.u32 2147483647, %v10721_v36  ;;  %vm1577_vm6 = vweird.f32 %v10721_v36 }
 0x2ba   : > { %v1502_v50 = vpop.f32.mrf.mxu3  ;;  %vm10794_vm9 = vcmp.eq.f32.partialorder %v1581_v62, 8.507059e+37 }
 0x2bb   : > { %v1503_v7 = vadd.f32 %v1502_v50, %v10030_v4  ;;  %v10718_v1 = vpop.permute.xlu0 %2282 }
 0x2bc   : > { %16111 = vst [vmem:[#allocation66_spill] sm:$0xff] %v10718_v1 }
 0x2c2   : > { %v1505_v41 = vpop.f32.mrf.mxu3 }
 0x2c3   : > { %v1506_v6 = vadd.f32 %v1505_v41, %v1437_v40 }
 0x2c5   : > { %v7657_v11 = vmul.f32 -1.442695, %v1506_v6  ;;  %v7656_v6 = vmul.f32 -1.442695, %v1503_v7 }
 0x2c7   : > { %8202 = vpow2.f32 %v7657_v11 }
 0x2c8   : > { %8204 = vrcp.f32 %v10711_v13 }
 0x2c9   : > { %8206 = vpow2.f32 %v7655_v15 }
 0x2ca   : > { %v1508_v46 = vpop.f32.mrf.mxu3 }
 0x2cb   : > { %v1509_v26 = vadd.f32 %v1508_v46, %v10090_v30 }
 0x2cd   : > { %v7658_v41 = vmul.f32 -1.442695, %v1509_v26  ;;  %v8203_v12 = vpop.eup %8202 }
 0x2ce   : > { %v8205_v25 = vpop.eup %8204  ;;  %v10723_v30 = vadd.f32 1.0, %v8203_v12 }
 0x2cf   : > { %8208 = vpow2.f32 %v7658_v41  ;;  %v8207_v4 = vpop.eup %8206  ;;  %v1558_v46 = vmul.f32 %v8205_v25, %v10711_v13  ;;  %vm1563_vm15 = vweird.f32 %v8205_v25 }
 0x2d0   : > { %8210 = vpow2.f32 %v7656_v6  ;;  %v10729_v60 = vadd.f32 1.0, %v8207_v4  ;;  %vm10767_vm2 = vmor %vm1562_vm1, %vm1563_vm15  ;;  %vm1638_vm8 = vweird.f32 %v10723_v30 }
 0x2d1   : > { %8212 = vrcp.f32 %v10721_v36  ;;  %v1559_v15 = vsub.f32 1.0, %v1558_v46 }
 0x2d2   : > { %v1511_v17 = vpop.f32.mrf.mxu3  ;;  %8214 = vrcp.f32 %v10723_v30  ;;  %vm1592_vm14 = vweird.f32 %v10729_v60 }
 0x2d3   : > { %v1512_v0 = vadd.f32 %v1511_v17, %v10047_v37  ;;  %v10732_v17 = vpop.permute.xlu0 %2696  ;;  %v1560_v4 = vmul.f32 %v8205_v25, %v1559_v15 }
 0x2d4   : > { %16112 = vst [vmem:[#allocation67_spill] sm:$0xff] %v10732_v17 }
 0x2d5   : > { %v7659_v11 = vmul.f32 -1.442695, %v1512_v0  ;;  %v8209_v37 = vpop.eup %8208 }
 0x2d6   : > { %v8211_v40 = vpop.eup %8210  ;;  %v10736_v26 = vadd.f32 1.0, %v8209_v37 }
 0x2d7   : > { %8216 = vpow2.f32 %v7659_v11  ;;  %v10738_v7 = vpop.eup %8212  ;;  %v10744_v12 = vadd.f32 1.0, %v8211_v40  ;;  %v1561_v40 = vadd.f32 %v8205_v25, %v1560_v4 }
 0x2d8   : > { %8218 = vrcp.f32 %v10729_v60  ;;  %v10742_v55 = vpop.eup %8214  ;;  %v1573_v11 = vmul.f32 %v10738_v7, %v10721_v36  ;;  %vm1578_vm7 = vweird.f32 %v10738_v7 }
 0x2d9   : > { %8220 = vrcp.f32 %v10736_v26  ;;  %vm1639_vm5 = vweird.f32 %v10742_v55  ;;  %vm10830_vm12 = vmor %vm1577_vm6, %vm1578_vm7  ;;  %vm1653_vm6 = vweird.f32 %v10736_v26 }
 0x2da   : > { %v1514_v3 = vpop.f32.mrf.mxu3  ;;  %8222 = vrcp.f32 %v10744_v12  ;;  %v1574_v28 = vsub.f32 1.0, %v1573_v11  ;;  %v1565_v11 = vsel %vm10767_vm2, %v8205_v25, %v1561_v40  ;;  %v1596_v40 = vand.u32 2147483647, %v10729_v60  ;;  %vm10812_vm11 = vmor %vm1638_vm8, %vm1639_vm5 }
 0x2db   : > { %v1515_v32 = vadd.f32 %v1514_v3, %v10616_v52  ;;  %v1634_v3 = vmul.f32 %v10742_v55, %v10723_v30  ;;  %v10756_v37 = vpop.permute.xlu0 %2684 }
 0x2dc   : > { %16113 = vst [vmem:[#allocation68_spill] sm:$0xff] %v10756_v37  ;;  %v1583_v37 = vand.u32 2147483648, %v10721_v36  ;;  %v1575_v59 = vmul.f32 %v10738_v7, %v1574_v28  ;;  %vm10835_vm15 = vcmp.eq.f32.partialorder %v1596_v40, 8.507059e+37 }
 0x2dd   : > { %v8217_v6 = vpop.eup %8216  ;;  %v7660_v0 = vmul.f32 -1.442695, %v1515_v32  ;;  %v1568_v32 = vand.u32 2147483648, %v10711_v13  ;;  %v1635_v17 = vsub.f32 1.0, %v1634_v3 }
 0x2de   : > { %v10749_v52 = vpop.eup %8218  ;;  %v10754_v46 = vadd.f32 1.0, %v8217_v6  ;;  %v1566_v6 = vand.u32 2147483647, %v10711_v13 }
 0x2df   : > { %8224 = vpow2.f32 %v7660_v0  ;;  %v1588_v15 = vmul.f32 %v10749_v52, %v10729_v60  ;;  %v10762_v1 = vpop.eup %8220  ;;  %v1569_v58 = vor.u32 1.1754944e-38, %v1568_v32  ;;  %vm1593_vm10 = vweird.f32 %v10749_v52 }
 0x2e0   : > { %8226 = vrcp.f32 %v10754_v46  ;;  %v10772_v10 = vpop.eup %8222  ;;  %vm1567_vm3 = vcmp.eq.f32.partialorder %v1566_v6, 8.507059e+37  ;;  %v1576_v6 = vadd.f32 %v10738_v7, %v1575_v59  ;;  %vm10845_vm2 = vmor %vm1592_vm14, %vm1593_vm10  ;;  %vm1668_vm8 = vweird.f32 %v10754_v46 }
 0x2e1   : > { %v1589_v13 = vsub.f32 1.0, %v1588_v15  ;;  %v1570_v51 = vsel %vm1567_vm3, %v1569_v58, %v1565_v11  ;;  %v1603_v25 = vmul.f32 %v10772_v10, %v10744_v12  ;;  %vm1654_vm3 = vweird.f32 %v10762_v1 }
 0x2e2   : > { %v10706_v18 = vpop.f32.mrf.mxu3  ;;  %vm10870_vm7 = vmor %vm1653_vm6, %vm1654_vm3  ;;  %vm1608_vm10 = vweird.f32 %v10772_v10 }
 0x2e3   : > { %v1518_v3 = vadd.f32 %v10706_v18, %v10100_v19  ;;  %v1584_v19 = vor.u32 1.1754944e-38, %v1583_v37  ;;  %v1590_v37 = vmul.f32 %v10749_v52, %v1589_v13  ;;  %v10799_v15 = vpop.permute.xlu0 %2690  ;;  %v1604_v13 = vsub.f32 1.0, %v1603_v25 }
 0x2e4   : > { %16118 = vst [vmem:[#allocation69_spill] sm:$0xff] %v10799_v15 }
 0x2e5   : > { %v8225_v43 = vpop.eup %8224  ;;  %v1591_v25 = vadd.f32 %v10749_v52, %v1590_v37  ;;  %v1605_v40 = vmul.f32 %v10772_v10, %v1604_v13 }
 0x2e6   : > { %v10785_v18 = vpop.eup %8226 }
 0x2e7   : > { %v1664_v62 = vmul.f32 %v10785_v18, %v10754_v46  ;;  %v1595_v5 = vsel %vm10845_vm2, %v10749_v52, %v1591_v25  ;;  %v1613_v52 = vand.u32 2147483648, %v10744_v12 }
 0x2ea   : > { %v10715_v35 = vpop.f32.mrf.mxu3 }
 0x2f2   : > { %v10725_v50 = vpop.f32.mrf.mxu3 }
 0x2fa   : > { %v10740_v41 = vpop.f32.mrf.mxu3 }
 0x302   : > { %v1529_v34 = vpop.f32.mrf.mxu3 }
 0x303   : > { %v1530_v0 = vadd.f32 %v1529_v34, %v10114_v9  ;;  %v1636_v9 = vmul.f32 %v10742_v55, %v1635_v17  ;;  %v1649_v34 = vmul.f32 %v10762_v1, %v10736_v26  ;;  %v10789_v17 = vadd.f32 1.0, %v8225_v43 }
 0x304   : > { %v1644_v43 = vand.u32 2147483648, %v10723_v30 }
 0x305   : > { %v7661_v29 = vmul.f32 -1.442695, %v1530_v0  ;;  %v1650_v28 = vsub.f32 1.0, %v1649_v34  ;;  %v1598_v0 = vand.u32 2147483648, %v10729_v60 }
 0x306   : > { %v1645_v61 = vor.u32 1.1754944e-38, %v1644_v43  ;;  %v1659_v43 = vand.u32 2147483648, %v10736_v26 }
 0x307   : > { %8228 = vpow2.f32 %v7661_v29  ;;  %v1637_v29 = vadd.f32 %v10742_v55, %v1636_v9  ;;  %v1651_v34 = vmul.f32 %v10762_v1, %v1650_v28  ;;  %v1599_v60 = vor.u32 1.1754944e-38, %v1598_v0 }
 0x308   : > { %8230 = vtanh.f32 %v1518_v3  ;;  %v1642_v3 = vand.u32 2147483647, %v10723_v30  ;;  %v1657_v0 = vand.u32 2147483647, %v10736_v26 }
 0x309   : > { %8232 = vrcp.f32 %v10789_v17  ;;  %v1641_v30 = vsel %vm10812_vm11, %v10742_v55, %v1637_v29  ;;  %v1580_v55 = vsel %vm10830_vm12, %v10738_v7, %v1576_v6  ;;  %v1652_v37 = vadd.f32 %v10762_v1, %v1651_v34 }
 0x30a   : > { %v1532_v32 = vpop.f32.mrf.mxu3  ;;  %vm1643_vm1 = vcmp.eq.f32.partialorder %v1642_v3, 8.507059e+37  ;;  %v1585_v6 = vsel %vm10794_vm9, %v1584_v19, %v1580_v55  ;;  %v10866_v3 = vpop.permute.xlu0 %2708  ;;  %v10878_v26 = vsel %vm10835_vm15, %v1599_v60, %v1595_v5  ;;  %vm1658_vm5 = vcmp.eq.f32.partialorder %v1657_v0, 8.507059e+37 }
 0x30b   : > { %v1533_v4 = vadd.f32 %v1532_v32, %v10645_v23  ;;  %v1521_v23 = vadd.f32 %v10715_v35, %v10126_v33  ;;  %v1665_v35 = vsub.f32 1.0, %v1664_v62  ;;  %v1646_v36 = vsel %vm1643_vm1, %v1645_v61, %v1641_v30 }
 0x30c   : > { %vm1669_vm9 = vweird.f32 %v10785_v18  ;;  %v1674_v30 = vand.u32 2147483648, %v10754_v46  ;;  %vm1607_vm12 = vweird.f32 %v10744_v12 }
 0x30d   : > { %v8229_v11 = vpop.eup %8228  ;;  %v7662_v59 = vmul.f32 -1.442695, %v1533_v4  ;;  %vm10901_vm11 = vmor %vm1668_vm8, %vm1669_vm9 }
 0x30e   : > { %v10824_v32 = vadd.f32 1.0, %v8229_v11  ;;  %v8231_v15 = vpop.eup %8230  ;;  %v1675_v5 = vor.u32 1.1754944e-38, %v1674_v30  ;;  %v1689_v30 = vand.u32 2147483648, %v10789_v17  ;;  %vm10943_vm9 = vmor %vm1607_vm12, %vm1608_vm10 }
 0x30f   : > { %8234 = vpow2.f32 %v7662_v59  ;;  %v1777_v29 = vmul.f32 %v8231_v15, %v1570_v51  ;;  %v10855_v7 = vpop.eup %8232  ;;  %v1666_v51 = vmul.f32 %v10785_v18, %v1665_v35  ;;  %v1773_v15 = vmul.f32 %v1646_v36, %v10433_v49 }
 0x310   : > { %8236 = vrcp.f32 %v10824_v32  ;;  %v10881_v49 = vadd.f32 %v10772_v10, %v1605_v40  ;;  %v1679_v13 = vmul.f32 %v10855_v7, %v10789_v17  ;;  %v1724_v28 = vand.u32 2147483648, %v10824_v32 }
 0x311   : > { %8238 = vtanh.f32 %v1521_v23  ;;  %v10885_v9 = vadd.f32 %v1777_v29, %v1773_v15  ;;  %v1656_v23 = vsel %vm10870_vm7, %v10762_v1, %v1652_v37  ;;  %v1667_v25 = vadd.f32 %v10785_v18, %v1666_v51 }
 0x312   : > { %v1535_v61 = vpop.f32.mrf.mxu3  ;;  %v1680_v35 = vsub.f32 1.0, %v1679_v13  ;;  %v1722_v37 = vand.u32 2147483647, %v10824_v32  ;;  %vm1718_vm15 = vweird.f32 %v10824_v32  ;;  %vm1684_vm6 = vweird.f32 %v10855_v7 }
 0x313   : > { %v1536_v4 = vadd.f32 %v1535_v61, %v10076_v45  ;;  %v1524_v45 = vadd.f32 %v10725_v50, %v10656_v2  ;;  %v1660_v50 = vor.u32 1.1754944e-38, %v1659_v43  ;;  %v1671_v43 = vsel %vm10901_vm11, %v10785_v18, %v1667_v25 }
 0x314   : > { %v1725_v18 = vor.u32 1.1754944e-38, %v1724_v28  ;;  %vm1723_vm2 = vcmp.eq.f32.partialorder %v1722_v37, 8.507059e+37  ;;  %v1610_v28 = vsel %vm10943_vm9, %v10772_v10, %v10881_v49 }
 0x315   : > { %v8235_v62 = vpop.eup %8234  ;;  %v7663_v19 = vmul.f32 -1.442695, %v1536_v4  ;;  %v1661_v33 = vsel %vm1658_vm5, %v1660_v50, %v1656_v23  ;;  %v1527_v4 = vadd.f32 %v10740_v41, %v10088_v20  ;;  %vm1683_vm5 = vweird.f32 %v10789_v17 }
 0x316   : > { %v8237_v11 = vpop.eup %8236  ;;  %v10890_v59 = vadd.f32 1.0, %v8235_v62  ;;  %v1774_v61 = vmul.f32 %v1661_v33, %v10469_v48  ;;  %v1681_v62 = vmul.f32 %v10855_v7, %v1680_v35  ;;  %v1611_v35 = vand.u32 2147483647, %v10744_v12  ;;  %vm10958_vm10 = vmor %vm1683_vm5, %vm1684_vm6 }
 0x317   : > { %v8239_v2 = vpop.eup %8238  ;;  %8240 = vpow2.f32 %v7663_v19  ;;  %v1714_v34 = vmul.f32 %v8237_v11, %v10824_v32  ;;  %vm1719_vm14 = vweird.f32 %v8237_v11 }
 0x318   : > { %8242 = vrcp.f32 %v10890_v59  ;;  %v1778_v55 = vmul.f32 %v8239_v2, %v1585_v6  ;;  %v1672_v6 = vand.u32 2147483647, %v10754_v46  ;;  %vm1720_vm1 = vmor %vm1718_vm15, %vm1719_vm14  ;;  %v10922_v46 = vpop.permute.xlu0 %2702  ;;  %v1737_v33 = vand.u32 2147483647, %v10890_v59 }
 0x319   : > { %8244 = vtanh.f32 %v1524_v45  ;;  %v1715_v1 = vsub.f32 1.0, %v1714_v34  ;;  %v1739_v34 = vand.u32 2147483648, %v10890_v59  ;;  %vm1733_vm8 = vweird.f32 %v10890_v59 }
 0x31a   : > { %v1538_v36 = vpop.f32.mrf.mxu3  ;;  %8246 = vtanh.f32 %v10885_v9  ;;  %v10917_v58 = vadd.f32 %v1778_v55, %v1774_v61  ;;  %vm1673_vm3 = vcmp.eq.f32.partialorder %v1672_v6, 8.507059e+37  ;;  %v1687_v55 = vand.u32 2147483647, %v10789_v17 }
 0x31b   : > { %v1539_v40 = vadd.f32 %v1538_v36, %v10102_v21  ;;  %v1716_v29 = vmul.f32 %v8237_v11, %v1715_v1  ;;  %v1676_v13 = vsel %vm1673_vm3, %v1675_v5, %v1671_v43  ;;  %v1740_v5 = vor.u32 1.1754944e-38, %v1739_v34 }
 0x31c   : > { %v1775_v1 = vmul.f32 %v1676_v13, %v10516_v24  ;;  %v1614_v24 = vor.u32 1.1754944e-38, %v1613_v52  ;;  %v1690_v52 = vor.u32 1.1754944e-38, %v1689_v30  ;;  %vm1738_vm12 = vcmp.eq.f32.partialorder %v1737_v33, 8.507059e+37 }
 0x31d   : > { %v8241_v0 = vpop.eup %8240  ;;  %v7664_v51 = vmul.f32 -1.442695, %v1539_v40  ;;  %v1717_v15 = vadd.f32 %v8237_v11, %v1716_v29  ;;  %vm1612_vm14 = vcmp.eq.f32.partialorder %v1611_v35, 8.507059e+37  ;;  %vm1688_vm15 = vcmp.eq.f32.partialorder %v1687_v55, 8.507059e+37 }
 0x31e   : > { %v8243_v21 = vpop.eup %8242  ;;  %v10919_v48 = vadd.f32 1.0, %v8241_v0  ;;  %v1615_v0 = vsel %vm1612_vm14, %v1614_v24, %v1610_v28 }
 0x31f   : > { %v8245_v45 = vpop.eup %8244  ;;  %8248 = vpow2.f32 %v7664_v51  ;;  %v1721_v19 = vsel %vm1720_vm1, %v8237_v11, %v1717_v15  ;;  %v1729_v20 = vmul.f32 %v8243_v21, %v10890_v59  ;;  %v1682_v11 = vadd.f32 %v10855_v7, %v1681_v62 }
 0x320   : > { %v8247_v41 = vpop.eup %8246  ;;  %8250 = vrcp.f32 %v10919_v48  ;;  %v1726_v32 = vsel %vm1723_vm2, %v1725_v18, %v1721_v19  ;;  %v1779_v50 = vmul.f32 %v8245_v45, %v10878_v26  ;;  %vm1734_vm7 = vweird.f32 %v8243_v21  ;;  %v10969_v6 = vpop.permute.xlu0 %3106 }
 0x321   : > { %8252 = vtanh.f32 %v1527_v4  ;;  %v10927_v23 = vmul.f32 %v8247_v41, %v1726_v32  ;;  %v1730_v2 = vsub.f32 1.0, %v1729_v20  ;;  %vm1735_vm11 = vmor %vm1733_vm8, %vm1734_vm7  ;;  %v1686_v10 = vsel %vm10958_vm10, %v10855_v7, %v1682_v11 }
 0x322   : > { %8254 = vtanh.f32 %v10917_v58  ;;  %v10962_v17 = vadd.f32 %v1779_v50, %v1775_v1  ;;  %v1691_v15 = vsel %vm1688_vm15, %v1690_v52, %v1686_v10  ;;  %v1754_v7 = vand.u32 2147483648, %v10919_v48 }
 0x323   : > { %1797 = vrot.lane.b32.xlu0 %v10927_v23, %s9207_s25  ;;  %v1731_v25 = vmul.f32 %v8243_v21, %v1730_v2  ;;  %v1752_v18 = vand.u32 2147483647, %v10919_v48  ;;  %v1776_v45 = vmul.f32 %v1691_v15, %v10529_v22  ;;  %vm1748_vm2 = vweird.f32 %v10919_v48 }
 0x324   : > { %v1755_v41 = vor.u32 1.1754944e-38, %v1754_v7  ;;  %vm1809_vm10 = vcmask 392448  }
 0x325   : > { %v8249_v36 = vpop.eup %8248  ;;  %v1732_v60 = vadd.f32 %v8243_v21, %v1731_v25  ;;  %vm1753_vm6 = vcmp.eq.f32.partialorder %v1752_v18, 8.507059e+37 }
 0x326   : > { %v8251_v29 = vpop.eup %8250  ;;  %v1712_v37 = vadd.f32 1.0, %v8249_v36 }
 0x327   : > { %v8253_v12 = vpop.eup %8252  ;;  %v1736_v49 = vsel %vm1735_vm11, %v8243_v21, %v1732_v60  ;;  %v1744_v59 = vmul.f32 %v8251_v29, %v10919_v48  ;;  %vm1749_vm1 = vweird.f32 %v8251_v29 }
 0x328   : > { %v8255_v61 = vpop.eup %8254  ;;  %8256 = vrcp.f32 %v1712_v37  ;;  %v1741_v43 = vsel %vm1738_vm12, %v1740_v5, %v1736_v49  ;;  %v1780_v62 = vmul.f32 %v8253_v12, %v1615_v0  ;;  %vm1750_vm3 = vmor %vm1748_vm2, %vm1749_vm1  ;;  %v1769_v25 = vand.u32 2147483648, %v1712_v37  ;;  %v10980_v33 = vpop.permute.xlu0 %3112 }
 0x329   : > { %v1790_v4 = vmul.f32 %v8255_v61, %v1741_v43  ;;  %v1745_v51 = vsub.f32 1.0, %v1744_v59  ;;  %8258 = vtanh.f32 %v10962_v17  ;;  %v1767_v48 = vand.u32 2147483647, %v1712_v37  ;;  %v16143_v43 = vld [vmem:[#allocation7_spill] sm:$0xff] }
 0x32a   : > { %v10977_v32 = vadd.f32 %v1780_v62, %v1776_v45  ;;  %vm1763_vm5 = vweird.f32 %v1712_v37  ;;  %v1770_v26 = vor.u32 1.1754944e-38, %v1769_v25  ;;  %v16145_v62 = vld [vmem:[#allocation9_spill] sm:$0xff] }
 0x32b   : > { %1799 = vrot.lane.b32.xlu2 %v1790_v4, %s9207_s25  ;;  %v1746_v21 = vmul.f32 %v8251_v29, %v1745_v51  ;;  %vm1768_vm8 = vcmp.eq.f32.partialorder %v1767_v48, 8.507059e+37 }
 0x32c   : > { %8260 = vtanh.f32 %v10977_v32 }
 0x32d   : > { %v1747_v19 = vadd.f32 %v8251_v29, %v1746_v21 }
 0x32e   : > { %v8257_v20 = vpop.eup %8256 }
 0x32f   : > { %v1751_v13 = vsel %vm1750_vm3, %v8251_v29, %v1747_v19  ;;  %v1759_v2 = vmul.f32 %v8257_v20, %v1712_v37  ;;  %v8259_v50 = vpop.eup %8258  ;;  %vm1764_vm7 = vweird.f32 %v8257_v20 }
 0x330   : > { %v1756_v34 = vsel %vm1753_vm6, %v1755_v41, %v1751_v13  ;;  %vm1765_vm9 = vmor %vm1763_vm5, %vm1764_vm7  ;;  %v10984_v24 = vpop.permute.xlu0 %3100 }
 0x331   : > { %v1791_v11 = vmul.f32 %v8259_v50, %v1756_v34  ;;  %v1760_v30 = vsub.f32 1.0, %v1759_v2 }
 0x332   : > { %v8261_v55 = vpop.eup %8260 }
 0x333   : > { %1801 = vrot.lane.b32.xlu0 %v1791_v11, %s9207_s25  ;;  %v1761_v22 = vmul.f32 %v8257_v20, %v1760_v30  ;;  %v16148_v30 = vld [vmem:[#allocation58_spill] sm:$0xff] }
 0x335   : > { %v1762_v1 = vadd.f32 %v8257_v20, %v1761_v22 }
 0x337   : > { %v1766_v35 = vsel %vm1765_vm9, %v8257_v20, %v1762_v1  ;;  %v16147_v20 = vld [vmem:[#allocation57_spill] sm:$0xff] }
 0x338   : > { %v1771_v36 = vsel %vm1768_vm8, %v1770_v26, %v1766_v35  ;;  %v10989_v60 = vpop.permute.xlu0 %3128 }
 0x339   : > { %v1792_v28 = vmul.f32 %v8261_v55, %v1771_v36  ;;  %16135 = vst [vmem:[#allocation70_spill] sm:$0xff] %v10989_v60 }
 0x33b   : > { %1906 = vmatpush.msrb.mxu0 %v1792_v28  ;;  %1803 = vrot.lane.b32.xlu0 %v1792_v28, %s9207_s25 }
 0x33d   : > { %1907 = vmatpush.msrb.mxu0 %v1791_v11 }
 0x33f   : > { %1908 = vmatpush.msrb.mxu0 %v1790_v4  ;;  %v16144_v4 = vld [vmem:[#allocation11_spill] sm:$0xff] }
 0x340   : > { %v10993_v40 = vpop.permute.xlu0 %3122 }
 0x341   : > { %1909 = vmatpush.msrb.mxu0 %v10927_v23  ;;  %16136 = vst [vmem:[#allocation71_spill] sm:$0xff] %v10993_v40 }
 0x342   : > { %7665 = vmatmul.msk.f32.vlgmr.msrb.gmra.mxu0 %vm607_vm0, %v10546_v14 }
 0x348   : > { %v10999_v29 = vpop.permute.xlu0 %3116 }
 0x349   : > { %16137 = vst [vmem:[#allocation72_spill] sm:$0xff] %v10999_v29 }
 0x34a   : > { %7666 = vmatmul.msk.f32.gmra.mxu0 %vm607_vm0, %v10557_v39 }
 0x350   : > { %v11003_v23 = vpop.permute.xlu0 %3522 }
 0x351   : > { %16138 = vst [vmem:[#allocation73_spill] sm:$0xff] %v11003_v23 }
 0x352   : > { %7667 = vmatmul.msk.f32.gmra.mxu0 %vm607_vm0, %v10568_v16 }
 0x358   : > { %v11007_v14 = vpop.permute.xlu0 %3528 }
 0x359   : > { %16139 = vst [vmem:[#allocation74_spill] sm:$0xff] %v11007_v14 }
 0x35a   : > { %7668 = vmatmul.msk.f32.gmra.mxu0 %vm607_vm0, %v10579_v38 }
 0x360   : > { %v11011_v39 = vpop.permute.xlu0 %3548 }
 0x361   : > { %16140 = vst [vmem:[#allocation75_spill] sm:$0xff] %v11011_v39 }
 0x362   : > { %7669 = vmatmul.msk.f32.gmra.mxu0 %vm607_vm0, %v10590_v27  ;;  %v11023_v27 = vld [vmem:[%s15956_s2 + $0x48] sm:$0xff] }
 0x368   : > { %v11017_v16 = vpop.permute.xlu0 %3542 }
 0x369   : > { %16141 = vst [vmem:[#allocation76_spill] sm:$0xff] %v11017_v16 }
 0x36a   : > { %7670 = vmatmul.msk.f32.gmra.mxu0 %vm607_vm0, %v10597_v63 }
 0x370   : > { %v11027_v63 = vpop.permute.xlu0 %3536 }
 0x371   : > { %16142 = vst [vmem:[#allocation77_spill] sm:$0xff] %v11027_v63 }
 0x372   : > { %7671 = vmatmul.msk.f32.gmra.mxu0 %vm607_vm0, %v10608_v53  ;;  %v11032_v53 = vld [vmem:[%s15956_s2 + $0x50] sm:$0xff] }
 0x37a   : > { %7672 = vmatmul.msk.f32.gmra.mxu0 %vm607_vm0, %v10621_v31 }
 0x382   : > { %7673 = vmatmul.msk.f32.gmra.mxu0 %vm607_vm0, %v10631_v42 }
 0x385   : > { %v1800_v38 = vpop.permute.xlu2 %1799 }
 0x386   : > { %1811 = vst.msk [vmem:[#allocation3 + $0x8] sm:$0xff] %vm1809_vm10, %v1800_v38 }
 0x38a   : > { %7674 = vmatmul.msk.f32.gmra.mxu0 %vm607_vm0, %v11023_v27 }
 0x392   : > { %7675 = vmatmul.msk.f32.gmra.mxu0 %vm607_vm0, %v11032_v53 }
 0x395   : > { %v1798_v31 = vpop.permute.xlu0 %1797 }
 0x396   : > { %1810 = vst.msk [vmem:[#allocation3] sm:$0xff] %vm1809_vm10, %v1798_v31 }
 0x39a   : > { %7676 = vmatmul.msk.f32.gmra.mxu0 %vm607_vm0, %v10650_v57 }
 0x3a2   : > { %7677 = vmatmul.msk.f32.gmra.mxu0 %vm607_vm0, %v10661_v47 }
 0x3a5   : > { %v1802_v42 = vpop.permute.xlu0 %1801 }
 0x3a6   : > { %1812 = vst.msk [vmem:[#allocation3 + $0x10] sm:$0xff] %vm1809_vm10, %v1802_v42  ;;  %v16149_v42 = vld [vmem:[#allocation5_spill] sm:$0xff] }
 0x3aa   : > { %7678 = vmatmul.msk.f32.gmra.mxu0 %vm607_vm0, %v10669_v8 }
 0x3ad   : > { %v1804_v37 = vpop.permute.xlu0 %1803 }
 0x3ae   : > { %1813 = vst.msk [vmem:[#allocation3 + $0x18] sm:$0xff] %vm1809_vm10, %v1804_v37 }
 0x3b2   : > { %7679 = vmatmul.msk.f32.gmra.mxu0 %vm607_vm0, %v10678_v44 }
 0x3ba   : > { %7680 = vmatmul.msk.f32.gmra.mxu0 %vm607_vm0, %v10687_v54 }
 0x3bf   : > { %v1911_v5 = vpop.f32.mrf.mxu0 }
 0x3c0   : > { %v1912_v59 = vadd.f32 %v1911_v5, %v10691_v56  ;;  %v16146_v56 = vld [vmem:[#allocation10_spill] sm:$0xff] }
 0x3c2   : > { %v7681_v61 = vmul.f32 -1.442695, %v1912_v59 }
 0x3c4   : > { %8262 = vpow2.f32 %v7681_v61 }
 0x3c7   : > { %v1914_v57 = vpop.f32.mrf.mxu0 }
 0x3c8   : > { %v1915_v0 = vadd.f32 %v1914_v57, %v16143_v43 }
 0x3ca   : > { %v7682_v15 = vmul.f32 -1.442695, %v1915_v0  ;;  %v8263_v54 = vpop.eup %8262 }
 0x3cb   : > { %v11055_v18 = vadd.f32 1.0, %v8263_v54 }
 0x3cc   : > { %8264 = vpow2.f32 %v7682_v15 }
 0x3cd   : > { %v1986_v15 = vand.u32 2147483648, %v11055_v18  ;;  %vm1980_vm12 = vweird.f32 %v11055_v18 }
 0x3cf   : > { %v1917_v10 = vpop.f32.mrf.mxu0 }
 0x3d0   : > { %v1918_v7 = vadd.f32 %v1917_v10, %v16145_v62 }
 0x3d2   : > { %v7683_v45 = vmul.f32 -1.442695, %v1918_v7  ;;  %v8265_v50 = vpop.eup %8264 }
 0x3d3   : > { %v11063_v22 = vadd.f32 1.0, %v8265_v50 }
 0x3d5   : > { %vm1995_vm1 = vweird.f32 %v11063_v22 }
 0x3d7   : > { %v1920_v12 = vpop.f32.mrf.mxu0 }
 0x3d8   : > { %v1921_v41 = vadd.f32 %v1920_v12, %v16147_v20 }
 0x3da   : > { %v7684_v11 = vmul.f32 -1.442695, %v1921_v41 }
 0x3df   : > { %v1923_v47 = vpop.f32.mrf.mxu0 }
 0x3e0   : > { %v1924_v51 = vadd.f32 %v1923_v47, %v16144_v4 }
 0x3e2   : > { %v7685_v21 = vmul.f32 -1.442695, %v1924_v51 }
 0x3e4   : > { %8266 = vpow2.f32 %v7685_v21 }
 0x3e5   : > { %8268 = vrcp.f32 %v11055_v18 }
 0x3e6   : > { %8270 = vpow2.f32 %v7683_v45 }
 0x3e7   : > { %v1926_v52 = vpop.f32.mrf.mxu0 }
 0x3e8   : > { %v1927_v19 = vadd.f32 %v1926_v52, %v16146_v56  ;;  %v1984_v56 = vand.u32 2147483647, %v11055_v18 }
 0x3ea   : > { %v7686_v2 = vmul.f32 -1.442695, %v1927_v19  ;;  %v8267_v34 = vpop.eup %8266  ;;  %v16150_v19 = vld [vmem:[#allocation6_spill] sm:$0xff]  ;;  %vm1985_vm15 = vcmp.eq.f32.partialorder %v1984_v56, 8.507059e+37 }
 0x3eb   : > { %v8269_v48 = vpop.eup %8268  ;;  %v11065_v1 = vadd.f32 1.0, %v8267_v34  ;;  %v16153_v34 = vld [vmem:[#allocation61_spill] sm:$0xff] }
 0x3ec   : > { %8272 = vpow2.f32 %v7686_v2  ;;  %v8271_v26 = vpop.eup %8270  ;;  %v1976_v36 = vmul.f32 %v8269_v48, %v11055_v18  ;;  %vm1981_vm11 = vweird.f32 %v8269_v48  ;;  %v2001_v2 = vand.u32 2147483648, %v11063_v22 }
 0x3ed   : > { %8274 = vpow2.f32 %v7684_v11  ;;  %v11071_v28 = vadd.f32 1.0, %v8271_v26  ;;  %vm11105_vm14 = vmor %vm1980_vm12, %vm1981_vm11  ;;  %vm2056_vm7 = vweird.f32 %v11065_v1 }
 0x3ee   : > { %8276 = vrcp.f32 %v11063_v22  ;;  %v1977_v5 = vsub.f32 1.0, %v1976_v36 }
 0x3ef   : > { %v1929_v49 = vpop.f32.mrf.mxu0  ;;  %8278 = vrcp.f32 %v11065_v1  ;;  %vm2010_vm11 = vweird.f32 %v11071_v28 }
 0x3f0   : > { %v1930_v25 = vadd.f32 %v1929_v49, %v16148_v30  ;;  %v1978_v61 = vmul.f32 %v8269_v48, %v1977_v5 }
 0x3f2   : > { %v7687_v35 = vmul.f32 -1.442695, %v1930_v25  ;;  %v8273_v38 = vpop.eup %8272  ;;  %v1979_v51 = vadd.f32 %v8269_v48, %v1978_v61  ;;  %v1987_v25 = vor.u32 1.1754944e-38, %v1986_v15 }
 0x3f3   : > { %v8275_v31 = vpop.eup %8274  ;;  %v11076_v57 = vadd.f32 1.0, %v8273_v38 }
 0x3f4   : > { %8280 = vpow2.f32 %v7687_v35  ;;  %v11078_v10 = vpop.eup %8276  ;;  %v11084_v52 = vadd.f32 1.0, %v8275_v31  ;;  %v1983_v30 = vsel %vm11105_vm14, %v8269_v48, %v1979_v51  ;;  %v1999_v31 = vand.u32 2147483647, %v11063_v22 }
 0x3f5   : > { %8282 = vrcp.f32 %v11071_v28  ;;  %v11082_v47 = vpop.eup %8278  ;;  %v1991_v0 = vmul.f32 %v11078_v10, %v11063_v22  ;;  %vm1996_vm2 = vweird.f32 %v11078_v10 }
 0x3f6   : > { %8284 = vrcp.f32 %v11076_v57  ;;  %vm2057_vm3 = vweird.f32 %v11082_v47  ;;  %vm11132_vm6 = vcmp.eq.f32.partialorder %v1999_v31, 8.507059e+37  ;;  %vm11166_vm8 = vmor %vm1995_vm1, %vm1996_vm2  ;;  %vm2071_vm2 = vweird.f32 %v11076_v57 }
 0x3f7   : > { %v1932_v8 = vpop.f32.mrf.mxu0  ;;  %8286 = vrcp.f32 %v11084_v52  ;;  %v1992_v45 = vsub.f32 1.0, %v1991_v0  ;;  %vm11148_vm9 = vmor %vm2056_vm7, %vm2057_vm3 }
 0x3f8   : > { %v1933_v37 = vadd.f32 %v1932_v8, %v16149_v42  ;;  %v2052_v8 = vmul.f32 %v11082_v47, %v11065_v1 }
 0x3f9   : > { %v1993_v42 = vmul.f32 %v11078_v10, %v1992_v45  ;;  %v16156_v45 = vld [vmem:[#allocation13_spill] sm:$0xff] }
 0x3fa   : > { %v8281_v49 = vpop.eup %8280  ;;  %v7688_v59 = vmul.f32 -1.442695, %v1933_v37  ;;  %v2053_v62 = vsub.f32 1.0, %v2052_v8  ;;  %v1988_v37 = vsel %vm1985_vm15, %v1987_v25, %v1983_v30 }
 0x3fb   : > { %v11089_v43 = vpop.eup %8282  ;;  %v11094_v4 = vadd.f32 1.0, %v8281_v49 }
 0x3fc   : > { %8288 = vpow2.f32 %v7688_v59  ;;  %v2006_v54 = vmul.f32 %v11089_v43, %v11071_v28  ;;  %v11100_v21 = vpop.eup %8284  ;;  %v2054_v36 = vmul.f32 %v11082_v47, %v2053_v62  ;;  %v2014_v59 = vand.u32 2147483647, %v11071_v28 }
 0x3fd   : > { %8290 = vrcp.f32 %v11094_v4  ;;  %v11110_v50 = vpop.eup %8286  ;;  %v2067_v38 = vmul.f32 %v11100_v21, %v11076_v57  ;;  %v1994_v62 = vadd.f32 %v11078_v10, %v1993_v42  ;;  %vm2011_vm5 = vweird.f32 %v11089_v43 }
 0x3fe   : > { %v2007_v18 = vsub.f32 1.0, %v2006_v54  ;;  %v2021_v5 = vmul.f32 %v11110_v50, %v11084_v52  ;;  %v2055_v8 = vadd.f32 %v11082_v47, %v2054_v36  ;;  %v2062_v54 = vand.u32 2147483648, %v11065_v1  ;;  %vm11181_vm15 = vmor %vm2010_vm11, %vm2011_vm5 }
 0x3ff   : > { %v11052_v44 = vpop.f32.mrf.mxu0  ;;  %v2068_v61 = vsub.f32 1.0, %v2067_v38  ;;  %vm11171_vm12 = vcmp.eq.f32.partialorder %v2014_v59, 8.507059e+37  ;;  %v1998_v42 = vsel %vm11166_vm8, %v11078_v10, %v1994_v62  ;;  %vm2072_vm1 = vweird.f32 %v11100_v21 }
 0x400   : > { %v1936_v11 = vadd.f32 %v11052_v44, %v16153_v34  ;;  %v2002_v44 = vor.u32 1.1754944e-38, %v2001_v2  ;;  %v2008_v51 = vmul.f32 %v11089_v43, %v2007_v18  ;;  %v2022_v2 = vsub.f32 1.0, %v2021_v5  ;;  %vm11204_vm3 = vmor %vm2071_vm2, %vm2072_vm1 }
 0x401   : > { %v2063_v38 = vor.u32 1.1754944e-38, %v2062_v54  ;;  %v2077_v54 = vand.u32 2147483648, %v11076_v57  ;;  %vm2086_vm5 = vweird.f32 %v11094_v4  ;;  %vm2025_vm11 = vweird.f32 %v11084_v52 }
 0x402   : > { %v8289_v35 = vpop.eup %8288  ;;  %v2023_v59 = vmul.f32 %v11110_v50, %v2022_v2  ;;  %v2003_v62 = vsel %vm11132_vm6, %v2002_v44, %v1998_v42  ;;  %v16169_v44 = vld [vmem:[#allocation15_spill] sm:$0xff] }
 0x403   : > { %v11123_v48 = vpop.eup %8290  ;;  %v11127_v49 = vadd.f32 1.0, %v8289_v35  ;;  %v2009_v35 = vadd.f32 %v11089_v43, %v2008_v51 }
 0x404   : > { %vm2087_vm7 = vweird.f32 %v11123_v48 }
 0x405   : > { %v2013_v10 = vsel %vm11181_vm15, %v11089_v43, %v2009_v35  ;;  %v2031_v43 = vand.u32 2147483648, %v11084_v52  ;;  %vm11233_vm8 = vmor %vm2086_vm5, %vm2087_vm7  ;;  %vm2101_vm7 = vweird.f32 %v11127_v49 }
 0x407   : > { %v11059_v13 = vpop.f32.mrf.mxu0  ;;  %v2032_v5 = vor.u32 1.1754944e-38, %v2031_v43 }
 0x40f   : > { %v11067_v55 = vpop.f32.mrf.mxu0 }
 0x410   : > { %v1942_v0 = vadd.f32 %v11067_v55, %v16169_v44 }
 0x417   : > { %v11080_v12 = vpop.f32.mrf.mxu0 }
 0x41f   : > { %v1947_v7 = vpop.f32.mrf.mxu0 }
 0x420   : > { %v1948_v20 = vadd.f32 %v1947_v7, %v16150_v19  ;;  %v2016_v7 = vand.u32 2147483648, %v11071_v28  ;;  %v2082_v19 = vmul.f32 %v11123_v48, %v11094_v4 }
 0x422   : > { %v7689_v26 = vmul.f32 -1.442695, %v1948_v20  ;;  %v2060_v20 = vand.u32 2147483647, %v11065_v1  ;;  %v2059_v1 = vsel %vm11148_vm9, %v11082_v47, %v2055_v8  ;;  %v2083_v47 = vsub.f32 1.0, %v2082_v19 }
 0x423   : > { %v2017_v28 = vor.u32 1.1754944e-38, %v2016_v7  ;;  %v2075_v7 = vand.u32 2147483647, %v11076_v57  ;;  %v11213_v57 = vadd.f32 %v11110_v50, %v2023_v59  ;;  %vm2026_vm9 = vweird.f32 %v11110_v50 }
 0x424   : > { %8292 = vpow2.f32 %v7689_v26  ;;  %v2069_v26 = vmul.f32 %v11100_v21, %v2068_v61  ;;  %vm2061_vm14 = vcmp.eq.f32.partialorder %v2060_v20, 8.507059e+37  ;;  %vm11272_vm5 = vmor %vm2025_vm11, %vm2026_vm9 }
 0x425   : > { %8294 = vtanh.f32 %v1936_v11  ;;  %v16159_v11 = vld [vmem:[#allocation8_spill] sm:$0xff]  ;;  %v2064_v22 = vsel %vm2061_vm14, %v2063_v38, %v2059_v1  ;;  %v2018_v2 = vsel %vm11171_vm12, %v2017_v28, %v2013_v10  ;;  %v2078_v1 = vor.u32 1.1754944e-38, %v2077_v54 }
 0x426   : > { %8296 = vrcp.f32 %v11127_v49  ;;  %v1939_v30 = vadd.f32 %v11059_v13, %v16159_v11  ;;  %v2070_v8 = vadd.f32 %v11100_v21, %v2069_v26  ;;  %v2191_v19 = vmul.f32 %v2064_v22, %v10885_v9  ;;  %v16172_v28 = vld [vmem:[#allocation4_spill] sm:$0xff] }
 0x427   : > { %v1950_v15 = vpop.f32.mrf.mxu0  ;;  %vm2076_vm6 = vcmp.eq.f32.partialorder %v2075_v7, 8.507059e+37 }
 0x428   : > { %v1951_v56 = vadd.f32 %v1950_v15, %v16156_v45  ;;  %v16166_v45 = vld [vmem:[#allocation59_spill] sm:$0xff] }
 0x42a   : > { %v8293_v41 = vpop.eup %8292  ;;  %v7690_v25 = vmul.f32 -1.442695, %v1951_v56 }
 0x42b   : > { %v11160_v18 = vadd.f32 1.0, %v8293_v41  ;;  %v8295_v36 = vpop.eup %8294 }
 0x42c   : > { %8298 = vpow2.f32 %v7690_v25  ;;  %v2195_v61 = vmul.f32 %v8295_v36, %v1988_v37  ;;  %v11191_v15 = vpop.eup %8296  ;;  %v2084_v37 = vmul.f32 %v11123_v48, %v2083_v47  ;;  %v2074_v25 = vsel %vm11204_vm3, %v11100_v21, %v2070_v8 }
 0x42d   : > { %8300 = vrcp.f32 %v11160_v18  ;;  %v2097_v11 = vmul.f32 %v11191_v15, %v11127_v49  ;;  %v2092_v36 = vand.u32 2147483648, %v11094_v4  ;;  %v2079_v31 = vsel %vm2076_vm6, %v2078_v1, %v2074_v25 }
 0x42e   : > { %8302 = vtanh.f32 %v1939_v30  ;;  %v11217_v30 = vadd.f32 %v2195_v61, %v2191_v19  ;;  %v2085_v38 = vadd.f32 %v11123_v48, %v2084_v37  ;;  %v2142_v22 = vand.u32 2147483648, %v11160_v18 }
 0x42f   : > { %v1953_v51 = vpop.f32.mrf.mxu0  ;;  %v2098_v13 = vsub.f32 1.0, %v2097_v11  ;;  %v2140_v8 = vand.u32 2147483647, %v11160_v18  ;;  %v2093_v10 = vor.u32 1.1754944e-38, %v2092_v36  ;;  %vm2136_vm14 = vweird.f32 %v11160_v18 }
 0x430   : > { %v1954_v56 = vadd.f32 %v1953_v51, %v16166_v45  ;;  %v2192_v51 = vmul.f32 %v2079_v31, %v10917_v58  ;;  %v2089_v54 = vsel %vm11233_vm8, %v11123_v48, %v2085_v38  ;;  %v16173_v45 = vld [vmem:[#allocation60_spill] sm:$0xff]  ;;  %v2143_v48 = vor.u32 1.1754944e-38, %v2142_v22 }
 0x431   : > { %v2099_v41 = vmul.f32 %v11191_v15, %v2098_v13  ;;  %vm2141_vm1 = vcmp.eq.f32.partialorder %v2140_v8, 8.507059e+37  ;;  %vm2102_vm2 = vweird.f32 %v11191_v15  ;;  %v2107_v36 = vand.u32 2147483648, %v11127_v49  ;;  %v11341_v22 = vld [vmem:[%s15956_s2 + $0x20] sm:$0xff] }
 0x432   : > { %v8299_v20 = vpop.eup %8298  ;;  %v7691_v34 = vmul.f32 -1.442695, %v1954_v56  ;;  %v1945_v56 = vadd.f32 %v11080_v12, %v16173_v45  ;;  %v2029_v13 = vand.u32 2147483647, %v11084_v52  ;;  %vm11280_vm8 = vmor %vm2101_vm7, %vm2102_vm2 }
 0x433   : > { %v8301_v9 = vpop.eup %8300  ;;  %v11222_v26 = vadd.f32 1.0, %v8299_v20 }
 0x434   : > { %v8303_v55 = vpop.eup %8302  ;;  %8304 = vpow2.f32 %v7691_v34  ;;  %v2132_v35 = vmul.f32 %v8301_v9, %v11160_v18  ;;  %vm2137_vm12 = vweird.f32 %v8301_v9 }
 0x435   : > { %8306 = vrcp.f32 %v11222_v26  ;;  %v2196_v47 = vmul.f32 %v8303_v55, %v2003_v62  ;;  %v2090_v62 = vand.u32 2147483647, %v11094_v4  ;;  %vm2138_vm15 = vmor %vm2136_vm14, %vm2137_vm12  ;;  %v2155_v31 = vand.u32 2147483647, %v11222_v26 }
 0x436   : > { %8308 = vtanh.f32 %v1942_v0  ;;  %v2133_v21 = vsub.f32 1.0, %v2132_v35  ;;  %v2100_v35 = vadd.f32 %v11191_v15, %v2099_v41  ;;  %vm2151_vm9 = vweird.f32 %v11222_v26 }
 0x437   : > { %v1956_v42 = vpop.f32.mrf.mxu0  ;;  %8310 = vtanh.f32 %v11217_v30  ;;  %v11249_v44 = vadd.f32 %v2196_v47, %v2192_v51  ;;  %vm2091_vm3 = vcmp.eq.f32.partialorder %v2090_v62, 8.507059e+37  ;;  %v2105_v47 = vand.u32 2147483647, %v11127_v49 }
 0x438   : > { %v1957_v59 = vadd.f32 %v1956_v42, %v16172_v28  ;;  %v2134_v61 = vmul.f32 %v8301_v9, %v2133_v21  ;;  %v2094_v11 = vsel %vm2091_vm3, %v2093_v10, %v2089_v54  ;;  %v2108_v54 = vor.u32 1.1754944e-38, %v2107_v36 }
 0x439   : > { %v2193_v21 = vmul.f32 %v2094_v11, %v10962_v17  ;;  %v2028_v17 = vsel %vm11272_vm5, %v11110_v50, %v11213_v57  ;;  %vm2156_vm12 = vcmp.eq.f32.partialorder %v2155_v31, 8.507059e+37  ;;  %vm2030_vm14 = vcmp.eq.f32.partialorder %v2029_v13, 8.507059e+37  ;;  %v11313_v13 = vld [vmem:[%s15956_s2] sm:$0xff] }
 0x43a   : > { %v8305_v7 = vpop.eup %8304  ;;  %v7692_v37 = vmul.f32 -1.442695, %v1957_v59  ;;  %v2135_v19 = vadd.f32 %v8301_v9, %v2134_v61  ;;  %v2104_v61 = vsel %vm11280_vm8, %v11191_v15, %v2100_v35 }
 0x43b   : > { %v8307_v20 = vpop.eup %8306  ;;  %v11251_v58 = vadd.f32 1.0, %v8305_v7 }
 0x43c   : > { %v8309_v0 = vpop.eup %8308  ;;  %8312 = vpow2.f32 %v7692_v37  ;;  %v2139_v4 = vsel %vm2138_vm15, %v8301_v9, %v2135_v19  ;;  %v2147_v12 = vmul.f32 %v8307_v20, %v11222_v26  ;;  %v2157_v9 = vand.u32 2147483648, %v11222_v26 }
 0x43d   : > { %v8311_v34 = vpop.eup %8310  ;;  %8314 = vrcp.f32 %v11251_v58  ;;  %v2144_v18 = vsel %vm2141_vm1, %v2143_v48, %v2139_v4  ;;  %v2197_v1 = vmul.f32 %v8309_v0, %v2018_v2  ;;  %vm2152_vm6 = vweird.f32 %v8307_v20 }
 0x43e   : > { %8316 = vtanh.f32 %v1945_v56  ;;  %v11257_v25 = vmul.f32 %v8311_v34, %v2144_v18  ;;  %v2148_v55 = vsub.f32 1.0, %v2147_v12  ;;  %vm2153_vm11 = vmor %vm2151_vm9, %vm2152_vm6  ;;  %v2158_v10 = vor.u32 1.1754944e-38, %v2157_v9 }
 0x43f   : > { %8318 = vtanh.f32 %v11249_v44  ;;  %v11291_v49 = vadd.f32 %v2197_v1, %v2193_v21  ;;  %vm2106_vm15 = vcmp.eq.f32.partialorder %v2105_v47, 8.507059e+37  ;;  %v2033_v26 = vsel %vm2030_vm14, %v2032_v5, %v2028_v17  ;;  %v11320_v47 = vld [vmem:[%s15956_s2 + $0x8] sm:$0xff]  ;;  %v11355_v5 = vld [vmem:[%s15956_s2 + $0x30] sm:$0xff] }
 0x440   : > { %2215 = vrot.lane.b32.xlu0 %v11257_v25, %s9206_s24  ;;  %v2149_v38 = vmul.f32 %v8307_v20, %v2148_v55  ;;  %v2109_v62 = vsel %vm2106_vm15, %v2108_v54, %v2104_v61  ;;  %v2172_v56 = vand.u32 2147483648, %v11251_v58  ;;  %v2170_v19 = vand.u32 2147483647, %v11251_v58  ;;  %v11348_v17 = vld [vmem:[%s15956_s2 + $0x28] sm:$0xff] }
 0x441   : > { %vm2166_vm2 = vweird.f32 %v11251_v58  ;;  %v11398_v54 = vld [vmem:[%s15956_s2 + $0x68] sm:$0xff] }
 0x442   : > { %v8313_v42 = vpop.eup %8312  ;;  %v2150_v28 = vadd.f32 %v8307_v20, %v2149_v38  ;;  %v2173_v4 = vor.u32 1.1754944e-38, %v2172_v56  ;;  %vm2171_vm6 = vcmp.eq.f32.partialorder %v2170_v19, 8.507059e+37  ;;  %v16178_v56 = vld [vmem:[#allocation21_spill] sm:$0xff] }
 0x443   : > { %v8315_v59 = vpop.eup %8314  ;;  %v2130_v8 = vadd.f32 1.0, %v8313_v42  ;;  %v11334_v42 = vld [vmem:[%s15956_s2 + $0x18] sm:$0xff] }
 0x444   : > { %v8317_v51 = vpop.eup %8316  ;;  %v2154_v50 = vsel %vm2153_vm11, %v8307_v20, %v2150_v28  ;;  %v2162_v52 = vmul.f32 %v8315_v59, %v11251_v58  ;;  %vm2167_vm1 = vweird.f32 %v8315_v59  ;;  %v2194_v20 = vmul.f32 %v2109_v62, %v10977_v32  ;;  %v11362_v28 = vld [vmem:[%s15956_s2 + $0x38] sm:$0xff] }
 0x445   : > { %v8319_v43 = vpop.eup %8318  ;;  %8320 = vrcp.f32 %v2130_v8  ;;  %v2159_v57 = vsel %vm2156_vm12, %v2158_v10, %v2154_v50  ;;  %v2198_v15 = vmul.f32 %v8317_v51, %v2033_v26  ;;  %vm2168_vm3 = vmor %vm2166_vm2, %vm2167_vm1  ;;  %v2187_v35 = vand.u32 2147483648, %v2130_v8  ;;  %v11382_v10 = vld [vmem:[%s15956_s2 + $0x58] sm:$0xff]  ;;  %v11405_v50 = vld [vmem:[%s15956_s2 + $0x70] sm:$0xff] }
 0x446   : > { %v2208_v7 = vmul.f32 %v8319_v43, %v2159_v57  ;;  %v2163_v45 = vsub.f32 1.0, %v2162_v52  ;;  %8322 = vtanh.f32 %v11291_v49  ;;  %v2185_v58 = vand.u32 2147483647, %v2130_v8  ;;  %v11412_v52 = vld [vmem:[%s15956_s2 + $0x78] sm:$0xff] }
 0x447   : > { %v11304_v0 = vadd.f32 %v2198_v15, %v2194_v20  ;;  %vm2181_vm5 = vweird.f32 %v2130_v8  ;;  %v2188_v36 = vor.u32 1.1754944e-38, %v2187_v35  ;;  %vm2227_vm11 = vcmask 523648  }
 0x448   : > { %2217 = vrot.lane.b32.xlu0 %v2208_v7, %s9206_s24  ;;  %v2164_v37 = vmul.f32 %v8315_v59, %v2163_v45  ;;  %vm2186_vm9 = vcmp.eq.f32.partialorder %v2185_v58, 8.507059e+37 }
 0x449   : > { %8324 = vtanh.f32 %v11304_v0 }
 0x44a   : > { %v2165_v41 = vadd.f32 %v8315_v59, %v2164_v37 }
 0x44b   : > { %v8321_v48 = vpop.eup %8320 }
 0x44c   : > { %v2169_v12 = vsel %vm2168_vm3, %v8315_v59, %v2165_v41  ;;  %v2177_v34 = vmul.f32 %v8321_v48, %v2130_v8  ;;  %v8323_v18 = vpop.eup %8322  ;;  %vm2182_vm7 = vweird.f32 %v8321_v48  ;;  %v11369_v59 = vld [vmem:[%s15956_s2 + $0x40] sm:$0xff]  ;;  %v16179_v41 = vld [vmem:[#allocation14_spill] sm:$0xff] }
 0x44d   : > { %v2174_v11 = vsel %vm2171_vm6, %v2173_v4, %v2169_v12  ;;  %vm2183_vm8 = vmor %vm2181_vm5, %vm2182_vm7  ;;  %v16180_v4 = vld [vmem:[#allocation16_spill] sm:$0xff] }
 0x44e   : > { %v2209_v55 = vmul.f32 %v8323_v18, %v2174_v11  ;;  %v2178_v1 = vsub.f32 1.0, %v2177_v34 }
 0x44f   : > { %v8325_v31 = vpop.eup %8324 }
 0x450   : > { %2219 = vrot.lane.b32.xlu0 %v2209_v55, %s9206_s24  ;;  %v2179_v32 = vmul.f32 %v8321_v48, %v2178_v1 }
 0x452   : > { %v2180_v9 = vadd.f32 %v8321_v48, %v2179_v32 }
 0x454   : > { %v2184_v38 = vsel %vm2183_vm8, %v8321_v48, %v2180_v9  ;;  %v16182_v9 = vld [vmem:[#allocation63_spill] sm:$0xff] }
 0x455   : > { %v2189_v21 = vsel %vm2186_vm9, %v2188_v36, %v2184_v38  ;;  %v16183_v38 = vld [vmem:[#allocation17_spill] sm:$0xff] }
 0x456   : > { %v2210_v2 = vmul.f32 %v8325_v31, %v2189_v21 }
 0x458   : > { %2221 = vrot.lane.b32.xlu2 %v2210_v2, %s9206_s24  ;;  %2324 = vmatpush.msrb.mxu1 %v2210_v2 }
 0x45a   : > { %2325 = vmatpush.msrb.mxu1 %v2209_v55  ;;  %v16181_v55 = vld [vmem:[#allocation62_spill] sm:$0xff] }
 0x45c   : > { %2326 = vmatpush.msrb.mxu1 %v2208_v7 }
 0x45e   : > { %2327 = vmatpush.msrb.mxu1 %v11257_v25  ;;  %v11327_v25 = vld [vmem:[%s15956_s2 + $0x10] sm:$0xff] }
 0x45f   : > { %7693 = vmatmul.msk.f32.vlgmr.msrb.gmra.mxu1 %vm607_vm0, %v11313_v13 }
 0x467   : > { %7694 = vmatmul.msk.f32.gmra.mxu1 %vm607_vm0, %v11320_v47 }
 0x46f   : > { %7695 = vmatmul.msk.f32.gmra.mxu1 %vm607_vm0, %v11327_v25 }
 0x477   : > { %7696 = vmatmul.msk.f32.gmra.mxu1 %vm607_vm0, %v11334_v42 }
 0x47f   : > { %7697 = vmatmul.msk.f32.gmra.mxu1 %vm607_vm0, %v11341_v22 }
 0x487   : > { %7698 = vmatmul.msk.f32.gmra.mxu1 %vm607_vm0, %v11348_v17 }
 0x48f   : > { %7699 = vmatmul.msk.f32.gmra.mxu1 %vm607_vm0, %v11355_v5 }
 0x497   : > { %7700 = vmatmul.msk.f32.gmra.mxu1 %vm607_vm0, %v11362_v28 }
 0x49f   : > { %7701 = vmatmul.msk.f32.gmra.mxu1 %vm607_vm0, %v11369_v59 }
 0x4a7   : > { %7702 = vmatmul.msk.f32.gmra.mxu1 %vm607_vm0, %v11023_v27  ;;  %v11390_v27 = vld [vmem:[%s15956_s2 + $0x60] sm:$0xff] }
 0x4af   : > { %7703 = vmatmul.msk.f32.gmra.mxu1 %vm607_vm0, %v11032_v53 }
 0x4b2   : > { %v2222_v61 = vpop.permute.xlu2 %2221  ;;  %v2216_v8 = vpop.permute.xlu0 %2215 }
 0x4b3   : > { %2231 = vst.msk [vmem:[#allocation3 + $0x18] sm:$0xff] %vm2227_vm11, %v2222_v61 }
 0x4b4   : > { %2228 = vst.msk [vmem:[#allocation3] sm:$0xff] %vm2227_vm11, %v2216_v8 }
 0x4b7   : > { %7704 = vmatmul.msk.f32.gmra.mxu1 %vm607_vm0, %v11382_v10 }
 0x4ba   : > { %v2218_v51 = vpop.permute.xlu0 %2217 }
 0x4bb   : > { %2229 = vst.msk [vmem:[#allocation3 + $0x8] sm:$0xff] %vm2227_vm11, %v2218_v51 }
 0x4bf   : > { %7705 = vmatmul.msk.f32.gmra.mxu1 %vm607_vm0, %v11390_v27 }
 0x4c2   : > { %v2220_v53 = vpop.permute.xlu0 %2219 }
 0x4c3   : > { %2230 = vst.msk [vmem:[#allocation3 + $0x10] sm:$0xff] %vm2227_vm11, %v2220_v53  ;;  %v16184_v53 = vld [vmem:[#allocation19_spill] sm:$0xff] }
 0x4c7   : > { %7706 = vmatmul.msk.f32.gmra.mxu1 %vm607_vm0, %v11398_v54 }
 0x4cf   : > { %7707 = vmatmul.msk.f32.gmra.mxu1 %vm607_vm0, %v11405_v50 }
 0x4d7   : > { %7708 = vmatmul.msk.f32.gmra.mxu1 %vm607_vm0, %v11412_v52 }
 0x4dc   : > { %v2329_v43 = vpop.f32.mrf.mxu1 }
 0x4dd   : > { %v2330_v37 = vadd.f32 %v2329_v43, %v16178_v56 }
 0x4df   : > { %v7709_v19 = vmul.f32 -1.442695, %v2330_v37 }
 0x4e1   : > { %8326 = vpow2.f32 %v7709_v19 }
 0x4e4   : > { %v2332_v57 = vpop.f32.mrf.mxu1 }
 0x4e5   : > { %v2333_v48 = vadd.f32 %v2332_v57, %v16179_v41 }
 0x4e7   : > { %v7710_v18 = vmul.f32 -1.442695, %v2333_v48  ;;  %v8327_v11 = vpop.eup %8326  ;;  %v16185_v48 = vld [vmem:[#allocation12_spill] sm:$0xff] }
 0x4e8   : > { %v11422_v32 = vadd.f32 1.0, %v8327_v11 }
 0x4e9   : > { %8328 = vpow2.f32 %v7710_v18 }
 0x4ea   : > { %vm2398_vm14 = vweird.f32 %v11422_v32 }
 0x4ec   : > { %v2335_v26 = vpop.f32.mrf.mxu1 }
 0x4ed   : > { %v2336_v1 = vadd.f32 %v2335_v26, %v16181_v55 }
 0x4ef   : > { %v7711_v58 = vmul.f32 -1.442695, %v2336_v1  ;;  %v8329_v61 = vpop.eup %8328 }
 0x4f0   : > { %v11430_v57 = vadd.f32 1.0, %v8329_v61 }
 0x4f2   : > { %v2417_v16 = vand.u32 2147483647, %v11430_v57  ;;  %vm2413_vm2 = vweird.f32 %v11430_v57 }
 0x4f4   : > { %v2338_v62 = vpop.f32.mrf.mxu1  ;;  %vm11499_vm7 = vcmp.eq.f32.partialorder %v2417_v16, 8.507059e+37 }
 0x4f5   : > { %v2339_v31 = vadd.f32 %v2338_v62, %v16183_v38 }
 0x4f7   : > { %v7712_v51 = vmul.f32 -1.442695, %v2339_v31 }
 0x4fc   : > { %v2341_v7 = vpop.f32.mrf.mxu1 }
 0x4fd   : > { %v2342_v12 = vadd.f32 %v2341_v7, %v16180_v4 }
 0x4ff   : > { %v7713_v35 = vmul.f32 -1.442695, %v2342_v12 }
 0x501   : > { %8330 = vpow2.f32 %v7713_v35 }
 0x502   : > { %8332 = vrcp.f32 %v11422_v32 }
 0x503   : > { %8334 = vpow2.f32 %v7711_v58 }
 0x504   : > { %v2344_v45 = vpop.f32.mrf.mxu1 }
 0x505   : > { %v2345_v36 = vadd.f32 %v2344_v45, %v16182_v9 }
 0x507   : > { %v7714_v2 = vmul.f32 -1.442695, %v2345_v36  ;;  %v8331_v8 = vpop.eup %8330 }
 0x508   : > { %v8333_v26 = vpop.eup %8332  ;;  %v11432_v7 = vadd.f32 1.0, %v8331_v8  ;;  %v2404_v8 = vand.u32 2147483648, %v11422_v32 }
 0x509   : > { %8336 = vpow2.f32 %v7714_v2  ;;  %v8335_v45 = vpop.eup %8334  ;;  %v2394_v37 = vmul.f32 %v8333_v26, %v11422_v32  ;;  %vm2399_vm12 = vweird.f32 %v8333_v26 }
 0x50a   : > { %8338 = vpow2.f32 %v7712_v51  ;;  %v11438_v19 = vadd.f32 1.0, %v8335_v45  ;;  %vm11472_vm15 = vmor %vm2398_vm14, %vm2399_vm12  ;;  %vm2474_vm5 = vweird.f32 %v11432_v7  ;;  %v2478_v16 = vand.u32 2147483647, %v11432_v7 }
 0x50b   : > { %8340 = vrcp.f32 %v11430_v57  ;;  %v2395_v12 = vsub.f32 1.0, %v2394_v37  ;;  %v2402_v37 = vand.u32 2147483647, %v11422_v32 }
 0x50c   : > { %v2347_v15 = vpop.f32.mrf.mxu1  ;;  %8342 = vrcp.f32 %v11432_v7  ;;  %vm2428_vm14 = vweird.f32 %v11438_v19 }
 0x50d   : > { %v2348_v43 = vadd.f32 %v2347_v15, %v16184_v53  ;;  %v2396_v36 = vmul.f32 %v8333_v26, %v2395_v12  ;;  %vm2403_vm1 = vcmp.eq.f32.partialorder %v2402_v37, 8.507059e+37 }
 0x50f   : > { %v7715_v62 = vmul.f32 -1.442695, %v2348_v43  ;;  %v8337_v15 = vpop.eup %8336  ;;  %v2397_v61 = vadd.f32 %v8333_v26, %v2396_v36 }
 0x510   : > { %v8339_v41 = vpop.eup %8338  ;;  %v11443_v18 = vadd.f32 1.0, %v8337_v15  ;;  %v16186_v15 = vld [vmem:[#allocation65_spill] sm:$0xff] }
 0x511   : > { %8344 = vpow2.f32 %v7715_v62  ;;  %v11445_v11 = vpop.eup %8340  ;;  %v11451_v35 = vadd.f32 1.0, %v8339_v41  ;;  %v2401_v36 = vsel %vm11472_vm15, %v8333_v26, %v2397_v61 }
 0x512   : > { %8346 = vrcp.f32 %v11438_v19  ;;  %v11449_v1 = vpop.eup %8342  ;;  %v2409_v31 = vmul.f32 %v11445_v11, %v11430_v57  ;;  %vm2414_vm3 = vweird.f32 %v11445_v11 }
 0x513   : > { %8348 = vrcp.f32 %v11443_v18  ;;  %vm2475_vm6 = vweird.f32 %v11449_v1  ;;  %vm11533_vm12 = vmor %vm2413_vm2, %vm2414_vm3 }
 0x514   : > { %v2350_v20 = vpop.f32.mrf.mxu1  ;;  %8350 = vrcp.f32 %v11451_v35  ;;  %v2410_v62 = vsub.f32 1.0, %v2409_v31  ;;  %vm11515_vm9 = vmor %vm2474_vm5, %vm2475_vm6  ;;  %vm2489_vm6 = vweird.f32 %v11443_v18 }
 0x515   : > { %v2351_v4 = vadd.f32 %v2350_v20, %v16185_v48  ;;  %v2470_v20 = vmul.f32 %v11449_v1, %v11432_v7 }
 0x516   : > { %v2411_v63 = vmul.f32 %v11445_v11, %v2410_v62 }
 0x517   : > { %v8345_v58 = vpop.eup %8344  ;;  %v7716_v9 = vmul.f32 -1.442695, %v2351_v4  ;;  %v2471_v53 = vsub.f32 1.0, %v2470_v20  ;;  %v2419_v4 = vand.u32 2147483648, %v11430_v57  ;;  %v2405_v20 = vor.u32 1.1754944e-38, %v2404_v8 }
 0x518   : > { %v11456_v38 = vpop.eup %8346  ;;  %v11461_v2 = vadd.f32 1.0, %v8345_v58  ;;  %v16189_v58 = vld [vmem:[#allocation27_spill] sm:$0xff] }
 0x519   : > { %8352 = vpow2.f32 %v7716_v9  ;;  %v2424_v51 = vmul.f32 %v11456_v38, %v11438_v19  ;;  %v11467_v45 = vpop.eup %8348  ;;  %v2406_v23 = vsel %vm2403_vm1, %v2405_v20, %v2401_v36  ;;  %vm2429_vm8 = vweird.f32 %v11456_v38 }
 0x51a   : > { %8354 = vrcp.f32 %v11461_v2  ;;  %v11477_v12 = vpop.eup %8350  ;;  %vm2479_vm1 = vcmp.eq.f32.partialorder %v2478_v16, 8.507059e+37  ;;  %vm11548_vm2 = vmor %vm2428_vm14, %vm2429_vm8  ;;  %vm2490_vm3 = vweird.f32 %v11467_v45 }
 0x51b   : > { %v2425_v32 = vsub.f32 1.0, %v2424_v51  ;;  %v2439_v61 = vmul.f32 %v11477_v12, %v11451_v35  ;;  %v2432_v51 = vand.u32 2147483647, %v11438_v19  ;;  %vm11571_vm5 = vmor %vm2489_vm6, %vm2490_vm3 }
 0x51c   : > { %v11419_v34 = vpop.f32.mrf.mxu1 }
 0x51d   : > { %v2354_v9 = vadd.f32 %v11419_v34, %v16189_v58  ;;  %v2420_v34 = vor.u32 1.1754944e-38, %v2419_v4  ;;  %v2480_v4 = vand.u32 2147483648, %v11432_v7  ;;  %v2434_v58 = vand.u32 2147483648, %v11438_v19 }
 0x51e   : > { %vm11538_vm15 = vcmp.eq.f32.partialorder %v2432_v51, 8.507059e+37 }
 0x51f   : > { %v8353_v39 = vpop.eup %8352  ;;  %v2481_v40 = vor.u32 1.1754944e-38, %v2480_v4  ;;  %v2435_v19 = vor.u32 1.1754944e-38, %v2434_v58  ;;  %v2493_v58 = vand.u32 2147483647, %v11443_v18 }
 0x520   : > { %v11490_v26 = vpop.eup %8354  ;;  %v11494_v8 = vadd.f32 1.0, %v8353_v39  ;;  %v2412_v39 = vadd.f32 %v11445_v11, %v2411_v63  ;;  %v16195_v63 = vld [vmem:[#allocation66_spill] sm:$0xff] }
 0x521   : > { %v2500_v20 = vmul.f32 %v11490_v26, %v11461_v2  ;;  %vm2505_vm8 = vweird.f32 %v11490_v26 }
 0x524   : > { %v11426_v21 = vpop.f32.mrf.mxu1 }
 0x52c   : > { %v11434_v56 = vpop.f32.mrf.mxu1 }
 0x534   : > { %v11447_v55 = vpop.f32.mrf.mxu1 }
 0x53c   : > { %v2365_v43 = vpop.f32.mrf.mxu1 }
 0x53d   : > { %v2366_v41 = vadd.f32 %v2365_v43, %v16186_v15  ;;  %v2472_v43 = vmul.f32 %v11449_v1, %v2471_v53  ;;  %v2485_v15 = vmul.f32 %v11467_v45, %v11443_v18 }
 0x53f   : > { %v7717_v31 = vmul.f32 -1.442695, %v2366_v41  ;;  %v2486_v53 = vsub.f32 1.0, %v2485_v15  ;;  %v2473_v62 = vadd.f32 %v11449_v1, %v2472_v43  ;;  %v2426_v41 = vmul.f32 %v11456_v38, %v2425_v32 }
 0x540   : > { %v2440_v32 = vsub.f32 1.0, %v2439_v61  ;;  %v2357_v15 = vadd.f32 %v11426_v21, %v16195_v63 }
 0x541   : > { %8356 = vpow2.f32 %v7717_v31  ;;  %v2477_v7 = vsel %vm11515_vm9, %v11449_v1, %v2473_v62  ;;  %v2427_v61 = vadd.f32 %v11456_v38, %v2426_v41  ;;  %v2501_v1 = vsub.f32 1.0, %v2500_v20  ;;  %v16202_v20 = vld [vmem:[#allocation23_spill] sm:$0xff] }
 0x542   : > { %8358 = vtanh.f32 %v2354_v9  ;;  %v16192_v9 = vld [vmem:[#allocation18_spill] sm:$0xff]  ;;  %v2482_v57 = vsel %vm2479_vm1, %v2481_v40, %v2477_v7  ;;  %v2441_v51 = vmul.f32 %v11477_v12, %v2440_v32  ;;  %vm2504_vm9 = vweird.f32 %v11461_v2 }
 0x543   : > { %8360 = vrcp.f32 %v11494_v8  ;;  %v2431_v60 = vsel %vm11548_vm2, %v11456_v38, %v2427_v61  ;;  %v2449_v38 = vand.u32 2147483648, %v11451_v35  ;;  %vm11600_vm14 = vmor %vm2504_vm9, %vm2505_vm8  ;;  %vm2519_vm9 = vweird.f32 %v11494_v8 }
 0x544   : > { %v2368_v48 = vpop.f32.mrf.mxu1  ;;  %v2436_v43 = vsel %vm11538_vm15, %v2435_v19, %v2431_v60  ;;  %vm2443_vm15 = vweird.f32 %v11451_v35  ;;  %v16208_v60 = vld [vmem:[#allocation64_spill] sm:$0xff] }
 0x545   : > { %v2369_v36 = vadd.f32 %v2368_v48, %v16192_v9  ;;  %v2487_v9 = vmul.f32 %v11467_v45, %v2486_v53  ;;  %v2416_v53 = vsel %vm11533_vm12, %v11445_v11, %v2412_v39  ;;  %v2495_v39 = vand.u32 2147483648, %v11443_v18 }
 0x546   : > { %v11580_v18 = vadd.f32 %v11477_v12, %v2441_v51  ;;  %vm2444_vm12 = vweird.f32 %v11477_v12 }
 0x547   : > { %v8357_v31 = vpop.eup %8356  ;;  %v7718_v48 = vmul.f32 -1.442695, %v2369_v36  ;;  %v2488_v4 = vadd.f32 %v11467_v45, %v2487_v9  ;;  %v2421_v36 = vsel %vm11499_vm7, %v2420_v34, %v2416_v53  ;;  %v16205_v34 = vld [vmem:[#allocation20_spill] sm:$0xff]  ;;  %v2496_v61 = vor.u32 1.1754944e-38, %v2495_v39 }
 0x548   : > { %v11527_v14 = vadd.f32 1.0, %v8357_v31  ;;  %v8359_v29 = vpop.eup %8358  ;;  %v2360_v37 = vadd.f32 %v11434_v56, %v16205_v34  ;;  %vm2494_vm7 = vcmp.eq.f32.partialorder %v2493_v58, 8.507059e+37 }
 0x549   : > { %8362 = vpow2.f32 %v7718_v48  ;;  %v2613_v41 = vmul.f32 %v8359_v29, %v2406_v23  ;;  %v11558_v11 = vpop.eup %8360  ;;  %v2502_v29 = vmul.f32 %v11490_v26, %v2501_v1  ;;  %v2609_v23 = vmul.f32 %v2482_v57, %v11217_v30 }
 0x54a   : > { %8364 = vrcp.f32 %v11527_v14  ;;  %v2492_v9 = vsel %vm11571_vm5, %v11467_v45, %v2488_v4  ;;  %v2510_v1 = vand.u32 2147483648, %v11461_v2  ;;  %v2558_v58 = vand.u32 2147483647, %v11527_v14 }
 0x54b   : > { %8366 = vtanh.f32 %v2357_v15  ;;  %v2515_v15 = vmul.f32 %v11558_v11, %v11494_v8  ;;  %v11584_v48 = vadd.f32 %v2613_v41, %v2609_v23  ;;  %v2503_v53 = vadd.f32 %v11490_v26, %v2502_v29 }
 0x54c   : > { %v2371_v40 = vpop.f32.mrf.mxu1  ;;  %v2497_v57 = vsel %vm2494_vm7, %v2496_v61, %v2492_v9  ;;  %v2560_v41 = vand.u32 2147483648, %v11527_v14  ;;  %v2508_v29 = vand.u32 2147483647, %v11461_v2  ;;  %vm2554_vm2 = vweird.f32 %v11527_v14 }
 0x54d   : > { %v2372_v16 = vadd.f32 %v2371_v40, %v16202_v20  ;;  %v2516_v62 = vsub.f32 1.0, %v2515_v15  ;;  %v2511_v20 = vor.u32 1.1754944e-38, %v2510_v1  ;;  %vm2559_vm6 = vcmp.eq.f32.partialorder %v2558_v58, 8.507059e+37 }
 0x54e   : > { %vm2520_vm5 = vweird.f32 %v11558_v11  ;;  %vm2509_vm7 = vcmp.eq.f32.partialorder %v2508_v29, 8.507059e+37  ;;  %v2447_v4 = vand.u32 2147483647, %v11451_v35  ;;  %v2450_v58 = vor.u32 1.1754944e-38, %v2449_v38 }
 0x54f   : > { %v8363_v31 = vpop.eup %8362  ;;  %v7719_v63 = vmul.f32 -1.442695, %v2372_v16  ;;  %v2610_v16 = vmul.f32 %v2497_v57, %v11249_v44  ;;  %v2517_v15 = vmul.f32 %v11558_v11, %v2516_v62  ;;  %v2525_v62 = vand.u32 2147483648, %v11494_v8 }
 0x550   : > { %v8365_v30 = vpop.eup %8364  ;;  %v11589_v7 = vadd.f32 1.0, %v8363_v31  ;;  %v16209_v31 = vld [vmem:[#allocation25_spill] sm:$0xff] }
 0x551   : > { %v8367_v56 = vpop.eup %8366  ;;  %v2550_v21 = vmul.f32 %v8365_v30, %v11527_v14  ;;  %8368 = vpow2.f32 %v7719_v63  ;;  %vm2555_vm1 = vweird.f32 %v8365_v30  ;;  %v2363_v32 = vadd.f32 %v11447_v55, %v16209_v31 }
 0x552   : > { %8370 = vrcp.f32 %v11589_v7  ;;  %v2614_v19 = vmul.f32 %v8367_v56, %v2421_v36  ;;  %v2507_v36 = vsel %vm11600_vm14, %v11490_v26, %v2503_v53  ;;  %vm2556_vm3 = vmor %vm2554_vm2, %vm2555_vm1  ;;  %v2561_v26 = vor.u32 1.1754944e-38, %v2560_v41 }
 0x553   : > { %8372 = vtanh.f32 %v2360_v37  ;;  %v2551_v45 = vsub.f32 1.0, %v2550_v21  ;;  %v2512_v21 = vsel %vm2509_vm7, %v2511_v20, %v2507_v36  ;;  %vm11639_vm14 = vmor %vm2443_vm15, %vm2444_vm12  ;;  %vm2569_vm12 = vweird.f32 %v11589_v7 }
 0x554   : > { %8374 = vtanh.f32 %v11584_v48  ;;  %v2374_v51 = vpop.f32.mrf.mxu1  ;;  %v11616_v9 = vadd.f32 %v2614_v19, %v2610_v16  ;;  %v2611_v41 = vmul.f32 %v2512_v21, %v11291_v49  ;;  %vm11647_vm1 = vmor %vm2519_vm9, %vm2520_vm5  ;;  %v2446_v49 = vsel %vm11639_vm14, %v11477_v12, %v11580_v18 }
 0x555   : > { %v2375_v40 = vadd.f32 %v2374_v51, %v16208_v60  ;;  %v2552_v39 = vmul.f32 %v8365_v30, %v2551_v45  ;;  %v2518_v45 = vadd.f32 %v11558_v11, %v2517_v15  ;;  %v2573_v51 = vand.u32 2147483647, %v11589_v7 }
 0x556   : > { %v2523_v60 = vand.u32 2147483647, %v11494_v8 }
 0x557   : > { %v8369_v23 = vpop.eup %8368  ;;  %v7720_v34 = vmul.f32 -1.442695, %v2375_v40  ;;  %v2553_v37 = vadd.f32 %v8365_v30, %v2552_v39  ;;  %v2522_v36 = vsel %vm11647_vm1, %v11558_v11, %v2518_v45  ;;  %vm2574_vm2 = vcmp.eq.f32.partialorder %v2573_v51, 8.507059e+37 }
 0x558   : > { %v8371_v63 = vpop.eup %8370  ;;  %v11618_v44 = vadd.f32 1.0, %v8369_v23 }
 0x559   : > { %v8373_v56 = vpop.eup %8372  ;;  %8376 = vpow2.f32 %v7720_v34  ;;  %v2557_v2 = vsel %vm2556_vm3, %v8365_v30, %v2553_v37  ;;  %v2565_v55 = vmul.f32 %v8371_v63, %v11589_v7  ;;  %v2575_v30 = vand.u32 2147483648, %v11589_v7 }
 0x55a   : > { %v8375_v61 = vpop.eup %8374  ;;  %8378 = vrcp.f32 %v11618_v44  ;;  %v2562_v14 = vsel %vm2559_vm6, %v2561_v26, %v2557_v2  ;;  %v2615_v57 = vmul.f32 %v8373_v56, %v2436_v43  ;;  %vm2570_vm8 = vweird.f32 %v8371_v63 }
 0x55b   : > { %8380 = vtanh.f32 %v2363_v32  ;;  %v11624_v1 = vmul.f32 %v8375_v61, %v2562_v14  ;;  %v2566_v53 = vsub.f32 1.0, %v2565_v55  ;;  %vm2571_vm15 = vmor %vm2569_vm12, %vm2570_vm8  ;;  %v2576_v23 = vor.u32 1.1754944e-38, %v2575_v30 }
 0x55c   : > { %8382 = vtanh.f32 %v11616_v9  ;;  %v11658_v8 = vadd.f32 %v2615_v57, %v2611_v41  ;;  %v2526_v32 = vor.u32 1.1754944e-38, %v2525_v62  ;;  %vm2448_vm3 = vcmp.eq.f32.partialorder %v2447_v4, 8.507059e+37 }
 0x55d   : > { %2633 = vrot.lane.b32.xlu0 %v11624_v1, %s9205_s19  ;;  %v2567_v19 = vmul.f32 %v8371_v63, %v2566_v53  ;;  %vm2524_vm6 = vcmp.eq.f32.partialorder %v2523_v60, 8.507059e+37  ;;  %v2451_v7 = vsel %vm2448_vm3, %v2450_v58, %v2446_v49  ;;  %v2590_v26 = vand.u32 2147483648, %v11618_v44 }
 0x55e   : > { %v2527_v34 = vsel %vm2524_vm6, %v2526_v32, %v2522_v36  ;;  %vm2584_vm7 = vweird.f32 %v11618_v44  ;;  %v16214_v49 = vmov 0.0  }
 0x55f   : > { %v8377_v40 = vpop.eup %8376  ;;  %v2568_v20 = vadd.f32 %v8371_v63, %v2567_v19  ;;  %v2612_v2 = vmul.f32 %v2527_v34, %v11304_v0  ;;  %v2591_v21 = vor.u32 1.1754944e-38, %v2590_v26 }
 0x560   : > { %v8379_v16 = vpop.eup %8378  ;;  %v2548_v29 = vadd.f32 1.0, %v8377_v40 }
 0x561   : > { %v8381_v31 = vpop.eup %8380  ;;  %v2580_v12 = vmul.f32 %v8379_v16, %v11618_v44  ;;  %v2572_v35 = vsel %vm2571_vm15, %v8371_v63, %v2568_v20  ;;  %vm2585_vm5 = vweird.f32 %v8379_v16  ;;  %v2588_v63 = vand.u32 2147483647, %v11618_v44  ;;  %v16215_v20 = vld [vmem:[#allocation26_spill] sm:$0xff] }
 0x562   : > { %v8383_v38 = vpop.eup %8382  ;;  %8384 = vrcp.f32 %v2548_v29  ;;  %v2577_v18 = vsel %vm2574_vm2, %v2576_v23, %v2572_v35  ;;  %v2616_v11 = vmul.f32 %v8381_v31, %v2451_v7  ;;  %vm2586_vm8 = vmor %vm2584_vm7, %vm2585_vm5  ;;  %v2605_v51 = vand.u32 2147483648, %v2548_v29  ;;  %v16217_v31 = vld [vmem:[#allocation69_spill] sm:$0xff] }
 0x563   : > { %v2581_v37 = vsub.f32 1.0, %v2580_v12  ;;  %v2626_v15 = vmul.f32 %v8383_v38, %v2577_v18  ;;  %8386 = vtanh.f32 %v11658_v8  ;;  %vm2589_vm9 = vcmp.eq.f32.partialorder %v2588_v63, 8.507059e+37  ;;  %v16218_v35 = vld [vmem:[#allocation29_spill] sm:$0xff] }
 0x564   : > { %v11671_v14 = vadd.f32 %v2616_v11, %v2612_v2  ;;  %v2603_v44 = vand.u32 2147483647, %v2548_v29  ;;  %vm2599_vm1 = vweird.f32 %v2548_v29  ;;  %v2606_v43 = vor.u32 1.1754944e-38, %v2605_v51  ;;  %v16220_v11 = vld [vmem:[#allocation22_spill] sm:$0xff] }
 0x565   : > { %2635 = vrot.lane.b32.xlu1 %v2626_v15, %s9205_s19  ;;  %v2582_v56 = vmul.f32 %v8379_v16, %v2581_v37  ;;  %vm2645_vm2 = vcmask 654848   ;;  %v16219_v37 = vld [vmem:[#allocation31_spill] sm:$0xff] }
 0x566   : > { %8388 = vtanh.f32 %v11671_v14  ;;  %vm2604_vm15 = vcmp.eq.f32.partialorder %v2603_v44, 8.507059e+37 }
 0x567   : > { %v2583_v55 = vadd.f32 %v8379_v16, %v2582_v56 }
 0x568   : > { %v8385_v61 = vpop.eup %8384 }
 0x569   : > { %v2595_v53 = vmul.f32 %v8385_v61, %v2548_v29  ;;  %v2587_v57 = vsel %vm2586_vm8, %v8379_v16, %v2583_v55  ;;  %v8387_v45 = vpop.eup %8386  ;;  %vm2600_vm14 = vweird.f32 %v8385_v61  ;;  %v16216_v29 = vld [vmem:[#allocation68_spill] sm:$0xff] }
 0x56a   : > { %v2592_v30 = vsel %vm2589_vm9, %v2591_v21, %v2587_v57  ;;  %vm2601_vm12 = vmor %vm2599_vm1, %vm2600_vm14  ;;  %v16221_v21 = vld [vmem:[#allocation24_spill] sm:$0xff] }
 0x56b   : > { %v2596_v62 = vsub.f32 1.0, %v2595_v53  ;;  %v2627_v19 = vmul.f32 %v8387_v45, %v2592_v30 }
 0x56c   : > { %v8389_v60 = vpop.eup %8388 }
 0x56d   : > { %2637 = vrot.lane.b32.xlu0 %v2627_v19, %s9205_s19  ;;  %v2597_v0 = vmul.f32 %v8385_v61, %v2596_v62 }
 0x56f   : > { %v2598_v41 = vadd.f32 %v8385_v61, %v2597_v0 }
 0x571   : > { %v2602_v4 = vsel %vm2601_vm12, %v8385_v61, %v2598_v41 }
 0x572   : > { %v2607_v40 = vsel %vm2604_vm15, %v2606_v43, %v2602_v4  ;;  %v16222_v4 = vld [vmem:[#allocation67_spill] sm:$0xff] }
 0x573   : > { %v2628_v39 = vmul.f32 %v8389_v60, %v2607_v40 }
 0x575   : > { %2742 = vmatpush.msra.mxu2 %v2628_v39  ;;  %2639 = vrot.lane.b32.xlu1 %v2628_v39, %s9205_s19 }
 0x577   : > { %2743 = vmatpush.msra.mxu2 %v2627_v19 }
 0x579   : > { %2744 = vmatpush.msra.mxu2 %v2626_v15 }
 0x57b   : > { %2745 = vmatpush.msra.mxu2 %v11624_v1 }
 0x57c   : > { %7721 = vmatmul.msk.f32.vlgmr.msra.gmra.mxu2 %vm607_vm0, %v11313_v13  ;;  %v11699_v13 = vld [vmem:[%s15956_s2 + $0x48] sm:$0xff] }
 0x57d   : > { %4244 = vmatpush.msrb.mxu2 %v16214_v49 }
 0x584   : > { %7722 = vmatmul.msk.f32.gmra.mxu2 %vm607_vm0, %v11320_v47  ;;  %v11706_v47 = vld [vmem:[%s15956_s2 + $0x50] sm:$0xff] }
 0x58c   : > { %7723 = vmatmul.msk.f32.gmra.mxu2 %vm607_vm0, %v11327_v25 }
 0x594   : > { %7724 = vmatmul.msk.f32.gmra.mxu2 %vm607_vm0, %v11334_v42 }
 0x59c   : > { %7725 = vmatmul.msk.f32.gmra.mxu2 %vm607_vm0, %v11341_v22 }
 0x5a4   : > { %7726 = vmatmul.msk.f32.gmra.mxu2 %vm607_vm0, %v11348_v17 }
 0x5ac   : > { %7727 = vmatmul.msk.f32.gmra.mxu2 %vm607_vm0, %v11355_v5 }
 0x5b4   : > { %7728 = vmatmul.msk.f32.gmra.mxu2 %vm607_vm0, %v11362_v28 }
 0x5bc   : > { %7729 = vmatmul.msk.f32.gmra.mxu2 %vm607_vm0, %v11369_v59 }
 0x5c4   : > { %7730 = vmatmul.msk.f32.gmra.mxu2 %vm607_vm0, %v11699_v13 }
 0x5cc   : > { %7731 = vmatmul.msk.f32.gmra.mxu2 %vm607_vm0, %v11706_v47 }
 0x5cf   : > { %v2634_v25 = vpop.permute.xlu0 %2633 }
 0x5d0   : > { %2646 = vst.msk [vmem:[#allocation3] sm:$0xff] %vm2645_vm2, %v2634_v25 }
 0x5d4   : > { %7732 = vmatmul.msk.f32.gmra.mxu2 %vm607_vm0, %v11382_v10 }
 0x5d7   : > { %v2636_v42 = vpop.permute.xlu1 %2635 }
 0x5d8   : > { %2647 = vst.msk [vmem:[#allocation3 + $0x8] sm:$0xff] %vm2645_vm2, %v2636_v42 }
 0x5dc   : > { %7733 = vmatmul.msk.f32.gmra.mxu2 %vm607_vm0, %v11390_v27 }
 0x5df   : > { %v2638_v22 = vpop.permute.xlu0 %2637 }
 0x5e0   : > { %2648 = vst.msk [vmem:[#allocation3 + $0x10] sm:$0xff] %vm2645_vm2, %v2638_v22 }
 0x5e4   : > { %7734 = vmatmul.msk.f32.gmra.mxu2 %vm607_vm0, %v11398_v54 }
 0x5e7   : > { %v2640_v17 = vpop.permute.xlu1 %2639 }
 0x5e8   : > { %2649 = vst.msk [vmem:[#allocation3 + $0x18] sm:$0xff] %vm2645_vm2, %v2640_v17 }
 0x5ec   : > { %7735 = vmatmul.msk.f32.gmra.mxu2 %vm607_vm0, %v11405_v50 }
 0x5f4   : > { %7736 = vmatmul.msk.f32.gmra.mxu2 %vm607_vm0, %v11412_v52 }
 0x5ff   : > { %v2747_v5 = vpop.f32.mrf.mxu2 }
 0x600   : > { %v2748_v16 = vadd.f32 %v2747_v5, %v16215_v20 }
 0x602   : > { %v7737_v36 = vmul.f32 -1.442695, %v2748_v16 }
 0x604   : > { %8390 = vpow2.f32 %v7737_v36 }
 0x607   : > { %v2750_v28 = vpop.f32.mrf.mxu2 }
 0x608   : > { %v2751_v23 = vadd.f32 %v2750_v28, %v16216_v29 }
 0x60a   : > { %v7738_v12 = vmul.f32 -1.442695, %v2751_v23  ;;  %v8391_v52 = vpop.eup %8390 }
 0x60b   : > { %v11730_v7 = vadd.f32 1.0, %v8391_v52 }
 0x60c   : > { %8392 = vpow2.f32 %v7738_v12 }
 0x60d   : > { %v2822_v20 = vand.u32 2147483648, %v11730_v7  ;;  %vm2816_vm6 = vweird.f32 %v11730_v7 }
 0x60f   : > { %v2753_v59 = vpop.f32.mrf.mxu2 }
 0x610   : > { %v2754_v38 = vadd.f32 %v2753_v59, %v16218_v35 }
 0x612   : > { %v7739_v34 = vmul.f32 -1.442695, %v2754_v38  ;;  %v8393_v2 = vpop.eup %8392 }
 0x613   : > { %v11738_v57 = vadd.f32 1.0, %v8393_v2 }
 0x615   : > { %v2837_v35 = vand.u32 2147483648, %v11738_v57  ;;  %vm2831_vm8 = vweird.f32 %v11738_v57 }
 0x617   : > { %v2756_v10 = vpop.f32.mrf.mxu2 }
 0x618   : > { %v2757_v26 = vadd.f32 %v2756_v10, %v16220_v11 }
 0x61a   : > { %v7740_v61 = vmul.f32 -1.442695, %v2757_v26 }
 0x61f   : > { %v2759_v27 = vpop.f32.mrf.mxu2 }
 0x620   : > { %v2760_v32 = vadd.f32 %v2759_v27, %v16217_v31  ;;  %v2820_v31 = vand.u32 2147483647, %v11730_v7 }
 0x622   : > { %v7741_v18 = vmul.f32 -1.442695, %v2760_v32  ;;  %v16223_v32 = vld [vmem:[#allocation35_spill] sm:$0xff]  ;;  %vm2821_vm7 = vcmp.eq.f32.partialorder %v2820_v31, 8.507059e+37 }
 0x624   : > { %8394 = vpow2.f32 %v7741_v18  ;;  %v16226_v18 = vld [vmem:[#allocation32_spill] sm:$0xff] }
 0x625   : > { %8396 = vrcp.f32 %v11730_v7 }
 0x626   : > { %8398 = vpow2.f32 %v7739_v34 }
 0x627   : > { %v2762_v1 = vpop.f32.mrf.mxu2 }
 0x628   : > { %v2763_v15 = vadd.f32 %v2762_v1, %v16219_v37 }
 0x62a   : > { %v7742_v63 = vmul.f32 -1.442695, %v2763_v15  ;;  %v8395_v55 = vpop.eup %8394  ;;  %v2823_v15 = vor.u32 1.1754944e-38, %v2822_v20 }
 0x62b   : > { %v8397_v45 = vpop.eup %8396  ;;  %v11740_v30 = vadd.f32 1.0, %v8395_v55  ;;  %v2835_v55 = vand.u32 2147483647, %v11738_v57 }
 0x62c   : > { %8400 = vpow2.f32 %v7742_v63  ;;  %v8399_v62 = vpop.eup %8398  ;;  %v2812_v0 = vmul.f32 %v8397_v45, %v11730_v7  ;;  %vm2817_vm3 = vweird.f32 %v8397_v45 }
 0x62d   : > { %8402 = vpow2.f32 %v7740_v61  ;;  %v11746_v44 = vadd.f32 1.0, %v8399_v62  ;;  %vm11780_vm5 = vmor %vm2816_vm6, %vm2817_vm3  ;;  %vm11807_vm1 = vcmp.eq.f32.partialorder %v2835_v55, 8.507059e+37  ;;  %vm2892_vm12 = vweird.f32 %v11740_v30 }
 0x62e   : > { %8404 = vrcp.f32 %v11738_v57  ;;  %v2813_v40 = vsub.f32 1.0, %v2812_v0 }
 0x62f   : > { %v2765_v58 = vpop.f32.mrf.mxu2  ;;  %8406 = vrcp.f32 %v11740_v30 }
 0x630   : > { %v2766_v53 = vadd.f32 %v2765_v58, %v16221_v21  ;;  %v2814_v28 = vmul.f32 %v8397_v45, %v2813_v40  ;;  %v2898_v40 = vand.u32 2147483648, %v11740_v30 }
 0x632   : > { %v7743_v19 = vmul.f32 -1.442695, %v2766_v53  ;;  %v8401_v41 = vpop.eup %8400  ;;  %v2815_v58 = vadd.f32 %v8397_v45, %v2814_v28  ;;  %v2899_v52 = vor.u32 1.1754944e-38, %v2898_v40 }
 0x633   : > { %v8403_v43 = vpop.eup %8402  ;;  %v11751_v39 = vadd.f32 1.0, %v8401_v41 }
 0x634   : > { %8408 = vpow2.f32 %v7743_v19  ;;  %v11753_v49 = vpop.eup %8404  ;;  %v11759_v22 = vadd.f32 1.0, %v8403_v43  ;;  %v2819_v37 = vsel %vm11780_vm5, %v8397_v45, %v2815_v58  ;;  %v2850_v19 = vand.u32 2147483647, %v11746_v44 }
 0x635   : > { %8410 = vrcp.f32 %v11746_v44  ;;  %v11757_v42 = vpop.eup %8406  ;;  %v2827_v27 = vmul.f32 %v11753_v49, %v11738_v57  ;;  %v2824_v21 = vsel %vm2821_vm7, %v2823_v15, %v2819_v37  ;;  %vm2832_vm9 = vweird.f32 %v11753_v49 }
 0x636   : > { %8412 = vrcp.f32 %v11751_v39  ;;  %v2888_v59 = vmul.f32 %v11757_v42, %v11740_v30  ;;  %vm2893_vm14 = vweird.f32 %v11757_v42  ;;  %vm11841_vm6 = vmor %vm2831_vm8, %vm2832_vm9  ;;  %vm2846_vm5 = vweird.f32 %v11746_v44 }
 0x637   : > { %v2768_v54 = vpop.f32.mrf.mxu2  ;;  %8414 = vrcp.f32 %v11759_v22  ;;  %v2828_v23 = vsub.f32 1.0, %v2827_v27  ;;  %v2896_v27 = vand.u32 2147483647, %v11740_v30  ;;  %vm11823_vm3 = vmor %vm2892_vm12, %vm2893_vm14  ;;  %vm11846_vm7 = vcmp.eq.f32.partialorder %v2850_v19, 8.507059e+37 }
 0x638   : > { %v2769_v60 = vadd.f32 %v2768_v54, %v16222_v4  ;;  %v2889_v36 = vsub.f32 1.0, %v2888_v59  ;;  %v2911_v55 = vand.u32 2147483647, %v11751_v39  ;;  %vm2907_vm12 = vweird.f32 %v11751_v39 }
 0x639   : > { %v2829_v61 = vmul.f32 %v11753_v49, %v2828_v23  ;;  %vm2897_vm14 = vcmp.eq.f32.partialorder %v2896_v27, 8.507059e+37 }
 0x63a   : > { %v8409_v17 = vpop.eup %8408  ;;  %v7744_v5 = vmul.f32 -1.442695, %v2769_v60  ;;  %v2890_v63 = vmul.f32 %v11757_v42, %v2889_v36 }
 0x63b   : > { %v11764_v10 = vpop.eup %8410  ;;  %v11769_v1 = vadd.f32 1.0, %v8409_v17  ;;  %v2830_v17 = vadd.f32 %v11753_v49, %v2829_v61  ;;  %v16238_v61 = vld [vmem:[#allocation28_spill] sm:$0xff] }
 0x63c   : > { %8416 = vpow2.f32 %v7744_v5  ;;  %v2842_v16 = vmul.f32 %v11764_v10, %v11746_v44  ;;  %v11775_v29 = vpop.eup %8412  ;;  %v2891_v41 = vadd.f32 %v11757_v42, %v2890_v63  ;;  %v2852_v5 = vand.u32 2147483648, %v11746_v44 }
 0x63d   : > { %8418 = vrcp.f32 %v11769_v1  ;;  %v11785_v38 = vpop.eup %8414  ;;  %v2903_v2 = vmul.f32 %v11775_v29, %v11751_v39  ;;  %vm2847_vm15 = vweird.f32 %v11764_v10  ;;  %vm2908_vm9 = vweird.f32 %v11775_v29 }
 0x63e   : > { %v2843_v7 = vsub.f32 1.0, %v2842_v16  ;;  %v2857_v45 = vmul.f32 %v11785_v38, %v11759_v22  ;;  %v2895_v30 = vsel %vm11823_vm3, %v11757_v42, %v2891_v41  ;;  %vm11856_vm8 = vmor %vm2846_vm5, %vm2847_vm15  ;;  %v2853_v44 = vor.u32 1.1754944e-38, %v2852_v5 }
 0x63f   : > { %v11727_v50 = vpop.f32.mrf.mxu2  ;;  %v2904_v0 = vsub.f32 1.0, %v2903_v2  ;;  %v2900_v57 = vsel %vm2897_vm14, %v2899_v52, %v2895_v30  ;;  %v2913_v63 = vand.u32 2147483648, %v11751_v39  ;;  %vm11879_vm15 = vmor %vm2907_vm12, %vm2908_vm9  ;;  %vm2862_vm5 = vweird.f32 %v11785_v38 }
 0x640   : > { %v2772_v34 = vadd.f32 %v11727_v50, %v16226_v18  ;;  %v2838_v50 = vor.u32 1.1754944e-38, %v2837_v35  ;;  %v2844_v4 = vmul.f32 %v11764_v10, %v2843_v7  ;;  %v2858_v20 = vsub.f32 1.0, %v2857_v45 }
 0x641   : > { %v2905_v23 = vmul.f32 %v11775_v29, %v2904_v0  ;;  %v2834_v18 = vsel %vm11841_vm6, %v11753_v49, %v2830_v17  ;;  %v3027_v19 = vmul.f32 %v2900_v57, %v11584_v48  ;;  %vm2922_vm6 = vweird.f32 %v11769_v1  ;;  %v16244_v57 = vld [vmem:[#allocation30_spill] sm:$0xff] }
 0x642   : > { %v8417_v26 = vpop.eup %8416  ;;  %v2845_v31 = vadd.f32 %v11764_v10, %v2844_v4  ;;  %v2859_v37 = vmul.f32 %v11785_v38, %v2858_v20  ;;  %v2839_v2 = vsel %vm11807_vm1, %v2838_v50, %v2834_v18  ;;  %vm2912_vm1 = vcmp.eq.f32.partialorder %v2911_v55, 8.507059e+37 }
 0x643   : > { %v11798_v53 = vpop.eup %8418  ;;  %v11802_v62 = vadd.f32 1.0, %v8417_v26  ;;  %vm2861_vm14 = vweird.f32 %v11759_v22 }
 0x644   : > { %v2918_v59 = vmul.f32 %v11798_v53, %v11769_v1  ;;  %v2849_v49 = vsel %vm11856_vm8, %v11764_v10, %v2845_v31  ;;  %v2867_v10 = vand.u32 2147483648, %v11759_v22  ;;  %v11888_v39 = vadd.f32 %v11785_v38, %v2859_v37 }
 0x645   : > { %v2854_v43 = vsel %vm11846_vm7, %v2853_v44, %v2849_v49  ;;  %vm2923_vm3 = vweird.f32 %v11798_v53 }
 0x646   : > { %v2919_v42 = vsub.f32 1.0, %v2918_v59  ;;  %v2928_v59 = vand.u32 2147483648, %v11769_v1  ;;  %vm11908_vm7 = vmor %vm2922_vm6, %vm2923_vm3 }
 0x647   : > { %v11734_v56 = vpop.f32.mrf.mxu2 }
 0x648   : > { %v2929_v52 = vor.u32 1.1754944e-38, %v2928_v59 }
 0x64f   : > { %v11742_v51 = vpop.f32.mrf.mxu2 }
 0x650   : > { %v2778_v50 = vadd.f32 %v11742_v51, %v10922_v46  ;;  %v2914_v51 = vor.u32 1.1754944e-38, %v2913_v63 }
 0x657   : > { %v11755_v25 = vpop.f32.mrf.mxu2 }
 0x65f   : > { %v2783_v54 = vpop.f32.mrf.mxu2 }
 0x660   : > { %v2784_v12 = vadd.f32 %v2783_v54, %v16223_v32 }
 0x662   : > { %v7745_v11 = vmul.f32 -1.442695, %v2784_v12 }
 0x664   : > { %8420 = vpow2.f32 %v7745_v11  ;;  %v2906_v11 = vadd.f32 %v11775_v29, %v2905_v23  ;;  %v16243_v23 = vld [vmem:[#allocation33_spill] sm:$0xff] }
 0x665   : > { %8422 = vtanh.f32 %v2772_v34  ;;  %v2781_v34 = vadd.f32 %v11755_v25, %v16244_v57 }
 0x666   : > { %8424 = vrcp.f32 %v11802_v62  ;;  %v2910_v17 = vsel %vm11879_vm15, %v11775_v29, %v2906_v11 }
 0x667   : > { %v2786_v60 = vpop.f32.mrf.mxu2 }
 0x668   : > { %v2787_v28 = vadd.f32 %v2786_v60, %v10866_v3  ;;  %v16231_v3 = vld [vmem:[#allocation37_spill] sm:$0xff] }
 0x669   : > { %v2775_v36 = vadd.f32 %v11734_v56, %v16231_v3 }
 0x66a   : > { %v8421_v58 = vpop.eup %8420  ;;  %v7746_v54 = vmul.f32 -1.442695, %v2787_v28 }
 0x66b   : > { %v11835_v32 = vadd.f32 1.0, %v8421_v58  ;;  %v8423_v12 = vpop.eup %8422  ;;  %v2915_v58 = vsel %vm2912_vm1, %v2914_v51, %v2910_v17  ;;  %v2868_v51 = vor.u32 1.1754944e-38, %v2867_v10 }
 0x66c   : > { %8426 = vpow2.f32 %v7746_v54  ;;  %v3031_v15 = vmul.f32 %v8423_v12, %v2824_v21  ;;  %v11866_v7 = vpop.eup %8424  ;;  %v2920_v21 = vmul.f32 %v11798_v53, %v2919_v42  ;;  %v3028_v35 = vmul.f32 %v2915_v58, %v11616_v9 }
 0x66d   : > { %8428 = vrcp.f32 %v11835_v32  ;;  %v2933_v60 = vmul.f32 %v11866_v7, %v11802_v62  ;;  %v2976_v12 = vand.u32 2147483647, %v11835_v32  ;;  %v2926_v42 = vand.u32 2147483647, %v11769_v1 }
 0x66e   : > { %8430 = vtanh.f32 %v2775_v36  ;;  %v11892_v40 = vadd.f32 %v3031_v15, %v3027_v19  ;;  %v2921_v27 = vadd.f32 %v11798_v53, %v2920_v21  ;;  %v2978_v36 = vand.u32 2147483648, %v11835_v32 }
 0x66f   : > { %v2789_v26 = vpop.f32.mrf.mxu2  ;;  %v2934_v20 = vsub.f32 1.0, %v2933_v60  ;;  %vm2972_vm9 = vweird.f32 %v11835_v32  ;;  %vm2977_vm15 = vcmp.eq.f32.partialorder %v2976_v12, 8.507059e+37  ;;  %vm2938_vm1 = vweird.f32 %v11866_v7 }
 0x670   : > { %v2790_v45 = vadd.f32 %v2789_v26, %v16238_v61  ;;  %v2925_v56 = vsel %vm11908_vm7, %v11798_v53, %v2921_v27  ;;  %v2979_v53 = vor.u32 1.1754944e-38, %v2978_v36  ;;  %vm2927_vm3 = vcmp.eq.f32.partialorder %v2926_v42, 8.507059e+37 }
 0x671   : > { %v2935_v11 = vmul.f32 %v11866_v7, %v2934_v20  ;;  %vm2937_vm7 = vweird.f32 %v11802_v62  ;;  %v2941_v60 = vand.u32 2147483647, %v11802_v62 }
 0x672   : > { %v8427_v0 = vpop.eup %8426  ;;  %v7747_v4 = vmul.f32 -1.442695, %v2790_v45 }
 0x673   : > { %v8429_v48 = vpop.eup %8428  ;;  %v11897_v5 = vadd.f32 1.0, %v8427_v0  ;;  %v2936_v21 = vadd.f32 %v11866_v7, %v2935_v11  ;;  %v2943_v0 = vand.u32 2147483648, %v11802_v62 }
 0x674   : > { %v8431_v46 = vpop.eup %8430  ;;  %8432 = vpow2.f32 %v7747_v4  ;;  %v2968_v28 = vmul.f32 %v8429_v48, %v11835_v32  ;;  %vm2973_vm8 = vweird.f32 %v8429_v48 }
 0x675   : > { %8434 = vrcp.f32 %v11897_v5  ;;  %v3032_v16 = vmul.f32 %v8431_v46, %v2839_v2  ;;  %vm2974_vm12 = vmor %vm2972_vm9, %vm2973_vm8  ;;  %v2930_v2 = vsel %vm2927_vm3, %v2929_v52, %v2925_v56  ;;  %v2993_v19 = vand.u32 2147483648, %v11897_v5  ;;  %v12080_v46 = vld [vmem:[%s15956_s2 + $0x70] sm:$0xff] }
 0x676   : > { %8436 = vtanh.f32 %v2778_v50  ;;  %v2969_v29 = vsub.f32 1.0, %v2968_v28  ;;  %v2991_v50 = vand.u32 2147483647, %v11897_v5  ;;  %v3029_v4 = vmul.f32 %v2930_v2, %v11658_v8  ;;  %vm11947_vm8 = vmor %vm2861_vm14, %vm2862_vm5  ;;  %v11988_v2 = vld [vmem:[%s15956_s2] sm:$0xff] }
 0x677   : > { %v2792_v3 = vpop.f32.mrf.mxu2  ;;  %8438 = vtanh.f32 %v11892_v40  ;;  %v11924_v49 = vadd.f32 %v3032_v16, %v3028_v35  ;;  %vm11955_vm9 = vmor %vm2937_vm7, %vm2938_vm1  ;;  %v2864_v8 = vsel %vm11947_vm8, %v11785_v38, %v11888_v39  ;;  %vm2987_vm5 = vweird.f32 %v11897_v5 }
 0x678   : > { %v2793_v30 = vadd.f32 %v2792_v3, %v16243_v23  ;;  %v2970_v31 = vmul.f32 %v8429_v48, %v2969_v29  ;;  %v2940_v27 = vsel %vm11955_vm9, %v11866_v7, %v2936_v21  ;;  %v2994_v29 = vor.u32 1.1754944e-38, %v2993_v19  ;;  %v12016_v21 = vld [vmem:[%s15956_s2 + $0x20] sm:$0xff]  ;;  %v12023_v19 = vld [vmem:[%s15956_s2 + $0x28] sm:$0xff] }
 0x679   : > { %v2944_v16 = vor.u32 1.1754944e-38, %v2943_v0  ;;  %vm2942_vm1 = vcmp.eq.f32.partialorder %v2941_v60, 8.507059e+37  ;;  %v12030_v0 = vld [vmem:[%s15956_s2 + $0x30] sm:$0xff]  ;;  %v12064_v60 = vld [vmem:[%s15956_s2 + $0x60] sm:$0xff] }
 0x67a   : > { %v8433_v18 = vpop.eup %8432  ;;  %v7748_v44 = vmul.f32 -1.442695, %v2793_v30  ;;  %v2971_v37 = vadd.f32 %v8429_v48, %v2970_v31 }
 0x67b   : > { %v8435_v15 = vpop.eup %8434  ;;  %v11926_v9 = vadd.f32 1.0, %v8433_v18  ;;  %v2945_v3 = vsel %vm2942_vm1, %v2944_v16, %v2940_v27 }
 0x67c   : > { %v8437_v26 = vpop.eup %8436  ;;  %8440 = vpow2.f32 %v7748_v44  ;;  %v2975_v1 = vsel %vm2974_vm12, %v8429_v48, %v2971_v37  ;;  %v2983_v25 = vmul.f32 %v8435_v15, %v11897_v5  ;;  %vm2988_vm6 = vweird.f32 %v8435_v15 }
 0x67d   : > { %v8439_v63 = vpop.eup %8438  ;;  %8442 = vrcp.f32 %v11926_v9  ;;  %v2980_v32 = vsel %vm2977_vm15, %v2979_v53, %v2975_v1  ;;  %v3033_v45 = vmul.f32 %v8437_v26, %v2854_v43  ;;  %v2865_v48 = vand.u32 2147483647, %v11759_v22  ;;  %vm2989_vm14 = vmor %vm2987_vm5, %vm2988_vm6  ;;  %v12056_v43 = vld [vmem:[%s15956_s2 + $0x58] sm:$0xff] }
 0x67e   : > { %8444 = vtanh.f32 %v2781_v34  ;;  %v11932_v55 = vmul.f32 %v8439_v63, %v2980_v32  ;;  %v2984_v61 = vsub.f32 1.0, %v2983_v25  ;;  %vm2992_vm12 = vcmp.eq.f32.partialorder %v2991_v50, 8.507059e+37 }
 0x67f   : > { %8446 = vtanh.f32 %v11924_v49  ;;  %v11966_v62 = vadd.f32 %v3033_v45, %v3029_v4  ;;  %vm2866_vm15 = vcmp.eq.f32.partialorder %v2865_v48, 8.507059e+37  ;;  %v3008_v23 = vand.u32 2147483648, %v11926_v9  ;;  %v12009_v45 = vld [vmem:[%s15956_s2 + $0x18] sm:$0xff]  ;;  %v12045_v4 = vld [vmem:[%s15956_s2 + $0x40] sm:$0xff] }
 0x680   : > { %3051 = vrot.lane.b32.xlu2 %v11932_v55, %s9204_s18  ;;  %v2985_v41 = vmul.f32 %v8435_v15, %v2984_v61  ;;  %v2869_v5 = vsel %vm2866_vm15, %v2868_v51, %v2864_v8  ;;  %v3006_v31 = vand.u32 2147483647, %v11926_v9  ;;  %v3030_v12 = vmul.f32 %v2945_v3, %v11671_v14  ;;  %v11995_v61 = vld [vmem:[%s15956_s2 + $0x8] sm:$0xff]  ;;  %v12087_v8 = vld [vmem:[%s15956_s2 + $0x78] sm:$0xff]  ;;  %v16250_v3 = vld [vmem:[#allocation36_spill] sm:$0xff] }
 0x681   : > { %vm3002_vm6 = vweird.f32 %v11926_v9  ;;  %v3009_v42 = vor.u32 1.1754944e-38, %v3008_v23  ;;  %vm15972_vm15 = vcmask 786048  }
 0x682   : > { %v8441_v17 = vpop.eup %8440  ;;  %v2986_v28 = vadd.f32 %v8435_v15, %v2985_v41  ;;  %vm3007_vm8 = vcmp.eq.f32.partialorder %v3006_v31, 8.507059e+37  ;;  %v12037_v41 = vld [vmem:[%s15956_s2 + $0x38] sm:$0xff] }
 0x683   : > { %v8443_v59 = vpop.eup %8442  ;;  %v2966_v58 = vadd.f32 1.0, %v8441_v17 }
 0x684   : > { %v8445_v20 = vpop.eup %8444  ;;  %v2990_v38 = vsel %vm2989_vm14, %v8435_v15, %v2986_v28  ;;  %v2998_v22 = vmul.f32 %v8443_v59, %v11926_v9  ;;  %vm3003_vm3 = vweird.f32 %v8443_v59 }
 0x685   : > { %v8447_v10 = vpop.eup %8446  ;;  %8448 = vrcp.f32 %v2966_v58  ;;  %v2995_v39 = vsel %vm2992_vm12, %v2994_v29, %v2990_v38  ;;  %v3034_v7 = vmul.f32 %v8445_v20, %v2869_v5  ;;  %vm3004_vm7 = vmor %vm3002_vm6, %vm3003_vm3  ;;  %v3023_v11 = vand.u32 2147483648, %v2966_v58 }
 0x686   : > { %v3044_v36 = vmul.f32 %v8447_v10, %v2995_v39  ;;  %v2999_v54 = vsub.f32 1.0, %v2998_v22  ;;  %8450 = vtanh.f32 %v11966_v62  ;;  %v3021_v9 = vand.u32 2147483647, %v2966_v58  ;;  %v16249_v22 = vld [vmem:[#allocation41_spill] sm:$0xff] }
 0x687   : > { %v11979_v56 = vadd.f32 %v3034_v7, %v3030_v12  ;;  %vm3017_vm5 = vweird.f32 %v2966_v58  ;;  %v3024_v26 = vor.u32 1.1754944e-38, %v3023_v11  ;;  %v16251_v7 = vld [vmem:[#allocation34_spill] sm:$0xff] }
 0x688   : > { %3053 = vrot.lane.b32.xlu1 %v3044_v36, %s9204_s18  ;;  %v3000_v30 = vmul.f32 %v8443_v59, %v2999_v54  ;;  %vm3022_vm12 = vcmp.eq.f32.partialorder %v3021_v9, 8.507059e+37 }
 0x689   : > { %8452 = vtanh.f32 %v11979_v56 }
 0x68a   : > { %v3001_v52 = vadd.f32 %v8443_v59, %v3000_v30 }
 0x68b   : > { %v8449_v35 = vpop.eup %8448 }
 0x68c   : > { %v3013_v18 = vmul.f32 %v8449_v35, %v2966_v58  ;;  %v3005_v57 = vsel %vm3004_vm7, %v8443_v59, %v3001_v52  ;;  %v8451_v34 = vpop.eup %8450  ;;  %vm3018_vm9 = vweird.f32 %v8449_v35 }
 0x68d   : > { %v3010_v44 = vsel %vm3007_vm8, %v3009_v42, %v3005_v57  ;;  %vm3019_vm14 = vmor %vm3017_vm5, %vm3018_vm9 }
 0x68e   : > { %v3014_v37 = vsub.f32 1.0, %v3013_v18  ;;  %v3045_v15 = vmul.f32 %v8451_v34, %v3010_v44 }
 0x68f   : > { %v8453_v25 = vpop.eup %8452 }
 0x690   : > { %3055 = vrot.lane.b32.xlu1 %v3045_v15, %s9204_s18  ;;  %v3015_v14 = vmul.f32 %v8449_v35, %v3014_v37 }
 0x692   : > { %v3016_v53 = vadd.f32 %v8449_v35, %v3015_v14 }
 0x694   : > { %v3020_v1 = vsel %vm3019_vm14, %v8449_v35, %v3016_v53 }
 0x695   : > { %v3025_v63 = vsel %vm3022_vm12, %v3024_v26, %v3020_v1 }
 0x696   : > { %v3046_v32 = vmul.f32 %v8453_v25, %v3025_v63  ;;  %v16253_v25 = vld [vmem:[#allocation43_spill] sm:$0xff] }
 0x698   : > { %3160 = vmatpush.msra.mxu3 %v3046_v32  ;;  %3057 = vrot.lane.b32.xlu1 %v3046_v32, %s9204_s18 }
 0x69a   : > { %3161 = vmatpush.msra.mxu3 %v3045_v15 }
 0x69c   : > { %3162 = vmatpush.msra.mxu3 %v3044_v36 }
 0x69e   : > { %3163 = vmatpush.msra.mxu3 %v11932_v55  ;;  %v12002_v55 = vld [vmem:[%s15956_s2 + $0x10] sm:$0xff] }
 0x69f   : > { %7749 = vmatmul.msk.f32.vlgmr.msra.gmra.mxu3 %vm607_vm0, %v11988_v2 }
 0x6a7   : > { %7750 = vmatmul.msk.f32.gmra.mxu3 %vm607_vm0, %v11995_v61 }
 0x6af   : > { %7751 = vmatmul.msk.f32.gmra.mxu3 %vm607_vm0, %v12002_v55 }
 0x6b7   : > { %7752 = vmatmul.msk.f32.gmra.mxu3 %vm607_vm0, %v12009_v45 }
 0x6bf   : > { %7753 = vmatmul.msk.f32.gmra.mxu3 %vm607_vm0, %v12016_v21 }
 0x6c7   : > { %7754 = vmatmul.msk.f32.gmra.mxu3 %vm607_vm0, %v12023_v19 }
 0x6cf   : > { %7755 = vmatmul.msk.f32.gmra.mxu3 %vm607_vm0, %v12030_v0 }
 0x6d7   : > { %7756 = vmatmul.msk.f32.gmra.mxu3 %vm607_vm0, %v12037_v41 }
 0x6da   : > { %v3052_v50 = vpop.permute.xlu2 %3051 }
 0x6db   : > { %3064 = vst.msk [vmem:[#allocation3] sm:$0xff] %vm15972_vm15, %v3052_v50 }
 0x6df   : > { %7757 = vmatmul.msk.f32.gmra.mxu3 %vm607_vm0, %v12045_v4 }
 0x6e7   : > { %7758 = vmatmul.msk.f32.gmra.mxu3 %vm607_vm0, %v11699_v13 }
 0x6ef   : > { %7759 = vmatmul.msk.f32.gmra.mxu3 %vm607_vm0, %v11706_v47  ;;  %v12072_v47 = vld [vmem:[%s15956_s2 + $0x68] sm:$0xff] }
 0x6f7   : > { %7760 = vmatmul.msk.f32.gmra.mxu3 %vm607_vm0, %v12056_v43 }
 0x6fa   : > { %v3054_v48 = vpop.permute.xlu1 %3053 }
 0x6fb   : > { %3065 = vst.msk [vmem:[#allocation3 + $0x8] sm:$0xff] %vm15972_vm15, %v3054_v48 }
 0x6ff   : > { %7761 = vmatmul.msk.f32.gmra.mxu3 %vm607_vm0, %v12064_v60 }
 0x702   : > { %v3056_v13 = vpop.permute.xlu1 %3055 }
 0x703   : > { %3066 = vst.msk [vmem:[#allocation3 + $0x10] sm:$0xff] %vm15972_vm15, %v3056_v13 }
 0x707   : > { %7762 = vmatmul.msk.f32.gmra.mxu3 %vm607_vm0, %v12072_v47 }
 0x70a   : > { %v3058_v17 = vpop.permute.xlu1 %3057 }
 0x70b   : > { %3067 = vst.msk [vmem:[#allocation3 + $0x18] sm:$0xff] %vm15972_vm15, %v3058_v17 }
 0x70f   : > { %7763 = vmatmul.msk.f32.gmra.mxu3 %vm607_vm0, %v12080_v46 }
 0x717   : > { %7764 = vmatmul.msk.f32.gmra.mxu3 %vm607_vm0, %v12087_v8 }
 0x722   : > { %v3165_v51 = vpop.f32.mrf.mxu3 }
 0x723   : > { %v3166_v39 = vadd.f32 %v3165_v51, %v10984_v24 }
 0x725   : > { %v7765_v54 = vmul.f32 -1.442695, %v3166_v39 }
 0x72a   : > { %v3168_v28 = vpop.f32.mrf.mxu3 }
 0x72b   : > { %v3169_v10 = vadd.f32 %v3168_v28, %v16249_v22 }
 0x72d   : > { %v7766_v5 = vmul.f32 -1.442695, %v3169_v10 }
 0x72f   : > { %8454 = vpow2.f32 %v7766_v5 }
 0x730   : > { %8456 = vpow2.f32 %v7765_v54 }
 0x732   : > { %v3171_v59 = vpop.f32.mrf.mxu3 }
 0x733   : > { %v3172_v23 = vadd.f32 %v3171_v59, %v16251_v7 }
 0x735   : > { %v7767_v12 = vmul.f32 -1.442695, %v3172_v23  ;;  %v8455_v35 = vpop.eup %8454 }
 0x736   : > { %v8457_v57 = vpop.eup %8456  ;;  %v12103_v34 = vadd.f32 1.0, %v8455_v35 }
 0x737   : > { %v12105_v15 = vadd.f32 1.0, %v8457_v57  ;;  %v16255_v57 = vld [vmem:[#allocation45_spill] sm:$0xff] }
 0x738   : > { %vm3249_vm1 = vweird.f32 %v12103_v34 }
 0x739   : > { %v3238_v23 = vand.u32 2147483647, %v12105_v15 }
 0x73a   : > { %v3174_v27 = vpop.f32.mrf.mxu3 }
 0x73b   : > { %v3175_v42 = vadd.f32 %v3174_v27, %v10969_v6 }
 0x73d   : > { %v7768_v44 = vmul.f32 -1.442695, %v3175_v42  ;;  %v3240_v42 = vand.u32 2147483648, %v12105_v15 }
 0x742   : > { %v3177_v58 = vpop.f32.mrf.mxu3 }
 0x743   : > { %v3178_v63 = vadd.f32 %v3177_v58, %v16253_v25 }
 0x745   : > { %v7769_v17 = vmul.f32 -1.442695, %v3178_v63 }
 0x74a   : > { %v3180_v29 = vpop.f32.mrf.mxu3 }
 0x74b   : > { %v3181_v36 = vadd.f32 %v3180_v29, %v16250_v3  ;;  %v16254_v3 = vld [vmem:[#allocation40_spill] sm:$0xff] }
 0x74d   : > { %v7770_v31 = vmul.f32 -1.442695, %v3181_v36 }
 0x74f   : > { %8458 = vpow2.f32 %v7770_v31 }
 0x750   : > { %8460 = vpow2.f32 %v7767_v12  ;;  %v3253_v12 = vand.u32 2147483647, %v12103_v34 }
 0x752   : > { %v3183_v20 = vpop.f32.mrf.mxu3  ;;  %vm12165_vm6 = vcmp.eq.f32.partialorder %v3253_v12, 8.507059e+37 }
 0x753   : > { %v3184_v52 = vadd.f32 %v3183_v20, %v10980_v33  ;;  %v16252_v33 = vld [vmem:[#allocation39_spill] sm:$0xff] }
 0x755   : > { %v7771_v18 = vmul.f32 -1.442695, %v3184_v52  ;;  %v8459_v37 = vpop.eup %8458 }
 0x756   : > { %v8461_v11 = vpop.eup %8460  ;;  %v12109_v9 = vadd.f32 1.0, %v8459_v37 }
 0x757   : > { %8462 = vpow2.f32 %v7771_v18  ;;  %v12114_v53 = vadd.f32 1.0, %v8461_v11  ;;  %v3255_v18 = vand.u32 2147483648, %v12103_v34 }
 0x758   : > { %8464 = vrcp.f32 %v12103_v34  ;;  %vm3325_vm14 = vweird.f32 %v12109_v9 }
 0x759   : > { %8466 = vpow2.f32 %v7768_v44  ;;  %vm3264_vm8 = vweird.f32 %v12114_v53 }
 0x75a   : > { %v3186_v16 = vpop.f32.mrf.mxu3  ;;  %8468 = vrcp.f32 %v12105_v15 }
 0x75b   : > { %v3187_v14 = vadd.f32 %v3186_v16, %v16252_v33  ;;  %8470 = vrcp.f32 %v12109_v9 }
 0x75c   : > { %8472 = vrcp.f32 %v12114_v53 }
 0x75d   : > { %v7772_v26 = vmul.f32 -1.442695, %v3187_v14  ;;  %v8463_v1 = vpop.eup %8462  ;;  %v16256_v14 = vld [vmem:[#allocation42_spill] sm:$0xff] }
 0x75e   : > { %v12118_v32 = vpop.eup %8464  ;;  %v12121_v48 = vadd.f32 1.0, %v8463_v1  ;;  %v3270_v1 = vand.u32 2147483648, %v12114_v53 }
 0x75f   : > { %v8467_v50 = vpop.eup %8466  ;;  %8474 = vpow2.f32 %v7772_v26  ;;  %v3245_v51 = vmul.f32 %v12118_v32, %v12103_v34  ;;  %vm3250_vm3 = vweird.f32 %v12118_v32 }
 0x760   : > { %v12123_v13 = vpop.eup %8468  ;;  %v12127_v28 = vadd.f32 1.0, %v8467_v50  ;;  %8476 = vrcp.f32 %v12121_v48  ;;  %vm12180_vm7 = vmor %vm3249_vm1, %vm3250_vm3 }
 0x761   : > { %v12129_v27 = vpop.eup %8470  ;;  %v3230_v58 = vmul.f32 %v12123_v13, %v12105_v15  ;;  %8478 = vpow2.f32 %v7769_v17  ;;  %v3246_v16 = vsub.f32 1.0, %v3245_v51 }
 0x762   : > { %v12091_v38 = vpop.f32.mrf.mxu3  ;;  %v12134_v29 = vpop.eup %8472  ;;  %8480 = vrcp.f32 %v12127_v28  ;;  %v3321_v22 = vmul.f32 %v12129_v27, %v12109_v9  ;;  %vm3326_vm9 = vweird.f32 %v12129_v27  ;;  %vm3279_vm3 = vweird.f32 %v12127_v28 }
 0x763   : > { %v3231_v10 = vsub.f32 1.0, %v3230_v58  ;;  %v3260_v39 = vmul.f32 %v12134_v29, %v12114_v53  ;;  %v3247_v31 = vmul.f32 %v12118_v32, %v3246_v16  ;;  %vm3265_vm5 = vweird.f32 %v12134_v29  ;;  %vm12206_vm1 = vmor %vm3325_vm14, %vm3326_vm9 }
 0x764   : > { %v3322_v7 = vsub.f32 1.0, %v3321_v22 }
 0x765   : > { %v8475_v20 = vpop.eup %8474  ;;  %v3261_v11 = vsub.f32 1.0, %v3260_v39  ;;  %v3232_v33 = vmul.f32 %v12123_v13, %v3231_v10  ;;  %v3248_v51 = vadd.f32 %v12118_v32, %v3247_v31  ;;  %v3268_v10 = vand.u32 2147483647, %v12114_v53 }
 0x766   : > { %v12141_v5 = vadd.f32 1.0, %v8475_v20  ;;  %v12144_v54 = vpop.eup %8476  ;;  %v3323_v17 = vmul.f32 %v12129_v27, %v3322_v7  ;;  %v3256_v20 = vor.u32 1.1754944e-38, %v3255_v18  ;;  %v16261_v18 = vld [vmem:[#allocation70_spill] sm:$0xff] }
 0x767   : > { %v8479_v35 = vpop.eup %8478  ;;  %v3336_v25 = vmul.f32 %v12144_v54, %v12121_v48  ;;  %v12174_v16 = vadd.f32 %v12123_v13, %v3232_v33  ;;  %v3262_v22 = vmul.f32 %v12134_v29, %v3261_v11  ;;  %v3252_v7 = vsel %vm12180_vm7, %v12118_v32, %v3248_v51 }
 0x768   : > { %v12153_v37 = vpop.eup %8480  ;;  %8482 = vrcp.f32 %v12141_v5  ;;  %v12171_v58 = vadd.f32 1.0, %v8479_v35  ;;  %v3324_v31 = vadd.f32 %v12129_v27, %v3323_v17  ;;  %v3331_v35 = vand.u32 2147483648, %v12109_v9 }
 0x769   : > { %v3337_v39 = vsub.f32 1.0, %v3336_v25  ;;  %v3263_v32 = vadd.f32 %v12134_v29, %v3262_v22  ;;  %vm12199_vm12 = vcmp.eq.f32.partialorder %v3268_v10, 8.507059e+37  ;;  %v3285_v33 = vand.u32 2147483648, %v12127_v28  ;;  %v16266_v25 = vld [vmem:[#allocation47_spill] sm:$0xff] }
 0x76a   : > { %v12097_v30 = vpop.f32.mrf.mxu3  ;;  %vm3280_vm9 = vweird.f32 %v12153_v37 }
 0x76b   : > { %v3193_v26 = vadd.f32 %v12097_v30, %v16256_v14  ;;  %v3275_v30 = vmul.f32 %v12153_v37, %v12127_v28 }
 0x76e   : > { %v12191_v34 = vpop.eup %8482 }
 0x76f   : > { %v3351_v51 = vmul.f32 %v12191_v34, %v12141_v5 }
 0x772   : > { %v12101_v24 = vpop.f32.mrf.mxu3 }
 0x77a   : > { %v12111_v6 = vpop.f32.mrf.mxu3 }
 0x782   : > { %v3201_v59 = vpop.f32.mrf.mxu3 }
 0x783   : > { %v3202_v36 = vadd.f32 %v3201_v59, %v16254_v3  ;;  %v12236_v3 = vor.u32 1.1754944e-38, %v3285_v33 }
 0x785   : > { %v7773_v63 = vmul.f32 -1.442695, %v3202_v36  ;;  %v3271_v36 = vor.u32 1.1754944e-38, %v3270_v1  ;;  %v3338_v1 = vmul.f32 %v12144_v54, %v3337_v39  ;;  %v3332_v39 = vor.u32 1.1754944e-38, %v3331_v35 }
 0x78a   : > { %v3204_v52 = vpop.f32.mrf.mxu3 }
 0x78b   : > { %v3205_v44 = vadd.f32 %v3204_v52, %v16255_v57  ;;  %v3276_v52 = vsub.f32 1.0, %v3275_v30  ;;  %v3328_v30 = vsel %vm12206_vm1, %v12129_v27, %v3324_v31  ;;  %v3339_v31 = vadd.f32 %v12144_v54, %v3338_v1 }
 0x78d   : > { %v7774_v50 = vmul.f32 -1.442695, %v3205_v44  ;;  %v3329_v44 = vand.u32 2147483647, %v12109_v9  ;;  %v3257_v9 = vsel %vm12165_vm6, %v3256_v20, %v3252_v7  ;;  %vm12227_vm6 = vmor %vm3264_vm8, %vm3265_vm5  ;;  %v3277_v59 = vmul.f32 %v12153_v37, %v3276_v52 }
 0x78e   : > { %v3283_v20 = vand.u32 2147483647, %v12127_v28  ;;  %v3267_v27 = vsel %vm12227_vm6, %v12134_v29, %v3263_v32  ;;  %vm3341_vm8 = vweird.f32 %v12144_v54  ;;  %vm3340_vm5 = vweird.f32 %v12121_v48  ;;  %vm12279_vm6 = vmor %vm3279_vm3, %vm3280_vm9 }
 0x78f   : > { %8484 = vpow2.f32 %v7774_v50  ;;  %vm3330_vm7 = vcmp.eq.f32.partialorder %v3329_v44, 8.507059e+37  ;;  %v3346_v29 = vand.u32 2147483648, %v12121_v48  ;;  %v16269_v44 = vld [vmem:[#allocation38_spill] sm:$0xff]  ;;  %vm12255_vm14 = vmor %vm3340_vm5, %vm3341_vm8  ;;  %vm3356_vm8 = vweird.f32 %v12191_v34 }
 0x790   : > { %8486 = vtanh.f32 %v3193_v26  ;;  %v3333_v53 = vsel %vm3330_vm7, %v3332_v39, %v3328_v30  ;;  %vm12261_vm1 = vcmp.eq.f32.partialorder %v3283_v20, 8.507059e+37  ;;  %v16277_v20 = vld [vmem:[#allocation72_spill] sm:$0xff]  ;;  %vm3234_vm9 = vweird.f32 %v12105_v15 }
 0x791   : > { %8488 = vpow2.f32 %v7773_v63  ;;  %v3196_v63 = vadd.f32 %v12101_v24, %v16266_v25  ;;  %v3446_v1 = vmul.f32 %v3333_v53, %v11924_v49  ;;  %vm3310_vm5 = vweird.f32 %v12171_v58 }
 0x792   : > { %v3207_v12 = vpop.f32.mrf.mxu3  ;;  %8490 = vrcp.f32 %v12171_v58 }
 0x793   : > { %v3208_v57 = vadd.f32 %v3207_v12, %v16261_v18  ;;  %v3352_v12 = vsub.f32 1.0, %v3351_v51  ;;  %v16274_v51 = vld [vmem:[#allocation71_spill] sm:$0xff] }
 0x794   : > { %v3199_v30 = vadd.f32 %v12111_v6, %v16274_v51  ;;  %v3347_v6 = vor.u32 1.1754944e-38, %v3346_v29 }
 0x795   : > { %v8485_v14 = vpop.eup %8484  ;;  %v7775_v50 = vmul.f32 -1.442695, %v3208_v57  ;;  %v3278_v57 = vadd.f32 %v12153_v37, %v3277_v59  ;;  %v3353_v49 = vmul.f32 %v12191_v34, %v3352_v12 }
 0x796   : > { %v8487_v17 = vpop.eup %8486  ;;  %v12221_v22 = vadd.f32 1.0, %v8485_v14  ;;  %v3316_v14 = vand.u32 2147483648, %v12171_v58 }
 0x797   : > { %v8489_v10 = vpop.eup %8488  ;;  %8492 = vpow2.f32 %v7775_v50  ;;  %v3450_v52 = vmul.f32 %v8487_v17, %v3257_v9  ;;  %v3344_v9 = vand.u32 2147483647, %v12121_v48  ;;  %v3272_v50 = vsel %vm12199_vm12, %v3271_v36, %v3267_v27 }
 0x798   : > { %8494 = vrcp.f32 %v12221_v22  ;;  %v12239_v7 = vpop.eup %8490  ;;  %v12244_v35 = vadd.f32 1.0, %v8489_v10  ;;  %v3343_v17 = vsel %vm12255_vm14, %v12144_v54, %v3339_v31  ;;  %vm3235_vm12 = vweird.f32 %v12123_v13 }
 0x799   : > { %8496 = vtanh.f32 %v3196_v63  ;;  %v3306_v33 = vmul.f32 %v12239_v7, %v12171_v58  ;;  %v12273_v48 = vadd.f32 %v3450_v52, %v3446_v1  ;;  %v3282_v24 = vsel %vm12279_vm6, %v12153_v37, %v3278_v57 }
 0x79a   : > { %v3210_v18 = vpop.f32.mrf.mxu3  ;;  %8498 = vrcp.f32 %v12244_v35  ;;  %vm3311_vm3 = vweird.f32 %v12239_v7  ;;  %v3190_v27 = vadd.f32 %v12091_v38, %v16277_v20  ;;  %vm3345_vm7 = vcmp.eq.f32.partialorder %v3344_v9, 8.507059e+37 }
 0x79b   : > { %v3211_v32 = vadd.f32 %v3210_v18, %v16269_v44  ;;  %v3307_v28 = vsub.f32 1.0, %v3306_v33  ;;  %v3348_v53 = vsel %vm3345_vm7, %v3347_v6, %v3343_v17  ;;  %v3354_v12 = vadd.f32 %v12191_v34, %v3353_v49 }
 0x79c   : > { %v3411_v52 = vand.u32 2147483648, %v12221_v22  ;;  %v3361_v38 = vand.u32 2147483648, %v12141_v5  ;;  %v3409_v29 = vand.u32 2147483647, %v12221_v22  ;;  %vm3355_vm6 = vweird.f32 %v12141_v5 }
 0x79d   : > { %v8493_v63 = vpop.eup %8492  ;;  %v7776_v10 = vmul.f32 -1.442695, %v3211_v32  ;;  %v3308_v44 = vmul.f32 %v12239_v7, %v3307_v28  ;;  %v3447_v32 = vmul.f32 %v3348_v53, %v11966_v62  ;;  %v3359_v33 = vand.u32 2147483647, %v12141_v5  ;;  %vm12311_vm7 = vmor %vm3355_vm6, %vm3356_vm8 }
 0x79e   : > { %v8495_v39 = vpop.eup %8494  ;;  %v12284_v54 = vadd.f32 1.0, %v8493_v63  ;;  %v3287_v9 = vsel %vm12261_vm1, %v12236_v3, %v3282_v24  ;;  %vm3405_vm15 = vweird.f32 %v12221_v22  ;;  %v3358_v62 = vsel %vm12311_vm7, %v12191_v34, %v3354_v12 }
 0x79f   : > { %v8497_v36 = vpop.eup %8496  ;;  %v3401_v59 = vmul.f32 %v8495_v39, %v12221_v22  ;;  %8500 = vpow2.f32 %v7776_v10  ;;  %vm3406_vm14 = vweird.f32 %v8495_v39  ;;  %v3412_v51 = vor.u32 1.1754944e-38, %v3411_v52 }
 0x7a0   : > { %8502 = vrcp.f32 %v12284_v54  ;;  %v3451_v37 = vmul.f32 %v8497_v36, %v3272_v50  ;;  %v12303_v57 = vpop.eup %8498  ;;  %vm3407_vm8 = vmor %vm3405_vm15, %vm3406_vm14  ;;  %v3362_v10 = vor.u32 1.1754944e-38, %v3361_v38  ;;  %vm3410_vm6 = vcmp.eq.f32.partialorder %v3409_v29, 8.507059e+37 }
 0x7a1   : > { %8504 = vtanh.f32 %v3199_v30  ;;  %v3402_v31 = vsub.f32 1.0, %v3401_v59  ;;  %v3309_v22 = vadd.f32 %v12239_v7, %v3308_v44  ;;  %vm3360_vm1 = vcmp.eq.f32.partialorder %v3359_v33, 8.507059e+37  ;;  %vm12338_vm15 = vmor %vm3234_vm9, %vm3235_vm12 }
 0x7a2   : > { %8506 = vtanh.f32 %v12273_v48  ;;  %v12319_v17 = vadd.f32 %v3451_v37, %v3447_v32  ;;  %v3363_v36 = vsel %vm3360_vm1, %v3362_v10, %v3358_v62  ;;  %v3386_v24 = vmul.f32 %v12303_v57, %v12244_v35  ;;  %vm12349_vm14 = vmor %vm3310_vm5, %vm3311_vm3 }
 0x7a3   : > { %v3403_v18 = vmul.f32 %v8495_v39, %v3402_v31  ;;  %8508 = vtanh.f32 %v3190_v27  ;;  %v3314_v59 = vand.u32 2147483647, %v12171_v58  ;;  %v3426_v20 = vand.u32 2147483648, %v12284_v54 }
 0x7a4   : > { %v3237_v31 = vsel %vm12338_vm15, %v12123_v13, %v12174_v16  ;;  %v3424_v12 = vand.u32 2147483647, %v12284_v54  ;;  %vm3239_vm9 = vcmp.eq.f32.partialorder %v3238_v23, 8.507059e+37  ;;  %v3241_v52 = vor.u32 1.1754944e-38, %v3240_v42 }
 0x7a5   : > { %v8501_v26 = vpop.eup %8500  ;;  %v3404_v63 = vadd.f32 %v8495_v39, %v3403_v18  ;;  %v3313_v38 = vsel %vm12349_vm14, %v12239_v7, %v3309_v22  ;;  %v3448_v18 = vmul.f32 %v3363_v36, %v11979_v56  ;;  %v3317_v13 = vor.u32 1.1754944e-38, %v3316_v14 }
 0x7a6   : > { %v8503_v50 = vpop.eup %8502  ;;  %v12324_v5 = vadd.f32 1.0, %v8501_v26  ;;  %vm3420_vm3 = vweird.f32 %v12284_v54  ;;  %v3387_v29 = vsub.f32 1.0, %v3386_v24  ;;  %v3242_v32 = vsel %vm3239_vm9, %v3241_v52, %v3237_v31  ;;  %v16284_v31 = vld [vmem:[#allocation46_spill] sm:$0xff] }
 0x7a7   : > { %v8505_v30 = vpop.eup %8504  ;;  %v3408_v49 = vsel %vm3407_vm8, %v8495_v39, %v3404_v63  ;;  %v3416_v3 = vmul.f32 %v8503_v50, %v12284_v54  ;;  %vm3421_vm12 = vweird.f32 %v8503_v50  ;;  %vm3315_vm5 = vcmp.eq.f32.partialorder %v3314_v59, 8.507059e+37 }
 0x7a8   : > { %v8507_v25 = vpop.eup %8506  ;;  %8510 = vrcp.f32 %v12324_v5  ;;  %v3413_v11 = vsel %vm3410_vm6, %v3412_v51, %v3408_v49  ;;  %v3452_v28 = vmul.f32 %v8505_v30, %v3287_v9  ;;  %vm3422_vm7 = vmor %vm3420_vm3, %vm3421_vm12  ;;  %v3427_v15 = vor.u32 1.1754944e-38, %v3426_v20 }
 0x7a9   : > { %v12330_v34 = vmul.f32 %v8507_v25, %v3413_v11  ;;  %v3417_v6 = vsub.f32 1.0, %v3416_v3  ;;  %8512 = vtanh.f32 %v12319_v17  ;;  %v8509_v27 = vpop.eup %8508  ;;  %v3318_v42 = vsel %vm3315_vm5, %v3317_v13, %v3313_v38  ;;  %v16286_v13 = vld [vmem:[#allocation53_spill] sm:$0xff] }
 0x7aa   : > { %v12371_v23 = vadd.f32 %v3452_v28, %v3448_v18  ;;  %vm3425_vm8 = vcmp.eq.f32.partialorder %v3424_v12, 8.507059e+37  ;;  %v3449_v26 = vmul.f32 %v8509_v27, %v3242_v32  ;;  %v3388_v54 = vmul.f32 %v12303_v57, %v3387_v29  ;;  %v16285_v12 = vld [vmem:[#allocation74_spill] sm:$0xff] }
 0x7ab   : > { %3471 = vrot.lane.b32.xlu1 %v12330_v34, %s9203_s17  ;;  %v3418_v37 = vmul.f32 %v8503_v50, %v3417_v6  ;;  %v3445_v9 = vmul.f32 %v3318_v42, %v11892_v40  ;;  %v3441_v63 = vand.u32 2147483648, %v12324_v5  ;;  %vm3435_vm1 = vweird.f32 %v12324_v5  ;;  %v16288_v42 = vld [vmem:[#allocation51_spill] sm:$0xff] }
 0x7ac   : > { %8514 = vtanh.f32 %v12371_v23  ;;  %v3389_v10 = vadd.f32 %v12303_v57, %v3388_v54  ;;  %vm3391_vm15 = vweird.f32 %v12303_v57  ;;  %v3396_v49 = vand.u32 2147483648, %v12244_v35 }
 0x7ad   : > { %v3419_v16 = vadd.f32 %v8503_v50, %v3418_v37  ;;  %v12380_v51 = vadd.f32 %v3449_v26, %v3445_v9  ;;  %v3442_v40 = vor.u32 1.1754944e-38, %v3441_v63  ;;  %vm3390_vm9 = vweird.f32 %v12244_v35  ;;  %v16289_v9 = vld [vmem:[#allocation49_spill] sm:$0xff] }
 0x7ae   : > { %v8511_v44 = vpop.eup %8510  ;;  %v3394_v25 = vand.u32 2147483647, %v12244_v35  ;;  %vm3392_vm3 = vmor %vm3390_vm9, %vm3391_vm15  ;;  %v3397_v6 = vor.u32 1.1754944e-38, %v3396_v49  ;;  %v3927_v35 = vld [vmem:[%s15960_s6 + $0x38] sm:$0xff] }
 0x7af   : > { %v3431_v33 = vmul.f32 %v8511_v44, %v12324_v5  ;;  %v3423_v7 = vsel %vm3422_vm7, %v8503_v50, %v3419_v16  ;;  %v8513_v56 = vpop.eup %8512  ;;  %vm3436_vm6 = vweird.f32 %v8511_v44  ;;  %v3439_v50 = vand.u32 2147483647, %v12324_v5 }
 0x7b0   : > { %v3428_v58 = vsel %vm3425_vm8, %v3427_v15, %v3423_v7  ;;  %vm3437_vm14 = vmor %vm3435_vm1, %vm3436_vm6  ;;  %8516 = vtanh.f32 %v12380_v51  ;;  %v3393_v36 = vsel %vm3392_vm3, %v12303_v57, %v3389_v10  ;;  %vm3395_vm5 = vcmp.eq.f32.partialorder %v3394_v25, 8.507059e+37  ;;  %v3921_v57 = vld [vmem:[%s15960_s6 + $0x8] sm:$0xff] }
 0x7b1   : > { %v3432_v14 = vsub.f32 1.0, %v3431_v33  ;;  %v3463_v1 = vmul.f32 %v8513_v56, %v3428_v58  ;;  %vm3440_vm12 = vcmp.eq.f32.partialorder %v3439_v50, 8.507059e+37  ;;  %v3398_v24 = vsel %vm3395_vm5, %v3397_v6, %v3393_v36  ;;  %v16291_v36 = vld [vmem:[#allocation48_spill] sm:$0xff] }
 0x7b2   : > { %v8515_v22 = vpop.eup %8514  ;;  %vm15973_vm7 = vcmask 917248  }
 0x7b3   : > { %3473 = vrot.lane.b32.xlu2 %v3463_v1, %s9203_s17  ;;  %v3433_v62 = vmul.f32 %v8511_v44, %v3432_v14 }
 0x7b5   : > { %v3434_v30 = vadd.f32 %v8511_v44, %v3433_v62  ;;  %v16290_v62 = vld [vmem:[#allocation44_spill] sm:$0xff] }
 0x7b6   : > { %v8517_v39 = vpop.eup %8516 }
 0x7b7   : > { %v3438_v3 = vsel %vm3437_vm14, %v8511_v44, %v3434_v30  ;;  %v3461_v59 = vmul.f32 %v8517_v39, %v3398_v24  ;;  %v16287_v44 = vld [vmem:[#allocation73_spill] sm:$0xff] }
 0x7b8   : > { %v3443_v11 = vsel %vm3440_vm12, %v3442_v40, %v3438_v3 }
 0x7b9   : > { %v3464_v5 = vmul.f32 %v8515_v22, %v3443_v11 }
 0x7bb   : > { %3578 = vmatpush.msra.mxu0 %v3464_v5  ;;  %3475 = vrot.lane.b32.xlu1 %v3464_v5, %s9203_s17 }
 0x7bd   : > { %3579 = vmatpush.msra.mxu0 %v3463_v1 }
 0x7bf   : > { %3580 = vmatpush.msra.mxu0 %v12330_v34 }
 0x7c1   : > { %3581 = vmatpush.msra.mxu0 %v3461_v59 }
 0x7c2   : > { %7777 = vmatmul.msk.f32.vlgmr.msra.gmra.mxu0 %vm607_vm0, %v11988_v2  ;;  %v3924_v2 = vld [vmem:[%s15960_s6 + $0x20] sm:$0xff] }
 0x7c3   : > { %3469 = vrot.lane.b32.xlu1 %v3461_v59, %s9203_s17 }
 0x7ca   : > { %7778 = vmatmul.msk.f32.gmra.mxu0 %vm607_vm0, %v11995_v61  ;;  %v3933_v61 = vld [vmem:[%s15960_s6 + $0x68] sm:$0xff] }
 0x7cb   : > { %3993 = vperm.xlu1 %8068, %v3927_v35  }
 0x7d2   : > { %7779 = vmatmul.msk.f32.gmra.mxu0 %vm607_vm0, %v12002_v55  ;;  %v3930_v55 = vld [vmem:[%s15960_s6 + $0x50] sm:$0xff] }
 0x7d3   : > { %3963 = vperm.xlu1 %8068, %v3921_v57  }
 0x7da   : > { %7780 = vmatmul.msk.f32.gmra.mxu0 %vm607_vm0, %v12009_v45  ;;  %v9142_v45 = vld [vmem:[%s15956_s2 + $0x48] sm:$0xff] }
 0x7db   : > { %3978 = vperm.xlu1 %8068, %v3924_v2  }
 0x7e2   : > { %7781 = vmatmul.msk.f32.gmra.mxu0 %vm607_vm0, %v12016_v21 }
 0x7e3   : > { %4023 = vperm.xlu1 %8068, %v3933_v61  }
 0x7ea   : > { %7782 = vmatmul.msk.f32.gmra.mxu0 %vm607_vm0, %v12023_v19  ;;  %v9143_v19 = vld [vmem:[%s15956_s2 + $0x50] sm:$0xff] }
 0x7eb   : > { %4008 = vperm.xlu1 %8068, %v3930_v55  }
 0x7f2   : > { %7783 = vmatmul.msk.f32.gmra.mxu0 %vm607_vm0, %v12030_v0 }
 0x7fa   : > { %7784 = vmatmul.msk.f32.gmra.mxu0 %vm607_vm0, %v12037_v41 }
 0x802   : > { %7785 = vmatmul.msk.f32.gmra.mxu0 %vm607_vm0, %v12045_v4 }
 0x80a   : > { %7786 = vmatmul.msk.f32.gmra.mxu0 %vm607_vm0, %v9142_v45 }
 0x80d   : > { %v3474_v21 = vpop.permute.xlu2 %3473 }
 0x80e   : > { %3484 = vst.msk [vmem:[#allocation3 + $0x10] sm:$0xff] %vm15973_vm7, %v3474_v21 }
 0x812   : > { %7787 = vmatmul.msk.f32.gmra.mxu0 %vm607_vm0, %v9143_v19 }
 0x81a   : > { %7788 = vmatmul.msk.f32.gmra.mxu0 %vm607_vm0, %v12056_v43 }
 0x81d   : > { %v3472_v0 = vpop.permute.xlu1 %3471 }
 0x81e   : > { %3483 = vst.msk [vmem:[#allocation3 + $0x8] sm:$0xff] %vm15973_vm7, %v3472_v0 }
 0x822   : > { %7789 = vmatmul.msk.f32.gmra.mxu0 %vm607_vm0, %v12064_v60 }
 0x82a   : > { %7790 = vmatmul.msk.f32.gmra.mxu0 %vm607_vm0, %v12072_v47 }
 0x82d   : > { %v3476_v41 = vpop.permute.xlu1 %3475 }
 0x82e   : > { %3485 = vst.msk [vmem:[#allocation3 + $0x18] sm:$0xff] %vm15973_vm7, %v3476_v41 }
 0x832   : > { %7791 = vmatmul.msk.f32.gmra.mxu0 %vm607_vm0, %v12080_v46 }
 0x835   : > { %v3470_v4 = vpop.permute.xlu1 %3469 }
 0x836   : > { %3482 = vst.msk [vmem:[#allocation3] sm:$0xff] %vm15973_vm7, %v3470_v4 }
 0x83a   : > { %7792 = vmatmul.msk.f32.gmra.mxu0 %vm607_vm0, %v12087_v8 }
 0x83f   : > { %v3583_v43 = vpop.f32.mrf.mxu0 }
 0x840   : > { %v3584_v16 = vadd.f32 %v3583_v43, %v16286_v13 }
 0x842   : > { %v7793_v29 = vmul.f32 -1.442695, %v3584_v16  ;;  %v16294_v16 = vld [vmem:[#allocation76_spill] sm:$0xff] }
 0x847   : > { %v3586_v34 = vpop.f32.mrf.mxu0 }
 0x848   : > { %v3587_v37 = vadd.f32 %v3586_v34, %v16284_v31 }
 0x84a   : > { %v7794_v46 = vmul.f32 -1.442695, %v3587_v37  ;;  %v16293_v37 = vld [vmem:[#allocation50_spill] sm:$0xff] }
 0x84c   : > { %8518 = vpow2.f32 %v7794_v46 }
 0x84f   : > { %v3589_v28 = vpop.f32.mrf.mxu0 }
 0x850   : > { %v3590_v32 = vadd.f32 %v3589_v28, %v16287_v44  ;;  %v16292_v28 = vld [vmem:[#allocation77_spill] sm:$0xff] }
 0x852   : > { %v8519_v15 = vpop.eup %8518  ;;  %v7795_v56 = vmul.f32 -1.442695, %v3590_v32 }
 0x853   : > { %v12455_v26 = vadd.f32 1.0, %v8519_v15 }
 0x855   : > { %vm3667_vm8 = vweird.f32 %v12455_v26  ;;  %v3671_v31 = vand.u32 2147483647, %v12455_v26 }
 0x857   : > { %v3592_v20 = vpop.f32.mrf.mxu0  ;;  %vm12536_vm9 = vcmp.eq.f32.partialorder %v3671_v31, 8.507059e+37 }
 0x858   : > { %v3593_v63 = vadd.f32 %v3592_v20, %v16289_v9 }
 0x85a   : > { %v7796_v40 = vmul.f32 -1.442695, %v3593_v63 }
 0x85f   : > { %v3595_v60 = vpop.f32.mrf.mxu0 }
 0x860   : > { %v3596_v6 = vadd.f32 %v3595_v60, %v16291_v36 }
 0x862   : > { %v7797_v35 = vmul.f32 -1.442695, %v3596_v6 }
 0x867   : > { %v3598_v27 = vpop.f32.mrf.mxu0 }
 0x868   : > { %v3599_v52 = vadd.f32 %v3598_v27, %v16285_v12 }
 0x86a   : > { %v7798_v18 = vmul.f32 -1.442695, %v3599_v52 }
 0x86c   : > { %8520 = vpow2.f32 %v7798_v18 }
 0x86d   : > { %8522 = vpow2.f32 %v7793_v29 }
 0x86e   : > { %8524 = vpow2.f32 %v7795_v56 }
 0x86f   : > { %v3601_v53 = vpop.f32.mrf.mxu0  ;;  %8526 = vrcp.f32 %v12455_v26 }
 0x870   : > { %v3602_v33 = vadd.f32 %v3601_v53, %v16288_v42  ;;  %v3673_v42 = vand.u32 2147483648, %v12455_v26 }
 0x872   : > { %v8521_v7 = vpop.eup %8520  ;;  %v7799_v58 = vmul.f32 -1.442695, %v3602_v33 }
 0x873   : > { %v12459_v1 = vadd.f32 1.0, %v8521_v7  ;;  %v8523_v54 = vpop.eup %8522 }
 0x874   : > { %8528 = vpow2.f32 %v7799_v58  ;;  %v12465_v30 = vadd.f32 1.0, %v8523_v54  ;;  %v8525_v10 = vpop.eup %8524 }
 0x875   : > { %8530 = vrcp.f32 %v12459_v1  ;;  %v12469_v3 = vpop.eup %8526  ;;  %v12474_v5 = vadd.f32 1.0, %v8525_v10  ;;  %v3749_v32 = vand.u32 2147483648, %v12459_v1  ;;  %vm3743_vm15 = vweird.f32 %v12459_v1 }
 0x876   : > { %8532 = vrcp.f32 %v12465_v30  ;;  %v3663_v24 = vmul.f32 %v12469_v3, %v12455_v26  ;;  %vm3668_vm6 = vweird.f32 %v12469_v3  ;;  %v3747_v56 = vand.u32 2147483647, %v12459_v1 }
 0x877   : > { %v3604_v47 = vpop.f32.mrf.mxu0  ;;  %8534 = vpow2.f32 %v7796_v40  ;;  %vm12524_vm14 = vmor %vm3667_vm8, %vm3668_vm6  ;;  %v3658_v54 = vand.u32 2147483648, %v12465_v30  ;;  %v3750_v40 = vor.u32 1.1754944e-38, %v3749_v32  ;;  %v3686_v36 = vand.u32 2147483647, %v12474_v5 }
 0x878   : > { %v3605_v50 = vadd.f32 %v3604_v47, %v16290_v62  ;;  %v3664_v55 = vsub.f32 1.0, %v3663_v24  ;;  %vm3748_vm3 = vcmp.eq.f32.partialorder %v3747_v56, 8.507059e+37  ;;  %vm3682_vm5 = vweird.f32 %v12474_v5 }
 0x879   : > { %vm12574_vm6 = vcmp.eq.f32.partialorder %v3686_v36, 8.507059e+37 }
 0x87a   : > { %v7800_v25 = vmul.f32 -1.442695, %v3605_v50  ;;  %v8529_v22 = vpop.eup %8528  ;;  %v3665_v34 = vmul.f32 %v12469_v3, %v3664_v55  ;;  %v3688_v55 = vand.u32 2147483648, %v12474_v5 }
 0x87b   : > { %v12471_v11 = vpop.eup %8530  ;;  %v12481_v59 = vadd.f32 1.0, %v8529_v22  ;;  %v3674_v22 = vor.u32 1.1754944e-38, %v3673_v42 }
 0x87c   : > { %8536 = vpow2.f32 %v7800_v25  ;;  %v3739_v39 = vmul.f32 %v12471_v11, %v12459_v1  ;;  %v12484_v2 = vpop.eup %8532  ;;  %vm3744_vm1 = vweird.f32 %v12471_v11  ;;  %v3666_v46 = vadd.f32 %v12469_v3, %v3665_v34 }
 0x87d   : > { %8538 = vrcp.f32 %v12474_v5  ;;  %v8535_v61 = vpop.eup %8534  ;;  %v3648_v19 = vmul.f32 %v12484_v2, %v12465_v30  ;;  %vm12531_vm12 = vmor %vm3743_vm15, %vm3744_vm1  ;;  %v3762_v58 = vand.u32 2147483647, %v12481_v59 }
 0x87e   : > { %v3740_v45 = vsub.f32 1.0, %v3739_v39  ;;  %8540 = vrcp.f32 %v12481_v59  ;;  %v12491_v41 = vadd.f32 1.0, %v8535_v61  ;;  %v3670_v1 = vsel %vm12524_vm14, %v12469_v3, %v3666_v46  ;;  %v16301_v39 = vld [vmem:[#allocation54_spill] sm:$0xff] }
 0x87f   : > { %v12450_v38 = vpop.f32.mrf.mxu0  ;;  %8542 = vpow2.f32 %v7797_v35  ;;  %v3649_v27 = vsub.f32 1.0, %v3648_v19  ;;  %v16302_v19 = vld [vmem:[#allocation52_spill] sm:$0xff] }
 0x880   : > { %v3741_v4 = vmul.f32 %v12471_v11, %v3740_v45  ;;  %8544 = vrcp.f32 %v12491_v41  ;;  %vm3697_vm14 = vweird.f32 %v12491_v41 }
 0x881   : > { %v3650_v15 = vmul.f32 %v12484_v2, %v3649_v27  ;;  %v3703_v27 = vand.u32 2147483648, %v12491_v41 }
 0x882   : > { %v8537_v21 = vpop.eup %8536  ;;  %v3742_v18 = vadd.f32 %v12471_v11, %v3741_v4 }
 0x883   : > { %v12489_v0 = vpop.eup %8538  ;;  %v12494_v43 = vadd.f32 1.0, %v8537_v21  ;;  %v12551_v25 = vadd.f32 %v12484_v2, %v3650_v15  ;;  %v16307_v15 = vld [vmem:[#allocation75_spill] sm:$0xff] }
 0x884   : > { %v12498_v60 = vpop.eup %8540  ;;  %v3678_v53 = vmul.f32 %v12489_v0, %v12474_v5  ;;  %v3746_v62 = vsel %vm12531_vm12, %v12471_v11, %v3742_v18  ;;  %vm3683_vm8 = vweird.f32 %v12489_v0  ;;  %vm3758_vm12 = vweird.f32 %v12481_v59 }
 0x885   : > { %v8543_v52 = vpop.eup %8542  ;;  %8546 = vrcp.f32 %v12494_v43  ;;  %v3754_v13 = vmul.f32 %v12498_v60, %v12481_v59  ;;  %v3751_v61 = vsel %vm3748_vm3, %v3750_v40, %v3746_v62  ;;  %vm3759_vm1 = vweird.f32 %v12498_v60  ;;  %vm12583_vm15 = vmor %vm3682_vm5, %vm3683_vm8  ;;  %v16310_v62 = vld [vmem:[#allocation55_spill] sm:$0xff] }
 0x886   : > { %v3679_v44 = vsub.f32 1.0, %v3678_v53  ;;  %v12517_v33 = vadd.f32 1.0, %v8543_v52  ;;  %v12540_v26 = vpop.eup %8544  ;;  %v3689_v52 = vor.u32 1.1754944e-38, %v3688_v55  ;;  %vm3763_vm8 = vcmp.eq.f32.partialorder %v3762_v58, 8.507059e+37 }
 0x887   : > { %v3610_v8 = vpop.f32.mrf.mxu0  ;;  %v3755_v63 = vsub.f32 1.0, %v3754_v13  ;;  %v3693_v11 = vmul.f32 %v12540_v26, %v12491_v41  ;;  %vm3698_vm3 = vweird.f32 %v12540_v26  ;;  %vm3773_vm7 = vweird.f32 %v12494_v43 }
 0x888   : > { %v3611_v20 = vadd.f32 %v3610_v8, %v16292_v28  ;;  %v3680_v3 = vmul.f32 %v12489_v0, %v3679_v44  ;;  %v3764_v44 = vand.u32 2147483648, %v12481_v59 }
 0x889   : > { %v3756_v21 = vmul.f32 %v12498_v60, %v3755_v63  ;;  %v3694_v31 = vsub.f32 1.0, %v3693_v11 }
 0x88a   : > { %8548 = vtanh.f32 %v3611_v20 }
 0x88b   : > { %v12548_v10 = vpop.eup %8546  ;;  %v3757_v46 = vadd.f32 %v12498_v60, %v3756_v21  ;;  %v3695_v9 = vmul.f32 %v12540_v26, %v3694_v31  ;;  %v3777_v31 = vand.u32 2147483647, %v12494_v43 }
 0x88c   : > { %v3769_v28 = vmul.f32 %v12548_v10, %v12494_v43 }
 0x88d   : > { %v3696_v11 = vadd.f32 %v12540_v26, %v3695_v9 }
 0x88e   : > { %v3770_v5 = vsub.f32 1.0, %v3769_v28 }
 0x88f   : > { %v12457_v14 = vpop.f32.mrf.mxu0 }
 0x890   : > { %v8549_v24 = vpop.eup %8548  ;;  %v3614_v4 = vadd.f32 %v12457_v14, %v16302_v19  ;;  %v3864_v14 = vmul.f32 %v3751_v61, %v12273_v48  ;;  %v3701_v48 = vand.u32 2147483647, %v12491_v41  ;;  %v3771_v36 = vmul.f32 %v12548_v10, %v3770_v5 }
 0x891   : > { %v3779_v19 = vand.u32 2147483648, %v12494_v43 }
 0x892   : > { %vm12621_vm5 = vcmp.eq.f32.partialorder %v3701_v48, 8.507059e+37 }
 0x897   : > { %v12467_v49 = vpop.f32.mrf.mxu0 }
 0x89f   : > { %v3619_v57 = vpop.f32.mrf.mxu0 }
 0x8a0   : > { %v3620_v8 = vadd.f32 %v3619_v57, %v16294_v16  ;;  %v3675_v57 = vsel %vm12536_vm9, %v3674_v22, %v3670_v1  ;;  %v12589_v16 = vor.u32 1.1754944e-38, %v3703_v27  ;;  %vm12601_vm9 = vmor %vm3758_vm12, %vm3759_vm1  ;;  %vm3774_vm1 = vweird.f32 %v12548_v10 }
 0x8a1   : > { %v3868_v20 = vmul.f32 %v8549_v24, %v3675_v57  ;;  %v3761_v1 = vsel %vm12601_vm9, %v12498_v60, %v3757_v46  ;;  %vm3652_vm12 = vweird.f32 %v12465_v30  ;;  %vm12640_vm9 = vmor %vm3697_vm14, %vm3698_vm3 }
 0x8a2   : > { %v7801_v50 = vmul.f32 -1.442695, %v3620_v8  ;;  %vm12654_vm14 = vmor %vm3773_vm7, %vm3774_vm1  ;;  %vm3778_vm1 = vcmp.eq.f32.partialorder %v3777_v31, 8.507059e+37 }
 0x8a3   : > { %v3872_v18 = vadd.f32 %v3868_v20, %v3864_v14 }
 0x8a7   : > { %v3622_v47 = vpop.f32.mrf.mxu0 }
 0x8a8   : > { %v3623_v12 = vadd.f32 %v3622_v47, %v16293_v37  ;;  %v3681_v47 = vadd.f32 %v12489_v0, %v3680_v3  ;;  %v3765_v3 = vor.u32 1.1754944e-38, %v3764_v44  ;;  %v3926_v37 = vld [vmem:[%s15960_s6 + $0x30] sm:$0xff] }
 0x8aa   : > { %v7802_v29 = vmul.f32 -1.442695, %v3623_v12  ;;  %v3685_v32 = vsel %vm12583_vm15, %v12489_v0, %v3681_v47  ;;  %v3734_v0 = vand.u32 2147483648, %v12517_v33  ;;  %vm3653_vm15 = vweird.f32 %v12484_v2 }
 0x8ab   : > { %v3766_v57 = vsel %vm3763_vm8, %v3765_v3, %v3761_v1  ;;  %v3700_v47 = vsel %vm12640_vm9, %v12540_v26, %v3696_v11 }
 0x8ac   : > { %8550 = vpow2.f32 %v7802_v29  ;;  %v3865_v27 = vmul.f32 %v3766_v57, %v12319_v17 }
 0x8ad   : > { %8552 = vrcp.f32 %v12517_v33 }
 0x8ae   : > { %8554 = vpow2.f32 %v7801_v50  ;;  %v3617_v50 = vadd.f32 %v12467_v49, %v16310_v62  ;;  %v3656_v62 = vand.u32 2147483647, %v12465_v30 }
 0x8af   : > { %v3625_v6 = vpop.f32.mrf.mxu0 }
 0x8b0   : > { %v3626_v35 = vadd.f32 %v3625_v6, %v16301_v39  ;;  %v3690_v39 = vsel %vm12574_vm6, %v3689_v52, %v3685_v32  ;;  %v16317_v52 = vld [vmem:[#allocation56_spill] sm:$0xff] }
 0x8b1   : > { %v3608_v46 = vadd.f32 %v12450_v38, %v16317_v52 }
 0x8b2   : > { %v8551_v45 = vpop.eup %8550  ;;  %v7803_v34 = vmul.f32 -1.442695, %v3626_v35 }
 0x8b3   : > { %v12568_v53 = vadd.f32 1.0, %v8551_v45  ;;  %v12579_v12 = vpop.eup %8552  ;;  %v3772_v45 = vadd.f32 %v12548_v10, %v3771_v36 }
 0x8b4   : > { %8556 = vpow2.f32 %v7803_v34  ;;  %v8555_v29 = vpop.eup %8554  ;;  %v3724_v7 = vmul.f32 %v12579_v12, %v12517_v33  ;;  %vm3729_vm6 = vweird.f32 %v12579_v12 }
 0x8b5   : > { %8558 = vrcp.f32 %v12568_v53  ;;  %v12615_v59 = vadd.f32 1.0, %v8555_v29  ;;  %v3829_v21 = vand.u32 2147483648, %v12568_v53  ;;  %v3827_v28 = vand.u32 2147483647, %v12568_v53 }
 0x8b6   : > { %8560 = vtanh.f32 %v3614_v4  ;;  %v3725_v60 = vsub.f32 1.0, %v3724_v7  ;;  %vm3823_vm3 = vweird.f32 %v12568_v53  ;;  %v3776_v43 = vsel %vm12654_vm14, %v12548_v10, %v3772_v45  ;;  %vm12685_vm14 = vmor %vm3652_vm12, %vm3653_vm15 }
 0x8b7   : > { %v3628_v8 = vpop.f32.mrf.mxu0  ;;  %8562 = vtanh.f32 %v3872_v18  ;;  %v3830_v13 = vor.u32 1.1754944e-38, %v3829_v21  ;;  %vm3828_vm7 = vcmp.eq.f32.partialorder %v3827_v28, 8.507059e+37  ;;  %v3655_v36 = vsel %vm12685_vm14, %v12484_v2, %v12551_v25 }
 0x8b8   : > { %v3629_v42 = vadd.f32 %v3628_v8, %v16307_v15  ;;  %v3726_v14 = vmul.f32 %v12579_v12, %v3725_v60  ;;  %v3780_v8 = vor.u32 1.1754944e-38, %v3779_v19 }
 0x8ba   : > { %v8557_v63 = vpop.eup %8556  ;;  %v7804_v40 = vmul.f32 -1.442695, %v3629_v42  ;;  %v3781_v32 = vsel %vm3778_vm1, %v3780_v8, %v3776_v43  ;;  %v3727_v7 = vadd.f32 %v12579_v12, %v3726_v14  ;;  %v3931_v8 = vld [vmem:[%s15960_s6 + $0x58] sm:$0xff] }
 0x8bb   : > { %v8559_v22 = vpop.eup %8558  ;;  %v12617_v6 = vadd.f32 1.0, %v8557_v63 }
 0x8bc   : > { %v8561_v24 = vpop.eup %8560  ;;  %v3819_v49 = vmul.f32 %v8559_v22, %v12568_v53  ;;  %8564 = vpow2.f32 %v7804_v40  ;;  %vm3824_vm8 = vweird.f32 %v8559_v22  ;;  %v3705_v53 = vsel %vm12621_vm5, %v12589_v16, %v3700_v47 }
 0x8bd   : > { %8566 = vrcp.f32 %v12617_v6  ;;  %v3869_v55 = vmul.f32 %v8561_v24, %v3690_v39  ;;  %v8563_v20 = vpop.eup %8562  ;;  %vm3825_vm9 = vmor %vm3823_vm3, %vm3824_vm8  ;;  %v3844_v58 = vand.u32 2147483648, %v12617_v6  ;;  %v3842_v63 = vand.u32 2147483647, %v12617_v6 }
 0x8be   : > { %8568 = vtanh.f32 %v3617_v50  ;;  %v3820_v61 = vsub.f32 1.0, %v3819_v49  ;;  %vm3728_vm8 = vweird.f32 %v12517_v33  ;;  %v3732_v50 = vand.u32 2147483647, %v12517_v33  ;;  %v3923_v33 = vld [vmem:[%s15960_s6 + $0x18] sm:$0xff] }
 0x8bf   : > { %8570 = vrcp.f32 %v12615_v59  ;;  %v3873_v18 = vadd.f32 %v3869_v55, %v3865_v27  ;;  %v3866_v40 = vmul.f32 %v3781_v32, %v12371_v23  ;;  %vm12694_vm3 = vmor %vm3728_vm8, %vm3729_vm6  ;;  %v3659_v24 = vor.u32 1.1754944e-38, %v3658_v54  ;;  %v12762_v32 = vld [vmem:[%s15959_s5] sm:$0xff] }
 0x8c0   : > { %v3821_v34 = vmul.f32 %v8559_v22, %v3820_v61  ;;  %vm3838_vm15 = vweird.f32 %v12617_v6  ;;  %v3735_v23 = vor.u32 1.1754944e-38, %v3734_v0  ;;  %v3731_v35 = vsel %vm12694_vm3, %v12579_v12, %v3727_v7  ;;  %7821 = vmatmul.msk.f32.vlgmr.msrb.gmra.mxu2 %vm607_vm0, %v12762_v32  ;;  %v12777_v7 = vld [vmem:[%s15959_s5 + $0x10] sm:$0xff] }
 0x8c1   : > { %v3845_v60 = vor.u32 1.1754944e-38, %v3844_v58  ;;  %vm3843_vm12 = vcmp.eq.f32.partialorder %v3842_v63, 8.507059e+37  ;;  %v12785_v58 = vld [vmem:[%s15959_s5 + $0x18] sm:$0xff] }
 0x8c2   : > { %v8565_v41 = vpop.eup %8564  ;;  %v3822_v5 = vadd.f32 %v8559_v22, %v3821_v34 }
 0x8c3   : > { %v8567_v17 = vpop.eup %8566  ;;  %v12664_v26 = vadd.f32 1.0, %v8565_v41 }
 0x8c4   : > { %v8569_v48 = vpop.eup %8568  ;;  %v3834_v29 = vmul.f32 %v8567_v17, %v12617_v6  ;;  %v3826_v44 = vsel %vm3825_vm9, %v8559_v22, %v3822_v5  ;;  %vm3839_vm5 = vweird.f32 %v8567_v17  ;;  %vm3657_vm9 = vcmp.eq.f32.partialorder %v3656_v62, 8.507059e+37  ;;  %v12794_v62 = vld [vmem:[%s15959_s5 + $0x20] sm:$0xff] }
 0x8c5   : > { %v12668_v38 = vpop.eup %8570  ;;  %8572 = vrcp.f32 %v12664_v26  ;;  %v3831_v10 = vsel %vm3828_vm7, %v3830_v13, %v3826_v44  ;;  %v3870_v56 = vmul.f32 %v8569_v48, %v3705_v53  ;;  %vm3840_vm6 = vmor %vm3838_vm15, %vm3839_vm5  ;;  %vm3733_vm7 = vcmp.eq.f32.partialorder %v3732_v50, 8.507059e+37  ;;  %v3922_v48 = vld [vmem:[%s15960_s6 + $0x10] sm:$0xff]  ;;  %v3928_v44 = vld [vmem:[%s15960_s6 + $0x40] sm:$0xff] }
 0x8c6   : > { %8574 = vtanh.f32 %v3608_v46  ;;  %v3835_v15 = vsub.f32 1.0, %v3834_v29  ;;  %v3880_v42 = vmul.f32 %v8563_v20, %v3831_v10  ;;  %v3804_v9 = vmul.f32 %v12668_v38, %v12615_v59  ;;  %v3925_v29 = vld [vmem:[%s15960_s6 + $0x28] sm:$0xff]  ;;  %v3932_v53 = vld [vmem:[%s15960_s6 + $0x60] sm:$0xff] }
 0x8c7   : > { %8576 = vtanh.f32 %v3873_v18  ;;  %v3874_v49 = vadd.f32 %v3870_v56, %v3866_v40  ;;  %v3660_v0 = vsel %vm3657_vm9, %v3659_v24, %v3655_v36  ;;  %v3736_v12 = vsel %vm3733_vm7, %v3735_v23, %v3731_v35  ;;  %v3929_v10 = vld [vmem:[%s15960_s6 + $0x48] sm:$0xff]  ;;  %v3936_v40 = vld [vmem:[%s15958_s4] sm:$0xff]  ;;  %v12827_v23 = vld [vmem:[%s15959_s5 + $0x38] sm:$0xff] }
 0x8c8   : > { %3889 = vrot.lane.b32.xlu0 %v3880_v42, %s9202_s16  ;;  %v3836_v16 = vmul.f32 %v8567_v17, %v3835_v15  ;;  %v3805_v2 = vsub.f32 1.0, %v3804_v9  ;;  %v3859_v45 = vand.u32 2147483648, %v12664_v26  ;;  %v3857_v19 = vand.u32 2147483647, %v12664_v26  ;;  %v12769_v15 = vld [vmem:[%s15959_s5 + $0x8] sm:$0xff]  ;;  %v3939_v35 = vld [vmem:[%s15958_s4 + $0x18] sm:$0xff] }
 0x8c9   : > { %8578 = vtanh.f32 %v3874_v49  ;;  %v3863_v34 = vmul.f32 %v3736_v12, %v12380_v51  ;;  %vm3853_vm5 = vweird.f32 %v12664_v26  ;;  %vm3809_vm3 = vweird.f32 %v12668_v38  ;;  %7822 = vmatmul.msk.f32.gmra.mxu2 %vm607_vm0, %v12769_v15  ;;  %v12805_v36 = vld [vmem:[%s15959_s5 + $0x28] sm:$0xff]  ;;  %v12838_v49 = vld [vmem:[%s15959_s5 + $0x40] sm:$0xff] }
 0x8ca   : > { %v3837_v3 = vadd.f32 %v8567_v17, %v3836_v16  ;;  %v3806_v4 = vmul.f32 %v12668_v38, %v3805_v2  ;;  %v3860_v27 = vor.u32 1.1754944e-38, %v3859_v45  ;;  %vm3858_vm14 = vcmp.eq.f32.partialorder %v3857_v19, 8.507059e+37  ;;  %v3937_v24 = vld [vmem:[%s15958_s4 + $0x8] sm:$0xff]  ;;  %v12915_v45 = vld [vmem:[%s15959_s5 + $0x78] sm:$0xff]  ;;  %v3948_v19 = vld [vmem:[%s15958_s4 + $0x60] sm:$0xff] }
 0x8cb   : > { %v8573_v39 = vpop.eup %8572  ;;  %v3814_v51 = vand.u32 2147483648, %v12615_v59  ;;  %vm3808_vm15 = vweird.f32 %v12615_v59  ;;  %v3812_v46 = vand.u32 2147483647, %v12615_v59  ;;  %v3934_v59 = vld [vmem:[%s15960_s6 + $0x70] sm:$0xff]  ;;  %vm3899_vm9 = vcmask 1048448   ;;  %v3941_v2 = vld [vmem:[%s15958_s4 + $0x28] sm:$0xff] }
 0x8cc   : > { %v8575_v11 = vpop.eup %8574  ;;  %v3849_v30 = vmul.f32 %v8573_v39, %v12664_v26  ;;  %v3841_v54 = vsel %vm3840_vm6, %v8567_v17, %v3837_v3  ;;  %vm3854_vm1 = vweird.f32 %v8573_v39  ;;  %v3807_v31 = vadd.f32 %v12668_v38, %v3806_v4  ;;  %vm3810_vm6 = vmor %vm3808_vm15, %vm3809_vm3  ;;  %v3920_v26 = vld [vmem:[%s15960_s6] sm:$0xff]  ;;  %v12816_v3 = vld [vmem:[%s15959_s5 + $0x30] sm:$0xff]  ;;  %16327 = vst [vmem:[#allocation58_spill] sm:$0xff] %v12915_v45 }
 0x8cd   : > { %v8577_v25 = vpop.eup %8576  ;;  %v3846_v6 = vsel %vm3843_vm12, %v3845_v60, %v3841_v54  ;;  %v3867_v55 = vmul.f32 %v8575_v11, %v3660_v0  ;;  %vm3855_vm8 = vmor %vm3853_vm5, %vm3854_vm1  ;;  %v3815_v17 = vor.u32 1.1754944e-38, %v3814_v51  ;;  %vm3813_vm12 = vcmp.eq.f32.partialorder %v3812_v46, 8.507059e+37  ;;  %v3940_v60 = vld [vmem:[%s15958_s4 + $0x20] sm:$0xff]  ;;  %v12849_v11 = vld [vmem:[%s15959_s5 + $0x48] sm:$0xff] }
 0x8ce   : > { %v3850_v57 = vsub.f32 1.0, %v3849_v30  ;;  %v3881_v61 = vmul.f32 %v8577_v25, %v3846_v6  ;;  %v3811_v5 = vsel %vm3810_vm6, %v12668_v38, %v3807_v31  ;;  %v3935_v38 = vld [vmem:[%s15960_s6 + $0x78] sm:$0xff]  ;;  %v12860_v30 = vld [vmem:[%s15959_s5 + $0x50] sm:$0xff]  ;;  %v3944_v0 = vld [vmem:[%s15958_s4 + $0x40] sm:$0xff] }
 0x8cf   : > { %v3871_v20 = vadd.f32 %v3867_v55, %v3863_v34  ;;  %v8579_v41 = vpop.eup %8578  ;;  %v3816_v18 = vsel %vm3813_vm12, %v3815_v17, %v3811_v5  ;;  %16322 = vst [vmem:[#allocation7_spill] sm:$0xff] %v12860_v30  ;;  %v3942_v54 = vld [vmem:[%s15958_s4 + $0x30] sm:$0xff]  ;;  %v12871_v25 = vld [vmem:[%s15959_s5 + $0x58] sm:$0xff]  ;;  %v12893_v12 = vld [vmem:[%s15959_s5 + $0x68] sm:$0xff] }
 0x8d0   : > { %3891 = vrot.lane.b32.xlu2 %v3881_v61, %s9202_s16  ;;  %3973 = vperm.xlu0 %8067, %v3923_v33   ;;  %v3851_v21 = vmul.f32 %v8573_v39, %v3850_v57  ;;  %16323 = vst [vmem:[#allocation11_spill] sm:$0xff] %v12871_v25  ;;  %v3943_v6 = vld [vmem:[%s15958_s4 + $0x38] sm:$0xff]  ;;  %v12882_v33 = vld [vmem:[%s15959_s5 + $0x60] sm:$0xff]  ;;  %v3945_v57 = vld [vmem:[%s15958_s4 + $0x48] sm:$0xff] }
 0x8d1   : > { %8580 = vtanh.f32 %v3871_v20  ;;  %7823 = vmatmul.msk.f32.gmra.mxu2 %vm607_vm0, %v12777_v7  ;;  %16324 = vst [vmem:[#allocation9_spill] sm:$0xff] %v12882_v33  ;;  %v12904_v61 = vld [vmem:[%s15959_s5 + $0x70] sm:$0xff]  ;;  %v3949_v4 = vld [vmem:[%s15958_s4 + $0x68] sm:$0xff]  ;;  %v3951_v20 = vld [vmem:[%s15958_s4 + $0x78] sm:$0xff] }
 0x8d2   : > { %v3852_v28 = vadd.f32 %v8573_v39, %v3851_v21  ;;  %16325 = vst [vmem:[#allocation10_spill] sm:$0xff] %v12893_v12  ;;  %v3946_v55 = vld [vmem:[%s15958_s4 + $0x50] sm:$0xff]  ;;  %v3947_v21 = vld [vmem:[%s15958_s4 + $0x58] sm:$0xff] }
 0x8d3   : > { %16326 = vst [vmem:[#allocation57_spill] sm:$0xff] %v12904_v61 }
 0x8d4   : > { %v3856_v47 = vsel %vm3855_vm8, %v8573_v39, %v3852_v28  ;;  %v3938_v39 = vld [vmem:[%s15958_s4 + $0x10] sm:$0xff] }
 0x8d5   : > { %v3861_v14 = vsel %vm3858_vm14, %v3860_v27, %v3856_v47  ;;  %v3950_v28 = vld [vmem:[%s15958_s4 + $0x70] sm:$0xff]  ;;  %v3994_v47 = vpop.permute.xlu1 %3993 }
 0x8d6   : > { %v3882_v52 = vmul.f32 %v8579_v41, %v3861_v14 }
 0x8d7   : > { %v8581_v43 = vpop.eup %8580 }
 0x8d8   : > { %3893 = vrot.lane.b32.xlu2 %v3882_v52, %s9202_s16  ;;  %3988 = vperm.xlu0 %8067, %v3926_v37   ;;  %v3879_v13 = vmul.f32 %v8581_v43, %v3816_v18 }
 0x8d9   : > { %7824 = vmatmul.msk.f32.gmra.mxu2 %vm607_vm0, %v12785_v58 }
 0x8dd   : > { %v3964_v14 = vpop.permute.xlu1 %3963 }
 0x8e0   : > { %3958 = vperm.xlu0 %8067, %v3920_v26   ;;  %3887 = vrot.lane.b32.xlu2 %v3879_v13, %s9202_s16 }
 0x8e1   : > { %7825 = vmatmul.msk.f32.gmra.mxu2 %vm607_vm0, %v12794_v62 }
 0x8e8   : > { %4028 = vperm.xlu0 %8067, %v3934_v59   ;;  %3968 = vperm.xlu2 %8069, %v3922_v48  }
 0x8e9   : > { %7826 = vmatmul.msk.f32.gmra.mxu2 %vm607_vm0, %v12805_v36 }
 0x8f0   : > { %4013 = vperm.xlu0 %8067, %v3931_v8   ;;  %3983 = vperm.xlu2 %8069, %v3925_v29  }
 0x8f1   : > { %7827 = vmatmul.msk.f32.gmra.mxu2 %vm607_vm0, %v12816_v3 }
 0x8f8   : > { %3998 = vperm.xlu0 %8067, %v3928_v44   ;;  %4033 = vperm.xlu2 %8069, %v3935_v38  }
 0x8f9   : > { %7828 = vmatmul.msk.f32.gmra.mxu2 %vm607_vm0, %v12827_v23 }
 0x900   : > { %4018 = vperm.xlu2 %8069, %v3932_v53  }
 0x901   : > { %7829 = vmatmul.msk.f32.gmra.mxu2 %vm607_vm0, %v12838_v49 }
 0x908   : > { %4003 = vperm.xlu2 %8069, %v3929_v10  }
 0x909   : > { %7830 = vmatmul.msk.f32.gmra.mxu2 %vm607_vm0, %v12849_v11 }
 0x911   : > { %7831 = vmatmul.msk.f32.gmra.mxu2 %vm607_vm0, %v12860_v30 }
 0x919   : > { %7832 = vmatmul.msk.f32.gmra.mxu2 %vm607_vm0, %v12871_v25 }
 0x921   : > { %7833 = vmatmul.msk.f32.gmra.mxu2 %vm607_vm0, %v12882_v33 }
 0x929   : > { %7834 = vmatmul.msk.f32.gmra.mxu2 %vm607_vm0, %v12893_v12 }
 0x92a   : > { %v3892_v42 = vpop.permute.xlu2 %3891 }
 0x92b   : > { %3902 = vst.msk [vmem:[#allocation3 + $0x10] sm:$0xff] %vm3899_vm9, %v3892_v42 }
 0x931   : > { %7835 = vmatmul.msk.f32.gmra.mxu2 %vm607_vm0, %v12904_v61 }
 0x932   : > { %v3894_v56 = vpop.permute.xlu2 %3893  ;;  %v3954_v1 = vld [vmem:[#allocation3 + $0x10] sm:$0xff] }
 0x933   : > { %3903 = vst.msk [vmem:[#allocation3 + $0x18] sm:$0xff] %vm3899_vm9, %v3894_v56 }
 0x939   : > { %7836 = vmatmul.msk.f32.gmra.mxu2 %vm607_vm0, %v12915_v45 }
 0x93a   : > { %v3890_v9 = vpop.permute.xlu0 %3889  ;;  %v3888_v16 = vpop.permute.xlu2 %3887  ;;  %v3955_v63 = vld [vmem:[#allocation3 + $0x18] sm:$0xff] }
 0x93b   : > { %3901 = vst.msk [vmem:[#allocation3 + $0x8] sm:$0xff] %vm3899_vm9, %v3890_v9  ;;  %4096 = vmatpush.msra.mxu1 %v3955_v63 }
 0x93c   : > { %3900 = vst.msk [vmem:[#allocation3] sm:$0xff] %vm3899_vm9, %v3888_v16 }
 0x93d   : > { %4097 = vmatpush.msra.mxu1 %v3954_v1 }
 0x942   : > { %v3953_v50 = vld [vmem:[#allocation3 + $0x8] sm:$0xff]  ;;  %v3969_v46 = vpop.permute.xlu2 %3968  ;;  %v3974_v43 = vpop.permute.xlu0 %3973 }
 0x943   : > { %4098 = vmatpush.msra.mxu1 %v3953_v50  ;;  %v3952_v22 = vld [vmem:[#allocation3] sm:$0xff]  ;;  %v4246_v34 = vpop.f32.mrf.mxu2 }
 0x945   : > { %4099 = vmatpush.msra.mxu1 %v3952_v22 }
 0x946   : > { %7805 = vmatmul.msk.f32.vlgmr.msra.gmra.mxu1 %vm607_vm0, %v3936_v40  ;;  %v3979_v40 = vpop.permute.xlu1 %3978 }
 0x94a   : > { %v3989_v29 = vpop.permute.xlu0 %3988  ;;  %v3984_v44 = vpop.permute.xlu2 %3983 }
 0x94c   : > { %v4249_v27 = vpop.f32.mrf.mxu2 }
 0x94e   : > { %7806 = vmatmul.msk.f32.gmra.mxu1 %vm607_vm0, %v3937_v24  ;;  %v4024_v12 = vpop.permute.xlu1 %4023 }
 0x952   : > { %v3959_v56 = vpop.permute.xlu0 %3958 }
 0x954   : > { %v4252_v41 = vpop.f32.mrf.mxu2 }
 0x956   : > { %7807 = vmatmul.msk.f32.gmra.mxu1 %vm607_vm0, %v3938_v39 }
 0x95c   : > { %v4255_v52 = vpop.f32.mrf.mxu2 }
 0x95e   : > { %7808 = vmatmul.msk.f32.gmra.mxu1 %vm607_vm0, %v3939_v35 }
 0x964   : > { %v4258_v18 = vpop.f32.mrf.mxu2 }
 0x966   : > { %7809 = vmatmul.msk.f32.gmra.mxu1 %vm607_vm0, %v3940_v60 }
 0x96c   : > { %v4261_v59 = vpop.f32.mrf.mxu2 }
 0x96e   : > { %7810 = vmatmul.msk.f32.gmra.mxu1 %vm607_vm0, %v3941_v2 }
 0x974   : > { %v4264_v8 = vpop.f32.mrf.mxu2 }
 0x976   : > { %7811 = vmatmul.msk.f32.gmra.mxu1 %vm607_vm0, %v3942_v54 }
 0x97c   : > { %v4267_v10 = vpop.f32.mrf.mxu2 }
 0x97e   : > { %7812 = vmatmul.msk.f32.gmra.mxu1 %vm607_vm0, %v3943_v6 }
 0x984   : > { %v12961_v63 = vpop.f32.mrf.mxu2 }
 0x986   : > { %7813 = vmatmul.msk.f32.gmra.mxu1 %vm607_vm0, %v3944_v0 }
 0x98c   : > { %v12972_v35 = vpop.f32.mrf.mxu2 }
 0x98e   : > { %7814 = vmatmul.msk.f32.gmra.mxu1 %vm607_vm0, %v3945_v57 }
 0x996   : > { %7815 = vmatmul.msk.f32.gmra.mxu1 %vm607_vm0, %v3946_v55 }
 0x99e   : > { %7816 = vmatmul.msk.f32.gmra.mxu1 %vm607_vm0, %v3947_v21 }
 0x9a6   : > { %7817 = vmatmul.msk.f32.gmra.mxu1 %vm607_vm0, %v3948_v19 }
 0x9ae   : > { %7818 = vmatmul.msk.f32.gmra.mxu1 %vm607_vm0, %v3949_v4  ;;  %v12982_v4 = vpop.f32.mrf.mxu2 }
 0x9b6   : > { %7819 = vmatmul.msk.f32.gmra.mxu1 %vm607_vm0, %v3950_v28 }
 0x9be   : > { %7820 = vmatmul.msk.f32.gmra.mxu1 %vm607_vm0, %v3951_v20 }
 0x9c3   : > { %v4101_v31 = vpop.f32.mrf.mxu1 }
 0x9c4   : > { %v12957_v16 = vadd.f32 %v4101_v31, %v3959_v56  ;;  %v12990_v31 = vpop.permute.xlu0 %4028 }
 0x9c6   : > { %v4247_v1 = vadd.f32 %v4246_v34, %v12957_v16 }
 0x9c8   : > { %v7837_v24 = vmul.f32 -1.442695, %v4247_v1 }
 0x9ca   : > { %8582 = vpow2.f32 %v7837_v24 }
 0x9cb   : > { %v4104_v37 = vpop.f32.mrf.mxu1 }
 0x9cc   : > { %v12939_v51 = vadd.f32 %v4104_v37, %v3964_v14 }
 0x9ce   : > { %4584 = vrot.lane.b32.xlu2 %v12939_v51, %s9202_s16  ;;  %v4250_v2 = vadd.f32 %v4249_v27, %v12939_v51 }
 0x9d0   : > { %v8583_v57 = vpop.eup %8582  ;;  %v7838_v55 = vmul.f32 -1.442695, %v4250_v2 }
 0x9d1   : > { %v12984_v34 = vadd.f32 1.0, %v8583_v57 }
 0x9d3   : > { %v4107_v5 = vpop.f32.mrf.mxu1  ;;  %vm4315_vm1 = vweird.f32 %v12984_v34 }
 0x9d4   : > { %v12943_v17 = vadd.f32 %v4107_v5, %v3969_v46 }
 0x9d6   : > { %4586 = vrot.lane.b32.xlu0 %v12943_v17, %s9202_s16  ;;  %v4253_v6 = vadd.f32 %v4252_v41, %v12943_v17 }
 0x9d8   : > { %v7839_v21 = vmul.f32 -1.442695, %v4253_v6 }
 0x9db   : > { %v4110_v26 = vpop.f32.mrf.mxu1 }
 0x9dc   : > { %v12947_v13 = vadd.f32 %v4110_v26, %v3974_v43  ;;  %v12997_v43 = vpop.f32.mrf.mxu2 }
 0x9de   : > { %4588 = vrot.lane.b32.xlu1 %v12947_v13, %s9202_s16  ;;  %v4256_v20 = vadd.f32 %v4255_v52, %v12947_v13 }
 0x9e0   : > { %v7840_v41 = vmul.f32 -1.442695, %v4256_v20 }
 0x9e3   : > { %v4113_v48 = vpop.f32.mrf.mxu1 }
 0x9e4   : > { %v12966_v39 = vadd.f32 %v4113_v48, %v3979_v40  ;;  %v4282_v2 = vpop.f32.mrf.mxu2 }
 0x9e6   : > { %v4259_v60 = vadd.f32 %v4258_v18, %v12966_v39 }
 0x9e8   : > { %v7841_v0 = vmul.f32 -1.442695, %v4259_v60 }
 0x9ea   : > { %8584 = vpow2.f32 %v7841_v0 }
 0x9eb   : > { %v4116_v38 = vpop.f32.mrf.mxu1  ;;  %8586 = vpow2.f32 %v7838_v55 }
 0x9ec   : > { %v12951_v53 = vadd.f32 %v4116_v38, %v3984_v44  ;;  %8588 = vpow2.f32 %v7839_v21  ;;  %v13011_v38 = vpop.permute.xlu0 %4013 }
 0x9ed   : > { %8590 = vrcp.f32 %v12984_v34 }
 0x9ee   : > { %4592 = vrot.lane.b32.xlu0 %v12951_v53, %s9202_s16  ;;  %v4262_v19 = vadd.f32 %v4261_v59, %v12951_v53 }
 0x9f0   : > { %v7842_v27 = vmul.f32 -1.442695, %v4262_v19 }
 0x9f2   : > { %8592 = vpow2.f32 %v7842_v27 }
 0x9f3   : > { %v4119_v42 = vpop.f32.mrf.mxu1  ;;  %8594 = vpow2.f32 %v7840_v41  ;;  %v4321_v41 = vand.u32 2147483648, %v12984_v34 }
 0x9f4   : > { %v12955_v9 = vadd.f32 %v4119_v42, %v3989_v29  ;;  %v13006_v29 = vpop.permute.xlu2 %4033 }
 0x9f6   : > { %4594 = vrot.lane.b32.xlu1 %v12955_v9, %s9202_s16  ;;  %v4265_v5 = vadd.f32 %v4264_v8, %v12955_v9 }
 0x9f8   : > { %v7843_v8 = vmul.f32 -1.442695, %v4265_v5 }
 0x9fb   : > { %v4122_v50 = vpop.f32.mrf.mxu1 }
 0x9fc   : > { %v12964_v22 = vadd.f32 %v4122_v50, %v3994_v47  ;;  %v8585_v47 = vpop.eup %8584  ;;  %v4019_v19 = vpop.permute.xlu2 %4018 }
 0x9fd   : > { %v8587_v14 = vpop.eup %8586  ;;  %v12992_v46 = vadd.f32 1.0, %v8585_v47  ;;  %v4319_v47 = vand.u32 2147483647, %v12984_v34 }
 0x9fe   : > { %4596 = vrot.lane.b32.xlu2 %v12964_v22, %s9202_s16  ;;  %4582 = vrot.lane.b32.xlu1 %v12957_v16, %s9202_s16  ;;  %v8589_v37 = vpop.eup %8588  ;;  %v13001_v52 = vadd.f32 1.0, %v8587_v14  ;;  %v4268_v50 = vadd.f32 %v4267_v10, %v12964_v22  ;;  %v3999_v14 = vpop.permute.xlu0 %3998 }
 0x9ff   : > { %v12999_v26 = vpop.eup %8590  ;;  %v13003_v59 = vadd.f32 1.0, %v8589_v37  ;;  %8596 = vrcp.f32 %v12992_v46  ;;  %vm13055_vm8 = vcmp.eq.f32.partialorder %v4319_v47, 8.507059e+37  ;;  %vm4391_vm12 = vweird.f32 %v12992_v46 }
 0xa00   : > { %v8593_v48 = vpop.eup %8592  ;;  %v4311_v44 = vmul.f32 %v12999_v26, %v12984_v34  ;;  %8598 = vrcp.f32 %v13001_v52  ;;  %v7844_v55 = vmul.f32 -1.442695, %v4268_v50  ;;  %vm4316_vm7 = vweird.f32 %v12999_v26 }
 0xa01   : > { %8600 = vrcp.f32 %v13003_v59  ;;  %v8595_v42 = vpop.eup %8594  ;;  %v13014_v56 = vadd.f32 1.0, %v8593_v48  ;;  %vm13051_vm5 = vmor %vm4315_vm1, %vm4316_vm7  ;;  %vm4330_vm14 = vweird.f32 %v13001_v52 }
 0xa02   : > { %v4312_v1 = vsub.f32 1.0, %v4311_v44  ;;  %8602 = vpow2.f32 %v7843_v8  ;;  %v13021_v60 = vadd.f32 1.0, %v8595_v42 }
 0xa03   : > { %v12976_v54 = vpop.f32.mrf.mxu1  ;;  %8604 = vrcp.f32 %v13014_v56 }
 0xa04   : > { %v4313_v21 = vmul.f32 %v12999_v26, %v4312_v1  ;;  %8606 = vrcp.f32 %v13021_v60  ;;  %v13045_v42 = vadd.f32 %v12976_v54, %v3999_v14  ;;  %v4285_v14 = vpop.f32.mrf.mxu2  ;;  %v4366_v45 = vand.u32 2147483648, %v13021_v60 }
 0xa05   : > { %v13019_v24 = vpop.eup %8596  ;;  %8608 = vpow2.f32 %v7844_v55 }
 0xa06   : > { %4590 = vrot.lane.b32.xlu2 %v12966_v39, %s9202_s16  ;;  %v13023_v6 = vpop.eup %8598  ;;  %v4387_v57 = vmul.f32 %v13019_v24, %v12992_v46  ;;  %v4314_v5 = vadd.f32 %v12999_v26, %v4313_v21  ;;  %v4271_v47 = vadd.f32 %v12961_v63, %v13045_v42  ;;  %vm4392_vm15 = vweird.f32 %v13019_v24 }
 0xa07   : > { %v13026_v0 = vpop.eup %8600  ;;  %v4326_v20 = vmul.f32 %v13023_v6, %v13001_v52  ;;  %vm4331_vm3 = vweird.f32 %v13023_v6  ;;  %vm13100_vm1 = vmor %vm4391_vm12, %vm4392_vm15 }
 0xa08   : > { %v8603_v10 = vpop.eup %8602  ;;  %v4341_v27 = vmul.f32 %v13026_v0, %v13003_v59  ;;  %v4388_v37 = vsub.f32 1.0, %v4387_v57  ;;  %v4336_v57 = vand.u32 2147483648, %v13001_v52  ;;  %vm4346_vm7 = vweird.f32 %v13026_v0  ;;  %vm13126_vm15 = vmor %vm4330_vm14, %vm4331_vm3 }
 0xa09   : > { %v13040_v44 = vpop.eup %8604  ;;  %v13042_v8 = vadd.f32 1.0, %v8603_v10  ;;  %v4327_v50 = vsub.f32 1.0, %v4326_v20  ;;  %v4318_v20 = vsel %vm13051_vm5, %v12999_v26, %v4314_v5  ;;  %v4004_v5 = vpop.permute.xlu2 %4003  ;;  %vm4345_vm5 = vweird.f32 %v13003_v59 }
 0xa0a   : > { %v4342_v55 = vsub.f32 1.0, %v4341_v27  ;;  %v13060_v54 = vpop.eup %8606  ;;  %v4402_v34 = vmul.f32 %v13040_v44, %v13014_v56  ;;  %v4322_v27 = vor.u32 1.1754944e-38, %v4321_v41  ;;  %v4337_v21 = vor.u32 1.1754944e-38, %v4336_v57  ;;  %vm13137_vm12 = vmor %vm4345_vm5, %vm4346_vm7 }
 0xa0b   : > { %v12986_v28 = vpop.f32.mrf.mxu1  ;;  %8610 = vrcp.f32 %v13042_v8  ;;  %v8609_v61 = vpop.eup %8608  ;;  %v4356_v26 = vmul.f32 %v13060_v54, %v13021_v60  ;;  %vm4407_vm3 = vweird.f32 %v13040_v44  ;;  %vm4406_vm7 = vweird.f32 %v13014_v56 }
 0xa0c   : > { %v4323_v41 = vsel %vm13055_vm8, %v4322_v27, %v4318_v20  ;;  %v4343_v63 = vmul.f32 %v13026_v0, %v4342_v55  ;;  %v13083_v30 = vadd.f32 1.0, %v8609_v61  ;;  %v13086_v57 = vadd.f32 %v12986_v28, %v4004_v5  ;;  %v4288_v5 = vpop.f32.mrf.mxu2  ;;  %v4009_v28 = vpop.permute.xlu1 %4008 }
 0xa0d   : > { %v4357_v20 = vsub.f32 1.0, %v4356_v26  ;;  %v4395_v27 = vand.u32 2147483647, %v12992_v46 }
 0xa0f   : > { %vm4396_vm14 = vcmp.eq.f32.partialorder %v4395_v27, 8.507059e+37 }
 0xa11   : > { %v13098_v61 = vpop.eup %8610 }
 0xa13   : > { %v12995_v18 = vpop.f32.mrf.mxu1 }
 0xa14   : > { %v13152_v27 = vadd.f32 %v12995_v18, %v4009_v28 }
 0xa1b   : > { %v13017_v40 = vpop.f32.mrf.mxu1 }
 0xa23   : > { %v4137_v48 = vpop.f32.mrf.mxu1 }
 0xa24   : > { %v13047_v1 = vadd.f32 %v4137_v48, %v4019_v19  ;;  %v4389_v19 = vmul.f32 %v13019_v24, %v4388_v37  ;;  %v4328_v37 = vmul.f32 %v13023_v6, %v4327_v50  ;;  %v4349_v50 = vand.u32 2147483647, %v13003_v59 }
 0xa26   : > { %v4283_v10 = vadd.f32 %v4282_v2, %v13047_v1  ;;  %v4334_v2 = vand.u32 2147483647, %v13001_v52  ;;  %v4390_v33 = vadd.f32 %v13019_v24, %v4389_v19  ;;  %v4397_v19 = vand.u32 2147483648, %v12992_v46 }
 0xa27   : > { %vm13113_vm8 = vcmp.eq.f32.partialorder %v4349_v50, 8.507059e+37 }
 0xa28   : > { %v7845_v48 = vmul.f32 -1.442695, %v4283_v10  ;;  %v4403_v10 = vsub.f32 1.0, %v4402_v34  ;;  %vm13088_vm6 = vcmp.eq.f32.partialorder %v4334_v2, 8.507059e+37  ;;  %v4329_v34 = vadd.f32 %v13023_v6, %v4328_v37 }
 0xa29   : > { %v4398_v26 = vor.u32 1.1754944e-38, %v4397_v19  ;;  %v4358_v19 = vmul.f32 %v13060_v54, %v4357_v20 }
 0xa2a   : > { %8612 = vpow2.f32 %v7845_v48  ;;  %v4351_v48 = vand.u32 2147483648, %v13003_v59  ;;  %v4404_v37 = vmul.f32 %v13040_v44, %v4403_v10  ;;  %v4417_v59 = vmul.f32 %v13098_v61, %v13042_v8 }
 0xa2b   : > { %v4140_v25 = vpop.f32.mrf.mxu1  ;;  %8614 = vtanh.f32 %v4271_v47  ;;  %v4394_v47 = vsel %vm13100_vm1, %v13019_v24, %v4390_v33  ;;  %vm4421_vm1 = vweird.f32 %v13042_v8 }
 0xa2c   : > { %v13092_v55 = vadd.f32 %v4140_v25, %v4024_v12  ;;  %v4344_v25 = vadd.f32 %v13026_v0, %v4343_v63  ;;  %8616 = vrcp.f32 %v13083_v30  ;;  %v4333_v63 = vsel %vm13126_vm15, %v13023_v6, %v4329_v34 }
 0xa2d   : > { %v4412_v6 = vand.u32 2147483648, %v13014_v56  ;;  %v4399_v34 = vsel %vm4396_vm14, %v4398_v26, %v4394_v47  ;;  %v4418_v20 = vsub.f32 1.0, %v4417_v59  ;;  %v4338_v33 = vsel %vm13088_vm6, %v4337_v21, %v4333_v63  ;;  %vm13171_vm6 = vmor %vm4406_vm7, %vm4407_vm3 }
 0xa2e   : > { %v4286_v12 = vadd.f32 %v4285_v14, %v13092_v55  ;;  %4608 = vrot.lane.b32.xlu2 %v13092_v55, %s9202_s16  ;;  %v4274_v14 = vadd.f32 %v12972_v35, %v13086_v57  ;;  %v4348_v50 = vsel %vm13137_vm12, %v13026_v0, %v4344_v25  ;;  %v4352_v47 = vor.u32 1.1754944e-38, %v4351_v48 }
 0xa2f   : > { %v4410_v26 = vand.u32 2147483647, %v13014_v56  ;;  %v4413_v59 = vor.u32 1.1754944e-38, %v4412_v6  ;;  %v4277_v63 = vadd.f32 %v12982_v4, %v13152_v27  ;;  %v4419_v2 = vmul.f32 %v13098_v61, %v4418_v20 }
 0xa30   : > { %v8613_v46 = vpop.eup %8612  ;;  %v7846_v24 = vmul.f32 -1.442695, %v4286_v12  ;;  %v13177_v56 = vsel %vm13113_vm8, %v4352_v47, %v4348_v50  ;;  %v4427_v4 = vand.u32 2147483648, %v13042_v8  ;;  %vm4422_vm8 = vweird.f32 %v13098_v61 }
 0xa31   : > { %v13141_v52 = vadd.f32 1.0, %v8613_v46  ;;  %v8615_v10 = vpop.eup %8614  ;;  %v4405_v46 = vadd.f32 %v13040_v44, %v4404_v37  ;;  %v4364_v37 = vand.u32 2147483647, %v13021_v60  ;;  %vm4411_vm5 = vcmp.eq.f32.partialorder %v4410_v26, 8.507059e+37  ;;  %vm13230_vm3 = vmor %vm4421_vm1, %vm4422_vm8 }
 0xa32   : > { %8618 = vpow2.f32 %v7846_v24  ;;  %v4530_v25 = vmul.f32 %v8615_v10, %v4323_v41  ;;  %v13159_v24 = vpop.eup %8616  ;;  %v13180_v41 = vadd.f32 %v13060_v54, %v4358_v19  ;;  %vm4361_vm15 = vweird.f32 %v13060_v54 }
 0xa33   : > { %8620 = vrcp.f32 %v13141_v52  ;;  %v4143_v12 = vpop.f32.mrf.mxu1  ;;  %v4432_v10 = vmul.f32 %v13159_v24, %v13083_v30  ;;  %vm4360_vm12 = vweird.f32 %v13021_v60  ;;  %v4428_v21 = vor.u32 1.1754944e-38, %v4427_v4 }
 0xa34   : > { %8622 = vtanh.f32 %v4274_v14  ;;  %v13155_v0 = vadd.f32 %v4143_v12, %v12990_v31  ;;  %v4526_v31 = vmul.f32 0.0, %v4399_v34  ;;  %v4409_v14 = vsel %vm13171_vm6, %v13040_v44, %v4405_v46  ;;  %v4291_v12 = vpop.f32.mrf.mxu2 }
 0xa35   : > { %v4414_v6 = vsel %vm4411_vm5, %v4413_v59, %v4409_v14  ;;  %v13205_v46 = vadd.f32 %v13017_v40, %v13011_v38  ;;  %v4433_v47 = vsub.f32 1.0, %v4432_v10  ;;  %v4477_v38 = vand.u32 2147483648, %v13141_v52 }
 0xa36   : > { %v4289_v18 = vadd.f32 %v4288_v5, %v13155_v0  ;;  %4602 = vrot.lane.b32.xlu2 %v13152_v27, %s9202_s16  ;;  %4610 = vrot.lane.b32.xlu1 %v13155_v0, %s9202_s16  ;;  %v13193_v50 = vadd.f32 %v4530_v25, %v4526_v31  ;;  %v4527_v40 = vmul.f32 0.0, %v4414_v6  ;;  %vm4471_vm7 = vweird.f32 %v13141_v52 }
 0xa37   : > { %vm4437_vm8 = vweird.f32 %v13159_v24 }
 0xa38   : > { %v8619_v48 = vpop.eup %8618  ;;  %v7847_v35 = vmul.f32 -1.442695, %v4289_v18  ;;  %v4420_v18 = vadd.f32 %v13098_v61, %v4419_v2 }
 0xa39   : > { %v13188_v5 = vpop.eup %8620  ;;  %v13195_v19 = vadd.f32 1.0, %v8619_v48  ;;  %v4475_v48 = vand.u32 2147483647, %v13141_v52 }
 0xa3a   : > { %v8623_v28 = vpop.eup %8622  ;;  %v4467_v44 = vmul.f32 %v13188_v5, %v13141_v52  ;;  %8624 = vpow2.f32 %v7847_v35  ;;  %vm4472_vm14 = vweird.f32 %v13188_v5 }
 0xa3b   : > { %8626 = vrcp.f32 %v13195_v19  ;;  %v4146_v34 = vpop.f32.mrf.mxu1  ;;  %v4531_v26 = vmul.f32 %v8623_v28, %v4338_v33  ;;  %v4425_v33 = vand.u32 2147483647, %v13042_v8  ;;  %v4434_v28 = vmul.f32 %v13159_v24, %v4433_v47  ;;  %vm4473_vm6 = vmor %vm4471_vm7, %vm4472_vm14 }
 0xa3c   : > { %8628 = vtanh.f32 %v4277_v63  ;;  %v13209_v20 = vadd.f32 %v4146_v34, %v13006_v29  ;;  %v4468_v25 = vsub.f32 1.0, %v4467_v44  ;;  %v4280_v63 = vadd.f32 %v12997_v43, %v13205_v46  ;;  %vm13273_vm7 = vmor %vm4360_vm12, %vm4361_vm15 }
 0xa3d   : > { %8630 = vtanh.f32 %v13193_v50  ;;  %v13241_v44 = vadd.f32 %v4531_v26, %v4527_v40  ;;  %v4424_v8 = vsel %vm13230_vm3, %v13098_v61, %v4420_v18  ;;  %v4478_v34 = vor.u32 1.1754944e-38, %v4477_v38 }
 0xa3e   : > { %v4292_v31 = vadd.f32 %v4291_v12, %v13209_v20  ;;  %4612 = vrot.lane.b32.xlu0 %v13209_v20, %s9202_s16  ;;  %5005 = vrot.lane.b32.xlu2 %v12947_v13, %s9203_s17  ;;  %v4469_v29 = vmul.f32 %v13188_v5, %v4468_v25  ;;  %v4442_v25 = vand.u32 2147483648, %v13083_v30  ;;  %vm4426_vm1 = vcmp.eq.f32.partialorder %v4425_v33, 8.507059e+37 }
 0xa3f   : > { %4604 = vrot.lane.b32.xlu1 %v13205_v46, %s9202_s16  ;;  %vm4476_vm5 = vcmp.eq.f32.partialorder %v4475_v48, 8.507059e+37  ;;  %v4429_v61 = vsel %vm4426_vm1, %v4428_v21, %v4424_v8  ;;  %v4492_v38 = vand.u32 2147483648, %v13195_v19  ;;  %vm4436_vm3 = vweird.f32 %v13083_v30 }
 0xa40   : > { %v8625_v14 = vpop.eup %8624  ;;  %v7848_v35 = vmul.f32 -1.442695, %v4292_v31  ;;  %v4470_v2 = vadd.f32 %v13188_v5, %v4469_v29  ;;  %v4435_v31 = vadd.f32 %v13159_v24, %v4434_v28  ;;  %v4440_v33 = vand.u32 2147483647, %v13083_v30  ;;  %vm13287_vm15 = vmor %vm4436_vm3, %vm4437_vm8 }
 0xa41   : > { %v13238_v10 = vpop.eup %8626  ;;  %v13246_v4 = vadd.f32 1.0, %v8625_v14  ;;  %v4490_v21 = vand.u32 2147483647, %v13195_v19  ;;  %v4367_v14 = vor.u32 1.1754944e-38, %v4366_v45  ;;  %vm4486_vm12 = vweird.f32 %v13195_v19 }
 0xa42   : > { %v8629_v43 = vpop.eup %8628  ;;  %v4482_v6 = vmul.f32 %v13238_v10, %v13195_v19  ;;  %8632 = vpow2.f32 %v7848_v35  ;;  %v4474_v52 = vsel %vm4473_vm6, %v13188_v5, %v4470_v2  ;;  %vm4487_vm14 = vweird.f32 %v13238_v10 }
 0xa43   : > { %v8631_v12 = vpop.eup %8630  ;;  %8634 = vrcp.f32 %v13246_v4  ;;  %v4479_v26 = vsel %vm4476_vm5, %v4478_v34, %v4474_v52  ;;  %v4532_v18 = vmul.f32 %v8629_v43, %v13177_v56  ;;  %v4528_v56 = vmul.f32 0.0, %v4429_v61  ;;  %vm4488_vm6 = vmor %vm4486_vm12, %vm4487_vm14 }
 0xa44   : > { %8636 = vtanh.f32 %v4280_v63  ;;  %v4483_v47 = vsub.f32 1.0, %v4482_v6  ;;  %v13258_v29 = vmul.f32 %v8631_v12, %v4479_v26  ;;  %v4363_v2 = vsel %vm13273_vm7, %v13060_v54, %v13180_v41 }
 0xa45   : > { %8638 = vtanh.f32 %v13241_v44  ;;  %v13293_v35 = vadd.f32 %v4532_v18, %v4528_v56  ;;  %v4439_v45 = vsel %vm13287_vm15, %v13159_v24, %v4435_v31  ;;  %v4443_v43 = vor.u32 1.1754944e-38, %v4442_v25 }
 0xa46   : > { %4606 = vrot.lane.b32.xlu0 %v13047_v1, %s9202_s16  ;;  %5011 = vrot.lane.b32.xlu2 %v12955_v9, %s9203_s17  ;;  %v4484_v5 = vmul.f32 %v13238_v10, %v4483_v47  ;;  %4546 = vst.msk [vmem:[#allocation3] sm:$0xff] %vm973_vm4, %v13258_v29  ;;  %v4493_v52 = vor.u32 1.1754944e-38, %v4492_v38  ;;  %vm4365_vm1 = vcmp.eq.f32.partialorder %v4364_v37, 8.507059e+37  ;;  %vm4441_vm5 = vcmp.eq.f32.partialorder %v4440_v33, 8.507059e+37 }
 0xa47   : > { %4598 = vrot.lane.b32.xlu1 %v13045_v42, %s9202_s16  ;;  %vm4491_vm8 = vcmp.eq.f32.partialorder %v4490_v21, 8.507059e+37  ;;  %v4368_v41 = vsel %vm4365_vm1, %v4367_v14, %v4363_v2  ;;  %v4444_v24 = vsel %vm4441_vm5, %v4443_v43, %v4439_v45  ;;  %v4507_v47 = vand.u32 2147483648, %v13246_v4 }
 0xa48   : > { %v8633_v48 = vpop.eup %8632  ;;  %v4485_v30 = vadd.f32 %v13238_v10, %v4484_v5  ;;  %v4505_v37 = vand.u32 2147483647, %v13246_v4  ;;  %vm4501_vm3 = vweird.f32 %v13246_v4 }
 0xa49   : > { %v8635_v63 = vpop.eup %8634  ;;  %v4465_v28 = vadd.f32 1.0, %v8633_v48  ;;  %v4508_v5 = vor.u32 1.1754944e-38, %v4507_v47 }
 0xa4a   : > { %v8637_v8 = vpop.eup %8636  ;;  %v4497_v19 = vmul.f32 %v8635_v63, %v13246_v4  ;;  %v4489_v6 = vsel %vm4488_vm6, %v13238_v10, %v4485_v30  ;;  %vm4502_vm14 = vweird.f32 %v8635_v63  ;;  %v4529_v10 = vmul.f32 0.0, %v4444_v24  ;;  %v16351_v24 = vld [vmem:[#allocation11_spill] sm:$0xff] }
 0xa4b   : > { %8640 = vrcp.f32 %v4465_v28  ;;  %v8639_v54 = vpop.eup %8638  ;;  %v4494_v12 = vsel %vm4491_vm8, %v4493_v52, %v4489_v6  ;;  %v4533_v61 = vmul.f32 %v8637_v8, %v4368_v41  ;;  %vm4503_vm7 = vmor %vm4501_vm3, %vm4502_vm14  ;;  %vm4506_vm15 = vcmp.eq.f32.partialorder %v4505_v37, 8.507059e+37 }
 0xa4c   : > { %v4498_v34 = vsub.f32 1.0, %v4497_v19  ;;  %8642 = vtanh.f32 %v13293_v35  ;;  %v4543_v25 = vmul.f32 %v8639_v54, %v4494_v12  ;;  %v4522_v14 = vand.u32 2147483648, %v4465_v28  ;;  %v16350_v54 = vld [vmem:[#allocation7_spill] sm:$0xff] }
 0xa4d   : > { %v13319_v31 = vadd.f32 %v4533_v61, %v4529_v10  ;;  %v4520_v59 = vand.u32 2147483647, %v4465_v28  ;;  %vm4516_vm6 = vweird.f32 %v4465_v28  ;;  %v16352_v61 = vld [vmem:[#allocation9_spill] sm:$0xff] }
 0xa4e   : > { %4600 = vrot.lane.b32.xlu0 %v13086_v57, %s9202_s16  ;;  %4999 = vrot.lane.b32.xlu2 %v12957_v16, %s9203_s17  ;;  %v4499_v60 = vmul.f32 %v8635_v63, %v4498_v34  ;;  %4547 = vst.msk [vmem:[#allocation3 + $0x8] sm:$0xff] %vm973_vm4, %v4543_v25 }
 0xa4f   : > { %5003 = vrot.lane.b32.xlu1 %v12943_v17, %s9203_s17  ;;  %8644 = vtanh.f32 %v13319_v31  ;;  %vm4521_vm5 = vcmp.eq.f32.partialorder %v4520_v59, 8.507059e+37 }
 0xa50   : > { %v4500_v26 = vadd.f32 %v8635_v63, %v4499_v60  ;;  %v16354_v60 = vld [vmem:[#allocation10_spill] sm:$0xff] }
 0xa51   : > { %v8641_v18 = vpop.eup %8640 }
 0xa52   : > { %v4512_v38 = vmul.f32 %v8641_v18, %v4465_v28  ;;  %v4504_v56 = vsel %vm4503_vm7, %v8635_v63, %v4500_v26  ;;  %v8643_v40 = vpop.eup %8642  ;;  %vm4517_vm12 = vweird.f32 %v8641_v18  ;;  %v4523_v63 = vor.u32 1.1754944e-38, %v4522_v14  ;;  %v13347_v28 = vpop.permute.xlu2 %4584  ;;  %v16356_v26 = vld [vmem:[#allocation57_spill] sm:$0xff] }
 0xa53   : > { %v4509_v33 = vsel %vm4506_vm15, %v4508_v5, %v4504_v56  ;;  %vm4518_vm1 = vmor %vm4516_vm6, %vm4517_vm12 }
 0xa54   : > { %v4513_v21 = vsub.f32 1.0, %v4512_v38  ;;  %v4544_v48 = vmul.f32 %v8643_v40, %v4509_v33  ;;  %v16358_v38 = vld [vmem:[#allocation58_spill] sm:$0xff] }
 0xa55   : > { %v8645_v45 = vpop.eup %8644 }
 0xa56   : > { %5013 = vrot.lane.b32.xlu0 %v12964_v22, %s9203_s17  ;;  %5027 = vrot.lane.b32.xlu2 %v13155_v0, %s9203_s17  ;;  %v4514_v4 = vmul.f32 %v8641_v18, %v4513_v21  ;;  %4548 = vst.msk [vmem:[#allocation3 + $0x10] sm:$0xff] %vm973_vm4, %v4544_v48 }
 0xa57   : > { %5009 = vrot.lane.b32.xlu1 %v12951_v53, %s9203_s17 }
 0xa58   : > { %v4515_v30 = vadd.f32 %v8641_v18, %v4514_v4 }
 0xa5a   : > { %v4519_v2 = vsel %vm4518_vm1, %v8641_v18, %v4515_v30 }
 0xa5b   : > { %v4524_v8 = vsel %vm4521_vm5, %v4523_v63, %v4519_v2 }
 0xa5c   : > { %v4545_v43 = vmul.f32 %v8645_v45, %v4524_v8 }
 0xa5e   : > { %4642 = vmatpush.msrb.mxu3 %v4545_v43  ;;  %4549 = vst.msk [vmem:[#allocation3 + $0x18] sm:$0xff] %vm973_vm4, %v4545_v43  ;;  %5001 = vrot.lane.b32.xlu0 %v12939_v51, %s9203_s17 }
 0xa5f   : > { %5021 = vrot.lane.b32.xlu2 %v13205_v46, %s9203_s17  ;;  %5029 = vrot.lane.b32.xlu1 %v13209_v20, %s9203_s17 }
 0xa60   : > { %4643 = vmatpush.msrb.mxu3 %v4544_v48 }
 0xa62   : > { %4644 = vmatpush.msrb.mxu3 %v4543_v25 }
 0xa64   : > { %4645 = vmatpush.msrb.mxu3 %v13258_v29 }
 0xa65   : > { %7849 = vmatmul.msk.f32.vlgmr.msrb.gmra.mxu3 %vm607_vm0, %v12762_v32  ;;  %v13357_v32 = vpop.permute.xlu2 %4596 }
 0xa66   : > { %5007 = vrot.lane.b32.xlu0 %v12966_v39, %s9203_s17 }
 0xa67   : > { %5015 = vrot.lane.b32.xlu2 %v13045_v42, %s9203_s17  ;;  %5023 = vrot.lane.b32.xlu1 %v13047_v1, %s9203_s17 }
 0xa6d   : > { %7850 = vmatmul.msk.f32.gmra.mxu3 %vm607_vm0, %v12769_v15  ;;  %v13373_v15 = vpop.permute.xlu2 %4590 }
 0xa6e   : > { %5025 = vrot.lane.b32.xlu0 %v13092_v55, %s9203_s17 }
 0xa6f   : > { %5420 = vrot.lane.b32.xlu2 %v12943_v17, %s9204_s18  ;;  %5017 = vrot.lane.b32.xlu1 %v13086_v57, %s9203_s17 }
 0xa75   : > { %7851 = vmatmul.msk.f32.gmra.mxu3 %vm607_vm0, %v12777_v7 }
 0xa76   : > { %5019 = vrot.lane.b32.xlu0 %v13152_v27, %s9203_s17 }
 0xa77   : > { %5426 = vrot.lane.b32.xlu2 %v12951_v53, %s9204_s18  ;;  %5430 = vrot.lane.b32.xlu1 %v12964_v22, %s9204_s18 }
 0xa7d   : > { %7852 = vmatmul.msk.f32.gmra.mxu3 %vm607_vm0, %v12785_v58  ;;  %v13387_v58 = vpop.permute.xlu1 %4588 }
 0xa7e   : > { %5422 = vrot.lane.b32.xlu0 %v12947_v13, %s9204_s18 }
 0xa7f   : > { %5446 = vrot.lane.b32.xlu2 %v13209_v20, %s9204_s18  ;;  %5418 = vrot.lane.b32.xlu1 %v12939_v51, %s9204_s18 }
 0xa85   : > { %7853 = vmatmul.msk.f32.gmra.mxu3 %vm607_vm0, %v12794_v62  ;;  %v13399_v29 = vpop.permute.xlu1 %4594 }
 0xa86   : > { %5428 = vrot.lane.b32.xlu0 %v12955_v9, %s9204_s18 }
 0xa87   : > { %5440 = vrot.lane.b32.xlu2 %v13047_v1, %s9204_s18  ;;  %5424 = vrot.lane.b32.xlu1 %v12966_v39, %s9204_s18 }
 0xa88   : > { %v13383_v7 = vpop.permute.xlu2 %4608 }
 0xa8d   : > { %7854 = vmatmul.msk.f32.gmra.mxu3 %vm607_vm0, %v12805_v36 }
 0xa8e   : > { %5416 = vrot.lane.b32.xlu0 %v12957_v16, %s9204_s18 }
 0xa8f   : > { %5434 = vrot.lane.b32.xlu2 %v13086_v57, %s9204_s18  ;;  %5442 = vrot.lane.b32.xlu1 %v13092_v55, %s9204_s18 }
 0xa90   : > { %v13395_v62 = vpop.permute.xlu2 %4602 }
 0xa95   : > { %7855 = vmatmul.msk.f32.gmra.mxu3 %vm607_vm0, %v12816_v3  ;;  %v13417_v3 = vpop.permute.xlu1 %4582 }
 0xa96   : > { %5444 = vrot.lane.b32.xlu0 %v13155_v0, %s9204_s18 }
 0xa97   : > { %5847 = vrot.lane.b32.xlu2 %v12964_v22, %s9205_s19  ;;  %5436 = vrot.lane.b32.xlu1 %v13152_v27, %s9204_s18 }
 0xa98   : > { %v13407_v36 = vpop.permute.xlu2 %5005 }
 0xa9d   : > { %7856 = vmatmul.msk.f32.gmra.mxu3 %vm607_vm0, %v12827_v23 }
 0xa9e   : > { %5438 = vrot.lane.b32.xlu0 %v13205_v46, %s9204_s18 }
 0xa9f   : > { %5835 = vrot.lane.b32.xlu2 %v12939_v51, %s9205_s19  ;;  %5839 = vrot.lane.b32.xlu1 %v12947_v13, %s9205_s19 }
 0xaa0   : > { %v13419_v19 = vpop.permute.xlu2 %5011 }
 0xaa5   : > { %7857 = vmatmul.msk.f32.gmra.mxu3 %vm607_vm0, %v12838_v49 }
 0xaa6   : > { %5432 = vrot.lane.b32.xlu0 %v13045_v42, %s9204_s18 }
 0xaa7   : > { %5841 = vrot.lane.b32.xlu2 %v12966_v39, %s9205_s19  ;;  %5845 = vrot.lane.b32.xlu1 %v12955_v9, %s9205_s19 }
 0xaa8   : > { %v13429_v23 = vpop.permute.xlu2 %4999  ;;  %v13431_v6 = vpop.permute.xlu1 %4610 }
 0xaad   : > { %7858 = vmatmul.msk.f32.gmra.mxu3 %vm607_vm0, %v12849_v11 }
 0xaae   : > { %5837 = vrot.lane.b32.xlu0 %v12943_v17, %s9205_s19 }
 0xaaf   : > { %5859 = vrot.lane.b32.xlu2 %v13092_v55, %s9205_s19  ;;  %5833 = vrot.lane.b32.xlu1 %v12957_v16, %s9205_s19 }
 0xab0   : > { %v13441_v49 = vpop.permute.xlu2 %5027 }
 0xab1   : > { %v13443_v52 = vpop.permute.xlu1 %4604 }
 0xab5   : > { %7859 = vmatmul.msk.f32.gmra.mxu3 %vm607_vm0, %v16350_v54 }
 0xab6   : > { %5843 = vrot.lane.b32.xlu0 %v12951_v53, %s9205_s19 }
 0xab7   : > { %5853 = vrot.lane.b32.xlu2 %v13152_v27, %s9205_s19  ;;  %5861 = vrot.lane.b32.xlu1 %v13155_v0, %s9205_s19 }
 0xab9   : > { %v13453_v11 = vpop.permute.xlu2 %5021  ;;  %v13455_v41 = vpop.permute.xlu1 %4598 }
 0xabd   : > { %7860 = vmatmul.msk.f32.gmra.mxu3 %vm607_vm0, %v16351_v24 }
 0xabe   : > { %5863 = vrot.lane.b32.xlu0 %v13209_v20, %s9205_s19 }
 0xabf   : > { %6256 = vrot.lane.b32.xlu2 %v12947_v13, %s9206_s24  ;;  %5855 = vrot.lane.b32.xlu1 %v13205_v46, %s9205_s19 }
 0xac1   : > { %v13465_v34 = vpop.permute.xlu2 %5015  ;;  %v13467_v12 = vpop.permute.xlu1 %5003 }
 0xac5   : > { %7861 = vmatmul.msk.f32.gmra.mxu3 %vm607_vm0, %v16352_v61 }
 0xac6   : > { %5857 = vrot.lane.b32.xlu0 %v13047_v1, %s9205_s19 }
 0xac7   : > { %6262 = vrot.lane.b32.xlu2 %v12955_v9, %s9206_s24  ;;  %5849 = vrot.lane.b32.xlu1 %v13045_v42, %s9205_s19 }
 0xac9   : > { %v13477_v47 = vpop.permute.xlu2 %5420  ;;  %v13479_v25 = vpop.permute.xlu1 %5009 }
 0xaca   : > { %16353 = vst [vmem:[#allocation5_spill] sm:$0xff] %v13477_v47 }
 0xacd   : > { %7862 = vmatmul.msk.f32.gmra.mxu3 %vm607_vm0, %v16354_v60 }
 0xace   : > { %5851 = vrot.lane.b32.xlu0 %v13086_v57, %s9205_s19 }
 0xacf   : > { %6250 = vrot.lane.b32.xlu2 %v12957_v16, %s9206_s24  ;;  %6254 = vrot.lane.b32.xlu1 %v12943_v17, %s9206_s24 }
 0xad1   : > { %v13489_v37 = vpop.permute.xlu2 %5426  ;;  %v13491_v10 = vpop.permute.xlu1 %5029 }
 0xad2   : > { %16355 = vst [vmem:[#allocation6_spill] sm:$0xff] %v13489_v37 }
 0xad5   : > { %7863 = vmatmul.msk.f32.gmra.mxu3 %vm607_vm0, %v16356_v26 }
 0xad6   : > { %6264 = vrot.lane.b32.xlu0 %v12964_v22, %s9206_s24 }
 0xad7   : > { %6278 = vrot.lane.b32.xlu2 %v13155_v0, %s9206_s24  ;;  %6260 = vrot.lane.b32.xlu1 %v12951_v53, %s9206_s24 }
 0xad9   : > { %v13501_v18 = vpop.permute.xlu2 %5446  ;;  %v13503_v5 = vpop.permute.xlu1 %5023 }
 0xada   : > { %16357 = vst [vmem:[#allocation61_spill] sm:$0xff] %v13501_v18 }
 0xadd   : > { %7864 = vmatmul.msk.f32.gmra.mxu3 %vm607_vm0, %v16358_v38 }
 0xade   : > { %6252 = vrot.lane.b32.xlu0 %v12939_v51, %s9206_s24 }
 0xadf   : > { %6272 = vrot.lane.b32.xlu2 %v13205_v46, %s9206_s24  ;;  %6280 = vrot.lane.b32.xlu1 %v13209_v20, %s9206_s24 }
 0xae1   : > { %v13513_v56 = vpop.permute.xlu2 %5440  ;;  %v13515_v40 = vpop.permute.xlu1 %5017 }
 0xae2   : > { %16359 = vst [vmem:[#allocation13_spill] sm:$0xff] %v13513_v56 }
 0xae6   : > { %6258 = vrot.lane.b32.xlu0 %v12966_v39, %s9206_s24 }
 0xae7   : > { %6266 = vrot.lane.b32.xlu2 %v13045_v42, %s9206_s24  ;;  %6274 = vrot.lane.b32.xlu1 %v13047_v1, %s9206_s24 }
 0xae8   : > { %v4647_v33 = vpop.f32.mrf.mxu3 }
 0xae9   : > { %v13523_v21 = vpop.permute.xlu2 %5434  ;;  %v13525_v48 = vpop.permute.xlu1 %5430 }
 0xaea   : > { %16360 = vst [vmem:[#allocation8_spill] sm:$0xff] %v13523_v21 }
 0xaeb   : > { %16361 = vst [vmem:[#allocation59_spill] sm:$0xff] %v13525_v48 }
 0xaee   : > { %6276 = vrot.lane.b32.xlu0 %v13092_v55, %s9206_s24 }
 0xaef   : > { %6671 = vrot.lane.b32.xlu2 %v12943_v17, %s9207_s25  ;;  %6268 = vrot.lane.b32.xlu1 %v13086_v57, %s9206_s24 }
 0xaf0   : > { %v4650_v14 = vpop.f32.mrf.mxu3 }
 0xaf1   : > { %v13533_v4 = vpop.permute.xlu1 %5418  ;;  %v13535_v59 = vpop.permute.xlu2 %5847  ;;  %v4651_v18 = vadd.f32 %v4650_v14, %v13347_v28 }
 0xaf2   : > { %16362 = vst [vmem:[#allocation15_spill] sm:$0xff] %v13533_v4 }
 0xaf3   : > { %16363 = vst [vmem:[#allocation4_spill] sm:$0xff] %v13535_v59 }
 0xaf6   : > { %6270 = vrot.lane.b32.xlu0 %v13152_v27, %s9206_s24 }
 0xaf7   : > { %6677 = vrot.lane.b32.xlu2 %v12951_v53, %s9207_s25  ;;  %6681 = vrot.lane.b32.xlu1 %v12964_v22, %s9207_s25 }
 0xaf8   : > { %v4653_v30 = vpop.f32.mrf.mxu3 }
 0xaf9   : > { %v13543_v63 = vpop.permute.xlu1 %5424  ;;  %v13545_v2 = vpop.permute.xlu2 %5835 }
 0xafa   : > { %16364 = vst [vmem:[#allocation60_spill] sm:$0xff] %v13543_v63 }
 0xafb   : > { %16365 = vst [vmem:[#allocation21_spill] sm:$0xff] %v13545_v2  ;;  %v4648_v2 = vadd.f32 %v4647_v33, %v13417_v3 }
 0xafe   : > { %6673 = vrot.lane.b32.xlu0 %v12947_v13, %s9207_s25 }
 0xaff   : > { %6697 = vrot.lane.b32.xlu2 %v13209_v20, %s9207_s25  ;;  %6669 = vrot.lane.b32.xlu1 %v12939_v51, %s9207_s25 }
 0xb00   : > { %v4656_v45 = vpop.f32.mrf.mxu3 }
 0xb01   : > { %v13553_v8 = vpop.permute.xlu1 %5442  ;;  %v13557_v43 = vpop.permute.xlu2 %5841 }
 0xb02   : > { %16366 = vst [vmem:[#allocation14_spill] sm:$0xff] %v13553_v8 }
 0xb03   : > { %16367 = vst [vmem:[#allocation16_spill] sm:$0xff] %v13557_v43 }
 0xb06   : > { %6679 = vrot.lane.b32.xlu0 %v12955_v9, %s9207_s25 }
 0xb07   : > { %6691 = vrot.lane.b32.xlu2 %v13047_v1, %s9207_s25  ;;  %6675 = vrot.lane.b32.xlu1 %v12966_v39, %s9207_s25 }
 0xb08   : > { %v4659_v54 = vpop.f32.mrf.mxu3 }
 0xb09   : > { %v13563_v24 = vpop.permute.xlu1 %5436  ;;  %v13571_v60 = vpop.permute.xlu2 %5859  ;;  %v4660_v3 = vadd.f32 %v4659_v54, %v13373_v15 }
 0xb0a   : > { %16368 = vst [vmem:[#allocation62_spill] sm:$0xff] %v13563_v24 }
 0xb0b   : > { %16369 = vst [vmem:[#allocation63_spill] sm:$0xff] %v13571_v60  ;;  %v7869_v14 = vmul.f32 -1.442695, %v4660_v3 }
 0xb0e   : > { %6667 = vrot.lane.b32.xlu0 %v12957_v16, %s9207_s25 }
 0xb0f   : > { %6685 = vrot.lane.b32.xlu2 %v13086_v57, %s9207_s25  ;;  %6693 = vrot.lane.b32.xlu1 %v13092_v55, %s9207_s25 }
 0xb10   : > { %v4662_v61 = vpop.f32.mrf.mxu3 }
 0xb11   : > { %v13573_v26 = vpop.permute.xlu1 %5839  ;;  %v13581_v59 = vpop.permute.xlu2 %5853 }
 0xb12   : > { %16370 = vst [vmem:[#allocation17_spill] sm:$0xff] %v13573_v26  ;;  %v4587_v26 = vpop.permute.xlu0 %4586 }
 0xb13   : > { %16371 = vst [vmem:[#allocation19_spill] sm:$0xff] %v13581_v59  ;;  %v4654_v28 = vadd.f32 %v4653_v30, %v4587_v26 }
 0xb15   : > { %v7867_v15 = vmul.f32 -1.442695, %v4654_v28 }
 0xb16   : > { %6695 = vrot.lane.b32.xlu0 %v13155_v0, %s9207_s25 }
 0xb17   : > { %7098 = vrot.lane.b32.xlu2 %v12964_v22, %s9208_s26  ;;  %6687 = vrot.lane.b32.xlu1 %v13152_v27, %s9207_s25  ;;  %v7865_v22 = vmul.f32 -1.442695, %v4648_v2 }
 0xb18   : > { %v4665_v38 = vpop.f32.mrf.mxu3 }
 0xb19   : > { %v13583_v43 = vpop.permute.xlu1 %5845  ;;  %8646 = vpow2.f32 %v7865_v22  ;;  %v13593_v59 = vpop.permute.xlu2 %6256  ;;  %v4666_v3 = vadd.f32 %v4665_v38, %v13399_v29 }
 0xb1a   : > { %16372 = vst [vmem:[#allocation12_spill] sm:$0xff] %v13583_v43  ;;  %v4593_v2 = vpop.permute.xlu0 %4592 }
 0xb1b   : > { %16373 = vst [vmem:[#allocation65_spill] sm:$0xff] %v13593_v59  ;;  %v4663_v54 = vadd.f32 %v4662_v61, %v4593_v2 }
 0xb1d   : > { %v7870_v30 = vmul.f32 -1.442695, %v4663_v54 }
 0xb1e   : > { %6689 = vrot.lane.b32.xlu0 %v13205_v46, %s9207_s25 }
 0xb1f   : > { %7086 = vrot.lane.b32.xlu2 %v12939_v51, %s9208_s26  ;;  %7090 = vrot.lane.b32.xlu1 %v12947_v13, %s9208_s26  ;;  %v7866_v13 = vmul.f32 -1.442695, %v4651_v18  ;;  %v8647_v33 = vpop.eup %8646 }
 0xb20   : > { %v4668_v60 = vpop.f32.mrf.mxu3  ;;  %v13606_v22 = vadd.f32 1.0, %v8647_v33 }
 0xb21   : > { %v13595_v43 = vpop.permute.xlu1 %5833  ;;  %8648 = vpow2.f32 %v7866_v13  ;;  %v4669_v2 = vadd.f32 %v4668_v60, %v13357_v32 }
 0xb22   : > { %16374 = vst [vmem:[#allocation27_spill] sm:$0xff] %v13595_v43  ;;  %8650 = vpow2.f32 %v7869_v14  ;;  %v13647_v14 = vpop.permute.xlu0 %4612  ;;  %vm4716_vm8 = vweird.f32 %v13606_v22 }
 0xb23   : > { %8652 = vrcp.f32 %v13606_v22  ;;  %v7872_v60 = vmul.f32 -1.442695, %v4669_v2 }
 0xb24   : > { %8654 = vpow2.f32 %v7867_v15 }
 0xb25   : > { %8656 = vpow2.f32 %v7870_v30 }
 0xb26   : > { %6683 = vrot.lane.b32.xlu0 %v13045_v42, %s9207_s25 }
 0xb27   : > { %7092 = vrot.lane.b32.xlu2 %v12966_v39, %s9208_s26  ;;  %7096 = vrot.lane.b32.xlu1 %v12955_v9, %s9208_s26  ;;  %v13610_v39 = vpop.permute.xlu2 %6262  ;;  %v4657_v9 = vadd.f32 %v4656_v45, %v13387_v58  ;;  %v8649_v61 = vpop.eup %8648  ;;  %v7871_v45 = vmul.f32 -1.442695, %v4666_v3 }
 0xb28   : > { %v13604_v51 = vpop.f32.mrf.mxu3  ;;  %16375 = vst [vmem:[#allocation18_spill] sm:$0xff] %v13610_v39  ;;  %v13623_v13 = vadd.f32 1.0, %v8649_v61 }
 0xb29   : > { %v13612_v59 = vpop.permute.xlu1 %5861  ;;  %v7868_v26 = vmul.f32 -1.442695, %v4657_v9 }
 0xb2a   : > { %16376 = vst [vmem:[#allocation66_spill] sm:$0xff] %v13612_v59  ;;  %v4607_v2 = vpop.permute.xlu0 %4606  ;;  %v4735_v24 = vand.u32 2147483647, %v13623_v13  ;;  %vm4731_vm7 = vweird.f32 %v13623_v13 }
 0xb2b   : > { %8658 = vpow2.f32 %v7868_v26 }
 0xb2c   : > { %8660 = vrcp.f32 %v13623_v13  ;;  %vm13728_vm6 = vcmp.eq.f32.partialorder %v4735_v24, 8.507059e+37 }
 0xb2e   : > { %7088 = vrot.lane.b32.xlu0 %v12943_v17, %s9208_s26  ;;  %v8651_v17 = vpop.eup %8650 }
 0xb2f   : > { %7110 = vrot.lane.b32.xlu2 %v13092_v55, %s9208_s26  ;;  %7084 = vrot.lane.b32.xlu1 %v12957_v16, %s9208_s26  ;;  %v13627_v16 = vpop.eup %8652  ;;  %v13629_v55 = vadd.f32 1.0, %v8651_v17  ;;  %v13637_v38 = vpop.permute.xlu2 %6250 }
 0xb30   : > { %v13619_v18 = vpop.f32.mrf.mxu3  ;;  %v8655_v58 = vpop.eup %8654  ;;  %16377 = vst [vmem:[#allocation23_spill] sm:$0xff] %v13637_v38  ;;  %vm4717_vm4 = vweird.f32 %v13627_v16 }
 0xb31   : > { %v13639_v33 = vpop.permute.xlu1 %5855  ;;  %v13644_v28 = vadd.f32 1.0, %v8655_v58  ;;  %8662 = vrcp.f32 %v13629_v55  ;;  %vm13694_vm14 = vmor %vm4716_vm8, %vm4717_vm4  ;;  %vm4792_vm1 = vweird.f32 %v13629_v55 }
 0xb32   : > { %16378 = vst [vmem:[#allocation20_spill] sm:$0xff] %v13639_v33  ;;  %8664 = vpow2.f32 %v7871_v45 }
 0xb33   : > { %8666 = vrcp.f32 %v13644_v28 }
 0xb36   : > { %7094 = vrot.lane.b32.xlu0 %v12951_v53, %s9208_s26  ;;  %v4712_v53 = vmul.f32 %v13627_v16, %v13606_v22 }
 0xb37   : > { %7104 = vrot.lane.b32.xlu2 %v13152_v27, %s9208_s26  ;;  %7112 = vrot.lane.b32.xlu1 %v13155_v0, %s9208_s26  ;;  %v8657_v27 = vpop.eup %8656  ;;  %v13667_v26 = vpop.permute.xlu2 %6278 }
 0xb38   : > { %v13635_v29 = vpop.f32.mrf.mxu3  ;;  %v8659_v0 = vpop.eup %8658  ;;  %v4713_v15 = vsub.f32 1.0, %v4712_v53  ;;  %v13653_v54 = vadd.f32 1.0, %v8657_v27  ;;  %16379 = vst [vmem:[#allocation64_spill] sm:$0xff] %v13667_v26 }
 0xb39   : > { %v13657_v9 = vpop.eup %8660  ;;  %v13663_v17 = vadd.f32 1.0, %v8659_v0  ;;  %v13669_v3 = vpop.permute.xlu1 %5849  ;;  %v4722_v0 = vand.u32 2147483648, %v13606_v22 }
 0xb3a   : > { %v13661_v61 = vpop.eup %8662  ;;  %8668 = vrcp.f32 %v13653_v54  ;;  %16380 = vst [vmem:[#allocation25_spill] sm:$0xff] %v13669_v3  ;;  %v4727_v45 = vmul.f32 %v13657_v9, %v13623_v13  ;;  %vm4732_vm15 = vweird.f32 %v13657_v9 }
 0xb3b   : > { %v8665_v32 = vpop.eup %8664  ;;  %8670 = vrcp.f32 %v13663_v17  ;;  %v4723_v59 = vor.u32 1.1754944e-38, %v4722_v0  ;;  %vm4793_vm12 = vweird.f32 %v13661_v61  ;;  %vm13761_vm8 = vmor %vm4731_vm7, %vm4732_vm15 }
 0xb3c   : > { %v13673_v58 = vpop.eup %8666  ;;  %v13678_v53 = vadd.f32 1.0, %v8665_v32  ;;  %8672 = vpow2.f32 %v7872_v60  ;;  %vm13745_vm4 = vmor %vm4792_vm1, %vm4793_vm12  ;;  %vm4807_vm1 = vweird.f32 %v13653_v54 }
 0xb3d   : > { %vm4747_vm5 = vweird.f32 %v13673_v58 }
 0xb3e   : > { %7108 = vrot.lane.b32.xlu0 %v13047_v1, %s9208_s26  ;;  %v4714_v1 = vmul.f32 %v13627_v16, %v4713_v15  ;;  %v4742_v15 = vmul.f32 %v13673_v58, %v13644_v28  ;;  %8674 = vrcp.f32 %v13678_v53 }
 0xb3f   : > { %7106 = vrot.lane.b32.xlu1 %v13205_v46, %s9208_s26  ;;  %v4788_v46 = vmul.f32 %v13661_v61, %v13629_v55  ;;  %v13711_v8 = vpop.permute.xlu2 %6272 }
 0xb40   : > { %v13659_v30 = vpop.f32.mrf.mxu3  ;;  %v4715_v27 = vadd.f32 %v13627_v16, %v4714_v1  ;;  %v13690_v60 = vpop.eup %8668  ;;  %v4720_v1 = vand.u32 2147483647, %v13606_v22  ;;  %v4743_v22 = vsub.f32 1.0, %v4742_v15  ;;  %16383 = vst [vmem:[#allocation26_spill] sm:$0xff] %v13711_v8 }
 0xb41   : > { %v4789_v26 = vsub.f32 1.0, %v4788_v46  ;;  %v13699_v33 = vpop.eup %8670  ;;  %v4672_v46 = vadd.f32 %v13604_v51, %v13455_v41  ;;  %v13713_v41 = vpop.permute.xlu1 %6254  ;;  %vm4808_vm15 = vweird.f32 %v13690_v60 }
 0xb42   : > { %v8673_v43 = vpop.eup %8672  ;;  %vm4721_vm3 = vcmp.eq.f32.partialorder %v4720_v1, 8.507059e+37  ;;  %16384 = vst [vmem:[#allocation68_spill] sm:$0xff] %v13713_v41  ;;  %v4757_v38 = vmul.f32 %v13699_v33, %v13663_v17  ;;  %v4752_v1 = vand.u32 2147483648, %v13644_v28 }
 0xb46   : > { %7114 = vrot.lane.b32.xlu0 %v13209_v20, %s9208_s26  ;;  %v4728_v20 = vsub.f32 1.0, %v4727_v45  ;;  %v4719_v45 = vsel %vm13694_vm14, %v13627_v16, %v4715_v27  ;;  %v13719_v16 = vpop.eup %8674  ;;  %v4750_v27 = vand.u32 2147483647, %v13644_v28  ;;  %vm4746_vm14 = vweird.f32 %v13644_v28 }
 0xb47   : > { %7100 = vrot.lane.b32.xlu1 %v13045_v42, %s9208_s26  ;;  %v4737_v42 = vand.u32 2147483648, %v13623_v13  ;;  %v4724_v51 = vsel %vm4721_vm3, %v4723_v59, %v4719_v45  ;;  %v4818_v24 = vmul.f32 %v13719_v16, %v13678_v53  ;;  %v4796_v45 = vand.u32 2147483647, %v13629_v55  ;;  %vm13776_vm7 = vmor %vm4746_vm14, %vm4747_vm5 }
 0xb48   : > { %v4683_v32 = vpop.f32.mrf.mxu3  ;;  %v4729_v21 = vmul.f32 %v13657_v9, %v4728_v20  ;;  %v4798_v20 = vand.u32 2147483648, %v13629_v55  ;;  %vm13766_vm3 = vcmp.eq.f32.partialorder %v4750_v27, 8.507059e+37  ;;  %v4753_v28 = vor.u32 1.1754944e-38, %v4752_v1  ;;  %v13780_v27 = vpop.permute.xlu2 %6266  ;;  %vm13801_vm5 = vmor %vm4807_vm1, %vm4808_vm15 }
 0xb49   : > { %v4684_v39 = vadd.f32 %v4683_v32, %v4607_v2  ;;  %v4790_v2 = vmul.f32 %v13661_v61, %v4789_v26  ;;  %v4803_v32 = vmul.f32 %v13690_v60, %v13653_v54  ;;  %v13723_v26 = vadd.f32 1.0, %v8673_v43  ;;  %16395 = vst [vmem:[#allocation69_spill] sm:$0xff] %v13780_v27 }
 0xb4a   : > { %v4730_v43 = vadd.f32 %v13657_v9, %v4729_v21  ;;  %v4799_v56 = vor.u32 1.1754944e-38, %v4798_v20  ;;  %vm4797_vm12 = vcmp.eq.f32.partialorder %v4796_v45, 8.507059e+37  ;;  %v13783_v20 = vpop.permute.xlu1 %6260  ;;  %v4813_v1 = vand.u32 2147483648, %v13653_v54 }
 0xb4b   : > { %v7873_v3 = vmul.f32 -1.442695, %v4684_v39  ;;  %v4738_v39 = vor.u32 1.1754944e-38, %v4737_v42  ;;  %v4791_v59 = vadd.f32 %v13661_v61, %v4790_v2  ;;  %v4758_v2 = vsub.f32 1.0, %v4757_v38  ;;  %16396 = vst [vmem:[#allocation29_spill] sm:$0xff] %v13783_v20 }
 0xb4c   : > { %vm4762_vm14 = vweird.f32 %v13699_v33 }
 0xb4d   : > { %8676 = vpow2.f32 %v7873_v3  ;;  %v4804_v3 = vsub.f32 1.0, %v4803_v32  ;;  %v4795_v55 = vsel %vm13745_vm4, %v13661_v61, %v4791_v59  ;;  %v4819_v61 = vsub.f32 1.0, %v4818_v24 }
 0xb4e   : > { %7102 = vrot.lane.b32.xlu0 %v13086_v57, %s9208_s26  ;;  %8678 = vtanh.f32 %v4672_v46  ;;  %v4744_v57 = vmul.f32 %v13673_v58, %v4743_v22  ;;  %v4601_v46 = vpop.permute.xlu0 %4600  ;;  %v4800_v13 = vsel %vm4797_vm12, %v4799_v56, %v4795_v55  ;;  %v4811_v24 = vand.u32 2147483647, %v13653_v54 }
 0xb4f   : > { %8680 = vrcp.f32 %v13723_v26  ;;  %v4927_v45 = vmul.f32 %v4800_v13, %v13193_v50  ;;  %v4828_v55 = vand.u32 2147483648, %v13678_v53  ;;  %vm4823_vm4 = vweird.f32 %v13719_v16 }
 0xb50   : > { %v4686_v15 = vpop.f32.mrf.mxu3  ;;  %v4745_v8 = vadd.f32 %v13673_v58, %v4744_v57  ;;  %v4759_v57 = vmul.f32 %v13699_v33, %v4758_v2  ;;  %vm4761_vm12 = vweird.f32 %v13663_v17 }
 0xb51   : > { %v4687_v42 = vadd.f32 %v4686_v15, %v13383_v7  ;;  %v4675_v7 = vadd.f32 %v13619_v18, %v4601_v46  ;;  %v4805_v15 = vmul.f32 %v13690_v60, %v4804_v3  ;;  %v4734_v3 = vsel %vm13761_vm8, %v13657_v9, %v4730_v43 }
 0xb52   : > { %v4749_v56 = vsel %vm13776_vm7, %v13673_v58, %v4745_v8  ;;  %v4739_v46 = vsel %vm13728_vm6, %v4738_v39, %v4734_v3  ;;  %v4767_v8 = vand.u32 2147483648, %v13663_v17  ;;  %v4678_v39 = vadd.f32 %v13635_v29, %v13395_v62 }
 0xb53   : > { %v8677_v22 = vpop.eup %8676  ;;  %v7874_v32 = vmul.f32 -1.442695, %v4687_v42  ;;  %v4806_v48 = vadd.f32 %v13690_v60, %v4805_v15  ;;  %v13809_v0 = vsel %vm13766_vm3, %v4753_v28, %v4749_v56  ;;  %vm4812_vm6 = vcmp.eq.f32.partialorder %v4811_v24, 8.507059e+37 }
 0xb54   : > { %v13755_v38 = vadd.f32 1.0, %v8677_v22  ;;  %v8679_v41 = vpop.eup %8678  ;;  %v4814_v29 = vor.u32 1.1754944e-38, %v4813_v1  ;;  %vm4822_vm8 = vweird.f32 %v13678_v53 }
 0xb55   : > { %8682 = vpow2.f32 %v7874_v32  ;;  %v4931_v42 = vmul.f32 %v8679_v41, %v4724_v51  ;;  %v13790_v43 = vpop.eup %8680  ;;  %v4820_v51 = vmul.f32 %v13719_v16, %v4819_v61  ;;  %vm13832_vm3 = vmor %vm4822_vm8, %vm4823_vm4 }
 0xb56   : > { %8684 = vrcp.f32 %v13755_v38  ;;  %v4833_v50 = vmul.f32 %v13790_v43, %v13723_v26  ;;  %v4878_v28 = vand.u32 2147483648, %v13755_v38  ;;  %v4876_v1 = vand.u32 2147483647, %v13755_v38 }
 0xb57   : > { %8686 = vtanh.f32 %v4675_v7  ;;  %v13816_v21 = vadd.f32 %v4931_v42, %v4927_v45  ;;  %v4810_v7 = vsel %vm13801_vm5, %v13690_v60, %v4806_v48  ;;  %v4821_v18 = vadd.f32 %v13719_v16, %v4820_v51  ;;  %v13837_v42 = vpop.permute.xlu2 %6671  ;;  %v13839_v48 = vpop.permute.xlu1 %6280 }
 0xb58   : > { %v4689_v9 = vpop.f32.mrf.mxu3  ;;  %v4815_v61 = vsel %vm4812_vm6, %v4814_v29, %v4810_v7  ;;  %v4834_v3 = vsub.f32 1.0, %v4833_v50  ;;  %16401 = vst [vmem:[#allocation31_spill] sm:$0xff] %v13837_v42  ;;  %v4829_v51 = vor.u32 1.1754944e-38, %v4828_v55  ;;  %vm4872_vm15 = vweird.f32 %v13755_v38 }
 0xb59   : > { %v4690_v41 = vadd.f32 %v4689_v9, %v13431_v6  ;;  %v13812_v6 = vadd.f32 %v13699_v33, %v4759_v57  ;;  %16402 = vst [vmem:[#allocation22_spill] sm:$0xff] %v13839_v48  ;;  %v4825_v24 = vsel %vm13832_vm3, %v13719_v16, %v4821_v18  ;;  %v4879_v16 = vor.u32 1.1754944e-38, %v4878_v28 }
 0xb5a   : > { %vm4877_vm5 = vcmp.eq.f32.partialorder %v4876_v1, 8.507059e+37  ;;  %vm4838_vm4 = vweird.f32 %v13790_v43  ;;  %vm4837_vm3 = vweird.f32 %v13723_v26  ;;  %v4841_v28 = vand.u32 2147483647, %v13723_v26 }
 0xb5b   : > { %v8683_v58 = vpop.eup %8682  ;;  %v7875_v54 = vmul.f32 -1.442695, %v4690_v41  ;;  %v4826_v41 = vand.u32 2147483647, %v13678_v53 }
 0xb5c   : > { %v8685_v2 = vpop.eup %8684  ;;  %v13821_v32 = vadd.f32 1.0, %v8683_v58  ;;  %v4681_v58 = vadd.f32 %v13659_v30, %v13443_v52 }
 0xb5d   : > { %v8687_v62 = vpop.eup %8686  ;;  %v4868_v15 = vmul.f32 %v8685_v2, %v13755_v38  ;;  %8688 = vpow2.f32 %v7875_v54  ;;  %vm4873_vm7 = vweird.f32 %v8685_v2  ;;  %v4835_v54 = vmul.f32 %v13790_v43, %v4834_v3 }
 0xb5e   : > { %8690 = vrcp.f32 %v13821_v32  ;;  %v4932_v13 = vmul.f32 %v8687_v62, %v4739_v46  ;;  %v4928_v46 = vmul.f32 %v4815_v61, %v13241_v44  ;;  %vm4874_vm1 = vmor %vm4872_vm15, %vm4873_vm7  ;;  %vm4827_vm6 = vcmp.eq.f32.partialorder %v4826_v41, 8.507059e+37 }
 0xb5f   : > { %8692 = vtanh.f32 %v4678_v39  ;;  %v4869_v60 = vsub.f32 1.0, %v4868_v15  ;;  %v4830_v38 = vsel %vm4827_vm6, %v4829_v51, %v4825_v24  ;;  %v4836_v18 = vadd.f32 %v13790_v43, %v4835_v54  ;;  %vm13876_vm7 = vmor %vm4761_vm12, %vm4762_vm14  ;;  %v13894_v1 = vpop.permute.xlu2 %6677 }
 0xb60   : > { %8694 = vtanh.f32 %v13816_v21  ;;  %v4692_v59 = vpop.f32.mrf.mxu3  ;;  %v13852_v50 = vadd.f32 %v4932_v13, %v4928_v46  ;;  %v4843_v61 = vand.u32 2147483648, %v13723_v26  ;;  %v4891_v3 = vand.u32 2147483647, %v13821_v32  ;;  %vm13890_vm15 = vmor %vm4837_vm3, %vm4838_vm4  ;;  %16407 = vst [vmem:[#allocation24_spill] sm:$0xff] %v13894_v1  ;;  %v13896_v46 = vpop.permute.xlu1 %6274 }
 0xb61   : > { %v4693_v56 = vadd.f32 %v4692_v59, %v13647_v14  ;;  %v4870_v9 = vmul.f32 %v8685_v2, %v4869_v60  ;;  %v4929_v13 = vmul.f32 %v4830_v38, %v13293_v35  ;;  %v4765_v59 = vand.u32 2147483647, %v13663_v17  ;;  %16408 = vst [vmem:[#allocation67_spill] sm:$0xff] %v13896_v46 }
 0xb62   : > { %v4768_v35 = vor.u32 1.1754944e-38, %v4767_v8  ;;  %vm4887_vm14 = vweird.f32 %v13821_v32  ;;  %v4844_v51 = vor.u32 1.1754944e-38, %v4843_v61  ;;  %vm4842_vm6 = vcmp.eq.f32.partialorder %v4841_v28, 8.507059e+37 }
 0xb63   : > { %v8689_v45 = vpop.eup %8688  ;;  %v7876_v22 = vmul.f32 -1.442695, %v4693_v56  ;;  %v4871_v39 = vadd.f32 %v8685_v2, %v4870_v9  ;;  %v4764_v56 = vsel %vm13876_vm7, %v13699_v33, %v13812_v6  ;;  %v4840_v33 = vsel %vm13890_vm15, %v13790_v43, %v4836_v18 }
 0xb64   : > { %v8691_v14 = vpop.eup %8690  ;;  %v13854_v44 = vadd.f32 1.0, %v8689_v45  ;;  %v4845_v54 = vsel %vm4842_vm6, %v4844_v51, %v4840_v33 }
 0xb65   : > { %v8693_v53 = vpop.eup %8692  ;;  %v4883_v7 = vmul.f32 %v8691_v14, %v13821_v32  ;;  %8696 = vpow2.f32 %v7876_v22  ;;  %v4875_v62 = vsel %vm4874_vm1, %v8685_v2, %v4871_v39  ;;  %v4893_v2 = vand.u32 2147483648, %v13821_v32 }
 0xb66   : > { %v8695_v52 = vpop.eup %8694  ;;  %8698 = vrcp.f32 %v13854_v44  ;;  %v4880_v30 = vsel %vm4877_vm5, %v4879_v16, %v4875_v62  ;;  %v4933_v55 = vmul.f32 %v8693_v53, %v13809_v0  ;;  %vm4888_vm8 = vweird.f32 %v8691_v14 }
 0xb67   : > { %8700 = vtanh.f32 %v4681_v58  ;;  %v4884_v29 = vsub.f32 1.0, %v4883_v7  ;;  %v13860_v15 = vmul.f32 %v8695_v52, %v4880_v30  ;;  %vm4889_vm12 = vmor %vm4887_vm14, %vm4888_vm8  ;;  %v4894_v8 = vor.u32 1.1754944e-38, %v4893_v2  ;;  %v13914_v18 = vpop.permute.xlu2 %6697 }
 0xb68   : > { %8702 = vtanh.f32 %v13852_v50  ;;  %v13899_v41 = vadd.f32 %v4933_v55, %v4929_v13  ;;  %vm4892_vm1 = vcmp.eq.f32.partialorder %v4891_v3, 8.507059e+37  ;;  %vm4766_vm5 = vcmp.eq.f32.partialorder %v4765_v59, 8.507059e+37  ;;  %16409 = vst [vmem:[#allocation35_spill] sm:$0xff] %v13914_v18  ;;  %v13916_v2 = vpop.permute.xlu1 %6268 }
 0xb69   : > { %4951 = vrot.lane.b32.xlu2 %v13860_v15, %s9208_s26  ;;  %v4885_v60 = vmul.f32 %v8691_v14, %v4884_v29  ;;  %v4769_v39 = vsel %vm4766_vm5, %v4768_v35, %v4764_v56  ;;  %v4908_v7 = vand.u32 2147483648, %v13854_v44  ;;  %v4930_v52 = vmul.f32 %v4845_v54, %v13319_v31  ;;  %16410 = vst [vmem:[#allocation32_spill] sm:$0xff] %v13916_v2  ;;  %v13962_v54 = vld [vmem:[%s15959_s5 + $0x18] sm:$0xff] }
 0xb6a   : > { %vm4902_vm8 = vweird.f32 %v13854_v44 }
 0xb6b   : > { %v8697_v57 = vpop.eup %8696  ;;  %v4886_v26 = vadd.f32 %v8691_v14, %v4885_v60  ;;  %v4909_v55 = vor.u32 1.1754944e-38, %v4908_v7  ;;  %v13980_v7 = vld [vmem:[%s15959_s5 + $0x28] sm:$0xff] }
 0xb6c   : > { %v8699_v24 = vpop.eup %8698  ;;  %v4866_v17 = vadd.f32 1.0, %v8697_v57 }
 0xb6d   : > { %v8701_v6 = vpop.eup %8700  ;;  %v4898_v45 = vmul.f32 %v8699_v24, %v13854_v44  ;;  %v4890_v58 = vsel %vm4889_vm12, %v8691_v14, %v4886_v26  ;;  %vm4903_vm4 = vweird.f32 %v8699_v24  ;;  %v4906_v14 = vand.u32 2147483647, %v13854_v44 }
 0xb6e   : > { %v8703_v22 = vpop.eup %8702  ;;  %8704 = vrcp.f32 %v4866_v17  ;;  %v4895_v32 = vsel %vm4892_vm1, %v4894_v8, %v4890_v58  ;;  %v4934_v43 = vmul.f32 %v8701_v6, %v4769_v39  ;;  %vm4904_vm3 = vmor %vm4902_vm8, %vm4903_vm4  ;;  %v4923_v31 = vand.u32 2147483648, %v4866_v17 }
 0xb6f   : > { %v4899_v16 = vsub.f32 1.0, %v4898_v45  ;;  %v4944_v53 = vmul.f32 %v8703_v22, %v4895_v32  ;;  %8706 = vtanh.f32 %v13899_v41  ;;  %vm4907_vm7 = vcmp.eq.f32.partialorder %v4906_v14, 8.507059e+37  ;;  %v13940_v45 = vld [vmem:[%s15959_s5 + $0x8] sm:$0xff]  ;;  %v13951_v22 = vld [vmem:[%s15959_s5 + $0x10] sm:$0xff] }
 0xb70   : > { %v13912_v29 = vadd.f32 %v4934_v43, %v4930_v52  ;;  %v4921_v28 = vand.u32 2147483647, %v4866_v17  ;;  %vm4917_vm14 = vweird.f32 %v4866_v17  ;;  %v4924_v56 = vor.u32 1.1754944e-38, %v4923_v31  ;;  %v13922_v33 = vpop.permute.xlu1 %6681  ;;  %v13973_v43 = vld [vmem:[%s15959_s5 + $0x20] sm:$0xff]  ;;  %v13991_v52 = vld [vmem:[%s15959_s5 + $0x30] sm:$0xff] }
 0xb71   : > { %4953 = vrot.lane.b32.xlu2 %v4944_v53, %s9208_s26  ;;  %v4900_v62 = vmul.f32 %v8699_v24, %v4899_v16  ;;  %16412 = vst [vmem:[#allocation28_spill] sm:$0xff] %v13922_v33 }
 0xb72   : > { %8708 = vtanh.f32 %v13912_v29  ;;  %vm4922_vm1 = vcmp.eq.f32.partialorder %v4921_v28, 8.507059e+37  ;;  %v14024_v28 = vld [vmem:[%s15959_s5 + $0x48] sm:$0xff] }
 0xb73   : > { %v4901_v30 = vadd.f32 %v8699_v24, %v4900_v62 }
 0xb74   : > { %v8705_v38 = vpop.eup %8704 }
 0xb75   : > { %v4913_v61 = vmul.f32 %v8705_v38, %v4866_v17  ;;  %v4905_v60 = vsel %vm4904_vm3, %v8699_v24, %v4901_v30  ;;  %v8707_v3 = vpop.eup %8706  ;;  %vm4918_vm15 = vweird.f32 %v8705_v38  ;;  %v13920_v24 = vpop.permute.xlu2 %6691  ;;  %v13929_v17 = vld [vmem:[%s15959_s5] sm:$0xff] }
 0xb76   : > { %v4910_v13 = vsel %vm4907_vm7, %v4909_v55, %v4905_v60  ;;  %vm4919_vm12 = vmor %vm4917_vm14, %vm4918_vm15  ;;  %16411 = vst [vmem:[#allocation37_spill] sm:$0xff] %v13920_v24  ;;  %v13995_v30 = vpop.permute.xlu0 %5013 }
 0xb77   : > { %v4914_v0 = vsub.f32 1.0, %v4913_v61  ;;  %v4945_v59 = vmul.f32 %v8707_v3, %v4910_v13  ;;  %v14004_v61 = vld [vmem:[%s15959_s5 + $0x38] sm:$0xff] }
 0xb78   : > { %v8709_v9 = vpop.eup %8708  ;;  %v13935_v51 = vpop.permute.xlu1 %6669 }
 0xb79   : > { %4955 = vrot.lane.b32.xlu1 %v4945_v59, %s9208_s26  ;;  %v4915_v44 = vmul.f32 %v8705_v38, %v4914_v0  ;;  %16414 = vst [vmem:[#allocation30_spill] sm:$0xff] %v13935_v51  ;;  %v14014_v0 = vld [vmem:[%s15959_s5 + $0x40] sm:$0xff] }
 0xb7b   : > { %v4916_v57 = vadd.f32 %v8705_v38, %v4915_v44 }
 0xb7d   : > { %v4920_v35 = vsel %vm4919_vm12, %v8705_v38, %v4916_v57  ;;  %v13933_v6 = vpop.permute.xlu2 %6685 }
 0xb7e   : > { %v4925_v26 = vsel %vm4922_vm1, %v4924_v56, %v4920_v35  ;;  %16413 = vst [vmem:[#allocation33_spill] sm:$0xff] %v13933_v6  ;;  %v5002_v3 = vpop.permute.xlu0 %5001  ;;  %v14033_v56 = vld [vmem:[%s15959_s5 + $0x50] sm:$0xff] }
 0xb7f   : > { %v4946_v8 = vmul.f32 %v8709_v9, %v4925_v26  ;;  %v14043_v26 = vld [vmem:[%s15959_s5 + $0x58] sm:$0xff] }
 0xb80   : > { %v13946_v58 = vpop.permute.xlu1 %6675 }
 0xb81   : > { %5059 = vmatpush.msrb.mxu0 %v4946_v8  ;;  %4957 = vrot.lane.b32.xlu2 %v4946_v8, %s9208_s26  ;;  %16416 = vst [vmem:[#allocation36_spill] sm:$0xff] %v13946_v58 }
 0xb83   : > { %5060 = vmatpush.msrb.mxu0 %v4945_v59 }
 0xb85   : > { %5061 = vmatpush.msrb.mxu0 %v4944_v53 }
 0xb86   : > { %v5008_v31 = vpop.permute.xlu0 %5007 }
 0xb87   : > { %5062 = vmatpush.msrb.mxu0 %v13860_v15  ;;  %v13944_v15 = vpop.permute.xlu2 %7098 }
 0xb88   : > { %7877 = vmatmul.msk.f32.vlgmr.msrb.gmra.mxu0 %vm607_vm0, %v13929_v17  ;;  %16415 = vst [vmem:[#allocation41_spill] sm:$0xff] %v13944_v15  ;;  %v13957_v39 = vpop.permute.xlu1 %6693 }
 0xb89   : > { %16418 = vst [vmem:[#allocation39_spill] sm:$0xff] %v13957_v39 }
 0xb8e   : > { %v14028_v57 = vpop.permute.xlu0 %5025 }
 0xb8f   : > { %v13955_v32 = vpop.permute.xlu2 %7086 }
 0xb90   : > { %7878 = vmatmul.msk.f32.gmra.mxu0 %vm607_vm0, %v13940_v45  ;;  %16417 = vst [vmem:[#allocation34_spill] sm:$0xff] %v13955_v32  ;;  %v13968_v53 = vpop.permute.xlu1 %6687 }
 0xb91   : > { %16420 = vst [vmem:[#allocation40_spill] sm:$0xff] %v13968_v53 }
 0xb96   : > { %v14047_v8 = vpop.permute.xlu0 %5019 }
 0xb97   : > { %v13966_v16 = vpop.permute.xlu2 %7092 }
 0xb98   : > { %7879 = vmatmul.msk.f32.gmra.mxu0 %vm607_vm0, %v13951_v22  ;;  %16419 = vst [vmem:[#allocation43_spill] sm:$0xff] %v13966_v16  ;;  %v13986_v14 = vpop.permute.xlu1 %7090 }
 0xb99   : > { %16422 = vst [vmem:[#allocation42_spill] sm:$0xff] %v13986_v14 }
 0xb9f   : > { %v13984_v62 = vpop.permute.xlu2 %7110 }
 0xba0   : > { %7880 = vmatmul.msk.f32.gmra.mxu0 %vm607_vm0, %v13962_v54  ;;  %16421 = vst [vmem:[#allocation45_spill] sm:$0xff] %v13984_v62  ;;  %v13999_v55 = vpop.permute.xlu1 %7096  ;;  %v14073_v62 = vld [vmem:[%s15959_s5 + $0x70] sm:$0xff] }
 0xba1   : > { %16424 = vst [vmem:[#allocation47_spill] sm:$0xff] %v13999_v55 }
 0xba7   : > { %v13997_v38 = vpop.permute.xlu2 %7104 }
 0xba8   : > { %7881 = vmatmul.msk.f32.gmra.mxu0 %vm607_vm0, %v13973_v43  ;;  %16423 = vst [vmem:[#allocation70_spill] sm:$0xff] %v13997_v38  ;;  %v14009_v13 = vpop.permute.xlu1 %7084  ;;  %v14064_v38 = vld [vmem:[%s15959_s5 + $0x68] sm:$0xff] }
 0xba9   : > { %16425 = vst [vmem:[#allocation38_spill] sm:$0xff] %v14009_v13 }
 0xbb0   : > { %7882 = vmatmul.msk.f32.gmra.mxu0 %vm607_vm0, %v13980_v7  ;;  %v14019_v44 = vpop.permute.xlu1 %7112 }
 0xbb1   : > { %16426 = vst [vmem:[#allocation71_spill] sm:$0xff] %v14019_v44 }
 0xbb8   : > { %7883 = vmatmul.msk.f32.gmra.mxu0 %vm607_vm0, %v13991_v52  ;;  %v14037_v35 = vpop.permute.xlu1 %7106 }
 0xbb9   : > { %16427 = vst [vmem:[#allocation72_spill] sm:$0xff] %v14037_v35  ;;  %v14058_v35 = vpop.permute.xlu0 %5422 }
 0xbba   : > { %16429 = vst [vmem:[#allocation74_spill] sm:$0xff] %v14058_v35 }
 0xbc0   : > { %7884 = vmatmul.msk.f32.gmra.mxu0 %vm607_vm0, %v14004_v61 }
 0xbc1   : > { %v14068_v44 = vpop.permute.xlu0 %5428 }
 0xbc2   : > { %16430 = vst [vmem:[#allocation53_spill] sm:$0xff] %v14068_v44 }
 0xbc3   : > { %v4952_v60 = vpop.permute.xlu2 %4951 }
 0xbc4   : > { %4963 = vst.msk [vmem:[#allocation3] sm:$0xff] %vm1391_vm13, %v4952_v60  ;;  %v14049_v60 = vpop.permute.xlu1 %7100 }
 0xbc5   : > { %16428 = vst [vmem:[#allocation46_spill] sm:$0xff] %v14049_v60 }
 0xbc8   : > { %7885 = vmatmul.msk.f32.gmra.mxu0 %vm607_vm0, %v14014_v0 }
 0xbc9   : > { %v14077_v15 = vpop.permute.xlu0 %5416 }
 0xbca   : > { %16431 = vst [vmem:[#allocation73_spill] sm:$0xff] %v14077_v15 }
 0xbcb   : > { %v4954_v59 = vpop.permute.xlu2 %4953 }
 0xbcc   : > { %4964 = vst.msk [vmem:[#allocation3 + $0x8] sm:$0xff] %vm1391_vm13, %v4954_v59  ;;  %v14054_v59 = vld [vmem:[%s15959_s5 + $0x60] sm:$0xff] }
 0xbd0   : > { %7886 = vmatmul.msk.f32.gmra.mxu0 %vm607_vm0, %v14024_v28 }
 0xbd1   : > { %v14086_v55 = vpop.permute.xlu0 %5444 }
 0xbd2   : > { %16433 = vst [vmem:[#allocation49_spill] sm:$0xff] %v14086_v55 }
 0xbd8   : > { %7887 = vmatmul.msk.f32.gmra.mxu0 %vm607_vm0, %v14033_v56 }
 0xbd9   : > { %v14088_v32 = vpop.permute.xlu0 %5438 }
 0xbda   : > { %16434 = vst [vmem:[#allocation44_spill] sm:$0xff] %v14088_v32 }
 0xbdb   : > { %v4958_v9 = vpop.permute.xlu2 %4957 }
 0xbdc   : > { %4966 = vst.msk [vmem:[#allocation3 + $0x18] sm:$0xff] %vm1391_vm13, %v4958_v9 }
 0xbe0   : > { %7888 = vmatmul.msk.f32.gmra.mxu0 %vm607_vm0, %v14043_v26 }
 0xbe1   : > { %v14090_v18 = vpop.permute.xlu0 %5432 }
 0xbe2   : > { %16435 = vst [vmem:[#allocation48_spill] sm:$0xff] %v14090_v18 }
 0xbe8   : > { %7889 = vmatmul.msk.f32.gmra.mxu0 %vm607_vm0, %v14054_v59 }
 0xbe9   : > { %v14092_v6 = vpop.permute.xlu0 %5837 }
 0xbea   : > { %16436 = vst [vmem:[#allocation77_spill] sm:$0xff] %v14092_v6 }
 0xbeb   : > { %v4956_v9 = vpop.permute.xlu1 %4955 }
 0xbec   : > { %4965 = vst.msk [vmem:[#allocation3 + $0x10] sm:$0xff] %vm1391_vm13, %v4956_v9  ;;  %v14082_v9 = vld [vmem:[%s15959_s5 + $0x78] sm:$0xff] }
 0xbed   : > { %16432 = vst [vmem:[#allocation51_spill] sm:$0xff] %v14082_v9 }
 0xbf0   : > { %7890 = vmatmul.msk.f32.gmra.mxu0 %vm607_vm0, %v14064_v38 }
 0xbf1   : > { %v14094_v24 = vpop.permute.xlu0 %5843 }
 0xbf2   : > { %16437 = vst [vmem:[#allocation50_spill] sm:$0xff] %v14094_v24 }
 0xbf8   : > { %7891 = vmatmul.msk.f32.gmra.mxu0 %vm607_vm0, %v14073_v62 }
 0xbf9   : > { %v14097_v1 = vpop.permute.xlu0 %5863 }
 0xbfa   : > { %16438 = vst [vmem:[#allocation76_spill] sm:$0xff] %v14097_v1 }
 0xc00   : > { %7892 = vmatmul.msk.f32.gmra.mxu0 %vm607_vm0, %v14082_v9 }
 0xc01   : > { %v14101_v46 = vpop.permute.xlu0 %5857 }
 0xc02   : > { %16439 = vst [vmem:[#allocation54_spill] sm:$0xff] %v14101_v46 }
 0xc05   : > { %v5064_v14 = vpop.f32.mrf.mxu0 }
 0xc06   : > { %v5065_v42 = vadd.f32 %v5064_v14, %v13429_v23 }
 0xc08   : > { %v7893_v51 = vmul.f32 -1.442695, %v5065_v42 }
 0xc0a   : > { %8710 = vpow2.f32 %v7893_v51 }
 0xc0d   : > { %v5067_v60 = vpop.f32.mrf.mxu0 }
 0xc0e   : > { %v5068_v48 = vadd.f32 %v5067_v60, %v5002_v3  ;;  %v14111_v3 = vpop.permute.xlu0 %5851 }
 0xc0f   : > { %16440 = vst [vmem:[#allocation52_spill] sm:$0xff] %v14111_v3 }
 0xc10   : > { %v7894_v20 = vmul.f32 -1.442695, %v5068_v48  ;;  %v8711_v32 = vpop.eup %8710 }
 0xc11   : > { %v14104_v24 = vadd.f32 1.0, %v8711_v32 }
 0xc12   : > { %8712 = vpow2.f32 %v7894_v20 }
 0xc13   : > { %vm5133_vm5 = vweird.f32 %v14104_v24 }
 0xc15   : > { %v5070_v16 = vpop.f32.mrf.mxu0 }
 0xc16   : > { %v5071_v6 = vadd.f32 %v5070_v16, %v13467_v12 }
 0xc18   : > { %v7895_v23 = vmul.f32 -1.442695, %v5071_v6  ;;  %v8713_v48 = vpop.eup %8712 }
 0xc19   : > { %v14114_v20 = vadd.f32 1.0, %v8713_v48 }
 0xc1b   : > { %v5152_v47 = vand.u32 2147483647, %v14114_v20  ;;  %vm5148_vm8 = vweird.f32 %v14114_v20 }
 0xc1d   : > { %v5073_v13 = vpop.f32.mrf.mxu0  ;;  %vm14187_vm15 = vcmp.eq.f32.partialorder %v5152_v47, 8.507059e+37 }
 0xc1e   : > { %v5074_v51 = vadd.f32 %v5073_v13, %v13407_v36 }
 0xc25   : > { %v5076_v53 = vpop.f32.mrf.mxu0 }
 0xc26   : > { %v5077_v2 = vadd.f32 %v5076_v53, %v5008_v31 }
 0xc28   : > { %v7897_v55 = vmul.f32 -1.442695, %v5077_v2  ;;  %v7896_v2 = vmul.f32 -1.442695, %v5074_v51 }
 0xc2a   : > { %8714 = vpow2.f32 %v7897_v55 }
 0xc2b   : > { %8716 = vrcp.f32 %v14104_v24 }
 0xc2c   : > { %8718 = vpow2.f32 %v7895_v23 }
 0xc2d   : > { %v5079_v39 = vpop.f32.mrf.mxu0 }
 0xc2e   : > { %v5080_v42 = vadd.f32 %v5079_v39, %v13479_v25 }
 0xc30   : > { %v7898_v53 = vmul.f32 -1.442695, %v5080_v42  ;;  %v8715_v12 = vpop.eup %8714 }
 0xc31   : > { %v8717_v6 = vpop.eup %8716  ;;  %v14116_v25 = vadd.f32 1.0, %v8715_v12 }
 0xc32   : > { %8720 = vpow2.f32 %v7898_v53  ;;  %v8719_v36 = vpop.eup %8718  ;;  %v5129_v55 = vmul.f32 %v8717_v6, %v14104_v24  ;;  %vm5134_vm13 = vweird.f32 %v8717_v6 }
 0xc33   : > { %8722 = vpow2.f32 %v7896_v2  ;;  %v14122_v13 = vadd.f32 1.0, %v8719_v36  ;;  %vm14160_vm6 = vmor %vm5133_vm5, %vm5134_vm13  ;;  %vm5209_vm14 = vweird.f32 %v14116_v25 }
 0xc34   : > { %8724 = vrcp.f32 %v14114_v20  ;;  %v5130_v23 = vsub.f32 1.0, %v5129_v55 }
 0xc35   : > { %v5082_v33 = vpop.f32.mrf.mxu0  ;;  %8726 = vrcp.f32 %v14116_v25  ;;  %vm5163_vm5 = vweird.f32 %v14122_v13 }
 0xc36   : > { %v5083_v32 = vadd.f32 %v5082_v33, %v13419_v19  ;;  %v14125_v33 = vpop.permute.xlu0 %6264  ;;  %v5131_v36 = vmul.f32 %v8717_v6, %v5130_v23 }
 0xc37   : > { %16441 = vst [vmem:[#allocation75_spill] sm:$0xff] %v14125_v33 }
 0xc38   : > { %v7899_v39 = vmul.f32 -1.442695, %v5083_v32  ;;  %v8721_v19 = vpop.eup %8720 }
 0xc39   : > { %v8723_v31 = vpop.eup %8722  ;;  %v14129_v42 = vadd.f32 1.0, %v8721_v19 }
 0xc3a   : > { %8728 = vpow2.f32 %v7899_v39  ;;  %v14131_v51 = vpop.eup %8724  ;;  %v14137_v12 = vadd.f32 1.0, %v8723_v31  ;;  %v5132_v31 = vadd.f32 %v8717_v6, %v5131_v36 }
 0xc3b   : > { %8730 = vrcp.f32 %v14122_v13  ;;  %v14135_v48 = vpop.eup %8726  ;;  %v5144_v39 = vmul.f32 %v14131_v51, %v14114_v20  ;;  %vm5149_vm3 = vweird.f32 %v14131_v51 }
 0xc3c   : > { %8732 = vrcp.f32 %v14129_v42  ;;  %vm5210_vm7 = vweird.f32 %v14135_v48  ;;  %vm14223_vm13 = vmor %vm5148_vm8, %vm5149_vm3 }
 0xc3d   : > { %v5085_v58 = vpop.f32.mrf.mxu0  ;;  %8734 = vrcp.f32 %v14137_v12  ;;  %v5145_v46 = vsub.f32 1.0, %v5144_v39  ;;  %v5136_v39 = vsel %vm14160_vm6, %v8717_v6, %v5132_v31  ;;  %v5167_v31 = vand.u32 2147483647, %v14122_v13  ;;  %vm14206_vm1 = vmor %vm5209_vm14, %vm5210_vm7 }
 0xc3e   : > { %v5086_v60 = vadd.f32 %v5085_v58, %v13995_v30  ;;  %v5205_v58 = vmul.f32 %v14135_v48, %v14116_v25  ;;  %v14149_v19 = vpop.permute.xlu0 %6252  ;;  %vm5224_vm7 = vweird.f32 %v14129_v42 }
 0xc3f   : > { %16442 = vst [vmem:[#allocation55_spill] sm:$0xff] %v14149_v19  ;;  %v5154_v19 = vand.u32 2147483648, %v14114_v20  ;;  %v5146_v63 = vmul.f32 %v14131_v51, %v5145_v46  ;;  %vm14228_vm6 = vcmp.eq.f32.partialorder %v5167_v31, 8.507059e+37 }
 0xc40   : > { %v8729_v2 = vpop.eup %8728  ;;  %v7900_v32 = vmul.f32 -1.442695, %v5086_v60  ;;  %v5139_v60 = vand.u32 2147483648, %v14104_v24  ;;  %v5206_v33 = vsub.f32 1.0, %v5205_v58 }
 0xc41   : > { %v14142_v30 = vpop.eup %8730  ;;  %v14147_v55 = vadd.f32 1.0, %v8729_v2  ;;  %v5137_v2 = vand.u32 2147483647, %v14104_v24 }
 0xc42   : > { %8736 = vpow2.f32 %v7900_v32  ;;  %v5159_v23 = vmul.f32 %v14142_v30, %v14122_v13  ;;  %v14155_v3 = vpop.eup %8732  ;;  %v5140_v44 = vor.u32 1.1754944e-38, %v5139_v60  ;;  %vm5164_vm12 = vweird.f32 %v14142_v30 }
 0xc43   : > { %8738 = vrcp.f32 %v14147_v55  ;;  %v14165_v18 = vpop.eup %8734  ;;  %vm5138_vm4 = vcmp.eq.f32.partialorder %v5137_v2, 8.507059e+37  ;;  %v5147_v2 = vadd.f32 %v14131_v51, %v5146_v63  ;;  %vm14238_vm8 = vmor %vm5163_vm5, %vm5164_vm12  ;;  %vm5225_vm3 = vweird.f32 %v14155_v3 }
 0xc44   : > { %v5160_v24 = vsub.f32 1.0, %v5159_v23  ;;  %v5141_v4 = vsel %vm5138_vm4, %v5140_v44, %v5136_v39  ;;  %v5174_v6 = vmul.f32 %v14165_v18, %v14137_v12  ;;  %vm14261_vm14 = vmor %vm5224_vm7, %vm5225_vm3 }
 0xc45   : > { %v14099_v27 = vpop.f32.mrf.mxu0 }
 0xc46   : > { %v5089_v58 = vadd.f32 %v14099_v27, %v13465_v34  ;;  %v5155_v34 = vor.u32 1.1754944e-38, %v5154_v19  ;;  %v14192_v23 = vpop.permute.xlu0 %6258 }
 0xc47   : > { %16447 = vst [vmem:[#allocation56_spill] sm:$0xff] %v14192_v23 }
 0xc48   : > { %v8737_v37 = vpop.eup %8736 }
 0xc49   : > { %v14178_v27 = vpop.eup %8738 }
 0xc4a   : > { %v5235_v47 = vmul.f32 %v14178_v27, %v14147_v55  ;;  %vm5240_vm12 = vweird.f32 %v14178_v27 }
 0xc4d   : > { %v14108_v14 = vpop.f32.mrf.mxu0 }
 0xc55   : > { %v14118_v16 = vpop.f32.mrf.mxu0 }
 0xc5d   : > { %v14133_v53 = vpop.f32.mrf.mxu0 }
 0xc65   : > { %v5100_v1 = vpop.f32.mrf.mxu0 }
 0xc66   : > { %v5101_v32 = vadd.f32 %v5100_v1, %v13503_v5  ;;  %v5207_v5 = vmul.f32 %v14135_v48, %v5206_v33  ;;  %v5220_v1 = vmul.f32 %v14155_v3, %v14129_v42  ;;  %v14182_v33 = vadd.f32 1.0, %v8737_v37 }
 0xc67   : > { %v5215_v37 = vand.u32 2147483648, %v14116_v25 }
 0xc68   : > { %v7901_v35 = vmul.f32 -1.442695, %v5101_v32  ;;  %v5221_v60 = vsub.f32 1.0, %v5220_v1  ;;  %v5208_v46 = vadd.f32 %v14135_v48, %v5207_v5  ;;  %v5169_v32 = vand.u32 2147483648, %v14122_v13 }
 0xc69   : > { %v5216_v15 = vor.u32 1.1754944e-38, %v5215_v37  ;;  %v5230_v37 = vand.u32 2147483648, %v14129_v42 }
 0xc6a   : > { %8740 = vpow2.f32 %v7901_v35  ;;  %v5161_v35 = vmul.f32 %v14142_v30, %v5160_v24  ;;  %v5175_v24 = vsub.f32 1.0, %v5174_v6  ;;  %v5222_v1 = vmul.f32 %v14155_v3, %v5221_v60 }
 0xc6b   : > { %8742 = vtanh.f32 %v5089_v58  ;;  %v5213_v58 = vand.u32 2147483647, %v14116_v25  ;;  %v5212_v25 = vsel %vm14206_vm1, %v14135_v48, %v5208_v46  ;;  %v5151_v48 = vsel %vm14223_vm13, %v14131_v51, %v5147_v2 }
 0xc6c   : > { %8744 = vrcp.f32 %v14182_v33  ;;  %v5162_v6 = vadd.f32 %v14142_v30, %v5161_v35  ;;  %v5170_v13 = vor.u32 1.1754944e-38, %v5169_v32  ;;  %v5176_v31 = vmul.f32 %v14165_v18, %v5175_v24 }
 0xc6d   : > { %v5103_v19 = vpop.f32.mrf.mxu0  ;;  %vm5214_vm4 = vcmp.eq.f32.partialorder %v5213_v58, 8.507059e+37  ;;  %v5223_v35 = vadd.f32 %v14155_v3, %v5222_v1  ;;  %v5156_v2 = vsel %vm14187_vm15, %v5155_v34, %v5151_v48  ;;  %v5228_v32 = vand.u32 2147483647, %v14129_v42  ;;  %v14259_v58 = vpop.permute.xlu0 %6276 }
 0xc6e   : > { %v5104_v36 = vadd.f32 %v5103_v19, %v14028_v57  ;;  %v5092_v57 = vadd.f32 %v14108_v14, %v13515_v40  ;;  %v5236_v14 = vsub.f32 1.0, %v5235_v47  ;;  %v5217_v20 = vsel %vm5214_vm4, %v5216_v15, %v5212_v25 }
 0xc6f   : > { %v5166_v9 = vsel %vm14238_vm8, %v14142_v30, %v5162_v6  ;;  %v5184_v30 = vand.u32 2147483648, %v14137_v12  ;;  %v5095_v34 = vadd.f32 %v14118_v16, %v14047_v8  ;;  %v14272_v42 = vadd.f32 %v14165_v18, %v5176_v31 }
 0xc70   : > { %v8741_v39 = vpop.eup %8740  ;;  %v7902_v5 = vmul.f32 -1.442695, %v5104_v36  ;;  %v5344_v36 = vmul.f32 %v5217_v20, %v13816_v21  ;;  %vm5229_vm15 = vcmp.eq.f32.partialorder %v5228_v32, 8.507059e+37  ;;  %v5231_v16 = vor.u32 1.1754944e-38, %v5230_v37 }
 0xc71   : > { %v14217_v19 = vadd.f32 1.0, %v8741_v39  ;;  %v8743_v23 = vpop.eup %8742  ;;  %v5245_v25 = vand.u32 2147483648, %v14147_v55  ;;  %vm5239_vm1 = vweird.f32 %v14147_v55  ;;  %vm5179_vm13 = vweird.f32 %v14165_v18 }
 0xc72   : > { %8746 = vpow2.f32 %v7902_v5  ;;  %v5348_v46 = vmul.f32 %v8743_v23, %v5141_v4  ;;  %v14248_v51 = vpop.eup %8744  ;;  %v5237_v23 = vmul.f32 %v14178_v27, %v5236_v14  ;;  %vm14292_vm5 = vmor %vm5239_vm1, %vm5240_vm12  ;;  %v5243_v37 = vand.u32 2147483647, %v14147_v55 }
 0xc73   : > { %8748 = vrcp.f32 %v14217_v19  ;;  %v5250_v24 = vmul.f32 %v14248_v51, %v14182_v33  ;;  %v5295_v60 = vand.u32 2147483648, %v14217_v19  ;;  %vm5289_vm8 = vweird.f32 %v14217_v19 }
 0xc74   : > { %8750 = vtanh.f32 %v5092_v57  ;;  %v14276_v63 = vadd.f32 %v5348_v46, %v5344_v36  ;;  %v5227_v57 = vsel %vm14261_vm14, %v14155_v3, %v5223_v35  ;;  %v5238_v6 = vadd.f32 %v14178_v27, %v5237_v23 }
 0xc75   : > { %v5106_v15 = vpop.f32.mrf.mxu0  ;;  %v5232_v40 = vsel %vm5229_vm15, %v5231_v16, %v5227_v57  ;;  %v5251_v14 = vsub.f32 1.0, %v5250_v24  ;;  %v5293_v35 = vand.u32 2147483647, %v14217_v19  ;;  %vm5244_vm14 = vcmp.eq.f32.partialorder %v5243_v37, 8.507059e+37 }
 0xc76   : > { %v5107_v4 = vadd.f32 %v5106_v15, %v13441_v49  ;;  %v14269_v49 = vsel %vm14228_vm6, %v5170_v13, %v5166_v9  ;;  %vm5178_vm6 = vweird.f32 %v14137_v12  ;;  %v5345_v9 = vmul.f32 %v5232_v40, %v13852_v50 }
 0xc77   : > { %v5242_v15 = vsel %vm14292_vm5, %v14178_v27, %v5238_v6  ;;  %v5296_v27 = vor.u32 1.1754944e-38, %v5295_v60  ;;  %vm5294_vm7 = vcmp.eq.f32.partialorder %v5293_v35, 8.507059e+37  ;;  %vm5255_vm15 = vweird.f32 %v14248_v51  ;;  %vm14334_vm5 = vmor %vm5178_vm6, %vm5179_vm13 }
 0xc78   : > { %v8747_v47 = vpop.eup %8746  ;;  %v7903_v21 = vmul.f32 -1.442695, %v5107_v4  ;;  %v5098_v4 = vadd.f32 %v14133_v53, %v13453_v11  ;;  %vm5254_vm1 = vweird.f32 %v14182_v33  ;;  %v5181_v60 = vsel %vm14334_vm5, %v14165_v18, %v14272_v42 }
 0xc79   : > { %v8749_v44 = vpop.eup %8748  ;;  %v14281_v5 = vadd.f32 1.0, %v8747_v47  ;;  %v5252_v47 = vmul.f32 %v14248_v51, %v5251_v14  ;;  %v5182_v14 = vand.u32 2147483647, %v14137_v12 }
 0xc7a   : > { %v8751_v8 = vpop.eup %8750  ;;  %v5285_v1 = vmul.f32 %v8749_v44, %v14217_v19  ;;  %8752 = vpow2.f32 %v7903_v21  ;;  %vm5290_vm4 = vweird.f32 %v8749_v44 }
 0xc7b   : > { %8754 = vrcp.f32 %v14281_v5  ;;  %v5349_v48 = vmul.f32 %v8751_v8, %v5156_v2  ;;  %v5246_v2 = vor.u32 1.1754944e-38, %v5245_v25  ;;  %vm5291_vm3 = vmor %vm5289_vm8, %vm5290_vm4  ;;  %v5260_v25 = vand.u32 2147483648, %v14182_v33 }
 0xc7c   : > { %8756 = vtanh.f32 %v5095_v34  ;;  %v5286_v3 = vsub.f32 1.0, %v5285_v1  ;;  %v14313_v34 = vpop.permute.xlu0 %6270  ;;  %v5253_v1 = vadd.f32 %v14248_v51, %v5252_v47  ;;  %v5308_v40 = vand.u32 2147483647, %v14281_v5  ;;  %vm14348_vm4 = vmor %vm5254_vm1, %vm5255_vm15 }
 0xc7d   : > { %8758 = vtanh.f32 %v14276_v63  ;;  %v5109_v20 = vpop.f32.mrf.mxu0  ;;  %v14308_v39 = vadd.f32 %v5349_v48, %v5345_v9  ;;  %v5247_v24 = vsel %vm5244_vm14, %v5246_v2, %v5242_v15  ;;  %v5258_v48 = vand.u32 2147483647, %v14182_v33 }
 0xc7e   : > { %v5110_v31 = vadd.f32 %v5109_v20, %v13491_v10  ;;  %v5287_v46 = vmul.f32 %v8749_v44, %v5286_v3  ;;  %v5346_v3 = vmul.f32 %v5247_v24, %v13899_v41  ;;  %v5185_v41 = vor.u32 1.1754944e-38, %v5184_v30 }
 0xc7f   : > { %vm5304_vm13 = vweird.f32 %v14281_v5  ;;  %v5257_v35 = vsel %vm14348_vm4, %v14248_v51, %v5253_v1  ;;  %v5261_v42 = vor.u32 1.1754944e-38, %v5260_v25  ;;  %vm5309_vm8 = vcmp.eq.f32.partialorder %v5308_v40, 8.507059e+37 }
 0xc80   : > { %v8753_v32 = vpop.eup %8752  ;;  %v7904_v23 = vmul.f32 -1.442695, %v5110_v31  ;;  %v5288_v36 = vadd.f32 %v8749_v44, %v5287_v46 }
 0xc81   : > { %v8755_v10 = vpop.eup %8754  ;;  %v14310_v50 = vadd.f32 1.0, %v8753_v32 }
 0xc82   : > { %v8757_v55 = vpop.eup %8756  ;;  %v5300_v21 = vmul.f32 %v8755_v10, %v14281_v5  ;;  %8760 = vpow2.f32 %v7904_v23  ;;  %v5292_v11 = vsel %vm5291_vm3, %v8749_v44, %v5288_v36  ;;  %v5310_v44 = vand.u32 2147483648, %v14281_v5 }
 0xc83   : > { %v8759_v53 = vpop.eup %8758  ;;  %8762 = vrcp.f32 %v14310_v50  ;;  %v5297_v19 = vsel %vm5294_vm7, %v5296_v27, %v5292_v11  ;;  %v5350_v16 = vmul.f32 %v8757_v55, %v14269_v49  ;;  %vm5305_vm12 = vweird.f32 %v8755_v10 }
 0xc84   : > { %8764 = vtanh.f32 %v5098_v4  ;;  %v5301_v57 = vsub.f32 1.0, %v5300_v21  ;;  %v14318_v8 = vmul.f32 %v8759_v53, %v5297_v19  ;;  %vm5306_vm6 = vmor %vm5304_vm13, %vm5305_vm12  ;;  %v5311_v12 = vor.u32 1.1754944e-38, %v5310_v44  ;;  %v14360_v2 = vpop.permute.xlu0 %6673 }
 0xc85   : > { %8766 = vtanh.f32 %v14308_v39  ;;  %v14353_v33 = vadd.f32 %v5350_v16, %v5346_v3  ;;  %vm5183_vm3 = vcmp.eq.f32.partialorder %v5182_v14, 8.507059e+37  ;;  %vm5259_vm7 = vcmp.eq.f32.partialorder %v5258_v48, 8.507059e+37  ;;  %16464 = vst [vmem:[#allocation7_spill] sm:$0xff] %v14360_v2 }
 0xc86   : > { %5368 = vrot.lane.b32.xlu0 %v14318_v8, %s9207_s25  ;;  %v5302_v6 = vmul.f32 %v8755_v10, %v5301_v57  ;;  %v5186_v32 = vsel %vm5183_vm3, %v5185_v41, %v5181_v60  ;;  %v5262_v4 = vsel %vm5259_vm7, %v5261_v42, %v5257_v35  ;;  %v5325_v47 = vand.u32 2147483648, %v14310_v50 }
 0xc87   : > { %v5323_v27 = vand.u32 2147483647, %v14310_v50  ;;  %v5347_v55 = vmul.f32 %v5262_v4, %v13912_v29  ;;  %vm5319_vm15 = vweird.f32 %v14310_v50 }
 0xc88   : > { %v8761_v20 = vpop.eup %8760  ;;  %v5303_v31 = vadd.f32 %v8755_v10, %v5302_v6  ;;  %v5326_v19 = vor.u32 1.1754944e-38, %v5325_v47 }
 0xc89   : > { %v8763_v46 = vpop.eup %8762  ;;  %v5283_v18 = vadd.f32 1.0, %v8761_v20  ;;  %vm5324_vm1 = vcmp.eq.f32.partialorder %v5323_v27, 8.507059e+37 }
 0xc8a   : > { %v8765_v30 = vpop.eup %8764  ;;  %v5315_v9 = vmul.f32 %v8763_v46, %v14310_v50  ;;  %v5307_v15 = vsel %vm5306_vm6, %v8755_v10, %v5303_v31  ;;  %vm5320_vm14 = vweird.f32 %v8763_v46 }
 0xc8b   : > { %v8767_v37 = vpop.eup %8766  ;;  %8768 = vrcp.f32 %v5283_v18  ;;  %v5312_v5 = vsel %vm5309_vm8, %v5311_v12, %v5307_v15  ;;  %v5351_v36 = vmul.f32 %v8765_v30, %v5186_v32  ;;  %vm5321_vm12 = vmor %vm5319_vm15, %vm5320_vm14  ;;  %v5340_v6 = vand.u32 2147483648, %v5283_v18  ;;  %v16475_v30 = vld [vmem:[#allocation73_spill] sm:$0xff]  ;;  %v16476_v15 = vld [vmem:[#allocation15_spill] sm:$0xff] }
 0xc8c   : > { %v5316_v51 = vsub.f32 1.0, %v5315_v9  ;;  %v5361_v23 = vmul.f32 %v8767_v37, %v5312_v5  ;;  %8770 = vtanh.f32 %v14353_v33  ;;  %v14371_v40 = vpop.permute.xlu0 %6679  ;;  %v5338_v50 = vand.u32 2147483647, %v5283_v18  ;;  %v16477_v5 = vld [vmem:[#allocation60_spill] sm:$0xff] }
 0xc8d   : > { %v14368_v53 = vadd.f32 %v5351_v36, %v5347_v55  ;;  %16465 = vst [vmem:[#allocation11_spill] sm:$0xff] %v14371_v40  ;;  %vm5334_vm4 = vweird.f32 %v5283_v18  ;;  %v5341_v49 = vor.u32 1.1754944e-38, %v5340_v6  ;;  %v16479_v55 = vld [vmem:[#allocation6_spill] sm:$0xff] }
 0xc8e   : > { %5370 = vrot.lane.b32.xlu2 %v5361_v23, %s9207_s25  ;;  %v5317_v10 = vmul.f32 %v8763_v46, %v5316_v51  ;;  %vm5339_vm6 = vcmp.eq.f32.partialorder %v5338_v50, 8.507059e+37 }
 0xc8f   : > { %8772 = vtanh.f32 %v14368_v53 }
 0xc90   : > { %v5318_v21 = vadd.f32 %v8763_v46, %v5317_v10 }
 0xc91   : > { %v8769_v11 = vpop.eup %8768 }
 0xc92   : > { %v5330_v24 = vmul.f32 %v8769_v11, %v5283_v18  ;;  %v5322_v57 = vsel %vm5321_vm12, %v8763_v46, %v5318_v21  ;;  %v8771_v16 = vpop.eup %8770  ;;  %vm5335_vm5 = vweird.f32 %v8769_v11 }
 0xc93   : > { %v5327_v1 = vsel %vm5324_vm1, %v5326_v19, %v5322_v57  ;;  %vm5336_vm13 = vmor %vm5334_vm4, %vm5335_vm5 }
 0xc94   : > { %v5331_v44 = vsub.f32 1.0, %v5330_v24  ;;  %v5362_v25 = vmul.f32 %v8771_v16, %v5327_v1  ;;  %v14375_v41 = vpop.permute.xlu0 %6667 }
 0xc95   : > { %v8773_v48 = vpop.eup %8772 }
 0xc96   : > { %5372 = vrot.lane.b32.xlu0 %v5362_v25, %s9207_s25  ;;  %v5332_v29 = vmul.f32 %v8769_v11, %v5331_v44 }
 0xc98   : > { %v5333_v3 = vadd.f32 %v8769_v11, %v5332_v29 }
 0xc9a   : > { %v5337_v14 = vsel %vm5336_vm13, %v8769_v11, %v5333_v3  ;;  %v16480_v11 = vld [vmem:[#allocation74_spill] sm:$0xff] }
 0xc9b   : > { %v5342_v20 = vsel %vm5339_vm6, %v5341_v49, %v5337_v14 }
 0xc9c   : > { %v5363_v60 = vmul.f32 %v8773_v48, %v5342_v20  ;;  %v14380_v13 = vpop.permute.xlu0 %6695 }
 0xc9d   : > { %16466 = vst [vmem:[#allocation9_spill] sm:$0xff] %v14380_v13 }
 0xc9e   : > { %5476 = vmatpush.msrb.mxu1 %v5363_v60  ;;  %5374 = vrot.lane.b32.xlu0 %v5363_v60, %s9207_s25 }
 0xca0   : > { %5477 = vmatpush.msrb.mxu1 %v5362_v25  ;;  %v16481_v25 = vld [vmem:[#allocation53_spill] sm:$0xff] }
 0xca2   : > { %5478 = vmatpush.msrb.mxu1 %v5361_v23  ;;  %v16478_v23 = vld [vmem:[#allocation5_spill] sm:$0xff] }
 0xca4   : > { %5479 = vmatpush.msrb.mxu1 %v14318_v8  ;;  %v14384_v31 = vpop.permute.xlu0 %6689 }
 0xca5   : > { %7905 = vmatmul.msk.f32.vlgmr.msrb.gmra.mxu1 %vm607_vm0, %v13929_v17  ;;  %16467 = vst [vmem:[#allocation10_spill] sm:$0xff] %v14384_v31 }
 0xcac   : > { %v14390_v46 = vpop.permute.xlu0 %6683 }
 0xcad   : > { %7906 = vmatmul.msk.f32.gmra.mxu1 %vm607_vm0, %v13940_v45  ;;  %16468 = vst [vmem:[#allocation57_spill] sm:$0xff] %v14390_v46 }
 0xcb4   : > { %v14394_v8 = vpop.permute.xlu0 %7088 }
 0xcb5   : > { %7907 = vmatmul.msk.f32.gmra.mxu1 %vm607_vm0, %v13951_v22  ;;  %16469 = vst [vmem:[#allocation58_spill] sm:$0xff] %v14394_v8 }
 0xcbc   : > { %v14398_v17 = vpop.permute.xlu0 %7094 }
 0xcbd   : > { %7908 = vmatmul.msk.f32.gmra.mxu1 %vm607_vm0, %v13962_v54  ;;  %16470 = vst [vmem:[#allocation78_spill] sm:$0xff] %v14398_v17 }
 0xcc4   : > { %v14402_v45 = vpop.permute.xlu0 %7108 }
 0xcc5   : > { %7909 = vmatmul.msk.f32.gmra.mxu1 %vm607_vm0, %v13973_v43  ;;  %16471 = vst [vmem:[#allocation79_spill] sm:$0xff] %v14402_v45 }
 0xccc   : > { %v14408_v22 = vpop.permute.xlu0 %7114 }
 0xccd   : > { %7910 = vmatmul.msk.f32.gmra.mxu1 %vm607_vm0, %v13980_v7  ;;  %16472 = vst [vmem:[#allocation80_spill] sm:$0xff] %v14408_v22 }
 0xcd4   : > { %v14413_v43 = vpop.permute.xlu0 %7102 }
 0xcd5   : > { %7911 = vmatmul.msk.f32.gmra.mxu1 %vm607_vm0, %v13991_v52  ;;  %16473 = vst [vmem:[#allocation81_spill] sm:$0xff] %v14413_v43 }
 0xcdd   : > { %7912 = vmatmul.msk.f32.gmra.mxu1 %vm607_vm0, %v14004_v61 }
 0xce5   : > { %7913 = vmatmul.msk.f32.gmra.mxu1 %vm607_vm0, %v14014_v0  ;;  %v16474_v0 = vld [vmem:[#allocation51_spill] sm:$0xff] }
 0xce8   : > { %v5371_v54 = vpop.permute.xlu2 %5370 }
 0xce9   : > { %5381 = vst.msk [vmem:[#allocation3 + $0x8] sm:$0xff] %vm1809_vm10, %v5371_v54 }
 0xced   : > { %7914 = vmatmul.msk.f32.gmra.mxu1 %vm607_vm0, %v14024_v28 }
 0xcf5   : > { %7915 = vmatmul.msk.f32.gmra.mxu1 %vm607_vm0, %v14033_v56 }
 0xcf8   : > { %v5369_v7 = vpop.permute.xlu0 %5368 }
 0xcf9   : > { %5380 = vst.msk [vmem:[#allocation3] sm:$0xff] %vm1809_vm10, %v5369_v7 }
 0xcfd   : > { %7916 = vmatmul.msk.f32.gmra.mxu1 %vm607_vm0, %v14043_v26 }
 0xd05   : > { %7917 = vmatmul.msk.f32.gmra.mxu1 %vm607_vm0, %v14054_v59 }
 0xd08   : > { %v5373_v52 = vpop.permute.xlu0 %5372 }
 0xd09   : > { %5382 = vst.msk [vmem:[#allocation3 + $0x10] sm:$0xff] %vm1809_vm10, %v5373_v52  ;;  %v16482_v52 = vld [vmem:[#allocation59_spill] sm:$0xff] }
 0xd0d   : > { %7918 = vmatmul.msk.f32.gmra.mxu1 %vm607_vm0, %v14064_v38 }
 0xd10   : > { %v5375_v61 = vpop.permute.xlu0 %5374 }
 0xd11   : > { %5383 = vst.msk [vmem:[#allocation3 + $0x18] sm:$0xff] %vm1809_vm10, %v5375_v61 }
 0xd15   : > { %7919 = vmatmul.msk.f32.gmra.mxu1 %vm607_vm0, %v14073_v62 }
 0xd1d   : > { %7920 = vmatmul.msk.f32.gmra.mxu1 %vm607_vm0, %v16474_v0 }
 0xd22   : > { %v5481_v28 = vpop.f32.mrf.mxu1 }
 0xd23   : > { %v5482_v42 = vadd.f32 %v5481_v28, %v16475_v30 }
 0xd25   : > { %v7921_v9 = vmul.f32 -1.442695, %v5482_v42 }
 0xd27   : > { %8774 = vpow2.f32 %v7921_v9 }
 0xd2a   : > { %v5484_v56 = vpop.f32.mrf.mxu1 }
 0xd2b   : > { %v5485_v37 = vadd.f32 %v5484_v56, %v16476_v15 }
 0xd2d   : > { %v7922_v4 = vmul.f32 -1.442695, %v5485_v37  ;;  %v8775_v51 = vpop.eup %8774 }
 0xd2e   : > { %v14436_v10 = vadd.f32 1.0, %v8775_v51 }
 0xd2f   : > { %8776 = vpow2.f32 %v7922_v4 }
 0xd30   : > { %vm5550_vm8 = vweird.f32 %v14436_v10 }
 0xd32   : > { %v5487_v26 = vpop.f32.mrf.mxu1 }
 0xd33   : > { %v5488_v36 = vadd.f32 %v5487_v26, %v16478_v23 }
 0xd35   : > { %v7923_v27 = vmul.f32 -1.442695, %v5488_v36  ;;  %v8777_v16 = vpop.eup %8776 }
 0xd36   : > { %v14444_v29 = vadd.f32 1.0, %v8777_v16 }
 0xd38   : > { %vm5565_vm14 = vweird.f32 %v14444_v29 }
 0xd3a   : > { %v5490_v35 = vpop.f32.mrf.mxu1 }
 0xd3b   : > { %v5491_v19 = vadd.f32 %v5490_v35, %v16480_v11  ;;  %v5571_v11 = vand.u32 2147483648, %v14444_v29 }
 0xd3d   : > { %v7924_v44 = vmul.f32 -1.442695, %v5491_v19 }
 0xd42   : > { %v5493_v59 = vpop.f32.mrf.mxu1 }
 0xd43   : > { %v5494_v32 = vadd.f32 %v5493_v59, %v16477_v5  ;;  %v5556_v5 = vand.u32 2147483648, %v14436_v10 }
 0xd45   : > { %v7925_v47 = vmul.f32 -1.442695, %v5494_v32 }
 0xd47   : > { %8778 = vpow2.f32 %v7925_v47  ;;  %v5554_v47 = vand.u32 2147483647, %v14436_v10 }
 0xd48   : > { %8780 = vrcp.f32 %v14436_v10 }
 0xd49   : > { %8782 = vpow2.f32 %v7923_v27  ;;  %v16483_v27 = vld [vmem:[#allocation13_spill] sm:$0xff]  ;;  %vm5555_vm7 = vcmp.eq.f32.partialorder %v5554_v47, 8.507059e+37 }
 0xd4a   : > { %v5496_v18 = vpop.f32.mrf.mxu1 }
 0xd4b   : > { %v5497_v21 = vadd.f32 %v5496_v18, %v16479_v55 }
 0xd4d   : > { %v7926_v57 = vmul.f32 -1.442695, %v5497_v21  ;;  %v8779_v1 = vpop.eup %8778 }
 0xd4e   : > { %v8781_v50 = vpop.eup %8780  ;;  %v14446_v3 = vadd.f32 1.0, %v8779_v1 }
 0xd4f   : > { %8784 = vpow2.f32 %v7926_v57  ;;  %v8783_v49 = vpop.eup %8782  ;;  %v5546_v20 = vmul.f32 %v8781_v50, %v14436_v10  ;;  %vm5551_vm10 = vweird.f32 %v8781_v50  ;;  %v16486_v57 = vld [vmem:[#allocation48_spill] sm:$0xff] }
 0xd50   : > { %8786 = vpow2.f32 %v7924_v44  ;;  %v14452_v60 = vadd.f32 1.0, %v8783_v49  ;;  %vm14486_vm3 = vmor %vm5550_vm8, %vm5551_vm10  ;;  %v5557_v44 = vor.u32 1.1754944e-38, %v5556_v5  ;;  %vm5626_vm5 = vweird.f32 %v14446_v3 }
 0xd51   : > { %8788 = vrcp.f32 %v14444_v29  ;;  %v5547_v0 = vsub.f32 1.0, %v5546_v20  ;;  %v5569_v20 = vand.u32 2147483647, %v14444_v29  ;;  %v5630_v47 = vand.u32 2147483647, %v14446_v3 }
 0xd52   : > { %v5499_v12 = vpop.f32.mrf.mxu1  ;;  %8790 = vrcp.f32 %v14446_v3  ;;  %vm5580_vm10 = vweird.f32 %v14452_v60 }
 0xd53   : > { %v5500_v6 = vadd.f32 %v5499_v12, %v16481_v25  ;;  %v5548_v30 = vmul.f32 %v8781_v50, %v5547_v0  ;;  %v5584_v0 = vand.u32 2147483647, %v14452_v60  ;;  %vm14513_vm1 = vcmp.eq.f32.partialorder %v5569_v20, 8.507059e+37 }
 0xd55   : > { %v7927_v14 = vmul.f32 -1.442695, %v5500_v6  ;;  %v8785_v54 = vpop.eup %8784  ;;  %v5549_v37 = vadd.f32 %v8781_v50, %v5548_v30  ;;  %vm14552_vm8 = vcmp.eq.f32.partialorder %v5584_v0, 8.507059e+37 }
 0xd56   : > { %v8787_v7 = vpop.eup %8786  ;;  %v14457_v28 = vadd.f32 1.0, %v8785_v54 }
 0xd57   : > { %8792 = vpow2.f32 %v7927_v14  ;;  %v14459_v56 = vpop.eup %8788  ;;  %v14465_v59 = vadd.f32 1.0, %v8787_v7  ;;  %v5553_v1 = vsel %vm14486_vm3, %v8781_v50, %v5549_v37  ;;  %v5632_v37 = vand.u32 2147483648, %v14446_v3 }
 0xd58   : > { %8794 = vrcp.f32 %v14452_v60  ;;  %v14463_v35 = vpop.eup %8790  ;;  %v5558_v7 = vsel %vm5555_vm7, %v5557_v44, %v5553_v1  ;;  %vm5566_vm15 = vweird.f32 %v14459_v56  ;;  %vm5631_vm3 = vcmp.eq.f32.partialorder %v5630_v47, 8.507059e+37  ;;  %v16502_v47 = vld [vmem:[#allocation62_spill] sm:$0xff] }
 0xd59   : > { %8796 = vrcp.f32 %v14457_v28  ;;  %v5622_v42 = vmul.f32 %v14463_v35, %v14446_v3  ;;  %vm5627_vm12 = vweird.f32 %v14463_v35  ;;  %vm14547_vm6 = vmor %vm5565_vm14, %vm5566_vm15  ;;  %vm5641_vm15 = vweird.f32 %v14457_v28 }
 0xd5a   : > { %v5502_v38 = vpop.f32.mrf.mxu1  ;;  %8798 = vrcp.f32 %v14465_v59  ;;  %vm14530_vm13 = vmor %vm5626_vm5, %vm5627_vm12 }
 0xd5b   : > { %v5503_v61 = vadd.f32 %v5502_v38, %v16482_v52  ;;  %v5561_v38 = vmul.f32 %v14459_v56, %v14444_v29  ;;  %v5623_v4 = vsub.f32 1.0, %v5622_v42 }
 0xd5d   : > { %v8793_v18 = vpop.eup %8792  ;;  %v7928_v12 = vmul.f32 -1.442695, %v5503_v61  ;;  %v5562_v36 = vsub.f32 1.0, %v5561_v38  ;;  %v5624_v49 = vmul.f32 %v14463_v35, %v5623_v4  ;;  %v16489_v4 = vld [vmem:[#allocation14_spill] sm:$0xff] }
 0xd5e   : > { %v14470_v9 = vpop.eup %8794  ;;  %v14475_v15 = vadd.f32 1.0, %v8793_v18 }
 0xd5f   : > { %8800 = vpow2.f32 %v7928_v12  ;;  %v5576_v32 = vmul.f32 %v14470_v9, %v14452_v60  ;;  %v14481_v23 = vpop.eup %8796  ;;  %v5563_v54 = vmul.f32 %v14459_v56, %v5562_v36  ;;  %v5625_v12 = vadd.f32 %v14463_v35, %v5624_v49 }
 0xd60   : > { %8802 = vrcp.f32 %v14475_v15  ;;  %v14491_v19 = vpop.eup %8798  ;;  %v5637_v14 = vmul.f32 %v14481_v23, %v14457_v28  ;;  %vm5581_vm4 = vweird.f32 %v14470_v9  ;;  %vm5642_vm14 = vweird.f32 %v14481_v23 }
 0xd61   : > { %v5577_v10 = vsub.f32 1.0, %v5576_v32  ;;  %v5591_v52 = vmul.f32 %v14491_v19, %v14465_v59  ;;  %v5564_v5 = vadd.f32 %v14459_v56, %v5563_v54  ;;  %v5586_v32 = vand.u32 2147483648, %v14452_v60  ;;  %vm14562_vm7 = vmor %vm5580_vm10, %vm5581_vm4 }
 0xd62   : > { %v14433_v62 = vpop.f32.mrf.mxu1  ;;  %v5638_v18 = vsub.f32 1.0, %v5637_v14  ;;  %v5629_v3 = vsel %vm14530_vm13, %v14463_v35, %v5625_v12  ;;  %vm14583_vm12 = vmor %vm5641_vm15, %vm5642_vm14  ;;  %vm5656_vm4 = vweird.f32 %v14475_v15  ;;  %vm5596_vm13 = vweird.f32 %v14491_v19 }
 0xd63   : > { %v5506_v16 = vadd.f32 %v14433_v62, %v16486_v57  ;;  %v5572_v62 = vor.u32 1.1754944e-38, %v5571_v11  ;;  %v5578_v42 = vmul.f32 %v14470_v9, %v5577_v10  ;;  %v16492_v11 = vld [vmem:[#allocation8_spill] sm:$0xff]  ;;  %v5633_v10 = vor.u32 1.1754944e-38, %v5632_v37 }
 0xd64   : > { %v5639_v1 = vmul.f32 %v14481_v23, %v5638_v18  ;;  %v5568_v14 = vsel %vm14547_vm6, %v14459_v56, %v5564_v5  ;;  %v5587_v60 = vor.u32 1.1754944e-38, %v5586_v32  ;;  %v5645_v37 = vand.u32 2147483647, %v14457_v28  ;;  %v16499_v5 = vld [vmem:[#allocation49_spill] sm:$0xff] }
 0xd65   : > { %v8801_v6 = vpop.eup %8800  ;;  %v5579_v44 = vadd.f32 %v14470_v9, %v5578_v42  ;;  %v5634_v29 = vsel %vm5631_vm3, %v5633_v10, %v5629_v3  ;;  %v5647_v42 = vand.u32 2147483648, %v14457_v28  ;;  %v5662_v3 = vand.u32 2147483648, %v14475_v15 }
 0xd66   : > { %v14504_v50 = vpop.eup %8802  ;;  %v14508_v61 = vadd.f32 1.0, %v8801_v6  ;;  %v5640_v0 = vadd.f32 %v14481_v23, %v5639_v1  ;;  %vm5595_vm10 = vweird.f32 %v14465_v59 }
 0xd67   : > { %v5652_v36 = vmul.f32 %v14504_v50, %v14475_v15  ;;  %v5583_v56 = vsel %vm14562_vm7, %v14470_v9, %v5579_v44  ;;  %v5601_v9 = vand.u32 2147483648, %v14465_v59  ;;  %vm5657_vm5 = vweird.f32 %v14504_v50 }
 0xd68   : > { %v14591_v30 = vsel %vm14552_vm8, %v5587_v60, %v5583_v56  ;;  %vm14614_vm6 = vmor %vm5656_vm4, %vm5657_vm5  ;;  %v5660_v56 = vand.u32 2147483647, %v14475_v15  ;;  %vm5671_vm5 = vweird.f32 %v14508_v61 }
 0xd69   : > { %v5653_v35 = vsub.f32 1.0, %v5652_v36  ;;  %vm14654_vm4 = vmor %vm5595_vm10, %vm5596_vm13 }
 0xd6a   : > { %v14440_v24 = vpop.f32.mrf.mxu1  ;;  %vm5661_vm15 = vcmp.eq.f32.partialorder %v5660_v56, 8.507059e+37 }
 0xd6b   : > { %v5509_v57 = vadd.f32 %v14440_v24, %v16492_v11  ;;  %v5654_v32 = vmul.f32 %v14504_v50, %v5653_v35  ;;  %v5644_v11 = vsel %vm14583_vm12, %v14481_v23, %v5640_v0 }
 0xd6d   : > { %v5655_v44 = vadd.f32 %v14504_v50, %v5654_v32 }
 0xd6f   : > { %v5659_v0 = vsel %vm14614_vm6, %v14504_v50, %v5655_v44 }
 0xd72   : > { %v14448_v48 = vpop.f32.mrf.mxu1 }
 0xd7a   : > { %v14461_v26 = vpop.f32.mrf.mxu1 }
 0xd82   : > { %v5517_v51 = vpop.f32.mrf.mxu1 }
 0xd83   : > { %v5518_v55 = vadd.f32 %v5517_v51, %v16483_v27 }
 0xd85   : > { %v7929_v25 = vmul.f32 -1.442695, %v5518_v55  ;;  %v5592_v55 = vsub.f32 1.0, %v5591_v52 }
 0xd87   : > { %8804 = vpow2.f32 %v7929_v25  ;;  %v5593_v54 = vmul.f32 %v14491_v19, %v5592_v55 }
 0xd88   : > { %8806 = vtanh.f32 %v5506_v16 }
 0xd89   : > { %8808 = vrcp.f32 %v14508_v61  ;;  %v14594_v28 = vadd.f32 %v14491_v19, %v5593_v54 }
 0xd8a   : > { %v5520_v38 = vpop.f32.mrf.mxu1 }
 0xd8b   : > { %v5521_v51 = vadd.f32 %v5520_v38, %v16489_v4  ;;  %v5573_v38 = vsel %vm14513_vm1, %v5572_v62, %v5568_v14  ;;  %v5761_v4 = vmul.f32 %v5634_v29, %v14276_v63  ;;  %v5512_v62 = vadd.f32 %v14448_v48, %v16502_v47  ;;  %v16505_v29 = vld [vmem:[#allocation61_spill] sm:$0xff] }
 0xd8c   : > { %vm5646_vm1 = vcmp.eq.f32.partialorder %v5645_v37, 8.507059e+37 }
 0xd8d   : > { %v8805_v27 = vpop.eup %8804  ;;  %v7930_v16 = vmul.f32 -1.442695, %v5521_v51 }
 0xd8e   : > { %v14541_v25 = vadd.f32 1.0, %v8805_v27  ;;  %v8807_v6 = vpop.eup %8806 }
 0xd8f   : > { %8810 = vpow2.f32 %v7930_v16  ;;  %v5765_v52 = vmul.f32 %v8807_v6, %v5558_v7  ;;  %v14572_v12 = vpop.eup %8808  ;;  %v5648_v16 = vor.u32 1.1754944e-38, %v5647_v42 }
 0xd90   : > { %8812 = vrcp.f32 %v14541_v25  ;;  %v5667_v63 = vmul.f32 %v14572_v12, %v14508_v61  ;;  %v5712_v35 = vand.u32 2147483648, %v14541_v25  ;;  %v5710_v54 = vand.u32 2147483647, %v14541_v25 }
 0xd91   : > { %8814 = vtanh.f32 %v5509_v57  ;;  %v14598_v21 = vadd.f32 %v5765_v52, %v5761_v4  ;;  %v5649_v6 = vsel %vm5646_vm1, %v5648_v16, %v5644_v11  ;;  %vm5706_vm3 = vweird.f32 %v14541_v25 }
 0xd92   : > { %v5523_v18 = vpop.f32.mrf.mxu1  ;;  %v5668_v10 = vsub.f32 1.0, %v5667_v63  ;;  %v5762_v52 = vmul.f32 %v5649_v6, %v14308_v39  ;;  %v5713_v50 = vor.u32 1.1754944e-38, %v5712_v35  ;;  %vm5711_vm14 = vcmp.eq.f32.partialorder %v5710_v54, 8.507059e+37 }
 0xd93   : > { %v5524_v7 = vadd.f32 %v5523_v18, %v16499_v5  ;;  %v5663_v18 = vor.u32 1.1754944e-38, %v5662_v3  ;;  %vm5672_vm12 = vweird.f32 %v14572_v12  ;;  %v5677_v16 = vand.u32 2147483648, %v14508_v61 }
 0xd94   : > { %v5669_v4 = vmul.f32 %v14572_v12, %v5668_v10  ;;  %v5599_v6 = vand.u32 2147483647, %v14465_v59  ;;  %vm14668_vm6 = vmor %vm5671_vm5, %vm5672_vm12 }
 0xd95   : > { %v8811_v51 = vpop.eup %8810  ;;  %v7931_v27 = vmul.f32 -1.442695, %v5524_v7 }
 0xd96   : > { %v8813_v55 = vpop.eup %8812  ;;  %v14603_v57 = vadd.f32 1.0, %v8811_v51 }
 0xd97   : > { %v8815_v48 = vpop.eup %8814  ;;  %v5702_v1 = vmul.f32 %v8813_v55, %v14541_v25  ;;  %8816 = vpow2.f32 %v7931_v27  ;;  %vm5707_vm8 = vweird.f32 %v8813_v55 }
 0xd98   : > { %8818 = vrcp.f32 %v14603_v57  ;;  %v5766_v49 = vmul.f32 %v8815_v48, %v5573_v38  ;;  %v16506_v38 = vld [vmem:[#allocation44_spill] sm:$0xff]  ;;  %vm5708_vm7 = vmor %vm5706_vm3, %vm5707_vm8  ;;  %v5670_v48 = vadd.f32 %v14572_v12, %v5669_v4  ;;  %v5725_v3 = vand.u32 2147483647, %v14603_v57 }
 0xd99   : > { %8820 = vtanh.f32 %v5512_v62  ;;  %v5703_v23 = vsub.f32 1.0, %v5702_v1  ;;  %v5515_v37 = vadd.f32 %v14461_v26, %v16506_v38  ;;  %v5664_v62 = vsel %vm5661_vm15, %v5663_v18, %v5659_v0 }
 0xd9a   : > { %8822 = vtanh.f32 %v14598_v21  ;;  %v5526_v24 = vpop.f32.mrf.mxu1  ;;  %v14630_v51 = vadd.f32 %v5766_v49, %v5762_v52  ;;  %v5763_v44 = vmul.f32 %v5664_v62, %v14353_v33  ;;  %v5598_v49 = vsel %vm14654_vm4, %v14491_v19, %v14594_v28 }
 0xd9b   : > { %v5527_v20 = vadd.f32 %v5526_v24, %v16505_v29  ;;  %v5704_v60 = vmul.f32 %v8813_v55, %v5703_v23  ;;  %v5675_v23 = vand.u32 2147483647, %v14508_v61  ;;  %v5602_v33 = vor.u32 1.1754944e-38, %v5601_v9  ;;  %v14751_v24 = vld [vmem:[%s15959_s5 + $0x40] sm:$0xff] }
 0xd9c   : > { %vm5721_vm13 = vweird.f32 %v14603_v57  ;;  %v5674_v29 = vsel %vm14668_vm6, %v14572_v12, %v5670_v48  ;;  %v5678_v28 = vor.u32 1.1754944e-38, %v5677_v16  ;;  %vm5726_vm8 = vcmp.eq.f32.partialorder %v5725_v3, 8.507059e+37 }
 0xd9d   : > { %v8817_v42 = vpop.eup %8816  ;;  %v7932_v5 = vmul.f32 -1.442695, %v5527_v20  ;;  %v5705_v7 = vadd.f32 %v8813_v55, %v5704_v60  ;;  %vm5600_vm3 = vcmp.eq.f32.partialorder %v5599_v6, 8.507059e+37  ;;  %v14716_v6 = vld [vmem:[%s15959_s5 + $0x18] sm:$0xff] }
 0xd9e   : > { %v8819_v32 = vpop.eup %8818  ;;  %v14632_v39 = vadd.f32 1.0, %v8817_v42  ;;  %v5603_v52 = vsel %vm5600_vm3, %v5602_v33, %v5598_v49  ;;  %v14737_v49 = vld [vmem:[%s15959_s5 + $0x30] sm:$0xff]  ;;  %v14744_v33 = vld [vmem:[%s15959_s5 + $0x38] sm:$0xff] }
 0xd9f   : > { %v8821_v15 = vpop.eup %8820  ;;  %v5717_v36 = vmul.f32 %v8819_v32, %v14603_v57  ;;  %8824 = vpow2.f32 %v7932_v5  ;;  %v5709_v47 = vsel %vm5708_vm7, %v8813_v55, %v5705_v7  ;;  %v5727_v55 = vand.u32 2147483648, %v14603_v57 }
 0xda0   : > { %v8823_v26 = vpop.eup %8822  ;;  %8826 = vrcp.f32 %v14632_v39  ;;  %v5714_v25 = vsel %vm5711_vm14, %v5713_v50, %v5709_v47  ;;  %v5767_v11 = vmul.f32 %v8821_v15, %v14591_v30  ;;  %vm5722_vm1 = vweird.f32 %v8819_v32  ;;  %v14702_v30 = vld [vmem:[%s15959_s5 + $0x8] sm:$0xff] }
 0xda1   : > { %8828 = vtanh.f32 %v5515_v37  ;;  %v5718_v27 = vsub.f32 1.0, %v5717_v36  ;;  %v14638_v63 = vmul.f32 %v8823_v26, %v5714_v25  ;;  %vm5723_vm10 = vmor %vm5721_vm13, %vm5722_vm1  ;;  %v5728_v59 = vor.u32 1.1754944e-38, %v5727_v55 }
 0xda2   : > { %8830 = vtanh.f32 %v14630_v51  ;;  %v14673_v61 = vadd.f32 %v5767_v11, %v5763_v44  ;;  %vm5676_vm7 = vcmp.eq.f32.partialorder %v5675_v23, 8.507059e+37  ;;  %v5742_v42 = vand.u32 2147483648, %v14632_v39  ;;  %v14695_v44 = vld [vmem:[%s15959_s5] sm:$0xff] }
 0xda3   : > { %5785 = vrot.lane.b32.xlu0 %v14638_v63, %s9206_s24  ;;  %v5719_v1 = vmul.f32 %v8819_v32, %v5718_v27  ;;  %v5679_v0 = vsel %vm5676_vm7, %v5678_v28, %v5674_v29  ;;  %v5740_v37 = vand.u32 2147483647, %v14632_v39  ;;  %vm5736_vm15 = vweird.f32 %v14632_v39  ;;  %v14723_v23 = vld [vmem:[%s15959_s5 + $0x20] sm:$0xff] }
 0xda4   : > { %v5764_v5 = vmul.f32 %v5679_v0, %v14368_v53  ;;  %v5743_v50 = vor.u32 1.1754944e-38, %v5742_v42  ;;  %v14782_v28 = vld [vmem:[%s15959_s5 + $0x60] sm:$0xff] }
 0xda5   : > { %v8825_v10 = vpop.eup %8824  ;;  %v5720_v35 = vadd.f32 %v8819_v32, %v5719_v1  ;;  %vm5741_vm1 = vcmp.eq.f32.partialorder %v5740_v37, 8.507059e+37  ;;  %v16511_v37 = vld [vmem:[#allocation27_spill] sm:$0xff] }
 0xda6   : > { %v8827_v14 = vpop.eup %8826  ;;  %v5700_v19 = vadd.f32 1.0, %v8825_v10  ;;  %v14730_v10 = vld [vmem:[%s15959_s5 + $0x28] sm:$0xff] }
 0xda7   : > { %v8829_v9 = vpop.eup %8828  ;;  %v5732_v20 = vmul.f32 %v8827_v14, %v14632_v39  ;;  %v5724_v60 = vsel %vm5723_vm10, %v8819_v32, %v5720_v35  ;;  %vm5737_vm14 = vweird.f32 %v8827_v14  ;;  %v14758_v35 = vld [vmem:[%s15959_s5 + $0x48] sm:$0xff] }
 0xda8   : > { %v8831_v54 = vpop.eup %8830  ;;  %8832 = vrcp.f32 %v5700_v19  ;;  %v5729_v57 = vsel %vm5726_vm8, %v5728_v59, %v5724_v60  ;;  %v5768_v12 = vmul.f32 %v8829_v9, %v5603_v52  ;;  %vm5738_vm12 = vmor %vm5736_vm15, %vm5737_vm14  ;;  %v5757_v27 = vand.u32 2147483648, %v5700_v19  ;;  %v14774_v59 = vld [vmem:[%s15959_s5 + $0x58] sm:$0xff]  ;;  %v14790_v60 = vld [vmem:[%s15959_s5 + $0x68] sm:$0xff] }
 0xda9   : > { %v5733_v56 = vsub.f32 1.0, %v5732_v20  ;;  %v5778_v18 = vmul.f32 %v8831_v54, %v5729_v57  ;;  %8834 = vtanh.f32 %v14673_v61  ;;  %v5755_v39 = vand.u32 2147483647, %v5700_v19  ;;  %v14797_v54 = vld [vmem:[%s15959_s5 + $0x70] sm:$0xff]  ;;  %v14804_v57 = vld [vmem:[%s15959_s5 + $0x78] sm:$0xff] }
 0xdaa   : > { %v14686_v4 = vadd.f32 %v5768_v12, %v5764_v5  ;;  %vm5751_vm4 = vweird.f32 %v5700_v19  ;;  %v5758_v48 = vor.u32 1.1754944e-38, %v5757_v27  ;;  %v16514_v27 = vld [vmem:[#allocation77_spill] sm:$0xff] }
 0xdab   : > { %5787 = vrot.lane.b32.xlu0 %v5778_v18, %s9206_s24  ;;  %v5734_v38 = vmul.f32 %v8827_v14, %v5733_v56  ;;  %vm5756_vm13 = vcmp.eq.f32.partialorder %v5755_v39, 8.507059e+37 }
 0xdac   : > { %8836 = vtanh.f32 %v14686_v4 }
 0xdad   : > { %v5735_v7 = vadd.f32 %v8827_v14, %v5734_v38 }
 0xdae   : > { %v8833_v32 = vpop.eup %8832 }
 0xdaf   : > { %v5747_v15 = vmul.f32 %v8833_v32, %v5700_v19  ;;  %v5739_v36 = vsel %vm5738_vm12, %v8827_v14, %v5735_v7  ;;  %v8835_v47 = vpop.eup %8834  ;;  %vm5752_vm5 = vweird.f32 %v8833_v32  ;;  %v14765_v14 = vld [vmem:[%s15959_s5 + $0x50] sm:$0xff] }
 0xdb0   : > { %v5744_v26 = vsel %vm5741_vm1, %v5743_v50, %v5739_v36  ;;  %vm5753_vm6 = vmor %vm5751_vm4, %vm5752_vm5  ;;  %v16512_v50 = vld [vmem:[#allocation21_spill] sm:$0xff]  ;;  %v16513_v36 = vld [vmem:[#allocation16_spill] sm:$0xff] }
 0xdb1   : > { %v5748_v25 = vsub.f32 1.0, %v5747_v15  ;;  %v5779_v62 = vmul.f32 %v8835_v47, %v5744_v26 }
 0xdb2   : > { %v8837_v16 = vpop.eup %8836 }
 0xdb3   : > { %5789 = vrot.lane.b32.xlu0 %v5779_v62, %s9206_s24  ;;  %v5749_v53 = vmul.f32 %v8833_v32, %v5748_v25 }
 0xdb5   : > { %v5750_v11 = vadd.f32 %v8833_v32, %v5749_v53 }
 0xdb7   : > { %v5754_v55 = vsel %vm5753_vm6, %v8833_v32, %v5750_v11 }
 0xdb8   : > { %v5759_v1 = vsel %vm5756_vm13, %v5758_v48, %v5754_v55  ;;  %v16515_v55 = vld [vmem:[#allocation50_spill] sm:$0xff] }
 0xdb9   : > { %v5780_v3 = vmul.f32 %v8837_v16, %v5759_v1  ;;  %v16516_v1 = vld [vmem:[#allocation17_spill] sm:$0xff] }
 0xdbb   : > { %5791 = vrot.lane.b32.xlu2 %v5780_v3, %s9206_s24  ;;  %5893 = vmatpush.msra.mxu2 %v5780_v3 }
 0xdbd   : > { %5894 = vmatpush.msra.mxu2 %v5779_v62 }
 0xdbf   : > { %5895 = vmatpush.msra.mxu2 %v5778_v18 }
 0xdc1   : > { %5896 = vmatpush.msra.mxu2 %v14638_v63  ;;  %v14709_v63 = vld [vmem:[%s15959_s5 + $0x10] sm:$0xff] }
 0xdc2   : > { %7933 = vmatmul.msk.f32.vlgmr.msra.gmra.mxu2 %vm607_vm0, %v14695_v44 }
 0xdca   : > { %7934 = vmatmul.msk.f32.gmra.mxu2 %vm607_vm0, %v14702_v30 }
 0xdd2   : > { %7935 = vmatmul.msk.f32.gmra.mxu2 %vm607_vm0, %v14709_v63 }
 0xdda   : > { %7936 = vmatmul.msk.f32.gmra.mxu2 %vm607_vm0, %v14716_v6 }
 0xde2   : > { %7937 = vmatmul.msk.f32.gmra.mxu2 %vm607_vm0, %v14723_v23 }
 0xdea   : > { %7938 = vmatmul.msk.f32.gmra.mxu2 %vm607_vm0, %v14730_v10 }
 0xdf2   : > { %7939 = vmatmul.msk.f32.gmra.mxu2 %vm607_vm0, %v14737_v49 }
 0xdfa   : > { %7940 = vmatmul.msk.f32.gmra.mxu2 %vm607_vm0, %v14744_v33 }
 0xe02   : > { %7941 = vmatmul.msk.f32.gmra.mxu2 %vm607_vm0, %v14751_v24 }
 0xe0a   : > { %7942 = vmatmul.msk.f32.gmra.mxu2 %vm607_vm0, %v14758_v35 }
 0xe12   : > { %7943 = vmatmul.msk.f32.gmra.mxu2 %vm607_vm0, %v14765_v14 }
 0xe15   : > { %v5792_v29 = vpop.permute.xlu2 %5791  ;;  %v5786_v19 = vpop.permute.xlu0 %5785 }
 0xe16   : > { %5800 = vst.msk [vmem:[#allocation3 + $0x18] sm:$0xff] %vm2227_vm11, %v5792_v29 }
 0xe17   : > { %5797 = vst.msk [vmem:[#allocation3] sm:$0xff] %vm2227_vm11, %v5786_v19 }
 0xe1a   : > { %7944 = vmatmul.msk.f32.gmra.mxu2 %vm607_vm0, %v14774_v59 }
 0xe1d   : > { %v5788_v9 = vpop.permute.xlu0 %5787 }
 0xe1e   : > { %5798 = vst.msk [vmem:[#allocation3 + $0x8] sm:$0xff] %vm2227_vm11, %v5788_v9 }
 0xe22   : > { %7945 = vmatmul.msk.f32.gmra.mxu2 %vm607_vm0, %v14782_v28 }
 0xe25   : > { %v5790_v20 = vpop.permute.xlu0 %5789 }
 0xe26   : > { %5799 = vst.msk [vmem:[#allocation3 + $0x10] sm:$0xff] %vm2227_vm11, %v5790_v20 }
 0xe2a   : > { %7946 = vmatmul.msk.f32.gmra.mxu2 %vm607_vm0, %v14790_v60 }
 0xe32   : > { %7947 = vmatmul.msk.f32.gmra.mxu2 %vm607_vm0, %v14797_v54 }
 0xe3a   : > { %7948 = vmatmul.msk.f32.gmra.mxu2 %vm607_vm0, %v14804_v57 }
 0xe45   : > { %v5898_v52 = vpop.f32.mrf.mxu2 }
 0xe46   : > { %v5899_v5 = vadd.f32 %v5898_v52, %v16511_v37 }
 0xe48   : > { %v7949_v7 = vmul.f32 -1.442695, %v5899_v5 }
 0xe4a   : > { %8838 = vpow2.f32 %v7949_v7 }
 0xe4d   : > { %v5901_v0 = vpop.f32.mrf.mxu2 }
 0xe4e   : > { %v5902_v15 = vadd.f32 %v5901_v0, %v16512_v50  ;;  %v16517_v0 = vld [vmem:[#allocation12_spill] sm:$0xff] }
 0xe50   : > { %v7950_v25 = vmul.f32 -1.442695, %v5902_v15  ;;  %v8839_v62 = vpop.eup %8838 }
 0xe51   : > { %v14814_v11 = vadd.f32 1.0, %v8839_v62 }
 0xe52   : > { %8840 = vpow2.f32 %v7950_v25 }
 0xe53   : > { %vm5967_vm10 = vweird.f32 %v14814_v11 }
 0xe55   : > { %v5904_v56 = vpop.f32.mrf.mxu2 }
 0xe56   : > { %v5905_v53 = vadd.f32 %v5904_v56, %v16514_v27 }
 0xe58   : > { %v7951_v48 = vmul.f32 -1.442695, %v5905_v53  ;;  %v8841_v9 = vpop.eup %8840 }
 0xe5d   : > { %v5907_v18 = vpop.f32.mrf.mxu2 }
 0xe5e   : > { %v5908_v3 = vadd.f32 %v5907_v18, %v16516_v1 }
 0xe60   : > { %v7952_v52 = vmul.f32 -1.442695, %v5908_v3 }
 0xe65   : > { %v5910_v12 = vpop.f32.mrf.mxu2 }
 0xe66   : > { %v5911_v47 = vadd.f32 %v5910_v12, %v16513_v36  ;;  %v14822_v12 = vadd.f32 1.0, %v8841_v9 }
 0xe68   : > { %v7953_v39 = vmul.f32 -1.442695, %v5911_v47  ;;  %v16518_v47 = vld [vmem:[#allocation4_spill] sm:$0xff]  ;;  %v5986_v8 = vand.u32 2147483647, %v14822_v12  ;;  %vm5982_vm7 = vweird.f32 %v14822_v12 }
 0xe6a   : > { %8842 = vpow2.f32 %v7953_v39  ;;  %vm14891_vm12 = vcmp.eq.f32.partialorder %v5986_v8, 8.507059e+37 }
 0xe6b   : > { %8844 = vrcp.f32 %v14814_v11 }
 0xe6c   : > { %8846 = vpow2.f32 %v7951_v48 }
 0xe6d   : > { %v5913_v42 = vpop.f32.mrf.mxu2 }
 0xe6e   : > { %v5914_v16 = vadd.f32 %v5913_v42, %v16515_v55 }
 0xe70   : > { %v7954_v19 = vmul.f32 -1.442695, %v5914_v16  ;;  %v8843_v20 = vpop.eup %8842 }
 0xe71   : > { %v8845_v37 = vpop.eup %8844  ;;  %v14824_v5 = vadd.f32 1.0, %v8843_v20 }
 0xe72   : > { %8848 = vpow2.f32 %v7954_v19  ;;  %v8847_v42 = vpop.eup %8846  ;;  %v5963_v50 = vmul.f32 %v8845_v37, %v14814_v11  ;;  %vm5968_vm11 = vweird.f32 %v8845_v37 }
 0xe73   : > { %8850 = vpow2.f32 %v7952_v52  ;;  %v14830_v15 = vadd.f32 1.0, %v8847_v42  ;;  %vm14864_vm8 = vmor %vm5967_vm10, %vm5968_vm11  ;;  %vm6043_vm1 = vweird.f32 %v14824_v5  ;;  %v6047_v8 = vand.u32 2147483647, %v14824_v5 }
 0xe74   : > { %8852 = vrcp.f32 %v14822_v12  ;;  %v5964_v62 = vsub.f32 1.0, %v5963_v50 }
 0xe75   : > { %v5916_v38 = vpop.f32.mrf.mxu2  ;;  %8854 = vrcp.f32 %v14824_v5  ;;  %vm5997_vm13 = vweird.f32 %v14830_v15  ;;  %vm6048_vm10 = vcmp.eq.f32.partialorder %v6047_v8, 8.507059e+37 }
 0xe76   : > { %v5917_v56 = vadd.f32 %v5916_v38, %v16517_v0  ;;  %v5965_v3 = vmul.f32 %v8845_v37, %v5964_v62  ;;  %v5973_v0 = vand.u32 2147483648, %v14814_v11  ;;  %v6003_v62 = vand.u32 2147483648, %v14830_v15 }
 0xe78   : > { %v7955_v18 = vmul.f32 -1.442695, %v5917_v56  ;;  %v8849_v38 = vpop.eup %8848  ;;  %v5966_v52 = vadd.f32 %v8845_v37, %v5965_v3  ;;  %v16522_v3 = vld [vmem:[#allocation25_spill] sm:$0xff]  ;;  %v5974_v22 = vor.u32 1.1754944e-38, %v5973_v0 }
 0xe79   : > { %v8851_v36 = vpop.eup %8850  ;;  %v14835_v27 = vadd.f32 1.0, %v8849_v38 }
 0xe7a   : > { %8856 = vpow2.f32 %v7955_v18  ;;  %v14837_v53 = vpop.eup %8852  ;;  %v14843_v55 = vadd.f32 1.0, %v8851_v36  ;;  %v5971_v36 = vand.u32 2147483647, %v14814_v11 }
 0xe7b   : > { %8858 = vrcp.f32 %v14830_v15  ;;  %v14841_v48 = vpop.eup %8854  ;;  %v5978_v9 = vmul.f32 %v14837_v53, %v14822_v12  ;;  %vm5983_vm14 = vweird.f32 %v14837_v53 }
 0xe7c   : > { %8860 = vrcp.f32 %v14835_v27  ;;  %vm5972_vm3 = vcmp.eq.f32.partialorder %v5971_v36, 8.507059e+37  ;;  %vm6044_vm15 = vweird.f32 %v14841_v48  ;;  %vm14925_vm6 = vmor %vm5982_vm7, %vm5983_vm14  ;;  %vm6058_vm7 = vweird.f32 %v14835_v27 }
 0xe7d   : > { %v5919_v32 = vpop.f32.mrf.mxu2  ;;  %8862 = vrcp.f32 %v14843_v55  ;;  %v5979_v38 = vsub.f32 1.0, %v5978_v9  ;;  %v5970_v9 = vsel %vm14864_vm8, %v8845_v37, %v5966_v52  ;;  %vm14907_vm4 = vmor %vm6043_vm1, %vm6044_vm15 }
 0xe7e   : > { %v5920_v25 = vadd.f32 %v5919_v32, %v16518_v47  ;;  %v6039_v32 = vmul.f32 %v14841_v48, %v14824_v5  ;;  %v16519_v47 = vld [vmem:[#allocation54_spill] sm:$0xff]  ;;  %v5975_v31 = vsel %vm5972_vm3, %v5974_v22, %v5970_v9 }
 0xe7f   : > { %v5980_v17 = vmul.f32 %v14837_v53, %v5979_v38 }
 0xe80   : > { %v8857_v16 = vpop.eup %8856  ;;  %v7956_v1 = vmul.f32 -1.442695, %v5920_v25  ;;  %v6040_v42 = vsub.f32 1.0, %v6039_v32 }
 0xe81   : > { %v14848_v19 = vpop.eup %8858  ;;  %v14853_v20 = vadd.f32 1.0, %v8857_v16  ;;  %v5988_v16 = vand.u32 2147483648, %v14822_v12 }
 0xe82   : > { %8864 = vpow2.f32 %v7956_v1  ;;  %v5993_v56 = vmul.f32 %v14848_v19, %v14830_v15  ;;  %v14859_v50 = vpop.eup %8860  ;;  %vm5998_vm5 = vweird.f32 %v14848_v19 }
 0xe83   : > { %8866 = vrcp.f32 %v14853_v20  ;;  %v14869_v1 = vpop.eup %8862  ;;  %vm14940_vm8 = vmor %vm5997_vm13, %vm5998_vm5  ;;  %vm6059_vm3 = vweird.f32 %v14859_v50  ;;  %vm6073_vm1 = vweird.f32 %v14853_v20 }
 0xe84   : > { %v5994_v11 = vsub.f32 1.0, %v5993_v56  ;;  %v6008_v52 = vmul.f32 %v14869_v1, %v14843_v55  ;;  %v6001_v56 = vand.u32 2147483647, %v14830_v15  ;;  %v6004_v15 = vor.u32 1.1754944e-38, %v6003_v62  ;;  %vm14963_vm14 = vmor %vm6058_vm7, %vm6059_vm3 }
 0xe85   : > { %v14811_v26 = vpop.f32.mrf.mxu2  ;;  %v6062_v62 = vand.u32 2147483647, %v14835_v27  ;;  %vm6013_vm5 = vweird.f32 %v14869_v1 }
 0xe86   : > { %v5923_v32 = vadd.f32 %v14811_v26, %v16522_v3  ;;  %v5989_v26 = vor.u32 1.1754944e-38, %v5988_v16  ;;  %v5995_v38 = vmul.f32 %v14848_v19, %v5994_v11  ;;  %v16525_v16 = vld [vmem:[#allocation63_spill] sm:$0xff]  ;;  %v6009_v11 = vsub.f32 1.0, %v6008_v52 }
 0xe87   : > { %vm14930_vm11 = vcmp.eq.f32.partialorder %v6001_v56, 8.507059e+37  ;;  %vm6063_vm15 = vcmp.eq.f32.partialorder %v6062_v62, 8.507059e+37 }
 0xe88   : > { %v8865_v43 = vpop.eup %8864  ;;  %v5996_v52 = vadd.f32 %v14848_v19, %v5995_v38  ;;  %v6010_v56 = vmul.f32 %v14869_v1, %v6009_v11 }
 0xe89   : > { %v14882_v37 = vpop.eup %8866  ;;  %v14886_v0 = vadd.f32 1.0, %v8865_v43  ;;  %v5981_v43 = vadd.f32 %v14837_v53, %v5980_v17  ;;  %v16528_v17 = vld [vmem:[#allocation52_spill] sm:$0xff] }
 0xe8a   : > { %v6000_v46 = vsel %vm14940_vm8, %v14848_v19, %v5996_v52  ;;  %v6018_v19 = vand.u32 2147483648, %v14843_v55 }
 0xe8d   : > { %v14818_v29 = vpop.f32.mrf.mxu2 }
 0xe95   : > { %v14826_v7 = vpop.f32.mrf.mxu2 }
 0xe9d   : > { %v14839_v39 = vpop.f32.mrf.mxu2 }
 0xea5   : > { %v5934_v18 = vpop.f32.mrf.mxu2 }
 0xea6   : > { %v5935_v25 = vadd.f32 %v5934_v18, %v16519_v47  ;;  %v6041_v18 = vmul.f32 %v14841_v48, %v6040_v42  ;;  %v6054_v47 = vmul.f32 %v14859_v50, %v14835_v27 }
 0xea8   : > { %v7957_v45 = vmul.f32 -1.442695, %v5935_v25  ;;  %v6055_v42 = vsub.f32 1.0, %v6054_v47  ;;  %v6049_v25 = vand.u32 2147483648, %v14824_v5  ;;  %v5926_v47 = vadd.f32 %v14818_v29, %v16528_v17 }
 0xeaa   : > { %8868 = vpow2.f32 %v7957_v45  ;;  %v6042_v45 = vadd.f32 %v14841_v48, %v6041_v18  ;;  %v6050_v40 = vor.u32 1.1754944e-38, %v6049_v25  ;;  %v14971_v18 = vsel %vm14930_vm11, %v6004_v15, %v6000_v46  ;;  %v16541_v46 = vld [vmem:[#allocation76_spill] sm:$0xff] }
 0xeab   : > { %8870 = vtanh.f32 %v5923_v32  ;;  %v6069_v32 = vmul.f32 %v14882_v37, %v14853_v20 }
 0xeac   : > { %8872 = vrcp.f32 %v14886_v0  ;;  %v6046_v5 = vsel %vm14907_vm4, %v14841_v48, %v6042_v45 }
 0xead   : > { %v5937_v36 = vpop.f32.mrf.mxu2  ;;  %v6070_v48 = vsub.f32 1.0, %v6069_v32  ;;  %v6051_v12 = vsel %vm6048_vm10, %v6050_v40, %v6046_v5  ;;  %v16535_v32 = vld [vmem:[#allocation66_spill] sm:$0xff] }
 0xeae   : > { %v5938_v3 = vadd.f32 %v5937_v36, %v16525_v16  ;;  %v6056_v16 = vmul.f32 %v14859_v50, %v6055_v42  ;;  %v5985_v42 = vsel %vm14925_vm6, %v14837_v53, %v5981_v43  ;;  %v6064_v43 = vand.u32 2147483648, %v14835_v27 }
 0xeaf   : > { %v14974_v27 = vadd.f32 %v14869_v1, %v6010_v56  ;;  %vm6012_vm6 = vweird.f32 %v14843_v55 }
 0xeb0   : > { %v8869_v9 = vpop.eup %8868  ;;  %v7958_v36 = vmul.f32 -1.442695, %v5938_v3  ;;  %v6057_v25 = vadd.f32 %v14859_v50, %v6056_v16  ;;  %v5990_v3 = vsel %vm14891_vm12, %v5989_v26, %v5985_v42  ;;  %v16538_v26 = vld [vmem:[#allocation19_spill] sm:$0xff]  ;;  %v6065_v52 = vor.u32 1.1754944e-38, %v6064_v43 }
 0xeb1   : > { %v14919_v13 = vadd.f32 1.0, %v8869_v9  ;;  %v8871_v2 = vpop.eup %8870  ;;  %v5929_v22 = vadd.f32 %v14826_v7, %v16538_v26  ;;  %vm6074_vm12 = vweird.f32 %v14882_v37 }
 0xeb2   : > { %8874 = vpow2.f32 %v7958_v36  ;;  %v6182_v38 = vmul.f32 %v8871_v2, %v5975_v31  ;;  %v14950_v53 = vpop.eup %8872  ;;  %v6071_v2 = vmul.f32 %v14882_v37, %v6070_v48  ;;  %v6178_v31 = vmul.f32 %v6051_v12, %v14598_v21  ;;  %vm14994_vm4 = vmor %vm6073_vm1, %vm6074_vm12 }
 0xeb3   : > { %8876 = vrcp.f32 %v14919_v13  ;;  %v6061_v16 = vsel %vm14963_vm14, %v14859_v50, %v6057_v25  ;;  %v6079_v48 = vand.u32 2147483648, %v14853_v20  ;;  %v6127_v62 = vand.u32 2147483647, %v14919_v13  ;;  %vm15034_vm12 = vmor %vm6012_vm6, %vm6013_vm5 }
 0xeb4   : > { %8878 = vtanh.f32 %v5926_v47  ;;  %v6084_v47 = vmul.f32 %v14950_v53, %v14886_v0  ;;  %v14978_v36 = vadd.f32 %v6182_v38, %v6178_v31  ;;  %v6072_v42 = vadd.f32 %v14882_v37, %v6071_v2 }
 0xeb5   : > { %v5940_v40 = vpop.f32.mrf.mxu2  ;;  %v6066_v12 = vsel %vm6063_vm15, %v6065_v52, %v6061_v16  ;;  %v6129_v38 = vand.u32 2147483648, %v14919_v13  ;;  %v6077_v2 = vand.u32 2147483647, %v14853_v20  ;;  %vm6123_vm11 = vweird.f32 %v14919_v13 }
 0xeb6   : > { %v5941_v8 = vadd.f32 %v5940_v40, %v16535_v32  ;;  %v6085_v45 = vsub.f32 1.0, %v6084_v47  ;;  %v6080_v32 = vor.u32 1.1754944e-38, %v6079_v48  ;;  %vm6128_vm8 = vcmp.eq.f32.partialorder %v6127_v62, 8.507059e+37 }
 0xeb7   : > { %vm6089_vm3 = vweird.f32 %v14950_v53  ;;  %vm6078_vm7 = vcmp.eq.f32.partialorder %v6077_v2, 8.507059e+37  ;;  %vm6088_vm15 = vweird.f32 %v14886_v0  ;;  %v6016_v25 = vand.u32 2147483647, %v14843_v55 }
 0xeb8   : > { %v8875_v9 = vpop.eup %8874  ;;  %v7959_v21 = vmul.f32 -1.442695, %v5941_v8  ;;  %v6179_v8 = vmul.f32 %v6066_v12, %v14630_v51  ;;  %v6086_v47 = vmul.f32 %v14950_v53, %v6085_v45  ;;  %v6094_v45 = vand.u32 2147483648, %v14886_v0  ;;  %vm15042_vm1 = vmor %vm6088_vm15, %vm6089_vm3 }
 0xeb9   : > { %v8877_v17 = vpop.eup %8876  ;;  %v14983_v5 = vadd.f32 1.0, %v8875_v9  ;;  %v16542_v9 = vld [vmem:[#allocation20_spill] sm:$0xff]  ;;  %v6019_v62 = vor.u32 1.1754944e-38, %v6018_v19 }
 0xeba   : > { %v8879_v7 = vpop.eup %8878  ;;  %v6119_v29 = vmul.f32 %v8877_v17, %v14919_v13  ;;  %8880 = vpow2.f32 %v7959_v21  ;;  %vm6124_vm13 = vweird.f32 %v8877_v17  ;;  %v5932_v11 = vadd.f32 %v14839_v39, %v16542_v9 }
 0xebb   : > { %8882 = vrcp.f32 %v14983_v5  ;;  %v6183_v15 = vmul.f32 %v8879_v7, %v5990_v3  ;;  %v6076_v3 = vsel %vm14994_vm4, %v14882_v37, %v6072_v42  ;;  %vm6125_vm10 = vmor %vm6123_vm11, %vm6124_vm13  ;;  %v6130_v37 = vor.u32 1.1754944e-38, %v6129_v38 }
 0xebc   : > { %8884 = vtanh.f32 %v5929_v22  ;;  %v6120_v50 = vsub.f32 1.0, %v6119_v29  ;;  %v6081_v29 = vsel %vm6078_vm7, %v6080_v32, %v6076_v3  ;;  %vm6138_vm5 = vweird.f32 %v14983_v5 }
 0xebd   : > { %8886 = vtanh.f32 %v14978_v36  ;;  %v5943_v56 = vpop.f32.mrf.mxu2  ;;  %v15010_v16 = vadd.f32 %v6183_v15, %v6179_v8  ;;  %v6180_v38 = vmul.f32 %v6081_v29, %v14673_v61  ;;  %v6015_v61 = vsel %vm15034_vm12, %v14869_v1, %v14974_v27 }
 0xebe   : > { %v5944_v40 = vadd.f32 %v5943_v56, %v16541_v46  ;;  %v6121_v43 = vmul.f32 %v8877_v17, %v6120_v50  ;;  %v6087_v50 = vadd.f32 %v14950_v53, %v6086_v47  ;;  %v6142_v56 = vand.u32 2147483647, %v14983_v5 }
 0xebf   : > { %v6092_v46 = vand.u32 2147483647, %v14886_v0  ;;  %vm6017_vm13 = vcmp.eq.f32.partialorder %v6016_v25, 8.507059e+37 }
 0xec0   : > { %v8881_v31 = vpop.eup %8880  ;;  %v7960_v26 = vmul.f32 -1.442695, %v5944_v40  ;;  %v6122_v22 = vadd.f32 %v8877_v17, %v6121_v43  ;;  %v6091_v3 = vsel %vm15042_vm1, %v14950_v53, %v6087_v50  ;;  %vm6143_vm6 = vcmp.eq.f32.partialorder %v6142_v56, 8.507059e+37 }
 0xec1   : > { %v8883_v21 = vpop.eup %8882  ;;  %v15012_v51 = vadd.f32 1.0, %v8881_v31  ;;  %vm6093_vm11 = vcmp.eq.f32.partialorder %v6092_v46, 8.507059e+37 }
 0xec2   : > { %v8885_v7 = vpop.eup %8884  ;;  %v6134_v20 = vmul.f32 %v8883_v21, %v14983_v5  ;;  %8888 = vpow2.f32 %v7960_v26  ;;  %v6126_v52 = vsel %vm6125_vm10, %v8877_v17, %v6122_v22  ;;  %v6144_v17 = vand.u32 2147483648, %v14983_v5 }
 0xec3   : > { %v8887_v39 = vpop.eup %8886  ;;  %8890 = vrcp.f32 %v15012_v51  ;;  %v6131_v13 = vsel %vm6128_vm8, %v6130_v37, %v6126_v52  ;;  %v6184_v12 = vmul.f32 %v8885_v7, %v14971_v18  ;;  %vm6139_vm14 = vweird.f32 %v8883_v21 }
 0xec4   : > { %8892 = vtanh.f32 %v5932_v11  ;;  %v6135_v48 = vsub.f32 1.0, %v6134_v20  ;;  %v15018_v42 = vmul.f32 %v8887_v39, %v6131_v13  ;;  %vm6140_vm4 = vmor %vm6138_vm5, %vm6139_vm14  ;;  %v6145_v31 = vor.u32 1.1754944e-38, %v6144_v17 }
 0xec5   : > { %8894 = vtanh.f32 %v15010_v16  ;;  %v15053_v0 = vadd.f32 %v6184_v12, %v6180_v38  ;;  %v6095_v11 = vor.u32 1.1754944e-38, %v6094_v45  ;;  %v6020_v5 = vsel %vm6017_vm13, %v6019_v62, %v6015_v61  ;;  %v16548_v61 = vld [vmem:[#allocation55_spill] sm:$0xff] }
 0xec6   : > { %6202 = vrot.lane.b32.xlu0 %v15018_v42, %s9205_s19  ;;  %v6136_v15 = vmul.f32 %v8883_v21, %v6135_v48  ;;  %v6159_v37 = vand.u32 2147483648, %v15012_v51  ;;  %vm6153_vm8 = vweird.f32 %v15012_v51 }
 0xec7   : > { %v6096_v26 = vsel %vm6093_vm11, %v6095_v11, %v6091_v3 }
 0xec8   : > { %v8889_v40 = vpop.eup %8888  ;;  %v6137_v32 = vadd.f32 %v8883_v21, %v6136_v15  ;;  %v6181_v20 = vmul.f32 %v6096_v26, %v14686_v4  ;;  %v6160_v29 = vor.u32 1.1754944e-38, %v6159_v37 }
 0xec9   : > { %v8891_v8 = vpop.eup %8890  ;;  %v6117_v2 = vadd.f32 1.0, %v8889_v40 }
 0xeca   : > { %v8893_v9 = vpop.eup %8892  ;;  %v6149_v1 = vmul.f32 %v8891_v8, %v15012_v51  ;;  %v6141_v55 = vsel %vm6140_vm4, %v8883_v21, %v6137_v32  ;;  %vm6154_vm10 = vweird.f32 %v8891_v8  ;;  %v6157_v21 = vand.u32 2147483647, %v15012_v51  ;;  %v16549_v32 = vld [vmem:[#allocation56_spill] sm:$0xff] }
 0xecb   : > { %v8895_v19 = vpop.eup %8894  ;;  %8896 = vrcp.f32 %v6117_v2  ;;  %v6146_v27 = vsel %vm6143_vm6, %v6145_v31, %v6141_v55  ;;  %v6185_v53 = vmul.f32 %v8893_v9, %v6020_v5  ;;  %vm6155_vm3 = vmor %vm6153_vm8, %vm6154_vm10  ;;  %v6174_v56 = vand.u32 2147483648, %v6117_v2  ;;  %v16551_v55 = vld [vmem:[#allocation29_spill] sm:$0xff] }
 0xecc   : > { %v6150_v22 = vsub.f32 1.0, %v6149_v1  ;;  %v6195_v47 = vmul.f32 %v8895_v19, %v6146_v27  ;;  %8898 = vtanh.f32 %v15053_v0  ;;  %vm6158_vm7 = vcmp.eq.f32.partialorder %v6157_v21, 8.507059e+37  ;;  %v16552_v27 = vld [vmem:[#allocation65_spill] sm:$0xff] }
 0xecd   : > { %v15066_v13 = vadd.f32 %v6185_v53, %v6181_v20  ;;  %v6172_v51 = vand.u32 2147483647, %v6117_v2  ;;  %vm6168_vm15 = vweird.f32 %v6117_v2  ;;  %v6175_v18 = vor.u32 1.1754944e-38, %v6174_v56  ;;  %v16554_v56 = vld [vmem:[#allocation75_spill] sm:$0xff] }
 0xece   : > { %6204 = vrot.lane.b32.xlu1 %v6195_v47, %s9205_s19  ;;  %v6151_v7 = vmul.f32 %v8891_v8, %v6150_v22 }
 0xecf   : > { %8900 = vtanh.f32 %v15066_v13  ;;  %vm6173_vm1 = vcmp.eq.f32.partialorder %v6172_v51, 8.507059e+37 }
 0xed0   : > { %v6152_v52 = vadd.f32 %v8891_v8, %v6151_v7  ;;  %v16553_v7 = vld [vmem:[#allocation18_spill] sm:$0xff] }
 0xed1   : > { %v8897_v39 = vpop.eup %8896 }
 0xed2   : > { %v6164_v48 = vmul.f32 %v8897_v39, %v6117_v2  ;;  %v6156_v12 = vsel %vm6155_vm3, %v8891_v8, %v6152_v52  ;;  %v8899_v50 = vpop.eup %8898  ;;  %vm6169_vm14 = vweird.f32 %v8897_v39  ;;  %v16550_v2 = vld [vmem:[#allocation68_spill] sm:$0xff] }
 0xed3   : > { %v6161_v17 = vsel %vm6158_vm7, %v6160_v29, %v6156_v12  ;;  %vm6170_vm12 = vmor %vm6168_vm15, %vm6169_vm14 }
 0xed4   : > { %v6165_v45 = vsub.f32 1.0, %v6164_v48  ;;  %v6196_v15 = vmul.f32 %v8899_v50, %v6161_v17 }
 0xed5   : > { %v8901_v46 = vpop.eup %8900 }
 0xed6   : > { %6206 = vrot.lane.b32.xlu0 %v6196_v15, %s9205_s19  ;;  %v6166_v4 = vmul.f32 %v8897_v39, %v6165_v45 }
 0xed8   : > { %v6167_v38 = vadd.f32 %v8897_v39, %v6166_v4 }
 0xeda   : > { %v6171_v25 = vsel %vm6170_vm12, %v8897_v39, %v6167_v38 }
 0xedb   : > { %v6176_v40 = vsel %vm6173_vm1, %v6175_v18, %v6171_v25 }
 0xedc   : > { %v6197_v43 = vmul.f32 %v8901_v46, %v6176_v40 }
 0xede   : > { %6310 = vmatpush.msra.mxu3 %v6197_v43  ;;  %6208 = vrot.lane.b32.xlu1 %v6197_v43, %s9205_s19  ;;  %s7563_s19 = sshll.u32 %s16653_s10, 3 }
 0xedf   : > { %s327_s24 = scalar_lea.vmem %s15963_s9, %s7563_s19 }
 0xee0   : > { %6311 = vmatpush.msra.mxu3 %v6196_v15 }
 0xee2   : > { %6312 = vmatpush.msra.mxu3 %v6195_v47 }
 0xee4   : > { %6313 = vmatpush.msra.mxu3 %v15018_v42 }
 0xee5   : > { %7961 = vmatmul.msk.f32.vlgmr.msra.gmra.mxu3 %vm607_vm0, %v14695_v44 }
 0xeed   : > { %7962 = vmatmul.msk.f32.gmra.mxu3 %vm607_vm0, %v14702_v30 }
 0xef5   : > { %7963 = vmatmul.msk.f32.gmra.mxu3 %vm607_vm0, %v14709_v63 }
 0xefd   : > { %7964 = vmatmul.msk.f32.gmra.mxu3 %vm607_vm0, %v14716_v6 }
 0xf05   : > { %7965 = vmatmul.msk.f32.gmra.mxu3 %vm607_vm0, %v14723_v23 }
 0xf0d   : > { %7966 = vmatmul.msk.f32.gmra.mxu3 %vm607_vm0, %v14730_v10 }
 0xf15   : > { %7967 = vmatmul.msk.f32.gmra.mxu3 %vm607_vm0, %v14737_v49 }
 0xf1d   : > { %7968 = vmatmul.msk.f32.gmra.mxu3 %vm607_vm0, %v14744_v33 }
 0xf25   : > { %7969 = vmatmul.msk.f32.gmra.mxu3 %vm607_vm0, %v14751_v24 }
 0xf2d   : > { %7970 = vmatmul.msk.f32.gmra.mxu3 %vm607_vm0, %v14758_v35 }
 0xf35   : > { %7971 = vmatmul.msk.f32.gmra.mxu3 %vm607_vm0, %v14765_v14 }
 0xf38   : > { %v6203_v44 = vpop.permute.xlu0 %6202 }
 0xf39   : > { %6214 = vst.msk [vmem:[#allocation3] sm:$0xff] %vm2645_vm2, %v6203_v44 }
 0xf3d   : > { %7972 = vmatmul.msk.f32.gmra.mxu3 %vm607_vm0, %v14774_v59  ;;  %v16547_v59 = vld [vmem:[#allocation23_spill] sm:$0xff] }
 0xf40   : > { %v6205_v30 = vpop.permute.xlu1 %6204 }
 0xf41   : > { %6215 = vst.msk [vmem:[#allocation3 + $0x8] sm:$0xff] %vm2645_vm2, %v6205_v30 }
 0xf45   : > { %7973 = vmatmul.msk.f32.gmra.mxu3 %vm607_vm0, %v14782_v28 }
 0xf48   : > { %v6207_v63 = vpop.permute.xlu0 %6206 }
 0xf49   : > { %6216 = vst.msk [vmem:[#allocation3 + $0x10] sm:$0xff] %vm2645_vm2, %v6207_v63 }
 0xf4d   : > { %7974 = vmatmul.msk.f32.gmra.mxu3 %vm607_vm0, %v14790_v60 }
 0xf50   : > { %v6209_v6 = vpop.permute.xlu1 %6208 }
 0xf51   : > { %6217 = vst.msk [vmem:[#allocation3 + $0x18] sm:$0xff] %vm2645_vm2, %v6209_v6 }
 0xf55   : > { %7975 = vmatmul.msk.f32.gmra.mxu3 %vm607_vm0, %v14797_v54 }
 0xf5d   : > { %7976 = vmatmul.msk.f32.gmra.mxu3 %vm607_vm0, %v14804_v57 }
 0xf68   : > { %v6315_v23 = vpop.f32.mrf.mxu3 }
 0xf69   : > { %v6316_v28 = vadd.f32 %v6315_v23, %v16547_v59 }
 0xf6b   : > { %v7977_v42 = vmul.f32 -1.442695, %v6316_v28 }
 0xf6d   : > { %8902 = vpow2.f32 %v7977_v42 }
 0xf70   : > { %v6318_v10 = vpop.f32.mrf.mxu3 }
 0xf71   : > { %v6319_v62 = vadd.f32 %v6318_v10, %v16548_v61 }
 0xf73   : > { %v7978_v3 = vmul.f32 -1.442695, %v6319_v62  ;;  %v8903_v57 = vpop.eup %8902 }
 0xf74   : > { %v15114_v11 = vadd.f32 1.0, %v8903_v57 }
 0xf75   : > { %8904 = vpow2.f32 %v7978_v3  ;;  %v16558_v3 = vld [vmem:[#allocation69_spill] sm:$0xff] }
 0xf76   : > { %vm6384_vm5 = vweird.f32 %v15114_v11  ;;  %v6388_v42 = vand.u32 2147483647, %v15114_v11 }
 0xf78   : > { %v6321_v49 = vpop.f32.mrf.mxu3  ;;  %vm6389_vm6 = vcmp.eq.f32.partialorder %v6388_v42, 8.507059e+37  ;;  %v16576_v42 = vld [vmem:[#allocation26_spill] sm:$0xff] }
 0xf79   : > { %v6322_v31 = vadd.f32 %v6321_v49, %v16550_v2 }
 0xf7b   : > { %v7979_v1 = vmul.f32 -1.442695, %v6322_v31  ;;  %v8905_v47 = vpop.eup %8904 }
 0xf7c   : > { %v15122_v20 = vadd.f32 1.0, %v8905_v47 }
 0xf7e   : > { %vm6399_vm13 = vweird.f32 %v15122_v20 }
 0xf80   : > { %v6324_v33 = vpop.f32.mrf.mxu3 }
 0xf81   : > { %v6325_v5 = vadd.f32 %v6324_v33, %v16552_v27  ;;  %v6390_v33 = vand.u32 2147483648, %v15114_v11  ;;  %v6403_v27 = vand.u32 2147483647, %v15122_v20 }
 0xf83   : > { %v7980_v37 = vmul.f32 -1.442695, %v6325_v5  ;;  %v6391_v31 = vor.u32 1.1754944e-38, %v6390_v33  ;;  %vm15191_vm8 = vcmp.eq.f32.partialorder %v6403_v27, 8.507059e+37 }
 0xf88   : > { %v6327_v24 = vpop.f32.mrf.mxu3 }
 0xf89   : > { %v6328_v8 = vadd.f32 %v6327_v24, %v16549_v32  ;;  %v6405_v32 = vand.u32 2147483648, %v15122_v20 }
 0xf8b   : > { %v7981_v9 = vmul.f32 -1.442695, %v6328_v8 }
 0xf8d   : > { %8906 = vpow2.f32 %v7981_v9 }
 0xf8e   : > { %8908 = vrcp.f32 %v15114_v11 }
 0xf8f   : > { %8910 = vpow2.f32 %v7979_v1 }
 0xf90   : > { %v6330_v35 = vpop.f32.mrf.mxu3 }
 0xf91   : > { %v6331_v19 = vadd.f32 %v6330_v35, %v16551_v55 }
 0xf93   : > { %v7982_v22 = vmul.f32 -1.442695, %v6331_v19  ;;  %v8907_v53 = vpop.eup %8906 }
 0xf94   : > { %v8909_v52 = vpop.eup %8908  ;;  %v15124_v39 = vadd.f32 1.0, %v8907_v53 }
 0xf95   : > { %8912 = vpow2.f32 %v7982_v22  ;;  %v8911_v29 = vpop.eup %8910  ;;  %v6380_v50 = vmul.f32 %v8909_v52, %v15114_v11  ;;  %vm6385_vm2 = vweird.f32 %v8909_v52 }
 0xf96   : > { %8914 = vpow2.f32 %v7980_v37  ;;  %v15130_v17 = vadd.f32 1.0, %v8911_v29  ;;  %vm15164_vm4 = vmor %vm6384_vm5, %vm6385_vm2  ;;  %vm6460_vm3 = vweird.f32 %v15124_v39 }
 0xf97   : > { %8916 = vrcp.f32 %v15122_v20  ;;  %v6381_v51 = vsub.f32 1.0, %v6380_v50 }
 0xf98   : > { %v6333_v14 = vpop.f32.mrf.mxu3  ;;  %8918 = vrcp.f32 %v15124_v39  ;;  %vm6414_vm12 = vweird.f32 %v15130_v17 }
 0xf99   : > { %v6334_v21 = vadd.f32 %v6333_v14, %v16553_v7  ;;  %v6382_v30 = vmul.f32 %v8909_v52, %v6381_v51  ;;  %v6418_v7 = vand.u32 2147483647, %v15130_v17 }
 0xf9b   : > { %v7983_v48 = vmul.f32 -1.442695, %v6334_v21  ;;  %v8913_v45 = vpop.eup %8912  ;;  %v6383_v49 = vadd.f32 %v8909_v52, %v6382_v30  ;;  %vm15230_vm1 = vcmp.eq.f32.partialorder %v6418_v7, 8.507059e+37 }
 0xf9c   : > { %v8915_v15 = vpop.eup %8914  ;;  %v15135_v38 = vadd.f32 1.0, %v8913_v45  ;;  %v6466_v45 = vand.u32 2147483648, %v15124_v39 }
 0xf9d   : > { %8920 = vpow2.f32 %v7983_v48  ;;  %v15137_v18 = vpop.eup %8916  ;;  %v15143_v40 = vadd.f32 1.0, %v8915_v15  ;;  %v6387_v2 = vsel %vm15164_vm4, %v8909_v52, %v6383_v49 }
 0xf9e   : > { %8922 = vrcp.f32 %v15130_v17  ;;  %v15141_v46 = vpop.eup %8918  ;;  %v6395_v23 = vmul.f32 %v15137_v18, %v15122_v20  ;;  %v6392_v22 = vsel %vm6389_vm6, %v6391_v31, %v6387_v2  ;;  %vm6400_vm11 = vweird.f32 %v15137_v18 }
 0xf9f   : > { %8924 = vrcp.f32 %v15135_v38  ;;  %v6456_v63 = vmul.f32 %v15141_v46, %v15124_v39  ;;  %vm6461_vm10 = vweird.f32 %v15141_v46  ;;  %vm15225_vm15 = vmor %vm6399_vm13, %vm6400_vm11  ;;  %v6481_v31 = vand.u32 2147483648, %v15135_v38 }
 0xfa0   : > { %v6336_v60 = vpop.f32.mrf.mxu3  ;;  %8926 = vrcp.f32 %v15143_v40  ;;  %v6396_v28 = vsub.f32 1.0, %v6395_v23  ;;  %vm15207_vm14 = vmor %vm6460_vm3, %vm6461_vm10  ;;  %vm6475_vm6 = vweird.f32 %v15135_v38 }
 0xfa1   : > { %v6337_v4 = vadd.f32 %v6336_v60, %v16554_v56  ;;  %v6457_v35 = vsub.f32 1.0, %v6456_v63  ;;  %v16555_v60 = vld [vmem:[#allocation67_spill] sm:$0xff]  ;;  %v6420_v56 = vand.u32 2147483648, %v15130_v17  ;;  %v16575_v63 = vld [vmem:[#allocation22_spill] sm:$0xff] }
 0xfa2   : > { %v6397_v5 = vmul.f32 %v15137_v18, %v6396_v28  ;;  %v6467_v28 = vor.u32 1.1754944e-38, %v6466_v45 }
 0xfa3   : > { %v8921_v43 = vpop.eup %8920  ;;  %v7984_v44 = vmul.f32 -1.442695, %v6337_v4  ;;  %v6458_v55 = vmul.f32 %v15141_v46, %v6457_v35 }
 0xfa4   : > { %v15148_v6 = vpop.eup %8922  ;;  %v15153_v10 = vadd.f32 1.0, %v8921_v43  ;;  %v6398_v15 = vadd.f32 %v15137_v18, %v6397_v5  ;;  %v6464_v43 = vand.u32 2147483647, %v15124_v39 }
 0xfa5   : > { %8928 = vpow2.f32 %v7984_v44  ;;  %v6410_v24 = vmul.f32 %v15148_v6, %v15130_v17  ;;  %v15159_v59 = vpop.eup %8924  ;;  %v6459_v52 = vadd.f32 %v15141_v46, %v6458_v55  ;;  %vm6415_vm7 = vweird.f32 %v15148_v6 }
 0xfa6   : > { %8930 = vrcp.f32 %v15153_v10  ;;  %v15169_v8 = vpop.eup %8926  ;;  %v6471_v19 = vmul.f32 %v15159_v59, %v15135_v38  ;;  %vm6465_vm2 = vcmp.eq.f32.partialorder %v6464_v43, 8.507059e+37  ;;  %vm15240_vm5 = vmor %vm6414_vm12, %vm6415_vm7  ;;  %v6421_v17 = vor.u32 1.1754944e-38, %v6420_v56 }
 0xfa7   : > { %v6411_v11 = vsub.f32 1.0, %v6410_v24  ;;  %v6425_v53 = vmul.f32 %v15169_v8, %v15143_v40  ;;  %v6463_v39 = vsel %vm15207_vm14, %v15141_v46, %v6459_v52  ;;  %vm6476_vm4 = vweird.f32 %v15159_v59 }
 0xfa8   : > { %v15111_v54 = vpop.f32.mrf.mxu3  ;;  %v6472_v21 = vsub.f32 1.0, %v6471_v19  ;;  %v6468_v20 = vsel %vm6465_vm2, %v6467_v28, %v6463_v39  ;;  %vm15263_vm13 = vmor %vm6475_vm6, %vm6476_vm4  ;;  %v6496_v45 = vand.u32 2147483648, %v15153_v10  ;;  %vm6430_vm3 = vweird.f32 %v15169_v8 }
 0xfa9   : > { %v6340_v57 = vadd.f32 %v15111_v54, %v16558_v3  ;;  %v6406_v54 = vor.u32 1.1754944e-38, %v6405_v32  ;;  %v6412_v48 = vmul.f32 %v15148_v6, %v6411_v11  ;;  %v6426_v30 = vsub.f32 1.0, %v6425_v53  ;;  %v16570_v11 = vld [vmem:[#allocation64_spill] sm:$0xff] }
 0xfaa   : > { %v6473_v33 = vmul.f32 %v15159_v59, %v6472_v21  ;;  %v6595_v27 = vmul.f32 %v6468_v20, %v14978_v36  ;;  %vm6429_vm14 = vweird.f32 %v15143_v40 }
 0xfab   : > { %v8929_v1 = vpop.eup %8928  ;;  %v6413_v24 = vadd.f32 %v15148_v6, %v6412_v48  ;;  %v6427_v62 = vmul.f32 %v15169_v8, %v6426_v30 }
 0xfac   : > { %v15182_v47 = vpop.eup %8930  ;;  %v15186_v37 = vadd.f32 1.0, %v8929_v1  ;;  %v6474_v3 = vadd.f32 %v15159_v59, %v6473_v33  ;;  %v6479_v1 = vand.u32 2147483647, %v15135_v38  ;;  %v6497_v33 = vor.u32 1.1754944e-38, %v6496_v45 }
 0xfad   : > { %v6486_v51 = vmul.f32 %v15182_v47, %v15153_v10  ;;  %v15274_v38 = vadd.f32 %v15169_v8, %v6427_v62  ;;  %vm6491_vm10 = vweird.f32 %v15182_v47 }
 0xfae   : > { %v6478_v29 = vsel %vm15263_vm13, %v15159_v59, %v6474_v3  ;;  %vm6480_vm11 = vcmp.eq.f32.partialorder %v6479_v1, 8.507059e+37  ;;  %vm6505_vm13 = vweird.f32 %v15186_v37 }
 0xfaf   : > { %v6487_v46 = vsub.f32 1.0, %v6486_v51 }
 0xfb0   : > { %v15118_v26 = vpop.f32.mrf.mxu3 }
 0xfb1   : > { %v6488_v19 = vmul.f32 %v15182_v47, %v6487_v46 }
 0xfb8   : > { %v15126_v12 = vpop.f32.mrf.mxu3 }
 0xfc0   : > { %v15139_v25 = vpop.f32.mrf.mxu3 }
 0xfc8   : > { %v6351_v14 = vpop.f32.mrf.mxu3 }
 0xfc9   : > { %v6352_v61 = vadd.f32 %v6351_v14, %v16555_v60  ;;  %v6402_v60 = vsel %vm15225_vm15, %v15137_v18, %v6398_v15  ;;  %v6417_v18 = vsel %vm15240_vm5, %v15148_v6, %v6413_v24  ;;  %v6435_v6 = vand.u32 2147483648, %v15143_v40 }
 0xfca   : > { %v15271_v53 = vsel %vm15230_vm1, %v6421_v17, %v6417_v18  ;;  %v6489_v15 = vadd.f32 %v15182_v47, %v6488_v19 }
 0xfcb   : > { %v7985_v9 = vmul.f32 -1.442695, %v6352_v61 }
 0xfcd   : > { %8932 = vpow2.f32 %v7985_v9  ;;  %v6407_v9 = vsel %vm15191_vm8, %v6406_v54, %v6402_v60  ;;  %v6346_v54 = vadd.f32 %v15126_v12, %v14313_v34  ;;  %v6482_v12 = vor.u32 1.1754944e-38, %v6481_v31 }
 0xfce   : > { %8934 = vtanh.f32 %v6340_v57  ;;  %vm6490_vm8 = vweird.f32 %v15153_v10 }
 0xfcf   : > { %8936 = vrcp.f32 %v15186_v37  ;;  %v6483_v56 = vsel %vm6480_vm11, %v6482_v12, %v6478_v29  ;;  %vm15294_vm7 = vmor %vm6490_vm8, %vm6491_vm10 }
 0xfd0   : > { %v6354_v50 = vpop.f32.mrf.mxu3  ;;  %v6596_v39 = vmul.f32 %v6483_v56, %v15010_v16  ;;  %v6493_v24 = vsel %vm15294_vm7, %v15182_v47, %v6489_v15  ;;  %vm15334_vm11 = vmor %vm6429_vm14, %vm6430_vm3 }
 0xfd1   : > { %v6355_v4 = vadd.f32 %v6354_v50, %v14259_v58  ;;  %v16563_v58 = vld [vmem:[#allocation32_spill] sm:$0xff] }
 0xfd2   : > { %v6343_v23 = vadd.f32 %v15118_v26, %v16563_v58  ;;  %v6349_v26 = vadd.f32 %v15139_v25, %v16576_v42 }
 0xfd3   : > { %v8933_v44 = vpop.eup %8932  ;;  %v7986_v49 = vmul.f32 -1.442695, %v6355_v4 }
 0xfd4   : > { %v15219_v35 = vadd.f32 1.0, %v8933_v44  ;;  %v8935_v14 = vpop.eup %8934 }
 0xfd5   : > { %8938 = vpow2.f32 %v7986_v49  ;;  %v6599_v32 = vmul.f32 %v8935_v14, %v6392_v22  ;;  %v15250_v2 = vpop.eup %8936  ;;  %v6494_v14 = vand.u32 2147483647, %v15153_v10  ;;  %v6433_v22 = vand.u32 2147483647, %v15143_v40 }
 0xfd6   : > { %8940 = vrcp.f32 %v15219_v35  ;;  %v6501_v21 = vmul.f32 %v15250_v2, %v15186_v37  ;;  %v6546_v44 = vand.u32 2147483648, %v15219_v35  ;;  %v6544_v49 = vand.u32 2147483647, %v15219_v35 }
 0xfd7   : > { %8942 = vtanh.f32 %v6343_v23  ;;  %v15278_v52 = vadd.f32 %v6599_v32, %v6595_v27  ;;  %vm6540_vm12 = vweird.f32 %v15219_v35  ;;  %vm6506_vm5 = vweird.f32 %v15250_v2 }
 0xfd8   : > { %v6357_v57 = vpop.f32.mrf.mxu3  ;;  %v6502_v4 = vsub.f32 1.0, %v6501_v21  ;;  %v6547_v47 = vor.u32 1.1754944e-38, %v6546_v44  ;;  %vm6545_vm2 = vcmp.eq.f32.partialorder %v6544_v49, 8.507059e+37  ;;  %vm6495_vm4 = vcmp.eq.f32.partialorder %v6494_v14, 8.507059e+37  ;;  %vm15342_vm10 = vmor %vm6505_vm13, %vm6506_vm5 }
 0xfd9   : > { %v6358_v55 = vadd.f32 %v6357_v57, %v16570_v11  ;;  %v6498_v3 = vsel %vm6495_vm4, %v6497_v33, %v6493_v24  ;;  %v6511_v11 = vand.u32 2147483648, %v15186_v37  ;;  %vm6434_vm14 = vcmp.eq.f32.partialorder %v6433_v22, 8.507059e+37 }
 0xfda   : > { %v6503_v61 = vmul.f32 %v15250_v2, %v6502_v4  ;;  %v6597_v27 = vmul.f32 %v6498_v3, %v15053_v0  ;;  %v6432_v0 = vsel %vm15334_vm11, %v15169_v8, %v15274_v38  ;;  %v15403_v3 = vld [vmem:[%s15959_s5 + $0x20] sm:$0xff] }
 0xfdb   : > { %v8939_v5 = vpop.eup %8938  ;;  %v7987_v36 = vmul.f32 -1.442695, %v6358_v55  ;;  %v6512_v15 = vor.u32 1.1754944e-38, %v6511_v11  ;;  %v15439_v11 = vld [vmem:[%s15959_s5 + $0x48] sm:$0xff] }
 0xfdc   : > { %v8941_v7 = vpop.eup %8940  ;;  %v15283_v48 = vadd.f32 1.0, %v8939_v5  ;;  %v15461_v5 = vld [vmem:[%s15959_s5 + $0x60] sm:$0xff] }
 0xfdd   : > { %v8943_v34 = vpop.eup %8942  ;;  %v6536_v50 = vmul.f32 %v8941_v7, %v15219_v35  ;;  %8944 = vpow2.f32 %v7987_v36  ;;  %vm6541_vm15 = vweird.f32 %v8941_v7  ;;  %v15477_v36 = vld [vmem:[%s15959_s5 + $0x70] sm:$0xff] }
 0xfde   : > { %8946 = vrcp.f32 %v15283_v48  ;;  %v6600_v51 = vmul.f32 %v8943_v34, %v6407_v9  ;;  %vm6542_vm1 = vmor %vm6540_vm12, %vm6541_vm15  ;;  %v6504_v9 = vadd.f32 %v15250_v2, %v6503_v61  ;;  %v6561_v1 = vand.u32 2147483648, %v15283_v48 }
 0xfdf   : > { %8948 = vtanh.f32 %v6346_v54  ;;  %v6537_v59 = vsub.f32 1.0, %v6536_v50  ;;  %v6559_v19 = vand.u32 2147483647, %v15283_v48  ;;  %v6509_v54 = vand.u32 2147483647, %v15186_v37 }
 0xfe0   : > { %8950 = vtanh.f32 %v15278_v52  ;;  %v6360_v43 = vpop.f32.mrf.mxu3  ;;  %v15310_v17 = vadd.f32 %v6600_v51, %v6596_v39  ;;  %vm6555_vm8 = vweird.f32 %v15283_v48  ;;  %v6508_v34 = vsel %vm15342_vm10, %v15250_v2, %v6504_v9 }
 0xfe1   : > { %v6361_v58 = vadd.f32 %v6360_v43, %v16575_v63  ;;  %v6538_v23 = vmul.f32 %v8941_v7, %v6537_v59  ;;  %v6562_v50 = vor.u32 1.1754944e-38, %v6561_v1  ;;  %vm6560_vm7 = vcmp.eq.f32.partialorder %v6559_v19, 8.507059e+37  ;;  %v15432_v1 = vld [vmem:[%s15959_s5 + $0x40] sm:$0xff]  ;;  %v15453_v19 = vld [vmem:[%s15959_s5 + $0x58] sm:$0xff] }
 0xfe2   : > { %vm6510_vm15 = vcmp.eq.f32.partialorder %v6509_v54, 8.507059e+37  ;;  %vm16581_vm10 = vcmask 786048   ;;  %v15469_v54 = vld [vmem:[%s15959_s5 + $0x68] sm:$0xff] }
 0xfe3   : > { %v8945_v28 = vpop.eup %8944  ;;  %v7988_v46 = vmul.f32 -1.442695, %v6361_v58  ;;  %v6539_v60 = vadd.f32 %v8941_v7, %v6538_v23  ;;  %v6513_v56 = vsel %vm6510_vm15, %v6512_v15, %v6508_v34  ;;  %v16585_v15 = vld [vmem:[#allocation36_spill] sm:$0xff] }
 0xfe4   : > { %v8947_v20 = vpop.eup %8946  ;;  %v15312_v16 = vadd.f32 1.0, %v8945_v28  ;;  %v6598_v30 = vmul.f32 %v6513_v56, %v15066_v13 }
 0xfe5   : > { %v8949_v62 = vpop.eup %8948  ;;  %v6551_v10 = vmul.f32 %v8947_v20, %v15283_v48  ;;  %8952 = vpow2.f32 %v7988_v46  ;;  %v6543_v32 = vsel %vm6542_vm1, %v8941_v7, %v6539_v60  ;;  %vm6556_vm6 = vweird.f32 %v8947_v20 }
 0xfe6   : > { %v8951_v25 = vpop.eup %8950  ;;  %8954 = vrcp.f32 %v15312_v16  ;;  %v6548_v35 = vsel %vm6545_vm2, %v6547_v47, %v6543_v32  ;;  %v6601_v31 = vmul.f32 %v8949_v62, %v15271_v53  ;;  %v6436_v7 = vor.u32 1.1754944e-38, %v6435_v6  ;;  %vm6557_vm3 = vmor %vm6555_vm8, %vm6556_vm6  ;;  %v15382_v32 = vld [vmem:[%s15959_s5 + $0x8] sm:$0xff] }
 0xfe7   : > { %8956 = vtanh.f32 %v6349_v26  ;;  %v6552_v18 = vsub.f32 1.0, %v6551_v10  ;;  %v15318_v57 = vmul.f32 %v8951_v25, %v6548_v35  ;;  %v6576_v51 = vand.u32 2147483648, %v15312_v16  ;;  %v15375_v10 = vld [vmem:[%s15959_s5] sm:$0xff]  ;;  %v15389_v25 = vld [vmem:[%s15959_s5 + $0x10] sm:$0xff]  ;;  %v15396_v35 = vld [vmem:[%s15959_s5 + $0x18] sm:$0xff] }
 0xfe8   : > { %8958 = vtanh.f32 %v15310_v17  ;;  %v15353_v37 = vadd.f32 %v6601_v31, %v6597_v27  ;;  %v6437_v48 = vsel %vm6434_vm14, %v6436_v7, %v6432_v0  ;;  %v6574_v44 = vand.u32 2147483647, %v15312_v16  ;;  %v15424_v31 = vld [vmem:[%s15959_s5 + $0x38] sm:$0xff]  ;;  %vm16582_vm8 = vmmov %vm16581_vm10 }
 0xfe9   : > { %6619 = vrot.lane.b32.xlu2 %v15318_v57, %s9204_s18  ;;  %v6553_v55 = vmul.f32 %v8947_v20, %v6552_v18  ;;  %vm6570_vm1 = vweird.f32 %v15312_v16  ;;  %v6577_v49 = vor.u32 1.1754944e-38, %v6576_v51  ;;  %v15410_v18 = vld [vmem:[%s15959_s5 + $0x28] sm:$0xff]  ;;  %v15484_v0 = vld [vmem:[%s15959_s5 + $0x78] sm:$0xff] }
 0xfea   : > { %vm6575_vm5 = vcmp.eq.f32.partialorder %v6574_v44, 8.507059e+37 }
 0xfeb   : > { %v8953_v53 = vpop.eup %8952  ;;  %v6554_v21 = vadd.f32 %v8947_v20, %v6553_v55  ;;  %v15446_v55 = vld [vmem:[%s15959_s5 + $0x50] sm:$0xff] }
 0xfec   : > { %v8955_v29 = vpop.eup %8954  ;;  %v6534_v12 = vadd.f32 1.0, %v8953_v53 }
 0xfed   : > { %v8957_v45 = vpop.eup %8956  ;;  %v6566_v8 = vmul.f32 %v8955_v29, %v15312_v16  ;;  %v6558_v40 = vsel %vm6557_vm3, %v8947_v20, %v6554_v21  ;;  %vm6571_vm12 = vweird.f32 %v8955_v29  ;;  %vm16583_vm3 = vmmov %vm16582_vm8 }
 0xfee   : > { %v8959_v6 = vpop.eup %8958  ;;  %8960 = vrcp.f32 %v6534_v12  ;;  %v6563_v38 = vsel %vm6560_vm7, %v6562_v50, %v6558_v40  ;;  %v6602_v2 = vmul.f32 %v8957_v45, %v6437_v48  ;;  %vm6572_vm2 = vmor %vm6570_vm1, %vm6571_vm12  ;;  %v6591_v26 = vand.u32 2147483648, %v6534_v12 }
 0xfef   : > { %v6567_v59 = vsub.f32 1.0, %v6566_v8  ;;  %v6612_v4 = vmul.f32 %v8959_v6, %v6563_v38  ;;  %8962 = vtanh.f32 %v15353_v37  ;;  %v6589_v46 = vand.u32 2147483647, %v6534_v12  ;;  %vm16584_vm7 = vmmov %vm16583_vm3 }
 0xff0   : > { %v15366_v23 = vadd.f32 %v6602_v2, %v6598_v30  ;;  %vm6585_vm6 = vweird.f32 %v6534_v12  ;;  %v6592_v20 = vor.u32 1.1754944e-38, %v6591_v26 }
 0xff1   : > { %6621 = vrot.lane.b32.xlu1 %v6612_v4, %s9204_s18  ;;  %v6568_v43 = vmul.f32 %v8955_v29, %v6567_v59  ;;  %vm6590_vm11 = vcmp.eq.f32.partialorder %v6589_v46, 8.507059e+37 }
 0xff2   : > { %8964 = vtanh.f32 %v15366_v23 }
 0xff3   : > { %v6569_v63 = vadd.f32 %v8955_v29, %v6568_v43 }
 0xff4   : > { %v8961_v58 = vpop.eup %8960 }
 0xff5   : > { %v6581_v33 = vmul.f32 %v8961_v58, %v6534_v12  ;;  %v6573_v39 = vsel %vm6572_vm2, %v8955_v29, %v6569_v63  ;;  %v8963_v24 = vpop.eup %8962  ;;  %vm6586_vm4 = vweird.f32 %v8961_v58 }
 0xff6   : > { %v6578_v14 = vsel %vm6575_vm5, %v6577_v49, %v6573_v39  ;;  %vm6587_vm13 = vmor %vm6585_vm6, %vm6586_vm4 }
 0xff7   : > { %v6582_v28 = vsub.f32 1.0, %v6581_v33  ;;  %v6613_v42 = vmul.f32 %v8963_v24, %v6578_v14  ;;  %v16586_v14 = vld [vmem:[#allocation57_spill] sm:$0xff] }
 0xff8   : > { %v8965_v16 = vpop.eup %8964 }
 0xff9   : > { %6623 = vrot.lane.b32.xlu1 %v6613_v42, %s9204_s18  ;;  %v6583_v13 = vmul.f32 %v8961_v58, %v6582_v28 }
 0xffb   : > { %v6584_v60 = vadd.f32 %v8961_v58, %v6583_v13  ;;  %v16587_v13 = vld [vmem:[#allocation30_spill] sm:$0xff] }
 0xffd   : > { %v6588_v61 = vsel %vm6587_vm13, %v8961_v58, %v6584_v60 }
 0xffe   : > { %v6593_v47 = vsel %vm6590_vm11, %v6592_v20, %v6588_v61 }
 0xfff   : > { %v6614_v62 = vmul.f32 %v8965_v16, %v6593_v47  ;;  %v16588_v47 = vld [vmem:[#allocation24_spill] sm:$0xff] }
0x1001   : > { %6727 = vmatpush.msra.mxu0 %v6614_v62  ;;  %6625 = vrot.lane.b32.xlu1 %v6614_v62, %s9204_s18 }
0x1003   : > { %6728 = vmatpush.msra.mxu0 %v6613_v42 }
0x1005   : > { %6729 = vmatpush.msra.mxu0 %v6612_v4 }
0x1007   : > { %6730 = vmatpush.msra.mxu0 %v15318_v57  ;;  %v15417_v57 = vld [vmem:[%s15959_s5 + $0x30] sm:$0xff] }
0x1008   : > { %7989 = vmatmul.msk.f32.vlgmr.msra.gmra.mxu0 %vm607_vm0, %v15375_v10 }
0x1010   : > { %7990 = vmatmul.msk.f32.gmra.mxu0 %vm607_vm0, %v15382_v32 }
0x1018   : > { %7991 = vmatmul.msk.f32.gmra.mxu0 %vm607_vm0, %v15389_v25 }
0x1020   : > { %7992 = vmatmul.msk.f32.gmra.mxu0 %vm607_vm0, %v15396_v35 }
0x1028   : > { %7993 = vmatmul.msk.f32.gmra.mxu0 %vm607_vm0, %v15403_v3 }
0x1030   : > { %7994 = vmatmul.msk.f32.gmra.mxu0 %vm607_vm0, %v15410_v18 }
0x1038   : > { %7995 = vmatmul.msk.f32.gmra.mxu0 %vm607_vm0, %v15417_v57 }
0x1040   : > { %7996 = vmatmul.msk.f32.gmra.mxu0 %vm607_vm0, %v15424_v31 }
0x1043   : > { %v6620_v9 = vpop.permute.xlu2 %6619 }
0x1044   : > { %6631 = vst.msk [vmem:[#allocation3] sm:$0xff] %vm16581_vm10, %v6620_v9 }
0x1048   : > { %7997 = vmatmul.msk.f32.gmra.mxu0 %vm607_vm0, %v15432_v1 }
0x1050   : > { %7998 = vmatmul.msk.f32.gmra.mxu0 %vm607_vm0, %v15439_v11 }
0x1058   : > { %7999 = vmatmul.msk.f32.gmra.mxu0 %vm607_vm0, %v15446_v55 }
0x1060   : > { %8000 = vmatmul.msk.f32.gmra.mxu0 %vm607_vm0, %v15453_v19 }
0x1063   : > { %v6622_v27 = vpop.permute.xlu1 %6621 }
0x1064   : > { %6632 = vst.msk [vmem:[#allocation3 + $0x8] sm:$0xff] %vm16582_vm8, %v6622_v27 }
0x1068   : > { %8001 = vmatmul.msk.f32.gmra.mxu0 %vm607_vm0, %v15461_v5 }
0x106b   : > { %v6624_v22 = vpop.permute.xlu1 %6623 }
0x106c   : > { %6633 = vst.msk [vmem:[#allocation3 + $0x10] sm:$0xff] %vm16583_vm3, %v6624_v22 }
0x1070   : > { %8002 = vmatmul.msk.f32.gmra.mxu0 %vm607_vm0, %v15469_v54 }
0x1073   : > { %v6626_v53 = vpop.permute.xlu1 %6625 }
0x1074   : > { %6634 = vst.msk [vmem:[#allocation3 + $0x18] sm:$0xff] %vm16584_vm7, %v6626_v53 }
0x1078   : > { %8003 = vmatmul.msk.f32.gmra.mxu0 %vm607_vm0, %v15477_v36 }
0x1080   : > { %8004 = vmatmul.msk.f32.gmra.mxu0 %vm607_vm0, %v15484_v0 }
0x1085   : > { %v6732_v7 = vpop.f32.mrf.mxu0 }
0x1086   : > { %v6733_v34 = vadd.f32 %v6732_v7, %v14375_v41 }
0x1088   : > { %v8005_v50 = vmul.f32 -1.442695, %v6733_v34 }
0x108a   : > { %8966 = vpow2.f32 %v8005_v50 }
0x108d   : > { %v6735_v21 = vpop.f32.mrf.mxu0 }
0x108e   : > { %v6736_v46 = vadd.f32 %v6735_v21, %v16587_v13 }
0x1090   : > { %v8967_v6 = vpop.eup %8966  ;;  %v8006_v27 = vmul.f32 -1.442695, %v6736_v46 }
0x1091   : > { %v6792_v48 = vadd.f32 1.0, %v8967_v6 }
0x1093   : > { %v6807_v60 = vand.u32 2147483648, %v6792_v48  ;;  %vm6801_vm2 = vweird.f32 %v6792_v48  ;;  %v6805_v20 = vand.u32 2147483647, %v6792_v48 }
0x1095   : > { %v6738_v29 = vpop.f32.mrf.mxu0  ;;  %v6808_v22 = vor.u32 1.1754944e-38, %v6807_v60  ;;  %vm6806_vm6 = vcmp.eq.f32.partialorder %v6805_v20, 8.507059e+37 }
0x109d   : > { %v15489_v12 = vpop.f32.mrf.mxu0 }
0x10a5   : > { %v6744_v45 = vpop.f32.mrf.mxu0 }
0x10a6   : > { %v6745_v8 = vadd.f32 %v6744_v45, %v16585_v15 }
0x10a8   : > { %v8009_v40 = vmul.f32 -1.442695, %v6745_v8  ;;  %v16589_v8 = vld [vmem:[#allocation31_spill] sm:$0xff] }
0x10aa   : > { %8968 = vpow2.f32 %v8009_v40  ;;  %v6739_v40 = vadd.f32 %v6738_v29, %v16589_v8 }
0x10ab   : > { %8970 = vrcp.f32 %v6792_v48 }
0x10ad   : > { %v6747_v38 = vpop.f32.mrf.mxu0 }
0x10ae   : > { %v6748_v62 = vadd.f32 %v6747_v38, %v16588_v47 }
0x10b0   : > { %v8969_v56 = vpop.eup %8968  ;;  %v8010_v21 = vmul.f32 -1.442695, %v6748_v62  ;;  %v16593_v62 = vld [vmem:[#allocation37_spill] sm:$0xff] }
0x10b1   : > { %v6868_v59 = vadd.f32 1.0, %v8969_v56  ;;  %v8971_v2 = vpop.eup %8970  ;;  %v8007_v56 = vmul.f32 -1.442695, %v6739_v40 }
0x10b2   : > { %v6797_v43 = vmul.f32 %v8971_v2, %v6792_v48  ;;  %vm6802_vm12 = vweird.f32 %v8971_v2  ;;  %v16590_v48 = vld [vmem:[#allocation11_spill] sm:$0xff] }
0x10b3   : > { %8972 = vrcp.f32 %v6868_v59  ;;  %v6883_v24 = vand.u32 2147483648, %v6868_v59  ;;  %vm6877_vm15 = vweird.f32 %v6868_v59  ;;  %v6881_v26 = vand.u32 2147483647, %v6868_v59  ;;  %vm6803_vm5 = vmor %vm6801_vm2, %vm6802_vm12 }
0x10b4   : > { %v6798_v63 = vsub.f32 1.0, %v6797_v43 }
0x10b5   : > { %v6750_v4 = vpop.f32.mrf.mxu0  ;;  %v6884_v16 = vor.u32 1.1754944e-38, %v6883_v24  ;;  %vm6882_vm4 = vcmp.eq.f32.partialorder %v6881_v26, 8.507059e+37 }
0x10b6   : > { %v6799_v49 = vmul.f32 %v8971_v2, %v6798_v63  ;;  %v6751_v38 = vadd.f32 %v6750_v4, %v16590_v48  ;;  %v16592_v63 = vld [vmem:[#allocation28_spill] sm:$0xff] }
0x10b8   : > { %v6800_v42 = vadd.f32 %v8971_v2, %v6799_v49 }
0x10b9   : > { %v8973_v51 = vpop.eup %8972 }
0x10ba   : > { %v6873_v41 = vmul.f32 %v8973_v51, %v6868_v59  ;;  %vm6878_vm14 = vweird.f32 %v8973_v51  ;;  %v6804_v9 = vsel %vm6803_vm5, %v8971_v2, %v6800_v42 }
0x10bb   : > { %vm6879_vm1 = vmor %vm6877_vm15, %vm6878_vm14  ;;  %v6809_v50 = vsel %vm6806_vm6, %v6808_v22, %v6804_v9 }
0x10bc   : > { %v6874_v44 = vsub.f32 1.0, %v6873_v41 }
0x10bd   : > { %v6753_v30 = vpop.f32.mrf.mxu0 }
0x10be   : > { %v6875_v58 = vmul.f32 %v8973_v51, %v6874_v44  ;;  %v16591_v44 = vld [vmem:[#allocation7_spill] sm:$0xff] }
0x10c0   : > { %v6876_v39 = vadd.f32 %v8973_v51, %v6875_v58  ;;  %v6754_v58 = vadd.f32 %v6753_v30, %v16592_v63 }
0x10c2   : > { %v6880_v61 = vsel %vm6879_vm1, %v8973_v51, %v6876_v39  ;;  %v8011_v51 = vmul.f32 -1.442695, %v6751_v38  ;;  %v8012_v39 = vmul.f32 -1.442695, %v6754_v58 }
0x10c3   : > { %v6885_v53 = vsel %vm6882_vm4, %v6884_v16, %v6880_v61 }
0x10c4   : > { %v7012_v45 = vmul.f32 %v6885_v53, %v15278_v52  ;;  %v6742_v52 = vadd.f32 %v15489_v12, %v16591_v44 }
0x10c5   : > { %v6756_v33 = vpop.f32.mrf.mxu0 }
0x10c6   : > { %v6757_v28 = vadd.f32 %v6756_v33, %v16586_v14  ;;  %v8008_v49 = vmul.f32 -1.442695, %v6742_v52 }
0x10c8   : > { %8974 = vtanh.f32 %v6757_v28 }
0x10c9   : > { %8976 = vpow2.f32 %v8006_v27 }
0x10ca   : > { %8978 = vpow2.f32 %v8010_v21 }
0x10cb   : > { %8980 = vpow2.f32 %v8007_v56 }
0x10cc   : > { %8982 = vpow2.f32 %v8011_v51 }
0x10cd   : > { %v6759_v7 = vpop.f32.mrf.mxu0 }
0x10ce   : > { %v8975_v34 = vpop.eup %8974 }
0x10cf   : > { %v7016_v15 = vmul.f32 %v8975_v34, %v6809_v50  ;;  %v8977_v2 = vpop.eup %8976  ;;  %v16594_v50 = vld [vmem:[#allocation39_spill] sm:$0xff] }
0x10d0   : > { %v8979_v41 = vpop.eup %8978  ;;  %v6793_v43 = vadd.f32 1.0, %v8977_v2 }
0x10d1   : > { %v15497_v6 = vadd.f32 %v7016_v15, %v7012_v45  ;;  %v15505_v29 = vadd.f32 1.0, %v8979_v41  ;;  %v8981_v33 = vpop.eup %8980  ;;  %v16595_v15 = vld [vmem:[#allocation33_spill] sm:$0xff] }
0x10d2   : > { %8984 = vrcp.f32 %v6793_v43  ;;  %v8983_v24 = vpop.eup %8982  ;;  %v15510_v14 = vadd.f32 1.0, %v8981_v33  ;;  %v6760_v8 = vadd.f32 %v6759_v7, %v16595_v15  ;;  %v6820_v2 = vand.u32 2147483647, %v6793_v43 }
0x10d3   : > { %8986 = vrcp.f32 %v15505_v29  ;;  %v15514_v12 = vadd.f32 1.0, %v8983_v24  ;;  %v6822_v51 = vand.u32 2147483648, %v6793_v43  ;;  %vm6816_vm11 = vweird.f32 %v6793_v43 }
0x10d4   : > { %8988 = vpow2.f32 %v8008_v49  ;;  %vm15551_vm3 = vcmp.eq.f32.partialorder %v6820_v2, 8.507059e+37  ;;  %vm6892_vm7 = vweird.f32 %v15505_v29  ;;  %vm6831_vm15 = vweird.f32 %v15510_v14 }
0x10d5   : > { %v15500_v59 = vpop.f32.mrf.mxu0  ;;  %8990 = vpow2.f32 %v8012_v39  ;;  %v6823_v49 = vor.u32 1.1754944e-38, %v6822_v51  ;;  %v6837_v15 = vand.u32 2147483648, %v15510_v14  ;;  %vm6907_vm4 = vweird.f32 %v15514_v12 }
0x10d6   : > { %8992 = vrcp.f32 %v15510_v14 }
0x10d7   : > { %8994 = vrcp.f32 %v15514_v12 }
0x10d8   : > { %v15512_v28 = vpop.eup %8984 }
0x10d9   : > { %v15516_v42 = vpop.eup %8986  ;;  %v6812_v26 = vmul.f32 %v15512_v28, %v6793_v43  ;;  %vm6817_vm13 = vweird.f32 %v15512_v28 }
0x10da   : > { %v8989_v13 = vpop.eup %8988  ;;  %v6888_v60 = vmul.f32 %v15516_v42, %v15505_v29  ;;  %vm6893_vm10 = vweird.f32 %v15516_v42  ;;  %vm15547_vm8 = vmor %vm6816_vm11, %vm6817_vm13 }
0x10db   : > { %v8991_v46 = vpop.eup %8990  ;;  %v6813_v20 = vsub.f32 1.0, %v6812_v26  ;;  %v15523_v61 = vadd.f32 1.0, %v8989_v13  ;;  %v6835_v26 = vand.u32 2147483647, %v15510_v14  ;;  %v16600_v13 = vld [vmem:[#allocation9_spill] sm:$0xff]  ;;  %vm15571_vm14 = vmor %vm6892_vm7, %vm6893_vm10 }
0x10dc   : > { %v15525_v16 = vpop.eup %8992  ;;  %v15527_v47 = vadd.f32 1.0, %v8991_v46  ;;  %v6889_v22 = vsub.f32 1.0, %v6888_v60 }
0x10dd   : > { %v15507_v4 = vpop.f32.mrf.mxu0  ;;  %v15530_v27 = vpop.eup %8994  ;;  %8996 = vrcp.f32 %v15523_v61  ;;  %v6814_v34 = vmul.f32 %v15512_v28, %v6813_v20  ;;  %v6827_v45 = vmul.f32 %v15525_v16, %v15510_v14  ;;  %v6896_v20 = vand.u32 2147483647, %v15505_v29 }
0x10de   : > { %v6903_v40 = vmul.f32 %v15530_v27, %v15514_v12  ;;  %8998 = vrcp.f32 %v15527_v47  ;;  %v6890_v56 = vmul.f32 %v15516_v42, %v6889_v22  ;;  %vm6832_vm12 = vweird.f32 %v15525_v16  ;;  %v16611_v22 = vld [vmem:[#allocation10_spill] sm:$0xff] }
0x10df   : > { %v6815_v41 = vadd.f32 %v15512_v28, %v6814_v34  ;;  %v6828_v44 = vsub.f32 1.0, %v6827_v45  ;;  %vm15590_vm1 = vcmp.eq.f32.partialorder %v6835_v26, 8.507059e+37  ;;  %vm6897_vm2 = vcmp.eq.f32.partialorder %v6896_v20, 8.507059e+37  ;;  %vm15606_vm6 = vmor %vm6831_vm15, %vm6832_vm12 }
0x10e0   : > { %v6904_v7 = vsub.f32 1.0, %v6903_v40  ;;  %v6891_v33 = vadd.f32 %v15516_v42, %v6890_v56  ;;  %vm6908_vm5 = vweird.f32 %v15530_v27  ;;  %vm6846_vm13 = vweird.f32 %v15523_v61 }
0x10e1   : > { %v6819_v43 = vsel %vm15547_vm8, %v15512_v28, %v6815_v41  ;;  %vm15615_vm11 = vmor %vm6907_vm4, %vm6908_vm5  ;;  %v6911_v14 = vand.u32 2147483647, %v15514_v12 }
0x10e2   : > { %v6905_v28 = vmul.f32 %v15530_v27, %v6904_v7  ;;  %v6895_v45 = vsel %vm15571_vm14, %v15516_v42, %v6891_v33  ;;  %v6838_v7 = vor.u32 1.1754944e-38, %v6837_v15  ;;  %vm6922_vm14 = vweird.f32 %v15527_v47 }
0x10e3   : > { %v15544_v52 = vpop.eup %8996  ;;  %vm6912_vm8 = vcmp.eq.f32.partialorder %v6911_v14, 8.507059e+37 }
0x10e4   : > { %v15556_v24 = vpop.eup %8998  ;;  %v6842_v60 = vmul.f32 %v15544_v52, %v15523_v61  ;;  %v6906_v51 = vadd.f32 %v15530_v27, %v6905_v28  ;;  %v6766_v28 = vadd.f32 %v15507_v4, %v16611_v22  ;;  %vm6847_vm10 = vweird.f32 %v15544_v52 }
0x10e5   : > { %v6768_v30 = vpop.f32.mrf.mxu0  ;;  %vm15657_vm15 = vmor %vm6846_vm13, %vm6847_vm10 }
0x10e6   : > { %v6769_v9 = vadd.f32 %v6768_v30, %v16593_v62  ;;  %v6898_v30 = vand.u32 2147483648, %v15505_v29  ;;  %v6829_v62 = vmul.f32 %v15525_v16, %v6828_v44  ;;  %v6918_v29 = vmul.f32 %v15556_v24, %v15527_v47 }
0x10e7   : > { %v6843_v56 = vsub.f32 1.0, %v6842_v60  ;;  %v6852_v60 = vand.u32 2147483648, %v15523_v61 }
0x10e8   : > { %v8013_v48 = vmul.f32 -1.442695, %v6769_v9  ;;  %v6830_v42 = vadd.f32 %v15525_v16, %v6829_v62  ;;  %v6919_v41 = vsub.f32 1.0, %v6918_v29 }
0x10ea   : > { %v6834_v62 = vsel %vm15606_vm6, %v15525_v16, %v6830_v42 }
0x10eb   : > { %v6839_v4 = vsel %vm15590_vm1, %v6838_v7, %v6834_v62  ;;  %v6926_v7 = vand.u32 2147483647, %v15527_v47 }
0x10ed   : > { %v6771_v53 = vpop.f32.mrf.mxu0  ;;  %vm6927_vm6 = vcmp.eq.f32.partialorder %v6926_v7, 8.507059e+37 }
0x10ee   : > { %v6772_v21 = vadd.f32 %v6771_v53, %v16594_v50  ;;  %v16603_v53 = vld [vmem:[#allocation40_spill] sm:$0xff] }
0x10ef   : > { %v6763_v34 = vadd.f32 %v15500_v59, %v16603_v53  ;;  %v6824_v59 = vsel %vm15551_vm3, %v6823_v49, %v6819_v43  ;;  %v6913_v49 = vand.u32 2147483648, %v15514_v12  ;;  %v6920_v12 = vmul.f32 %v15556_v24, %v6919_v41 }
0x10f0   : > { %v8014_v38 = vmul.f32 -1.442695, %v6772_v21  ;;  %vm6923_vm3 = vweird.f32 %v15556_v24 }
0x10f1   : > { %v6914_v29 = vor.u32 1.1754944e-38, %v6913_v49  ;;  %vm15668_vm1 = vmor %vm6922_vm14, %vm6923_vm3 }
0x10f2   : > { %9000 = vpow2.f32 %v8014_v38  ;;  %v6928_v38 = vand.u32 2147483648, %v15527_v47 }
0x10f3   : > { %9002 = vtanh.f32 %v6760_v8 }
0x10f4   : > { %9004 = vpow2.f32 %v8013_v48  ;;  %v6899_v48 = vor.u32 1.1754944e-38, %v6898_v30  ;;  %v16608_v30 = vld [vmem:[#allocation35_spill] sm:$0xff]  ;;  %v6929_v14 = vor.u32 1.1754944e-38, %v6928_v38 }
0x10f5   : > { %v6774_v39 = vpop.f32.mrf.mxu0 }
0x10f6   : > { %v6775_v46 = vadd.f32 %v6774_v39, %v16600_v13  ;;  %v6900_v2 = vsel %vm6897_vm2, %v6899_v48, %v6895_v45  ;;  %v6850_v39 = vand.u32 2147483647, %v15523_v61  ;;  %v6921_v48 = vadd.f32 %v15556_v24, %v6920_v12 }
0x10f7   : > { %v7013_v13 = vmul.f32 %v6900_v2, %v15310_v17  ;;  %v6853_v61 = vor.u32 1.1754944e-38, %v6852_v60 }
0x10f8   : > { %v9001_v9 = vpop.eup %9000  ;;  %v8015_v50 = vmul.f32 -1.442695, %v6775_v46  ;;  %v6844_v46 = vmul.f32 %v15544_v52, %v6843_v56  ;;  %vm15661_vm12 = vcmp.eq.f32.partialorder %v6850_v39, 8.507059e+37  ;;  %v6925_v47 = vsel %vm15668_vm1, %v15556_v24, %v6921_v48 }
0x10f9   : > { %v9003_v21 = vpop.eup %9002  ;;  %v15585_v8 = vadd.f32 1.0, %v9001_v9  ;;  %v6910_v9 = vsel %vm15615_vm11, %v15530_v27, %v6906_v51  ;;  %v6930_v62 = vsel %vm6927_vm6, %v6929_v14, %v6925_v47 }
0x10fa   : > { %v9005_v40 = vpop.eup %9004  ;;  %9006 = vpow2.f32 %v8015_v50  ;;  %v7017_v44 = vmul.f32 %v9003_v21, %v6824_v59  ;;  %v6845_v27 = vadd.f32 %v15544_v52, %v6844_v46  ;;  %v6915_v45 = vsel %vm6912_vm8, %v6914_v29, %v6910_v9 }
0x10fb   : > { %9008 = vrcp.f32 %v15585_v8  ;;  %v15598_v63 = vadd.f32 1.0, %v9005_v40  ;;  %v6978_v59 = vand.u32 2147483648, %v15585_v8  ;;  %v6976_v42 = vand.u32 2147483647, %v15585_v8 }
0x10fc   : > { %9010 = vtanh.f32 %v6763_v34  ;;  %v15632_v34 = vadd.f32 %v7017_v44, %v7013_v13  ;;  %v7014_v51 = vmul.f32 %v6915_v45, %v15353_v37  ;;  %v6849_v37 = vsel %vm15657_vm15, %v15544_v52, %v6845_v27 }
0x10fd   : > { %v6777_v58 = vpop.f32.mrf.mxu0  ;;  %9012 = vrcp.f32 %v15598_v63  ;;  %vm6972_vm2 = vweird.f32 %v15585_v8  ;;  %v6979_v26 = vor.u32 1.1754944e-38, %v6978_v59  ;;  %vm6977_vm4 = vcmp.eq.f32.partialorder %v6976_v42, 8.507059e+37 }
0x10fe   : > { %v6778_v43 = vadd.f32 %v6777_v58, %v16608_v30  ;;  %vm6957_vm1 = vweird.f32 %v15598_v63 }
0x1100   : > { %v9007_v20 = vpop.eup %9006  ;;  %v8016_v53 = vmul.f32 -1.442695, %v6778_v43 }
0x1101   : > { %v9009_v17 = vpop.eup %9008  ;;  %v15635_v50 = vadd.f32 1.0, %v9007_v20 }
0x1102   : > { %v9011_v21 = vpop.eup %9010  ;;  %v6968_v16 = vmul.f32 %v9009_v17, %v15585_v8  ;;  %9014 = vpow2.f32 %v8016_v53  ;;  %vm6973_vm7 = vweird.f32 %v9009_v17  ;;  %v6854_v8 = vsel %vm15661_vm12, %v6853_v61, %v6849_v37 }
0x1103   : > { %9016 = vrcp.f32 %v15635_v50  ;;  %v7018_v40 = vmul.f32 %v9011_v21, %v6839_v4  ;;  %v15649_v2 = vpop.eup %9012  ;;  %vm6974_vm5 = vmor %vm6972_vm2, %vm6973_vm7  ;;  %v6993_v53 = vand.u32 2147483648, %v15635_v50  ;;  %v6991_v12 = vand.u32 2147483647, %v15635_v50 }
0x1104   : > { %9018 = vtanh.f32 %v6766_v28  ;;  %v6969_v15 = vsub.f32 1.0, %v6968_v16  ;;  %v6953_v24 = vmul.f32 %v15649_v2, %v15598_v63  ;;  %v7015_v21 = vmul.f32 %v6930_v62, %v15366_v23 }
0x1105   : > { %9020 = vtanh.f32 %v15632_v34  ;;  %v15676_v30 = vadd.f32 %v7018_v40, %v7014_v51  ;;  %vm6987_vm11 = vweird.f32 %v15635_v50  ;;  %v6994_v45 = vor.u32 1.1754944e-38, %v6993_v53 }
0x1106   : > { %v6970_v56 = vmul.f32 %v9009_v17, %v6969_v15  ;;  %v6954_v16 = vsub.f32 1.0, %v6953_v24  ;;  %vm6992_vm8 = vcmp.eq.f32.partialorder %v6991_v12, 8.507059e+37  ;;  %vm6958_vm14 = vweird.f32 %v15649_v2 }
0x1107   : > { %v6961_v37 = vand.u32 2147483647, %v15598_v63  ;;  %vm6959_vm2 = vmor %vm6957_vm1, %vm6958_vm14 }
0x1108   : > { %v9015_v58 = vpop.eup %9014  ;;  %v6971_v33 = vadd.f32 %v9009_v17, %v6970_v56  ;;  %v6955_v42 = vmul.f32 %v15649_v2, %v6954_v16 }
0x1109   : > { %v9017_v39 = vpop.eup %9016  ;;  %v6951_v43 = vadd.f32 1.0, %v9015_v58  ;;  %v6963_v58 = vand.u32 2147483648, %v15598_v63 }
0x110a   : > { %v9019_v13 = vpop.eup %9018  ;;  %v6983_v46 = vmul.f32 %v9017_v39, %v15635_v50  ;;  %v6975_v52 = vsel %vm6974_vm5, %v9009_v17, %v6971_v33  ;;  %vm6988_vm13 = vweird.f32 %v9017_v39  ;;  %v6956_v44 = vadd.f32 %v15649_v2, %v6955_v42 }
0x110b   : > { %v9021_v60 = vpop.eup %9020  ;;  %9022 = vrcp.f32 %v6951_v43  ;;  %v6980_v20 = vsel %vm6977_vm4, %v6979_v26, %v6975_v52  ;;  %v7019_v28 = vmul.f32 %v9019_v13, %v6854_v8  ;;  %vm6989_vm10 = vmor %vm6987_vm11, %vm6988_vm13  ;;  %v7008_v23 = vand.u32 2147483648, %v6951_v43 }
0x110c   : > { %v6984_v9 = vsub.f32 1.0, %v6983_v46  ;;  %v7029_v22 = vmul.f32 %v9021_v60, %v6980_v20  ;;  %9024 = vtanh.f32 %v15676_v30  ;;  %v7006_v51 = vand.u32 2147483647, %v6951_v43 }
0x110d   : > { %v15693_v27 = vadd.f32 %v7019_v28, %v7015_v21  ;;  %vm7002_vm7 = vweird.f32 %v6951_v43  ;;  %v7009_v7 = vor.u32 1.1754944e-38, %v7008_v23  ;;  %v6960_v47 = vsel %vm6959_vm2, %v15649_v2, %v6956_v44 }
0x110e   : > { %7038 = vrot.lane.b32.xlu1 %v7029_v22, %s9203_s17  ;;  %v6985_v17 = vmul.f32 %v9017_v39, %v6984_v9  ;;  %vm7007_vm12 = vcmp.eq.f32.partialorder %v7006_v51, 8.507059e+37  ;;  %vm6962_vm5 = vcmp.eq.f32.partialorder %v6961_v37, 8.507059e+37  ;;  %vm16618_vm4 = vcmask 917248  }
0x110f   : > { %9026 = vtanh.f32 %v15693_v27  ;;  %vm16619_vm6 = vmmov %vm16618_vm4 }
0x1110   : > { %v6986_v29 = vadd.f32 %v9017_v39, %v6985_v17  ;;  %9028 = vtanh.f32 %v15497_v6  ;;  %vm16620_vm13 = vmmov %vm16618_vm4  ;;  %v16624_v17 = vld [vmem:[#allocation34_spill] sm:$0xff] }
0x1111   : > { %v9023_v4 = vpop.eup %9022  ;;  %vm16621_vm11 = vmmov %vm16618_vm4 }
0x1112   : > { %v6998_v15 = vmul.f32 %v9023_v4, %v6951_v43  ;;  %v6990_v40 = vsel %vm6989_vm10, %v9017_v39, %v6986_v29  ;;  %v9025_v48 = vpop.eup %9024  ;;  %vm7003_vm3 = vweird.f32 %v9023_v4  ;;  %v6964_v43 = vor.u32 1.1754944e-38, %v6963_v58  ;;  %v16625_v29 = vld [vmem:[#allocation78_spill] sm:$0xff] }
0x1113   : > { %v6995_v59 = vsel %vm6992_vm8, %v6994_v45, %v6990_v40  ;;  %vm7004_vm15 = vmor %vm7002_vm7, %vm7003_vm3 }
0x1114   : > { %v6999_v38 = vsub.f32 1.0, %v6998_v15  ;;  %v7030_v56 = vmul.f32 %v9025_v48, %v6995_v59  ;;  %v6965_v26 = vsel %vm6962_vm5, %v6964_v43, %v6960_v47  ;;  %v16626_v48 = vld [vmem:[#allocation46_spill] sm:$0xff] }
0x1115   : > { %v9027_v61 = vpop.eup %9026 }
0x1116   : > { %7040 = vrot.lane.b32.xlu2 %v7030_v56, %s9203_s17  ;;  %v7000_v50 = vmul.f32 %v9023_v4, %v6999_v38  ;;  %v9029_v13 = vpop.eup %9028 }
0x1117   : > { %v7028_v14 = vmul.f32 %v9029_v13, %v6965_v26  ;;  %v16628_v13 = vld [vmem:[#allocation47_spill] sm:$0xff] }
0x1118   : > { %v7001_v41 = vadd.f32 %v9023_v4, %v7000_v50 }
0x111a   : > { %v7005_v49 = vsel %vm7004_vm15, %v9023_v4, %v7001_v41 }
0x111b   : > { %v7010_v33 = vsel %vm7007_vm12, %v7009_v7, %v7005_v49 }
0x111c   : > { %v7031_v39 = vmul.f32 %v9027_v61, %v7010_v33  ;;  %v16627_v33 = vld [vmem:[#allocation58_spill] sm:$0xff] }
0x111e   : > { %7144 = vmatpush.msra.mxu1 %v7031_v39  ;;  %7042 = vrot.lane.b32.xlu1 %v7031_v39, %s9203_s17 }
0x1120   : > { %7145 = vmatpush.msra.mxu1 %v7030_v56 }
0x1122   : > { %7146 = vmatpush.msra.mxu1 %v7029_v22 }
0x1124   : > { %7147 = vmatpush.msra.mxu1 %v7028_v14 }
0x1125   : > { %8017 = vmatmul.msk.f32.vlgmr.msra.gmra.mxu1 %vm607_vm0, %v15375_v10 }
0x1126   : > { %7036 = vrot.lane.b32.xlu1 %v7028_v14, %s9203_s17 }
0x112d   : > { %8018 = vmatmul.msk.f32.gmra.mxu1 %vm607_vm0, %v15382_v32 }
0x1135   : > { %8019 = vmatmul.msk.f32.gmra.mxu1 %vm607_vm0, %v15389_v25 }
0x113d   : > { %8020 = vmatmul.msk.f32.gmra.mxu1 %vm607_vm0, %v15396_v35 }
0x1145   : > { %8021 = vmatmul.msk.f32.gmra.mxu1 %vm607_vm0, %v15403_v3 }
0x114d   : > { %8022 = vmatmul.msk.f32.gmra.mxu1 %vm607_vm0, %v15410_v18 }
0x1155   : > { %8023 = vmatmul.msk.f32.gmra.mxu1 %vm607_vm0, %v15417_v57 }
0x115d   : > { %8024 = vmatmul.msk.f32.gmra.mxu1 %vm607_vm0, %v15424_v31  ;;  %v16622_v31 = vld [vmem:[#allocation38_spill] sm:$0xff] }
0x1165   : > { %8025 = vmatmul.msk.f32.gmra.mxu1 %vm607_vm0, %v15432_v1 }
0x116d   : > { %8026 = vmatmul.msk.f32.gmra.mxu1 %vm607_vm0, %v15439_v11 }
0x1170   : > { %v7041_v10 = vpop.permute.xlu2 %7040 }
0x1171   : > { %7050 = vst.msk [vmem:[#allocation3 + $0x10] sm:$0xff] %vm16618_vm4, %v7041_v10 }
0x1175   : > { %8027 = vmatmul.msk.f32.gmra.mxu1 %vm607_vm0, %v15446_v55 }
0x117d   : > { %8028 = vmatmul.msk.f32.gmra.mxu1 %vm607_vm0, %v15453_v19 }
0x1180   : > { %v7039_v32 = vpop.permute.xlu1 %7038 }
0x1181   : > { %7049 = vst.msk [vmem:[#allocation3 + $0x8] sm:$0xff] %vm16619_vm6, %v7039_v32 }
0x1185   : > { %8029 = vmatmul.msk.f32.gmra.mxu1 %vm607_vm0, %v15461_v5  ;;  %v16623_v5 = vld [vmem:[#allocation43_spill] sm:$0xff] }
0x118d   : > { %8030 = vmatmul.msk.f32.gmra.mxu1 %vm607_vm0, %v15469_v54 }
0x1190   : > { %v7043_v25 = vpop.permute.xlu1 %7042 }
0x1191   : > { %7051 = vst.msk [vmem:[#allocation3 + $0x18] sm:$0xff] %vm16620_vm13, %v7043_v25 }
0x1195   : > { %8031 = vmatmul.msk.f32.gmra.mxu1 %vm607_vm0, %v15477_v36 }
0x1198   : > { %v7037_v35 = vpop.permute.xlu1 %7036 }
0x1199   : > { %7048 = vst.msk [vmem:[#allocation3] sm:$0xff] %vm16621_vm11, %v7037_v35 }
0x119d   : > { %8032 = vmatmul.msk.f32.gmra.mxu1 %vm607_vm0, %v15484_v0 }
0x11a2   : > { %v7149_v3 = vpop.f32.mrf.mxu1 }
0x11a3   : > { %v7150_v1 = vadd.f32 %v7149_v3, %v16622_v31 }
0x11a5   : > { %v8033_v55 = vmul.f32 -1.442695, %v7150_v1  ;;  %v16630_v1 = vld [vmem:[#allocation41_spill] sm:$0xff] }
0x11a7   : > { %9030 = vpow2.f32 %v8033_v55 }
0x11aa   : > { %v7152_v18 = vpop.f32.mrf.mxu1 }
0x11ab   : > { %v7153_v12 = vadd.f32 %v7152_v18, %v16624_v17 }
0x11ad   : > { %v9031_v36 = vpop.eup %9030  ;;  %v8034_v15 = vmul.f32 -1.442695, %v7153_v12 }
0x11ae   : > { %v7209_v46 = vadd.f32 1.0, %v9031_v36 }
0x11b0   : > { %v7224_v42 = vand.u32 2147483648, %v7209_v46  ;;  %vm7218_vm14 = vweird.f32 %v7209_v46  ;;  %v7222_v50 = vand.u32 2147483647, %v7209_v46 }
0x11b2   : > { %v7155_v57 = vpop.f32.mrf.mxu1  ;;  %v7225_v7 = vor.u32 1.1754944e-38, %v7224_v42  ;;  %vm7223_vm1 = vcmp.eq.f32.partialorder %v7222_v50, 8.507059e+37 }
0x11b3   : > { %v7156_v39 = vadd.f32 %v7155_v57, %v16627_v33  ;;  %v16629_v57 = vld [vmem:[#allocation42_spill] sm:$0xff] }
0x11b5   : > { %v8035_v25 = vmul.f32 -1.442695, %v7156_v39 }
0x11ba   : > { %v15744_v11 = vpop.f32.mrf.mxu1 }
0x11c2   : > { %v7161_v19 = vpop.f32.mrf.mxu1 }
0x11c3   : > { %v7162_v54 = vadd.f32 %v7161_v19, %v16623_v5 }
0x11c5   : > { %v8037_v63 = vmul.f32 -1.442695, %v7162_v54 }
0x11c7   : > { %9032 = vpow2.f32 %v8037_v63 }
0x11c8   : > { %9034 = vrcp.f32 %v7209_v46 }
0x11ca   : > { %v7164_v2 = vpop.f32.mrf.mxu1 }
0x11cb   : > { %v7165_v16 = vadd.f32 %v7164_v2, %v16625_v29 }
0x11cd   : > { %v9033_v52 = vpop.eup %9032  ;;  %v8038_v23 = vmul.f32 -1.442695, %v7165_v16 }
0x11ce   : > { %v7285_v60 = vadd.f32 1.0, %v9033_v52  ;;  %v9035_v8 = vpop.eup %9034 }
0x11cf   : > { %v7214_v24 = vmul.f32 %v9035_v8, %v7209_v46  ;;  %vm7219_vm3 = vweird.f32 %v9035_v8 }
0x11d0   : > { %9036 = vrcp.f32 %v7285_v60  ;;  %v7300_v40 = vand.u32 2147483648, %v7285_v60  ;;  %vm7294_vm8 = vweird.f32 %v7285_v60  ;;  %v7298_v56 = vand.u32 2147483647, %v7285_v60  ;;  %vm7220_vm15 = vmor %vm7218_vm14, %vm7219_vm3 }
0x11d1   : > { %v7215_v28 = vsub.f32 1.0, %v7214_v24 }
0x11d2   : > { %v7167_v0 = vpop.f32.mrf.mxu1  ;;  %v7301_v41 = vor.u32 1.1754944e-38, %v7300_v40  ;;  %vm7299_vm12 = vcmp.eq.f32.partialorder %v7298_v56, 8.507059e+37  ;;  %v16633_v56 = vld [vmem:[#allocation79_spill] sm:$0xff] }
0x11d3   : > { %v7216_v21 = vmul.f32 %v9035_v8, %v7215_v28  ;;  %v7168_v14 = vadd.f32 %v7167_v0, %v16628_v13 }
0x11d5   : > { %v7217_v38 = vadd.f32 %v9035_v8, %v7216_v21  ;;  %v8039_v3 = vmul.f32 -1.442695, %v7168_v14  ;;  %v16631_v21 = vld [vmem:[#allocation81_spill] sm:$0xff] }
0x11d6   : > { %v9037_v20 = vpop.eup %9036 }
0x11d7   : > { %v7290_v62 = vmul.f32 %v9037_v20, %v7285_v60  ;;  %vm7295_vm10 = vweird.f32 %v9037_v20  ;;  %v7221_v44 = vsel %vm7220_vm15, %v9035_v8, %v7217_v38 }
0x11d8   : > { %vm7296_vm7 = vmor %vm7294_vm8, %vm7295_vm10  ;;  %v7226_v61 = vsel %vm7223_vm1, %v7225_v7, %v7221_v44 }
0x11d9   : > { %v7291_v9 = vsub.f32 1.0, %v7290_v62 }
0x11da   : > { %v7170_v22 = vpop.f32.mrf.mxu1 }
0x11db   : > { %v7292_v53 = vmul.f32 %v9037_v20, %v7291_v9  ;;  %v7171_v55 = vadd.f32 %v7170_v22, %v16630_v1 }
0x11dd   : > { %v7293_v45 = vadd.f32 %v9037_v20, %v7292_v53  ;;  %v8040_v36 = vmul.f32 -1.442695, %v7171_v55 }
0x11df   : > { %v7297_v51 = vsel %vm7296_vm7, %v9037_v20, %v7293_v45 }
0x11e0   : > { %v7302_v58 = vsel %vm7299_vm12, %v7301_v41, %v7297_v51 }
0x11e1   : > { %v7429_v47 = vmul.f32 %v7302_v58, %v15497_v6  ;;  %v7159_v6 = vadd.f32 %v15744_v11, %v16629_v57 }
0x11e2   : > { %v7173_v4 = vpop.f32.mrf.mxu1 }
0x11e3   : > { %v7174_v59 = vadd.f32 %v7173_v4, %v16626_v48  ;;  %v8036_v5 = vmul.f32 -1.442695, %v7159_v6 }
0x11e5   : > { %9038 = vtanh.f32 %v7174_v59 }
0x11e6   : > { %9040 = vpow2.f32 %v8034_v15  ;;  %v16632_v15 = vld [vmem:[#allocation45_spill] sm:$0xff] }
0x11e7   : > { %9042 = vpow2.f32 %v8038_v23 }
0x11e8   : > { %9044 = vpow2.f32 %v8035_v25  ;;  %v16638_v25 = vld [vmem:[#allocation71_spill] sm:$0xff] }
0x11ea   : > { %v7176_v49 = vpop.f32.mrf.mxu1 }
0x11eb   : > { %v9039_v37 = vpop.eup %9038  ;;  %v7177_v29 = vadd.f32 %v7176_v49, %v16631_v21 }
0x11ec   : > { %v7433_v43 = vmul.f32 %v9039_v37, %v7226_v61  ;;  %v9041_v26 = vpop.eup %9040 }
0x11ed   : > { %v9043_v32 = vpop.eup %9042  ;;  %v15755_v35 = vadd.f32 1.0, %v9041_v26 }
0x11ee   : > { %v15753_v10 = vadd.f32 %v7433_v43, %v7429_v47  ;;  %v15759_v31 = vadd.f32 1.0, %v9043_v32  ;;  %v9045_v19 = vpop.eup %9044 }
0x11ef   : > { %9046 = vrcp.f32 %v15755_v35  ;;  %v15772_v60 = vadd.f32 1.0, %v9045_v19  ;;  %vm7233_vm4 = vweird.f32 %v15755_v35  ;;  %v7239_v51 = vand.u32 2147483648, %v15755_v35  ;;  %v16639_v19 = vld [vmem:[#allocation70_spill] sm:$0xff] }
0x11f0   : > { %9048 = vpow2.f32 %v8039_v3  ;;  %v7315_v50 = vand.u32 2147483648, %v15759_v31  ;;  %vm7309_vm6 = vweird.f32 %v15759_v31  ;;  %v7237_v44 = vand.u32 2147483647, %v15755_v35 }
0x11f1   : > { %9050 = vrcp.f32 %v15759_v31  ;;  %v7313_v7 = vand.u32 2147483647, %v15759_v31  ;;  %v7240_v13 = vor.u32 1.1754944e-38, %v7239_v51  ;;  %vm7248_vm14 = vweird.f32 %v15772_v60 }
0x11f2   : > { %v15757_v18 = vpop.f32.mrf.mxu1  ;;  %9052 = vpow2.f32 %v8036_v5  ;;  %v7316_v26 = vor.u32 1.1754944e-38, %v7315_v50  ;;  %vm7238_vm10 = vcmp.eq.f32.partialorder %v7237_v44, 8.507059e+37 }
0x11f3   : > { %9054 = vpow2.f32 %v8040_v36  ;;  %vm7314_vm8 = vcmp.eq.f32.partialorder %v7313_v7, 8.507059e+37  ;;  %v7180_v5 = vadd.f32 %v15757_v18, %v16639_v19 }
0x11f4   : > { %9056 = vrcp.f32 %v15772_v60 }
0x11f5   : > { %v15768_v63 = vpop.eup %9046 }
0x11f6   : > { %v9049_v2 = vpop.eup %9048  ;;  %v7229_v52 = vmul.f32 %v15768_v63, %v15755_v35  ;;  %vm7234_vm2 = vweird.f32 %v15768_v63 }
0x11f7   : > { %v9051_v46 = vpop.eup %9050  ;;  %v15775_v0 = vadd.f32 1.0, %v9049_v2  ;;  %vm15803_vm13 = vmor %vm7233_vm4, %vm7234_vm2 }
0x11f8   : > { %v7305_v11 = vmul.f32 %v9051_v46, %v15759_v31  ;;  %v7230_v20 = vsub.f32 1.0, %v7229_v52  ;;  %v9053_v62 = vpop.eup %9052  ;;  %vm7310_vm5 = vweird.f32 %v9051_v46 }
0x11f9   : > { %9058 = vrcp.f32 %v15775_v0  ;;  %v9055_v9 = vpop.eup %9054  ;;  %v15779_v22 = vadd.f32 1.0, %v9053_v62  ;;  %vm15810_vm11 = vmor %vm7309_vm6, %vm7310_vm5  ;;  %vm7324_vm12 = vweird.f32 %v15775_v0  ;;  %v7330_v21 = vand.u32 2147483648, %v15775_v0 }
0x11fa   : > { %v15766_v54 = vpop.f32.mrf.mxu1  ;;  %v7306_v24 = vsub.f32 1.0, %v7305_v11  ;;  %v7231_v28 = vmul.f32 %v15768_v63, %v7230_v20  ;;  %v15782_v17 = vadd.f32 1.0, %v9055_v9  ;;  %v15784_v12 = vpop.eup %9056  ;;  %v7254_v11 = vand.u32 2147483648, %v15772_v60 }
0x11fb   : > { %9060 = vrcp.f32 %v15779_v22  ;;  %v7244_v48 = vmul.f32 %v15784_v12, %v15772_v60  ;;  %vm7249_vm3 = vweird.f32 %v15784_v12  ;;  %vm7263_vm5 = vweird.f32 %v15779_v22 }
0x11fc   : > { %v7307_v53 = vmul.f32 %v9051_v46, %v7306_v24  ;;  %v7232_v45 = vadd.f32 %v15768_v63, %v7231_v28  ;;  %9062 = vrcp.f32 %v15782_v17  ;;  %vm15849_vm1 = vmor %vm7248_vm14, %vm7249_vm3  ;;  %v7331_v49 = vor.u32 1.1754944e-38, %v7330_v21 }
0x11fd   : > { %9064 = vtanh.f32 %v7177_v29  ;;  %v7245_v58 = vsub.f32 1.0, %v7244_v48 }
0x11fe   : > { %v7308_v59 = vadd.f32 %v9051_v46, %v7307_v53  ;;  %v7236_v33 = vsel %vm15803_vm13, %v15768_v63, %v7232_v45  ;;  %v16644_v45 = vld [vmem:[#allocation80_spill] sm:$0xff] }
0x11ff   : > { %v15787_v16 = vpop.eup %9058  ;;  %v7241_v31 = vsel %vm7238_vm10, %v7240_v13, %v7236_v33  ;;  %v7246_v6 = vmul.f32 %v15784_v12, %v7245_v58  ;;  %v7345_v13 = vand.u32 2147483648, %v15782_v17  ;;  %vm7339_vm10 = vweird.f32 %v15782_v17 }
0x1200   : > { %v7320_v38 = vmul.f32 %v15787_v16, %v15775_v0  ;;  %v7312_v39 = vsel %vm15810_vm11, %v9051_v46, %v7308_v59  ;;  %v7252_v46 = vand.u32 2147483647, %v15772_v60  ;;  %vm7325_vm7 = vweird.f32 %v15787_v16 }
0x1201   : > { %v15814_v37 = vpop.eup %9060  ;;  %v7317_v57 = vsel %vm7314_vm8, %v7316_v26, %v7312_v39  ;;  %v7247_v18 = vadd.f32 %v15784_v12, %v7246_v6  ;;  %vm15856_vm2 = vmor %vm7324_vm12, %vm7325_vm7  ;;  %v7269_v59 = vand.u32 2147483648, %v15779_v22 }
0x1202   : > { %v7185_v8 = vpop.f32.mrf.mxu1  ;;  %v7321_v61 = vsub.f32 1.0, %v7320_v38  ;;  %v15821_v43 = vpop.eup %9062  ;;  %v7259_v3 = vmul.f32 %v15814_v37, %v15779_v22  ;;  %v7430_v20 = vmul.f32 %v7317_v57, %v15632_v34  ;;  %vm15843_vm15 = vcmp.eq.f32.partialorder %v7252_v46, 8.507059e+37 }
0x1203   : > { %v7186_v42 = vadd.f32 %v7185_v8, %v16633_v56  ;;  %v9065_v32 = vpop.eup %9064  ;;  %v7335_v36 = vmul.f32 %v15821_v43, %v15782_v17  ;;  %v7251_v56 = vsel %vm15849_vm1, %v15784_v12, %v7247_v18  ;;  %vm7264_vm4 = vweird.f32 %v15814_v37 }
0x1204   : > { %v7322_v55 = vmul.f32 %v15787_v16, %v7321_v61  ;;  %v7434_v2 = vmul.f32 %v9065_v32, %v7241_v31  ;;  %v7260_v8 = vsub.f32 1.0, %v7259_v3  ;;  %vm7340_vm13 = vweird.f32 %v15821_v43  ;;  %vm15895_vm8 = vmor %vm7263_vm5, %vm7264_vm4 }
0x1205   : > { %v8041_v47 = vmul.f32 -1.442695, %v7186_v42  ;;  %v7336_v24 = vsub.f32 1.0, %v7335_v36  ;;  %v7267_v31 = vand.u32 2147483647, %v15779_v22  ;;  %vm15903_vm3 = vmor %vm7339_vm10, %vm7340_vm13  ;;  %v7346_v46 = vor.u32 1.1754944e-38, %v7345_v13 }
0x1206   : > { %v7323_v62 = vadd.f32 %v15787_v16, %v7322_v55  ;;  %v7438_v9 = vadd.f32 %v7434_v2, %v7430_v20  ;;  %v7261_v48 = vmul.f32 %v15814_v37, %v7260_v8  ;;  %v7343_v57 = vand.u32 2147483647, %v15782_v17 }
0x1207   : > { %v7337_v41 = vmul.f32 %v15821_v43, %v7336_v24  ;;  %v7270_v55 = vor.u32 1.1754944e-38, %v7269_v59  ;;  %vm7268_vm12 = vcmp.eq.f32.partialorder %v7267_v31, 8.507059e+37 }
0x1208   : > { %v7327_v42 = vsel %vm15856_vm2, %v15787_v16, %v7323_v62  ;;  %vm7344_vm1 = vcmp.eq.f32.partialorder %v7343_v57, 8.507059e+37  ;;  %v7469_v57 = vld [vmem:[%s15961_s7] sm:$0xff] }
0x120a   : > { %v7188_v4 = vpop.f32.mrf.mxu1 }
0x120b   : > { %v7189_v40 = vadd.f32 %v7188_v4, %v16632_v15  ;;  %v7255_v4 = vor.u32 1.1754944e-38, %v7254_v11 }
0x120d   : > { %v8042_v23 = vmul.f32 -1.442695, %v7189_v40  ;;  %v7328_v40 = vand.u32 2147483647, %v15775_v0  ;;  %v7256_v16 = vsel %vm15843_vm15, %v7255_v4, %v7251_v56  ;;  %v7474_v56 = vld [vmem:[%s15962_s8] sm:$0xff] }
0x120f   : > { %9066 = vpow2.f32 %v8042_v23  ;;  %v16647_v23 = vld [vmem:[#allocation72_spill] sm:$0xff]  ;;  %vm7329_vm6 = vcmp.eq.f32.partialorder %v7328_v40, 8.507059e+37 }
0x1210   : > { %9068 = vpow2.f32 %v8041_v47  ;;  %v7183_v50 = vadd.f32 %v15766_v54, %v16647_v23  ;;  %v7262_v54 = vadd.f32 %v15814_v37, %v7261_v48  ;;  %v7332_v61 = vsel %vm7329_vm6, %v7331_v49, %v7327_v42 }
0x1211   : > { %v7338_v47 = vadd.f32 %v15821_v43, %v7337_v41 }
0x1212   : > { %v7191_v14 = vpop.f32.mrf.mxu1 }
0x1213   : > { %v7192_v35 = vadd.f32 %v7191_v14, %v16638_v25  ;;  %v7342_v22 = vsel %vm15903_vm3, %v15821_v43, %v7338_v47 }
0x1214   : > { %v7347_v18 = vsel %vm7344_vm1, %v7346_v46, %v7342_v22 }
0x1215   : > { %v9067_v1 = vpop.eup %9066  ;;  %v8043_v63 = vmul.f32 -1.442695, %v7192_v35  ;;  %v7431_v35 = vmul.f32 %v7332_v61, %v15676_v30  ;;  %v7266_v30 = vsel %vm15895_vm8, %v15814_v37, %v7262_v54  ;;  %v7432_v21 = vmul.f32 %v7347_v18, %v15693_v27 }
0x1216   : > { %v15833_v52 = vadd.f32 1.0, %v9067_v1  ;;  %v9069_v53 = vpop.eup %9068  ;;  %v7271_v20 = vsel %vm7268_vm12, %v7270_v55, %v7266_v30 }
0x1217   : > { %9070 = vpow2.f32 %v8043_v63  ;;  %v15873_v44 = vadd.f32 1.0, %v9069_v53 }
0x1218   : > { %9072 = vrcp.f32 %v15833_v52  ;;  %v7395_v26 = vand.u32 2147483648, %v15833_v52  ;;  %v7393_v32 = vand.u32 2147483647, %v15833_v52  ;;  %vm7389_vm7 = vweird.f32 %v15833_v52 }
0x1219   : > { %9074 = vtanh.f32 %v7180_v5  ;;  %v7380_v54 = vand.u32 2147483648, %v15873_v44 }
0x121a   : > { %v7194_v34 = vpop.f32.mrf.mxu1  ;;  %9076 = vtanh.f32 %v7438_v9  ;;  %v7396_v36 = vor.u32 1.1754944e-38, %v7395_v26  ;;  %vm7394_vm15 = vcmp.eq.f32.partialorder %v7393_v32, 8.507059e+37 }
0x121b   : > { %v7195_v15 = vadd.f32 %v7194_v34, %v16644_v45  ;;  %v7381_v47 = vor.u32 1.1754944e-38, %v7380_v54 }
0x121d   : > { %v9071_v38 = vpop.eup %9070  ;;  %v8044_v51 = vmul.f32 -1.442695, %v7195_v15 }
0x121e   : > { %v9073_v0 = vpop.eup %9072  ;;  %v15875_v7 = vadd.f32 1.0, %v9071_v38 }
0x121f   : > { %v9075_v58 = vpop.eup %9074  ;;  %v7385_v12 = vmul.f32 %v9073_v0, %v15833_v52  ;;  %9078 = vpow2.f32 %v8044_v51  ;;  %vm7390_vm11 = vweird.f32 %v9073_v0 }
0x1220   : > { %9080 = vrcp.f32 %v15875_v7  ;;  %v7435_v39 = vmul.f32 %v9075_v58, %v7256_v16  ;;  %v9077_v25 = vpop.eup %9076  ;;  %vm7391_vm14 = vmor %vm7389_vm7, %vm7390_vm11  ;;  %v7410_v9 = vand.u32 2147483648, %v15875_v7  ;;  %v7408_v53 = vand.u32 2147483647, %v15875_v7 }
0x1221   : > { %9082 = vtanh.f32 %v7183_v50  ;;  %v7386_v33 = vsub.f32 1.0, %v7385_v12  ;;  %vm7404_vm5 = vweird.f32 %v15875_v7  ;;  %vm7374_vm7 = vweird.f32 %v15873_v44 }
0x1222   : > { %9084 = vrcp.f32 %v15873_v44  ;;  %v7439_v63 = vadd.f32 %v7435_v39, %v7431_v35  ;;  %v7411_v15 = vor.u32 1.1754944e-38, %v7410_v9  ;;  %vm7409_vm6 = vcmp.eq.f32.partialorder %v7408_v53, 8.507059e+37 }
0x1223   : > { %v7387_v14 = vmul.f32 %v9073_v0, %v7386_v33  ;;  %v7378_v33 = vand.u32 2147483647, %v15873_v44 }
0x1225   : > { %v9079_v6 = vpop.eup %9078  ;;  %v7388_v19 = vadd.f32 %v9073_v0, %v7387_v14 }
0x1226   : > { %v9081_v5 = vpop.eup %9080  ;;  %v7368_v17 = vadd.f32 1.0, %v9079_v6 }
0x1227   : > { %v9083_v2 = vpop.eup %9082  ;;  %v7400_v11 = vmul.f32 %v9081_v5, %v15875_v7  ;;  %v7392_v8 = vsel %vm7391_vm14, %v9073_v0, %v7388_v19  ;;  %vm7405_vm2 = vweird.f32 %v9081_v5 }
0x1228   : > { %v15916_v37 = vpop.eup %9084  ;;  %9086 = vrcp.f32 %v7368_v17  ;;  %v7397_v52 = vsel %vm7394_vm15, %v7396_v36, %v7392_v8  ;;  %v7436_v24 = vmul.f32 %v9083_v2, %v7271_v20  ;;  %vm7406_vm4 = vmor %vm7404_vm5, %vm7405_vm2  ;;  %v7425_v27 = vand.u32 2147483648, %v7368_v17 }
0x1229   : > { %v7401_v62 = vsub.f32 1.0, %v7400_v11  ;;  %v7446_v43 = vmul.f32 %v9077_v25, %v7397_v52  ;;  %9088 = vtanh.f32 %v7439_v63  ;;  %v7370_v28 = vmul.f32 %v15916_v37, %v15873_v44 }
0x122a   : > { %v7440_v45 = vadd.f32 %v7436_v24, %v7432_v21  ;;  %v7423_v51 = vand.u32 2147483647, %v7368_v17  ;;  %vm7419_vm11 = vweird.f32 %v7368_v17  ;;  %v7426_v7 = vor.u32 1.1754944e-38, %v7425_v27 }
0x122b   : > { %7455 = vrot.lane.b32.xlu0 %v7446_v43, %s9202_s16  ;;  %v7402_v34 = vmul.f32 %v9081_v5, %v7401_v62  ;;  %v7371_v60 = vsub.f32 1.0, %v7370_v28  ;;  %vm7375_vm3 = vweird.f32 %v15916_v37  ;;  %vm7379_vm15 = vcmp.eq.f32.partialorder %v7378_v33, 8.507059e+37 }
0x122c   : > { %9090 = vtanh.f32 %v7440_v45  ;;  %vm7424_vm8 = vcmp.eq.f32.partialorder %v7423_v51, 8.507059e+37  ;;  %vm7376_vm14 = vmor %vm7374_vm7, %vm7375_vm3 }
0x122d   : > { %v7403_v29 = vadd.f32 %v9081_v5, %v7402_v34  ;;  %v7372_v0 = vmul.f32 %v15916_v37, %v7371_v60  ;;  %9092 = vtanh.f32 %v15753_v10 }
0x122e   : > { %v9087_v4 = vpop.eup %9086 }
0x122f   : > { %v7415_v40 = vmul.f32 %v9087_v4, %v7368_v17  ;;  %v7407_v48 = vsel %vm7406_vm4, %v9081_v5, %v7403_v29  ;;  %v9089_v59 = vpop.eup %9088  ;;  %vm7420_vm13 = vweird.f32 %v9087_v4  ;;  %v7373_v49 = vadd.f32 %v15916_v37, %v7372_v0 }
0x1230   : > { %v7412_v38 = vsel %vm7409_vm6, %v7411_v15, %v7407_v48  ;;  %vm7421_vm10 = vmor %vm7419_vm11, %vm7420_vm13 }
0x1231   : > { %v7416_v42 = vsub.f32 1.0, %v7415_v40  ;;  %v7447_v23 = vmul.f32 %v9089_v59, %v7412_v38  ;;  %v7377_v39 = vsel %vm7376_vm14, %v15916_v37, %v7373_v49 }
0x1232   : > { %v9091_v12 = vpop.eup %9090  ;;  %v7382_v26 = vsel %vm7379_vm15, %v7381_v47, %v7377_v39 }
0x1233   : > { %7457 = vrot.lane.b32.xlu2 %v7447_v23, %s9202_s16  ;;  %7477 = vperm.xlu0 %8067, %v7474_v56   ;;  %v7417_v50 = vmul.f32 %v9087_v4, %v7416_v42  ;;  %v9093_v13 = vpop.eup %9092 }
0x1234   : > { %v7445_v14 = vmul.f32 %v9093_v13, %v7382_v26 }
0x1235   : > { %v7418_v41 = vadd.f32 %v9087_v4, %v7417_v50 }
0x1237   : > { %v7422_v58 = vsel %vm7421_vm10, %v9087_v4, %v7418_v41 }
0x1238   : > { %v7427_v16 = vsel %vm7424_vm8, %v7426_v7, %v7422_v58 }
0x1239   : > { %v7448_v61 = vmul.f32 %v9091_v12, %v7427_v16 }
0x123b   : > { %7459 = vrot.lane.b32.xlu2 %v7448_v61, %s9202_s16 }
0x1243   : > { %7453 = vrot.lane.b32.xlu2 %v7445_v14, %s9202_s16 }
0x128d   : > { %v7458_v32 = vpop.permute.xlu2 %7457 }
0x128e   : > { %7467 = vst.msk [vmem:[#allocation3 + $0x10] sm:$0xff] %vm3899_vm9, %v7458_v32 }
0x1295   : > { %v7460_v25 = vpop.permute.xlu2 %7459  ;;  %v7472_v3 = vld [vmem:[#allocation3 + $0x10] sm:$0xff] }
0x1296   : > { %7468 = vst.msk [vmem:[#allocation3 + $0x18] sm:$0xff] %vm3899_vm9, %v7460_v25 }
0x129d   : > { %v7456_v10 = vpop.permute.xlu0 %7455  ;;  %v7454_v44 = vpop.permute.xlu2 %7453  ;;  %v7473_v35 = vld [vmem:[#allocation3 + $0x18] sm:$0xff] }
0x129e   : > { %7466 = vst.msk [vmem:[#allocation3 + $0x8] sm:$0xff] %vm3899_vm9, %v7456_v10  ;;  %7495 = vmatpush.msrb.mxu2 %v7473_v35 }
0x129f   : > { %7465 = vst.msk [vmem:[#allocation3] sm:$0xff] %vm3899_vm9, %v7454_v44 }
0x12a0   : > { %7496 = vmatpush.msrb.mxu2 %v7472_v3 }
0x12a5   : > { %v7471_v31 = vld [vmem:[#allocation3 + $0x8] sm:$0xff]  ;;  %v7478_v1 = vpop.permute.xlu0 %7477 }
0x12a6   : > { %7497 = vmatpush.msrb.mxu2 %v7471_v31  ;;  %v7470_v6 = vld [vmem:[#allocation3] sm:$0xff] }
0x12a8   : > { %7498 = vmatpush.msrb.mxu2 %v7470_v6 }
0x12a9   : > { %8045 = vmatmul.msk.f32.vlgmr.msrb.gmra.mxu2 %vm607_vm0, %v7469_v57 }
0x132c   : > { %v7500_v30 = vpop.f32.mrf.mxu2 }
0x132d   : > { %v7501_v55 = vadd.f32 %v7500_v30, %v7478_v1 }
0x132f   : > { %7503 = vst [vmem:[%s327_s24] sm:$0xff] %v7501_v55 }
0x1330 PF: > { %s19_s30 = sadd.s32 1, %s9198_s30  }
0x1331   : > { %p16_p4 = scmp.ge.s32.totalorder %s19_s30, 4  }
0x1333   :  { %18 = sbr.rel (!%p16_p4) target bundleno = 1 (0x1), region = 86 }

</bundles_post_ra>
